<compile_context>
chip_gen: v7x
topology: tpu7x:2x2x1
jax: 0.10.0
libtpu: 0.0.40
codegen_flags: <defaults>
</compile_context>

<pallas_src>
import jax
import jax.numpy as jnp
from jax.experimental import pallas as pl
from jax.experimental.pallas import tpu as pltpu

_VMEM_LIMIT = 48 * 1024 * 1024
_PADL = 8  # left zero margin in the pad scratch -> interior store is sublane aligned


def _pick_row_tile(n, target=512):
    """Row tile: multiple of 8; prefer large tiles with an even, >=2 block count."""
    if n % target == 0 and (n // target) >= 2 and (n // target) % 2 == 0:
        return target
    half = n // 2
    if half >= 8 and half % 8 == 0 and n % half == 0:
        return half
    return n


def _pick_images_per_block(batch, hw, target_rows=256):
    """Images per 3x3 block: raise MXU M for small maps while keeping >=2 blocks."""
    ipb = max(1, min(batch, target_rows // max(hw, 1)))
    while ipb > 1 and (batch % ipb != 0 or batch // ipb < 2):
        ipb -= 1
    return ipb


# ----------------------------------------------------------------------------
# Kernel 1: 1x1 conv (matmul) + bias + LeakyReLU(0.01) + BatchNorm (eval)
# ----------------------------------------------------------------------------
def _conv1x1_kernel(x_ref, w_ref, b_ref, s_ref, t_ref, o_ref):
    y = jnp.dot(x_ref[...], w_ref[...], preferred_element_type=jnp.float32)
    y = y + b_ref[...]
    y = jnp.maximum(y, 0.01 * y)              # LeakyReLU(0.01)
    y = y * s_ref[...] + t_ref[...]           # BatchNorm (eval) scale/shift
    o_ref[...] = y.astype(o_ref.dtype)


def conv1x1_act_bn(x, w, b, s, t, *, out_dtype=jnp.bfloat16):
    """x: (N, K) -> (N, C). bf16 MXU operands, f32 accumulate + epilogue."""
    N, K = x.shape
    Kw, C = w.shape
    assert K == Kw and K % 128 == 0 and C % 128 == 0
    tn = _pick_row_tile(N)
    assert N % tn == 0 and tn % 8 == 0

    flops = 2 * N * K * C + 4 * N * C
    bytes_accessed = N * K * 2 + K * C * 2 + N * C * 2 + 3 * C * 4

    return pl.pallas_call(
        _conv1x1_kernel,
        out_shape=jax.ShapeDtypeStruct((N, C), out_dtype),
        grid_spec=pltpu.PrefetchScalarGridSpec(
            num_scalar_prefetch=0,
            grid=(N // tn,),
            in_specs=[
                pl.BlockSpec((tn, K), lambda i: (i, 0)),   # activation row tile
                pl.BlockSpec((K, C), lambda i: (0, 0)),    # resident weight
                pl.BlockSpec((1, C), lambda i: (0, 0)),    # bias
                pl.BlockSpec((1, C), lambda i: (0, 0)),    # BN scale
                pl.BlockSpec((1, C), lambda i: (0, 0)),    # BN shift
            ],
            out_specs=pl.BlockSpec((tn, C), lambda i: (i, 0)),
        ),
        compiler_params=pltpu.CompilerParams(
            dimension_semantics=("parallel",), vmem_limit_bytes=_VMEM_LIMIT),
        cost_estimate=pl.CostEstimate(flops=flops, transcendentals=0,
                                      bytes_accessed=bytes_accessed),
    )(x.astype(jnp.bfloat16), w.astype(jnp.bfloat16),
      b.reshape(1, C).astype(jnp.float32),
      s.reshape(1, C).astype(jnp.float32),
      t.reshape(1, C).astype(jnp.float32))


# ----------------------------------------------------------------------------
# Shared 3x3 helper: in-kernel zero padding + in-VMEM im2col (one store pass)
# ----------------------------------------------------------------------------
def _build_im2col(x_ref, pad_ref, col_ref):
    ipb, H, W, Cin = x_ref.shape
    HW = H * W
    pad_ref[...] = jnp.zeros_like(pad_ref)
    # Interior placed at column offset _PADL (sublane-aligned store); the zero
    # halo columns/rows come from the scratch zero fill.
    pad_ref[:, 1:H + 1, _PADL:_PADL + W, :] = x_ref[...]
    for b in range(ipb):
        r0 = b * HW
        for dy in range(3):
            for dx in range(3):
                tap = dy * 3 + dx
                c0 = _PADL - 1 + dx
                col_ref[r0:r0 + HW, tap * Cin:(tap + 1) * Cin] = (
                    pad_ref[b, dy:dy + H, c0:c0 + W, :].reshape(HW, Cin))


# ----------------------------------------------------------------------------
# Kernel 2: 3x3 conv (padding=1) + bias + LeakyReLU(0.01) + BatchNorm (eval)
# ----------------------------------------------------------------------------
def _conv3x3_kernel(x_ref, w_ref, b_ref, s_ref, t_ref, o_ref, pad_ref, col_ref):
    _build_im2col(x_ref, pad_ref, col_ref)
    y = jnp.dot(col_ref[...], w_ref[...], preferred_element_type=jnp.float32)
    y = y + b_ref[...]
    y = jnp.maximum(y, 0.01 * y)              # LeakyReLU(0.01)
    y = y * s_ref[...] + t_ref[...]           # BatchNorm (eval) scale/shift
    o_ref[...] = y.astype(o_ref.dtype)


def conv3x3_act_bn(x_nhwc, w, b, s, t, *, out_dtype=jnp.bfloat16):
    """x: (B, H, W, Cin), w: (9, Cin, Cout) -> (B*H*W, Cout)."""
    B, H, W, Cin = x_nhwc.shape
    _, Cw, Cout = w.shape
    assert Cw == Cin and Cin % 128 == 0 and Cout % 128 == 0
    ipb = _pick_images_per_block(B, H * W)
    M = ipb * H * W
    N = B * H * W
    assert M % 8 == 0 and B % ipb == 0

    flops = 2 * N * 9 * Cin * Cout + 4 * N * Cout
    bytes_accessed = (N * Cin * 2 + 9 * Cin * Cout * 2
                      + N * Cout * 2 + 3 * Cout * 4)

    return pl.pallas_call(
        _conv3x3_kernel,
        out_shape=jax.ShapeDtypeStruct((N, Cout), out_dtype),
        grid_spec=pltpu.PrefetchScalarGridSpec(
            num_scalar_prefetch=0,
            grid=(B // ipb,),
            in_specs=[
                pl.BlockSpec((ipb, H, W, Cin), lambda i: (i, 0, 0, 0)),  # images
                pl.BlockSpec((9 * Cin, Cout), lambda i: (0, 0)),         # weight
                pl.BlockSpec((1, Cout), lambda i: (0, 0)),               # bias
                pl.BlockSpec((1, Cout), lambda i: (0, 0)),               # BN scale
                pl.BlockSpec((1, Cout), lambda i: (0, 0)),               # BN shift
            ],
            out_specs=pl.BlockSpec((M, Cout), lambda i: (i, 0)),
            scratch_shapes=[
                pltpu.VMEM((ipb, H + 2, W + 2 * _PADL, Cin), jnp.bfloat16),
                pltpu.VMEM((M, 9 * Cin), jnp.bfloat16),
            ],
        ),
        compiler_params=pltpu.CompilerParams(
            dimension_semantics=("parallel",), vmem_limit_bytes=_VMEM_LIMIT),
        cost_estimate=pl.CostEstimate(flops=flops, transcendentals=0,
                                      bytes_accessed=bytes_accessed),
    )(x_nhwc.astype(jnp.bfloat16),
      w.reshape(9 * Cin, Cout).astype(jnp.bfloat16),
      b.reshape(1, Cout).astype(jnp.float32),
      s.reshape(1, Cout).astype(jnp.float32),
      t.reshape(1, Cout).astype(jnp.float32))


# ----------------------------------------------------------------------------
# Kernel 3 (fused): conv3 3x3 + LeakyReLU + BN + avg_conv4 1x1 + channel mean
# + sigmoid(s) + attention + alpha*x0*att.  h3 never leaves VMEM.
# ----------------------------------------------------------------------------
def _conv3x3_attn_kernel(alpha_ref, x_ref, x0_ref, w3_ref, b3_ref, s3_ref, t3_ref,
                         w4_ref, b4_ref, o_ref, pad_ref, col_ref):
    _build_im2col(x_ref, pad_ref, col_ref)
    h3 = jnp.dot(col_ref[...], w3_ref[...], preferred_element_type=jnp.float32)
    h3 = h3 + b3_ref[...]
    h3 = jnp.maximum(h3, 0.01 * h3)           # LeakyReLU(0.01)
    h3 = h3 * s3_ref[...] + t3_ref[...]       # BatchNorm (eval)
    # avg_conv4 (1x1) on the VMEM-resident h3 tile.
    y = jnp.dot(h3.astype(jnp.bfloat16), w4_ref[...],
                preferred_element_type=jnp.float32) + b4_ref[...]
    # torch.mean over channels + sigmoid; torch.max over the (now singleton)
    # channel dim is the identity, so x_max = sigmoid(x_avg).
    x_avg = jax.nn.sigmoid(jnp.mean(y, axis=-1, keepdims=True))
    x_max = jax.nn.sigmoid(x_avg)
    att = x_avg + x_max
    o_ref[...] = (alpha_ref[0] * x0_ref[...].astype(jnp.float32) * att
                  ).astype(o_ref.dtype)


def conv3x3_conv4_attention(alpha, x0, x_nhwc, w3, b3, s3, t3, w4, b4):
    """x0: (N, C0) bf16 original rows; x_nhwc: (B, H, W, Cin) h2 -> (N, C0) f32."""
    B, H, W, Cin = x_nhwc.shape
    _, Cw, Cmid = w3.shape
    C4w, C4 = w4.shape
    N, C0 = x0.shape
    assert Cw == Cin and C4w == Cmid and N == B * H * W
    assert Cin % 128 == 0 and Cmid % 128 == 0 and C4 % 128 == 0 and C0 % 128 == 0
    ipb = _pick_images_per_block(B, H * W)
    M = ipb * H * W
    assert M % 8 == 0 and B % ipb == 0

    flops = 2 * N * 9 * Cin * Cmid + 2 * N * Cmid * C4 + 8 * N * C0
    transcendentals = 2 * N
    bytes_accessed = (N * Cin * 2 + N * C0 * 2 + 9 * Cin * Cmid * 2
                      + Cmid * C4 * 2 + N * C0 * 4 + (3 * Cmid + C4) * 4)

    return pl.pallas_call(
        _conv3x3_attn_kernel,
        out_shape=jax.ShapeDtypeStruct((N, C0), jnp.float32),
        grid_spec=pltpu.PrefetchScalarGridSpec(
            num_scalar_prefetch=0,
            grid=(B // ipb,),
            in_specs=[
                pl.BlockSpec(memory_space=pltpu.SMEM),                   # alpha (1,)
                pl.BlockSpec((ipb, H, W, Cin), lambda i: (i, 0, 0, 0)),  # h2 tile
                pl.BlockSpec((M, C0), lambda i: (i, 0)),                 # x0 rows bf16
                pl.BlockSpec((9 * Cin, Cmid), lambda i: (0, 0)),         # conv3 weight
                pl.BlockSpec((1, Cmid), lambda i: (0, 0)),               # conv3 bias
                pl.BlockSpec((1, Cmid), lambda i: (0, 0)),               # BN scale
                pl.BlockSpec((1, Cmid), lambda i: (0, 0)),               # BN shift
                pl.BlockSpec((Cmid, C4), lambda i: (0, 0)),              # avg_conv4 w
                pl.BlockSpec((1, C4), lambda i: (0, 0)),                 # avg_conv4 b
            ],
            out_specs=pl.BlockSpec((M, C0), lambda i: (i, 0)),
            scratch_shapes=[
                pltpu.VMEM((ipb, H + 2, W + 2 * _PADL, Cin), jnp.bfloat16),
                pltpu.VMEM((M, 9 * Cin), jnp.bfloat16),
            ],
        ),
        compiler_params=pltpu.CompilerParams(
            dimension_semantics=("parallel",), vmem_limit_bytes=_VMEM_LIMIT),
        cost_estimate=pl.CostEstimate(flops=flops, transcendentals=transcendentals,
                                      bytes_accessed=bytes_accessed),
    )(alpha.astype(jnp.float32), x_nhwc.astype(jnp.bfloat16),
      x0.astype(jnp.bfloat16),
      w3.reshape(9 * Cin, Cmid).astype(jnp.bfloat16),
      b3.reshape(1, Cmid).astype(jnp.float32),
      s3.reshape(1, Cmid).astype(jnp.float32),
      t3.reshape(1, Cmid).astype(jnp.float32),
      w4.astype(jnp.bfloat16),
      b4.reshape(1, C4).astype(jnp.float32))


# ----------------------------------------------------------------------------
# Full CA forward (NCHW in / NCHW out, like the PyTorch module)
# ----------------------------------------------------------------------------
def ca_forward(x_nchw, p):
    B, C0, H, W = x_nchw.shape
    assert C0 == 512, "CA hard-codes 512 input channels"
    # One fused HBM pass: NCHW f32 -> NHWC bf16; reused as conv1 input and x0.
    xh = jnp.transpose(x_nchw, (0, 2, 3, 1)).astype(jnp.bfloat16)
    N = B * H * W
    x_flat = xh.reshape(N, C0)

    h1 = conv1x1_act_bn(x_flat, p["w1"], p["b1"], p["s1"], p["t1"])
    h2 = conv3x3_act_bn(h1.reshape(B, H, W, 256),
                        p["w2"], p["b2"], p["s2"], p["t2"])
    out = conv3x3_conv4_attention(p["alpha"], x_flat, h2.reshape(B, H, W, 256),
                                  p["w3"], p["b3"], p["s3"], p["t3"],
                                  p["w4a"], p["b4a"])
    return jnp.transpose(out.reshape(B, H, W, C0), (0, 3, 1, 2))


# ----------------------------------------------------------------------------
# Pure-JAX reference (same math, same bf16 operand casts, no Pallas)
# ----------------------------------------------------------------------------
def _leaky(v):
    return jnp.maximum(v, 0.01 * v)


def _im2col3x3(x):
    B, H, W, C = x.shape
    xp = jnp.pad(x, ((0, 0), (1, 1), (1, 1), (0, 0)))
    cols = [xp[:, dy:dy + H, dx:dx + W, :] for dy in range(3) for dx in range(3)]
    return jnp.concatenate(cols, axis=-1).reshape(B * H * W, 9 * C)


def ca_reference(x_nchw, p):
    B, C0, H, W = x_nchw.shape
    xh = jnp.transpose(x_nchw, (0, 2, 3, 1)).astype(jnp.bfloat16)
    N = B * H * W

    def mm(a, w):
        return jnp.dot(a.astype(jnp.bfloat16), w.astype(jnp.bfloat16),
                       preferred_element_type=jnp.float32)

    h1 = _leaky(mm(xh.reshape(N, C0), p["w1"]) + p["b1"]) * p["s1"] + p["t1"]
    h1 = h1.astype(jnp.bfloat16)
    h2 = _leaky(mm(_im2col3x3(h1.reshape(B, H, W, 256)),
                   p["w2"].reshape(9 * 256, 256)) + p["b2"]) * p["s2"] + p["t2"]
    h2 = h2.astype(jnp.bfloat16)
    h3 = _leaky(mm(_im2col3x3(h2.reshape(B, H, W, 256)),
                   p["w3"].reshape(9 * 256, 512)) + p["b3"]) * p["s3"] + p["t3"]
    y = mm(h3, p["w4a"]) + p["b4a"]
    x_avg = jax.nn.sigmoid(jnp.mean(y, axis=-1, keepdims=True))
    x_max = jax.nn.sigmoid(x_avg)     # torch.max over a singleton dim == identity
    att = x_avg + x_max
    out = p["alpha"][0] * xh.reshape(N, C0).astype(jnp.float32) * att
    return jnp.transpose(out.reshape(B, H, W, C0), (0, 3, 1, 2))


# ----------------------------------------------------------------------------
# Deterministic synthetic parameters (shapes per CA.__init__)
# ----------------------------------------------------------------------------
def init_params(key):
    ks = jax.random.split(key, 14)
    eps = 1e-5

    def bn(kg, kb, c):
        gamma = 1.0 + 0.1 * jax.random.normal(kg, (c,), jnp.float32)
        beta = 0.1 * jax.random.normal(kb, (c,), jnp.float32)
        mean = jnp.zeros((c,), jnp.float32)      # fresh-module running stats
        var = jnp.ones((c,), jnp.float32)
        scale = gamma / jnp.sqrt(var + eps)
        shift = beta - mean * scale
        return scale, shift

    def conv_w(k, shape, fan_in):
        return jax.random.normal(k, shape, jnp.float32) / jnp.sqrt(jnp.float32(fan_in))

    p = {}
    p["w1"] = conv_w(ks[0], (512, 256), 512)              # Conv2d(512,256,1)
    p["b1"] = 0.05 * jax.random.normal(ks[1], (256,), jnp.float32)
    p["s1"], p["t1"] = bn(ks[2], ks[3], 256)
    p["w2"] = conv_w(ks[4], (9, 256, 256), 9 * 256)       # Conv2d(256,256,3,p=1)
    p["b2"] = 0.05 * jax.random.normal(ks[5], (256,), jnp.float32)
    p["s2"], p["t2"] = bn(ks[6], ks[7], 256)
    p["w3"] = conv_w(ks[8], (9, 256, 512), 9 * 256)       # Conv2d(256,512,3,p=1)
    p["b3"] = 0.05 * jax.random.normal(ks[9], (512,), jnp.float32)
    p["s3"], p["t3"] = bn(ks[10], ks[11], 512)
    p["w4a"] = conv_w(ks[12], (512, 512), 512)            # avg_conv4: Conv2d(512,512,1)
    p["b4a"] = 0.05 * jax.random.normal(ks[13], (512,), jnp.float32)
    # max_conv4 weights omitted: its result is discarded by the original forward.
    # alpha = Parameter(torch.zeros(1)) in PyTorch; nonzero here for a live check.
    p["alpha"] = jnp.array([0.5], jnp.float32)
    return p


if __name__ == "__main__":
    key = jax.random.PRNGKey(0)
    kx, kp = jax.random.split(key)
    params = init_params(kp)

    # Small shapes consistent with the module: CA hard-codes 512 input channels.
    B, C, H, W = 2, 512, 8, 8
    x = jax.random.normal(kx, (B, C, H, W), jnp.float32)

    out = jax.block_until_ready(jax.jit(ca_forward)(x, params))
    ref = jax.block_until_ready(jax.jit(ca_reference)(x, params))

    assert out.shape == (B, C, H, W)
    max_diff = float(jnp.max(jnp.abs(out - ref)))
    assert jnp.allclose(out, ref, atol=2e-2, rtol=2e-2), (
        "mismatch vs reference: max abs diff = %g" % max_diff)

    print("KERNEL_OK")
</pallas_src>

<mosaic_0001>
module attributes {stable_mosaic.version = 11 : i64} {
  func.func @_conv1x1_kernel(%arg0: i32, %arg1: memref<64x512xbf16, #tpu.memory_space<vmem>>, %arg2: memref<512x256xbf16, #tpu.memory_space<vmem>>, %arg3: memref<1x256xf32, #tpu.memory_space<vmem>>, %arg4: memref<1x256xf32, #tpu.memory_space<vmem>>, %arg5: memref<1x256xf32, #tpu.memory_space<vmem>>, %arg6: memref<64x256xbf16, #tpu.memory_space<vmem>>) attributes {dimension_semantics = [#tpu.dimension_semantics<parallel>], iteration_bounds = array<i64: 2>, scalar_prefetch = 0 : i64, scratch_operands = 0 : i64, tpu.core_type = #tpu.core_type<tc>, window_params = [{transform_indices = @transform_0, window_bounds = array<i64: 64, 512>}, {pipeline_mode = #tpu.pipeline_mode<synchronous>, transform_indices = @transform_1, window_bounds = array<i64: 512, 256>}, {pipeline_mode = #tpu.pipeline_mode<synchronous>, transform_indices = @transform_2, window_bounds = array<i64: 1, 256>}, {pipeline_mode = #tpu.pipeline_mode<synchronous>, transform_indices = @transform_3, window_bounds = array<i64: 1, 256>}, {pipeline_mode = #tpu.pipeline_mode<synchronous>, transform_indices = @transform_4, window_bounds = array<i64: 1, 256>}, {transform_indices = @transform_5, window_bounds = array<i64: 64, 256>}]} {
    %c0 = arith.constant 0 : index
    %c0_0 = arith.constant 0 : index
    %0 = vector.load %arg1[%c0, %c0_0] : memref<64x512xbf16, #tpu.memory_space<vmem>>, vector<64x512xbf16>
    %c0_1 = arith.constant 0 : index
    %c0_2 = arith.constant 0 : index
    %1 = vector.load %arg2[%c0_1, %c0_2] : memref<512x256xbf16, #tpu.memory_space<vmem>>, vector<512x256xbf16>
    %cst = arith.constant dense<0.000000e+00> : vector<64x256xf32>
    %2 = tpu.matmul %0, %1, %cst {dimension_numbers = #tpu.dot_dimension_numbers<[1], [0], [0], [1], [0, 0, 1, 1], [], []>} : vector<64x512xbf16>, vector<512x256xbf16>, vector<64x256xf32> -> vector<64x256xf32>
    %c0_3 = arith.constant 0 : index
    %c0_4 = arith.constant 0 : index
    %3 = vector.load %arg3[%c0_3, %c0_4] : memref<1x256xf32, #tpu.memory_space<vmem>>, vector<1x256xf32>
    %4 = vector.broadcast %3 : vector<1x256xf32> to vector<64x256xf32>
    %5 = arith.addf %2, %4 : vector<64x256xf32>
    %cst_5 = arith.constant 0.00999999977 : f32
    %6 = vector.broadcast %cst_5 : f32 to vector<64x256xf32>
    %7 = arith.mulf %6, %5 : vector<64x256xf32>
    %8 = arith.maximumf %5, %7 : vector<64x256xf32>
    %c0_6 = arith.constant 0 : index
    %c0_7 = arith.constant 0 : index
    %9 = vector.load %arg4[%c0_6, %c0_7] : memref<1x256xf32, #tpu.memory_space<vmem>>, vector<1x256xf32>
    %10 = vector.broadcast %9 : vector<1x256xf32> to vector<64x256xf32>
    %11 = arith.mulf %8, %10 : vector<64x256xf32>
    %c0_8 = arith.constant 0 : index
    %c0_9 = arith.constant 0 : index
    %12 = vector.load %arg5[%c0_8, %c0_9] : memref<1x256xf32, #tpu.memory_space<vmem>>, vector<1x256xf32>
    %13 = vector.broadcast %12 : vector<1x256xf32> to vector<64x256xf32>
    %14 = arith.addf %11, %13 : vector<64x256xf32>
    %15 = arith.truncf %14 : vector<64x256xf32> to vector<64x256xbf16>
    %c0_10 = arith.constant 0 : index
    %c0_11 = arith.constant 0 : index
    %16 = vector.load %arg6[%c0_10, %c0_11] : memref<64x256xbf16, #tpu.memory_space<vmem>>, vector<64x256xbf16>
    tpu.vector_store %arg6[%c0_10, %c0_11], %15 {strides = array<i32>} : memref<64x256xbf16, #tpu.memory_space<vmem>>, vector<64x256xbf16>,
    return
  }
  func.func @transform_0(%arg0: i32) -> (i32, i32) {
    %c0_i32 = arith.constant 0 : i32
    %c0_i32_0 = arith.constant 0 : i32
    return %arg0, %c0_i32 : i32, i32
  }
  func.func @transform_1(%arg0: i32) -> (i32, i32) {
    %c0_i32 = arith.constant 0 : i32
    %c0_i32_0 = arith.constant 0 : i32
    %c0_i32_1 = arith.constant 0 : i32
    return %c0_i32, %c0_i32_0 : i32, i32
  }
  func.func @transform_2(%arg0: i32) -> (i32, i32) {
    %c0_i32 = arith.constant 0 : i32
    %c0_i32_0 = arith.constant 0 : i32
    %c0_i32_1 = arith.constant 0 : i32
    return %c0_i32, %c0_i32_0 : i32, i32
  }
  func.func @transform_3(%arg0: i32) -> (i32, i32) {
    %c0_i32 = arith.constant 0 : i32
    %c0_i32_0 = arith.constant 0 : i32
    %c0_i32_1 = arith.constant 0 : i32
    return %c0_i32, %c0_i32_0 : i32, i32
  }
  func.func @transform_4(%arg0: i32) -> (i32, i32) {
    %c0_i32 = arith.constant 0 : i32
    %c0_i32_0 = arith.constant 0 : i32
    %c0_i32_1 = arith.constant 0 : i32
    return %c0_i32, %c0_i32_0 : i32, i32
  }
  func.func @transform_5(%arg0: i32) -> (i32, i32) {
    %c0_i32 = arith.constant 0 : i32
    %c0_i32_0 = arith.constant 0 : i32
    return %arg0, %c0_i32 : i32, i32
  }
}

module attributes {stable_mosaic.version = 11 : i64} {
  func.func @_conv3x3_kernel(%arg0: i32, %arg1: memref<1x8x8x256xbf16, #tpu.memory_space<vmem>>, %arg2: memref<2304x256xbf16, #tpu.memory_space<vmem>>, %arg3: memref<1x256xf32, #tpu.memory_space<vmem>>, %arg4: memref<1x256xf32, #tpu.memory_space<vmem>>, %arg5: memref<1x256xf32, #tpu.memory_space<vmem>>, %arg6: memref<64x256xbf16, #tpu.memory_space<vmem>>, %arg7: memref<1x10x24x256xbf16, #tpu.memory_space<vmem>>, %arg8: memref<64x2304xbf16, #tpu.memory_space<vmem>>) attributes {dimension_semantics = [#tpu.dimension_semantics<parallel>], iteration_bounds = array<i64: 2>, scalar_prefetch = 0 : i64, scratch_operands = 2 : i64, tpu.core_type = #tpu.core_type<tc>, window_params = [{transform_indices = @transform_0, window_bounds = array<i64: 1, 8, 8, 256>}, {pipeline_mode = #tpu.pipeline_mode<synchronous>, transform_indices = @transform_1, window_bounds = array<i64: 2304, 256>}, {pipeline_mode = #tpu.pipeline_mode<synchronous>, transform_indices = @transform_2, window_bounds = array<i64: 1, 256>}, {pipeline_mode = #tpu.pipeline_mode<synchronous>, transform_indices = @transform_3, window_bounds = array<i64: 1, 256>}, {pipeline_mode = #tpu.pipeline_mode<synchronous>, transform_indices = @transform_4, window_bounds = array<i64: 1, 256>}, {transform_indices = @transform_5, window_bounds = array<i64: 64, 256>}]} {
    %cst = arith.constant 0.000000e+00 : bf16
    %0 = vector.broadcast %cst : bf16 to vector<1x10x24x256xbf16>
    %c0 = arith.constant 0 : index
    %c0_0 = arith.constant 0 : index
    %c0_1 = arith.constant 0 : index
    %c0_2 = arith.constant 0 : index
    %1 = vector.load %arg7[%c0, %c0_0, %c0_1, %c0_2] : memref<1x10x24x256xbf16, #tpu.memory_space<vmem>>, vector<1x10x24x256xbf16>
    tpu.vector_store %arg7[%c0, %c0_0, %c0_1, %c0_2], %0 {strides = array<i32>} : memref<1x10x24x256xbf16, #tpu.memory_space<vmem>>, vector<1x10x24x256xbf16>,
    %c0_3 = arith.constant 0 : index
    %c0_4 = arith.constant 0 : index
    %c0_5 = arith.constant 0 : index
    %c0_6 = arith.constant 0 : index
    %2 = vector.load %arg1[%c0_3, %c0_4, %c0_5, %c0_6] : memref<1x8x8x256xbf16, #tpu.memory_space<vmem>>, vector<1x8x8x256xbf16>
    %c0_7 = arith.constant 0 : index
    %c1 = arith.constant 1 : index
    %c8 = arith.constant 8 : index
    %c0_8 = arith.constant 0 : index
    %3 = vector.load %arg7[%c0_7, %c1, %c8, %c0_8] : memref<1x10x24x256xbf16, #tpu.memory_space<vmem>>, vector<1x8x8x256xbf16>
    tpu.vector_store %arg7[%c0_7, %c1, %c8, %c0_8], %2 {strides = array<i32>} : memref<1x10x24x256xbf16, #tpu.memory_space<vmem>>, vector<1x8x8x256xbf16>,
    %c0_9 = arith.constant 0 : index
    %c0_10 = arith.constant 0 : index
    %c7 = arith.constant 7 : index
    %c0_11 = arith.constant 0 : index
    %4 = vector.load %arg7[%c0_9, %c0_10, %c7, %c0_11] : memref<1x10x24x256xbf16, #tpu.memory_space<vmem>>, vector<1x8x8x256xbf16>
    %5 = vector.shape_cast %4 : vector<1x8x8x256xbf16> to vector<8x8x256xbf16>
    %6 = vector.shape_cast %5 : vector<8x8x256xbf16> to vector<64x256xbf16>
    %c0_12 = arith.constant 0 : index
    %c0_13 = arith.constant 0 : index
    %7 = vector.load %arg8[%c0_12, %c0_13] : memref<64x2304xbf16, #tpu.memory_space<vmem>>, vector<64x256xbf16>
    tpu.vector_store %arg8[%c0_12, %c0_13], %6 {strides = array<i32>} : memref<64x2304xbf16, #tpu.memory_space<vmem>>, vector<64x256xbf16>,
    %c0_14 = arith.constant 0 : index
    %c0_15 = arith.constant 0 : index
    %c8_16 = arith.constant 8 : index
    %c0_17 = arith.constant 0 : index
    %8 = vector.load %arg7[%c0_14, %c0_15, %c8_16, %c0_17] : memref<1x10x24x256xbf16, #tpu.memory_space<vmem>>, vector<1x8x8x256xbf16>
    %9 = vector.shape_cast %8 : vector<1x8x8x256xbf16> to vector<8x8x256xbf16>
    %10 = vector.shape_cast %9 : vector<8x8x256xbf16> to vector<64x256xbf16>
    %c0_18 = arith.constant 0 : index
    %c256 = arith.constant 256 : index
    %11 = vector.load %arg8[%c0_18, %c256] : memref<64x2304xbf16, #tpu.memory_space<vmem>>, vector<64x256xbf16>
    tpu.vector_store %arg8[%c0_18, %c256], %10 {strides = array<i32>} : memref<64x2304xbf16, #tpu.memory_space<vmem>>, vector<64x256xbf16>,
    %c0_19 = arith.constant 0 : index
    %c0_20 = arith.constant 0 : index
    %c9 = arith.constant 9 : index
    %c0_21 = arith.constant 0 : index
    %12 = vector.load %arg7[%c0_19, %c0_20, %c9, %c0_21] : memref<1x10x24x256xbf16, #tpu.memory_space<vmem>>, vector<1x8x8x256xbf16>
    %13 = vector.shape_cast %12 : vector<1x8x8x256xbf16> to vector<8x8x256xbf16>
    %14 = vector.shape_cast %13 : vector<8x8x256xbf16> to vector<64x256xbf16>
    %c0_22 = arith.constant 0 : index
    %c512 = arith.constant 512 : index
    %15 = vector.load %arg8[%c0_22, %c512] : memref<64x2304xbf16, #tpu.memory_space<vmem>>, vector<64x256xbf16>
    tpu.vector_store %arg8[%c0_22, %c512], %14 {strides = array<i32>} : memref<64x2304xbf16, #tpu.memory_space<vmem>>, vector<64x256xbf16>,
    %c0_23 = arith.constant 0 : index
    %c1_24 = arith.constant 1 : index
    %c7_25 = arith.constant 7 : index
    %c0_26 = arith.constant 0 : index
    %16 = vector.load %arg7[%c0_23, %c1_24, %c7_25, %c0_26] : memref<1x10x24x256xbf16, #tpu.memory_space<vmem>>, vector<1x8x8x256xbf16>
    %17 = vector.shape_cast %16 : vector<1x8x8x256xbf16> to vector<8x8x256xbf16>
    %18 = vector.shape_cast %17 : vector<8x8x256xbf16> to vector<64x256xbf16>
    %c0_27 = arith.constant 0 : index
    %c768 = arith.constant 768 : index
    %19 = vector.load %arg8[%c0_27, %c768] : memref<64x2304xbf16, #tpu.memory_space<vmem>>, vector<64x256xbf16>
    tpu.vector_store %arg8[%c0_27, %c768], %18 {strides = array<i32>} : memref<64x2304xbf16, #tpu.memory_space<vmem>>, vector<64x256xbf16>,
    %c0_28 = arith.constant 0 : index
    %c1_29 = arith.constant 1 : index
    %c8_30 = arith.constant 8 : index
    %c0_31 = arith.constant 0 : index
    %20 = vector.load %arg7[%c0_28, %c1_29, %c8_30, %c0_31] : memref<1x10x24x256xbf16, #tpu.memory_space<vmem>>, vector<1x8x8x256xbf16>
    %21 = vector.shape_cast %20 : vector<1x8x8x256xbf16> to vector<8x8x256xbf16>
    %22 = vector.shape_cast %21 : vector<8x8x256xbf16> to vector<64x256xbf16>
    %c0_32 = arith.constant 0 : index
    %c1024 = arith.constant 1024 : index
    %23 = vector.load %arg8[%c0_32, %c1024] : memref<64x2304xbf16, #tpu.memory_space<vmem>>, vector<64x256xbf16>
    tpu.vector_store %arg8[%c0_32, %c1024], %22 {strides = array<i32>} : memref<64x2304xbf16, #tpu.memory_space<vmem>>, vector<64x256xbf16>,
    %c0_33 = arith.constant 0 : index
    %c1_34 = arith.constant 1 : index
    %c9_35 = arith.constant 9 : index
    %c0_36 = arith.constant 0 : index
    %24 = vector.load %arg7[%c0_33, %c1_34, %c9_35, %c0_36] : memref<1x10x24x256xbf16, #tpu.memory_space<vmem>>, vector<1x8x8x256xbf16>
    %25 = vector.shape_cast %24 : vector<1x8x8x256xbf16> to vector<8x8x256xbf16>
    %26 = vector.shape_cast %25 : vector<8x8x256xbf16> to vector<64x256xbf16>
    %c0_37 = arith.constant 0 : index
    %c1280 = arith.constant 1280 : index
    %27 = vector.load %arg8[%c0_37, %c1280] : memref<64x2304xbf16, #tpu.memory_space<vmem>>, vector<64x256xbf16>
    tpu.vector_store %arg8[%c0_37, %c1280], %26 {strides = array<i32>} : memref<64x2304xbf16, #tpu.memory_space<vmem>>, vector<64x256xbf16>,
    %c0_38 = arith.constant 0 : index
    %c2 = arith.constant 2 : index
    %c7_39 = arith.constant 7 : index
    %c0_40 = arith.constant 0 : index
    %28 = vector.load %arg7[%c0_38, %c2, %c7_39, %c0_40] : memref<1x10x24x256xbf16, #tpu.memory_space<vmem>>, vector<1x8x8x256xbf16>
    %29 = vector.shape_cast %28 : vector<1x8x8x256xbf16> to vector<8x8x256xbf16>
    %30 = vector.shape_cast %29 : vector<8x8x256xbf16> to vector<64x256xbf16>
    %c0_41 = arith.constant 0 : index
    %c1536 = arith.constant 1536 : index
    %31 = vector.load %arg8[%c0_41, %c1536] : memref<64x2304xbf16, #tpu.memory_space<vmem>>, vector<64x256xbf16>
    tpu.vector_store %arg8[%c0_41, %c1536], %30 {strides = array<i32>} : memref<64x2304xbf16, #tpu.memory_space<vmem>>, vector<64x256xbf16>,
    %c0_42 = arith.constant 0 : index
    %c2_43 = arith.constant 2 : index
    %c8_44 = arith.constant 8 : index
    %c0_45 = arith.constant 0 : index
    %32 = vector.load %arg7[%c0_42, %c2_43, %c8_44, %c0_45] : memref<1x10x24x256xbf16, #tpu.memory_space<vmem>>, vector<1x8x8x256xbf16>
    %33 = vector.shape_cast %32 : vector<1x8x8x256xbf16> to vector<8x8x256xbf16>
    %34 = vector.shape_cast %33 : vector<8x8x256xbf16> to vector<64x256xbf16>
    %c0_46 = arith.constant 0 : index
    %c1792 = arith.constant 1792 : index
    %35 = vector.load %arg8[%c0_46, %c1792] : memref<64x2304xbf16, #tpu.memory_space<vmem>>, vector<64x256xbf16>
    tpu.vector_store %arg8[%c0_46, %c1792], %34 {strides = array<i32>} : memref<64x2304xbf16, #tpu.memory_space<vmem>>, vector<64x256xbf16>,
    %c0_47 = arith.constant 0 : index
    %c2_48 = arith.constant 2 : index
    %c9_49 = arith.constant 9 : index
    %c0_50 = arith.constant 0 : index
    %36 = vector.load %arg7[%c0_47, %c2_48, %c9_49, %c0_50] : memref<1x10x24x256xbf16, #tpu.memory_space<vmem>>, vector<1x8x8x256xbf16>
    %37 = vector.shape_cast %36 : vector<1x8x8x256xbf16> to vector<8x8x256xbf16>
    %38 = vector.shape_cast %37 : vector<8x8x256xbf16> to vector<64x256xbf16>
    %c0_51 = arith.constant 0 : index
    %c2048 = arith.constant 2048 : index
    %39 = vector.load %arg8[%c0_51, %c2048] : memref<64x2304xbf16, #tpu.memory_space<vmem>>, vector<64x256xbf16>
    tpu.vector_store %arg8[%c0_51, %c2048], %38 {strides = array<i32>} : memref<64x2304xbf16, #tpu.memory_space<vmem>>, vector<64x256xbf16>,
    %c0_52 = arith.constant 0 : index
    %c0_53 = arith.constant 0 : index
    %40 = vector.load %arg8[%c0_52, %c0_53] : memref<64x2304xbf16, #tpu.memory_space<vmem>>, vector<64x2304xbf16>
    %c0_54 = arith.constant 0 : index
    %c0_55 = arith.constant 0 : index
    %41 = vector.load %arg2[%c0_54, %c0_55] : memref<2304x256xbf16, #tpu.memory_space<vmem>>, vector<2304x256xbf16>
    %cst_56 = arith.constant dense<0.000000e+00> : vector<64x256xf32>
    %42 = tpu.matmul %40, %41, %cst_56 {dimension_numbers = #tpu.dot_dimension_numbers<[1], [0], [0], [1], [0, 0, 1, 1], [], []>} : vector<64x2304xbf16>, vector<2304x256xbf16>, vector<64x256xf32> -> vector<64x256xf32>
    %c0_57 = arith.constant 0 : index
    %c0_58 = arith.constant 0 : index
    %43 = vector.load %arg3[%c0_57, %c0_58] : memref<1x256xf32, #tpu.memory_space<vmem>>, vector<1x256xf32>
    %44 = vector.broadcast %43 : vector<1x256xf32> to vector<64x256xf32>
    %45 = arith.addf %42, %44 : vector<64x256xf32>
    %cst_59 = arith.constant 0.00999999977 : f32
    %46 = vector.broadcast %cst_59 : f32 to vector<64x256xf32>
    %47 = arith.mulf %46, %45 : vector<64x256xf32>
    %48 = arith.maximumf %45, %47 : vector<64x256xf32>
    %c0_60 = arith.constant 0 : index
    %c0_61 = arith.constant 0 : index
    %49 = vector.load %arg4[%c0_60, %c0_61] : memref<1x256xf32, #tpu.memory_space<vmem>>, vector<1x256xf32>
    %50 = vector.broadcast %49 : vector<1x256xf32> to vector<64x256xf32>
    %51 = arith.mulf %48, %50 : vector<64x256xf32>
    %c0_62 = arith.constant 0 : index
    %c0_63 = arith.constant 0 : index
    %52 = vector.load %arg5[%c0_62, %c0_63] : memref<1x256xf32, #tpu.memory_space<vmem>>, vector<1x256xf32>
    %53 = vector.broadcast %52 : vector<1x256xf32> to vector<64x256xf32>
    %54 = arith.addf %51, %53 : vector<64x256xf32>
    %55 = arith.truncf %54 : vector<64x256xf32> to vector<64x256xbf16>
    %c0_64 = arith.constant 0 : index
    %c0_65 = arith.constant 0 : index
    %56 = vector.load %arg6[%c0_64, %c0_65] : memref<64x256xbf16, #tpu.memory_space<vmem>>, vector<64x256xbf16>
    tpu.vector_store %arg6[%c0_64, %c0_65], %55 {strides = array<i32>} : memref<64x256xbf16, #tpu.memory_space<vmem>>, vector<64x256xbf16>,
    return
  }
  func.func @transform_0(%arg0: i32) -> (i32, i32, i32, i32) {
    %c0_i32 = arith.constant 0 : i32
    %c0_i32_0 = arith.constant 0 : i32
    %c0_i32_1 = arith.constant 0 : i32
    %c0_i32_2 = arith.constant 0 : i32
    return %arg0, %c0_i32, %c0_i32_0, %c0_i32_1 : i32, i32, i32, i32
  }
  func.func @transform_1(%arg0: i32) -> (i32, i32) {
    %c0_i32 = arith.constant 0 : i32
    %c0_i32_0 = arith.constant 0 : i32
    %c0_i32_1 = arith.constant 0 : i32
    return %c0_i32, %c0_i32_0 : i32, i32
  }
  func.func @transform_2(%arg0: i32) -> (i32, i32) {
    %c0_i32 = arith.constant 0 : i32
    %c0_i32_0 = arith.constant 0 : i32
    %c0_i32_1 = arith.constant 0 : i32
    return %c0_i32, %c0_i32_0 : i32, i32
  }
  func.func @transform_3(%arg0: i32) -> (i32, i32) {
    %c0_i32 = arith.constant 0 : i32
    %c0_i32_0 = arith.constant 0 : i32
    %c0_i32_1 = arith.constant 0 : i32
    return %c0_i32, %c0_i32_0 : i32, i32
  }
  func.func @transform_4(%arg0: i32) -> (i32, i32) {
    %c0_i32 = arith.constant 0 : i32
    %c0_i32_0 = arith.constant 0 : i32
    %c0_i32_1 = arith.constant 0 : i32
    return %c0_i32, %c0_i32_0 : i32, i32
  }
  func.func @transform_5(%arg0: i32) -> (i32, i32) {
    %c0_i32 = arith.constant 0 : i32
    %c0_i32_0 = arith.constant 0 : i32
    return %arg0, %c0_i32 : i32, i32
  }
}

module attributes {stable_mosaic.version = 11 : i64} {
  func.func @_conv3x3_attn_kernel(%arg0: i32, %arg1: memref<1xf32, #tpu.memory_space<smem>>, %arg2: memref<1x8x8x256xbf16, #tpu.memory_space<vmem>>, %arg3: memref<64x512xbf16, #tpu.memory_space<vmem>>, %arg4: memref<2304x512xbf16, #tpu.memory_space<vmem>>, %arg5: memref<1x512xf32, #tpu.memory_space<vmem>>, %arg6: memref<1x512xf32, #tpu.memory_space<vmem>>, %arg7: memref<1x512xf32, #tpu.memory_space<vmem>>, %arg8: memref<512x512xbf16, #tpu.memory_space<vmem>>, %arg9: memref<1x512xf32, #tpu.memory_space<vmem>>, %arg10: memref<64x512xf32, #tpu.memory_space<vmem>>, %arg11: memref<1x10x24x256xbf16, #tpu.memory_space<vmem>>, %arg12: memref<64x2304xbf16, #tpu.memory_space<vmem>>) attributes {dimension_semantics = [#tpu.dimension_semantics<parallel>], iteration_bounds = array<i64: 2>, scalar_prefetch = 0 : i64, scratch_operands = 2 : i64, tpu.core_type = #tpu.core_type<tc>, window_params = [{transform_indices = @transform_0, window_bounds = array<i64: 1>}, {transform_indices = @transform_1, window_bounds = array<i64: 1, 8, 8, 256>}, {transform_indices = @transform_2, window_bounds = array<i64: 64, 512>}, {pipeline_mode = #tpu.pipeline_mode<synchronous>, transform_indices = @transform_3, window_bounds = array<i64: 2304, 512>}, {pipeline_mode = #tpu.pipeline_mode<synchronous>, transform_indices = @transform_4, window_bounds = array<i64: 1, 512>}, {pipeline_mode = #tpu.pipeline_mode<synchronous>, transform_indices = @transform_5, window_bounds = array<i64: 1, 512>}, {pipeline_mode = #tpu.pipeline_mode<synchronous>, transform_indices = @transform_6, window_bounds = array<i64: 1, 512>}, {pipeline_mode = #tpu.pipeline_mode<synchronous>, transform_indices = @transform_7, window_bounds = array<i64: 512, 512>}, {pipeline_mode = #tpu.pipeline_mode<synchronous>, transform_indices = @transform_8, window_bounds = array<i64: 1, 512>}, {transform_indices = @transform_9, window_bounds = array<i64: 64, 512>}]} {
    %cst = arith.constant 0.000000e+00 : bf16
    %0 = vector.broadcast %cst : bf16 to vector<1x10x24x256xbf16>
    %c0 = arith.constant 0 : index
    %c0_0 = arith.constant 0 : index
    %c0_1 = arith.constant 0 : index
    %c0_2 = arith.constant 0 : index
    %1 = vector.load %arg11[%c0, %c0_0, %c0_1, %c0_2] : memref<1x10x24x256xbf16, #tpu.memory_space<vmem>>, vector<1x10x24x256xbf16>
    tpu.vector_store %arg11[%c0, %c0_0, %c0_1, %c0_2], %0 {strides = array<i32>} : memref<1x10x24x256xbf16, #tpu.memory_space<vmem>>, vector<1x10x24x256xbf16>,
    %c0_3 = arith.constant 0 : index
    %c0_4 = arith.constant 0 : index
    %c0_5 = arith.constant 0 : index
    %c0_6 = arith.constant 0 : index
    %2 = vector.load %arg2[%c0_3, %c0_4, %c0_5, %c0_6] : memref<1x8x8x256xbf16, #tpu.memory_space<vmem>>, vector<1x8x8x256xbf16>
    %c0_7 = arith.constant 0 : index
    %c1 = arith.constant 1 : index
    %c8 = arith.constant 8 : index
    %c0_8 = arith.constant 0 : index
    %3 = vector.load %arg11[%c0_7, %c1, %c8, %c0_8] : memref<1x10x24x256xbf16, #tpu.memory_space<vmem>>, vector<1x8x8x256xbf16>
    tpu.vector_store %arg11[%c0_7, %c1, %c8, %c0_8], %2 {strides = array<i32>} : memref<1x10x24x256xbf16, #tpu.memory_space<vmem>>, vector<1x8x8x256xbf16>,
    %c0_9 = arith.constant 0 : index
    %c0_10 = arith.constant 0 : index
    %c7 = arith.constant 7 : index
    %c0_11 = arith.constant 0 : index
    %4 = vector.load %arg11[%c0_9, %c0_10, %c7, %c0_11] : memref<1x10x24x256xbf16, #tpu.memory_space<vmem>>, vector<1x8x8x256xbf16>
    %5 = vector.shape_cast %4 : vector<1x8x8x256xbf16> to vector<8x8x256xbf16>
    %6 = vector.shape_cast %5 : vector<8x8x256xbf16> to vector<64x256xbf16>
    %c0_12 = arith.constant 0 : index
    %c0_13 = arith.constant 0 : index
    %7 = vector.load %arg12[%c0_12, %c0_13] : memref<64x2304xbf16, #tpu.memory_space<vmem>>, vector<64x256xbf16>
    tpu.vector_store %arg12[%c0_12, %c0_13], %6 {strides = array<i32>} : memref<64x2304xbf16, #tpu.memory_space<vmem>>, vector<64x256xbf16>,
    %c0_14 = arith.constant 0 : index
    %c0_15 = arith.constant 0 : index
    %c8_16 = arith.constant 8 : index
    %c0_17 = arith.constant 0 : index
    %8 = vector.load %arg11[%c0_14, %c0_15, %c8_16, %c0_17] : memref<1x10x24x256xbf16, #tpu.memory_space<vmem>>, vector<1x8x8x256xbf16>
    %9 = vector.shape_cast %8 : vector<1x8x8x256xbf16> to vector<8x8x256xbf16>
    %10 = vector.shape_cast %9 : vector<8x8x256xbf16> to vector<64x256xbf16>
    %c0_18 = arith.constant 0 : index
    %c256 = arith.constant 256 : index
    %11 = vector.load %arg12[%c0_18, %c256] : memref<64x2304xbf16, #tpu.memory_space<vmem>>, vector<64x256xbf16>
    tpu.vector_store %arg12[%c0_18, %c256], %10 {strides = array<i32>} : memref<64x2304xbf16, #tpu.memory_space<vmem>>, vector<64x256xbf16>,
    %c0_19 = arith.constant 0 : index
    %c0_20 = arith.constant 0 : index
    %c9 = arith.constant 9 : index
    %c0_21 = arith.constant 0 : index
    %12 = vector.load %arg11[%c0_19, %c0_20, %c9, %c0_21] : memref<1x10x24x256xbf16, #tpu.memory_space<vmem>>, vector<1x8x8x256xbf16>
    %13 = vector.shape_cast %12 : vector<1x8x8x256xbf16> to vector<8x8x256xbf16>
    %14 = vector.shape_cast %13 : vector<8x8x256xbf16> to vector<64x256xbf16>
    %c0_22 = arith.constant 0 : index
    %c512 = arith.constant 512 : index
    %15 = vector.load %arg12[%c0_22, %c512] : memref<64x2304xbf16, #tpu.memory_space<vmem>>, vector<64x256xbf16>
    tpu.vector_store %arg12[%c0_22, %c512], %14 {strides = array<i32>} : memref<64x2304xbf16, #tpu.memory_space<vmem>>, vector<64x256xbf16>,
    %c0_23 = arith.constant 0 : index
    %c1_24 = arith.constant 1 : index
    %c7_25 = arith.constant 7 : index
    %c0_26 = arith.constant 0 : index
    %16 = vector.load %arg11[%c0_23, %c1_24, %c7_25, %c0_26] : memref<1x10x24x256xbf16, #tpu.memory_space<vmem>>, vector<1x8x8x256xbf16>
    %17 = vector.shape_cast %16 : vector<1x8x8x256xbf16> to vector<8x8x256xbf16>
    %18 = vector.shape_cast %17 : vector<8x8x256xbf16> to vector<64x256xbf16>
    %c0_27 = arith.constant 0 : index
    %c768 = arith.constant 768 : index
    %19 = vector.load %arg12[%c0_27, %c768] : memref<64x2304xbf16, #tpu.memory_space<vmem>>, vector<64x256xbf16>
    tpu.vector_store %arg12[%c0_27, %c768], %18 {strides = array<i32>} : memref<64x2304xbf16, #tpu.memory_space<vmem>>, vector<64x256xbf16>,
    %c0_28 = arith.constant 0 : index
    %c1_29 = arith.constant 1 : index
    %c8_30 = arith.constant 8 : index
    %c0_31 = arith.constant 0 : index
    %20 = vector.load %arg11[%c0_28, %c1_29, %c8_30, %c0_31] : memref<1x10x24x256xbf16, #tpu.memory_space<vmem>>, vector<1x8x8x256xbf16>
    %21 = vector.shape_cast %20 : vector<1x8x8x256xbf16> to vector<8x8x256xbf16>
    %22 = vector.shape_cast %21 : vector<8x8x256xbf16> to vector<64x256xbf16>
    %c0_32 = arith.constant 0 : index
    %c1024 = arith.constant 1024 : index
    %23 = vector.load %arg12[%c0_32, %c1024] : memref<64x2304xbf16, #tpu.memory_space<vmem>>, vector<64x256xbf16>
    tpu.vector_store %arg12[%c0_32, %c1024], %22 {strides = array<i32>} : memref<64x2304xbf16, #tpu.memory_space<vmem>>, vector<64x256xbf16>,
    %c0_33 = arith.constant 0 : index
    %c1_34 = arith.constant 1 : index
    %c9_35 = arith.constant 9 : index
    %c0_36 = arith.constant 0 : index
    %24 = vector.load %arg11[%c0_33, %c1_34, %c9_35, %c0_36] : memref<1x10x24x256xbf16, #tpu.memory_space<vmem>>, vector<1x8x8x256xbf16>
    %25 = vector.shape_cast %24 : vector<1x8x8x256xbf16> to vector<8x8x256xbf16>
    %26 = vector.shape_cast %25 : vector<8x8x256xbf16> to vector<64x256xbf16>
    %c0_37 = arith.constant 0 : index
    %c1280 = arith.constant 1280 : index
    %27 = vector.load %arg12[%c0_37, %c1280] : memref<64x2304xbf16, #tpu.memory_space<vmem>>, vector<64x256xbf16>
    tpu.vector_store %arg12[%c0_37, %c1280], %26 {strides = array<i32>} : memref<64x2304xbf16, #tpu.memory_space<vmem>>, vector<64x256xbf16>,
    %c0_38 = arith.constant 0 : index
    %c2 = arith.constant 2 : index
    %c7_39 = arith.constant 7 : index
    %c0_40 = arith.constant 0 : index
    %28 = vector.load %arg11[%c0_38, %c2, %c7_39, %c0_40] : memref<1x10x24x256xbf16, #tpu.memory_space<vmem>>, vector<1x8x8x256xbf16>
    %29 = vector.shape_cast %28 : vector<1x8x8x256xbf16> to vector<8x8x256xbf16>
    %30 = vector.shape_cast %29 : vector<8x8x256xbf16> to vector<64x256xbf16>
    %c0_41 = arith.constant 0 : index
    %c1536 = arith.constant 1536 : index
    %31 = vector.load %arg12[%c0_41, %c1536] : memref<64x2304xbf16, #tpu.memory_space<vmem>>, vector<64x256xbf16>
    tpu.vector_store %arg12[%c0_41, %c1536], %30 {strides = array<i32>} : memref<64x2304xbf16, #tpu.memory_space<vmem>>, vector<64x256xbf16>,
    %c0_42 = arith.constant 0 : index
    %c2_43 = arith.constant 2 : index
    %c8_44 = arith.constant 8 : index
    %c0_45 = arith.constant 0 : index
    %32 = vector.load %arg11[%c0_42, %c2_43, %c8_44, %c0_45] : memref<1x10x24x256xbf16, #tpu.memory_space<vmem>>, vector<1x8x8x256xbf16>
    %33 = vector.shape_cast %32 : vector<1x8x8x256xbf16> to vector<8x8x256xbf16>
    %34 = vector.shape_cast %33 : vector<8x8x256xbf16> to vector<64x256xbf16>
    %c0_46 = arith.constant 0 : index
    %c1792 = arith.constant 1792 : index
    %35 = vector.load %arg12[%c0_46, %c1792] : memref<64x2304xbf16, #tpu.memory_space<vmem>>, vector<64x256xbf16>
    tpu.vector_store %arg12[%c0_46, %c1792], %34 {strides = array<i32>} : memref<64x2304xbf16, #tpu.memory_space<vmem>>, vector<64x256xbf16>,
    %c0_47 = arith.constant 0 : index
    %c2_48 = arith.constant 2 : index
    %c9_49 = arith.constant 9 : index
    %c0_50 = arith.constant 0 : index
    %36 = vector.load %arg11[%c0_47, %c2_48, %c9_49, %c0_50] : memref<1x10x24x256xbf16, #tpu.memory_space<vmem>>, vector<1x8x8x256xbf16>
    %37 = vector.shape_cast %36 : vector<1x8x8x256xbf16> to vector<8x8x256xbf16>
    %38 = vector.shape_cast %37 : vector<8x8x256xbf16> to vector<64x256xbf16>
    %c0_51 = arith.constant 0 : index
    %c2048 = arith.constant 2048 : index
    %39 = vector.load %arg12[%c0_51, %c2048] : memref<64x2304xbf16, #tpu.memory_space<vmem>>, vector<64x256xbf16>
    tpu.vector_store %arg12[%c0_51, %c2048], %38 {strides = array<i32>} : memref<64x2304xbf16, #tpu.memory_space<vmem>>, vector<64x256xbf16>,
    %c0_52 = arith.constant 0 : index
    %c0_53 = arith.constant 0 : index
    %40 = vector.load %arg12[%c0_52, %c0_53] : memref<64x2304xbf16, #tpu.memory_space<vmem>>, vector<64x2304xbf16>
    %c0_54 = arith.constant 0 : index
    %c0_55 = arith.constant 0 : index
    %41 = vector.load %arg4[%c0_54, %c0_55] : memref<2304x512xbf16, #tpu.memory_space<vmem>>, vector<2304x512xbf16>
    %cst_56 = arith.constant dense<0.000000e+00> : vector<64x512xf32>
    %42 = tpu.matmul %40, %41, %cst_56 {dimension_numbers = #tpu.dot_dimension_numbers<[1], [0], [0], [1], [0, 0, 1, 1], [], []>} : vector<64x2304xbf16>, vector<2304x512xbf16>, vector<64x512xf32> -> vector<64x512xf32>
    %c0_57 = arith.constant 0 : index
    %c0_58 = arith.constant 0 : index
    %43 = vector.load %arg5[%c0_57, %c0_58] : memref<1x512xf32, #tpu.memory_space<vmem>>, vector<1x512xf32>
    %44 = vector.broadcast %43 : vector<1x512xf32> to vector<64x512xf32>
    %45 = arith.addf %42, %44 : vector<64x512xf32>
    %cst_59 = arith.constant 0.00999999977 : f32
    %46 = vector.broadcast %cst_59 : f32 to vector<64x512xf32>
    %47 = arith.mulf %46, %45 : vector<64x512xf32>
    %48 = arith.maximumf %45, %47 : vector<64x512xf32>
    %c0_60 = arith.constant 0 : index
    %c0_61 = arith.constant 0 : index
    %49 = vector.load %arg6[%c0_60, %c0_61] : memref<1x512xf32, #tpu.memory_space<vmem>>, vector<1x512xf32>
    %50 = vector.broadcast %49 : vector<1x512xf32> to vector<64x512xf32>
    %51 = arith.mulf %48, %50 : vector<64x512xf32>
    %c0_62 = arith.constant 0 : index
    %c0_63 = arith.constant 0 : index
    %52 = vector.load %arg7[%c0_62, %c0_63] : memref<1x512xf32, #tpu.memory_space<vmem>>, vector<1x512xf32>
    %53 = vector.broadcast %52 : vector<1x512xf32> to vector<64x512xf32>
    %54 = arith.addf %51, %53 : vector<64x512xf32>
    %55 = arith.truncf %54 : vector<64x512xf32> to vector<64x512xbf16>
    %c0_64 = arith.constant 0 : index
    %c0_65 = arith.constant 0 : index
    %56 = vector.load %arg8[%c0_64, %c0_65] : memref<512x512xbf16, #tpu.memory_space<vmem>>, vector<512x512xbf16>
    %cst_66 = arith.constant dense<0.000000e+00> : vector<64x512xf32>
    %57 = tpu.matmul %55, %56, %cst_66 {dimension_numbers = #tpu.dot_dimension_numbers<[1], [0], [0], [1], [0, 0, 1, 1], [], []>} : vector<64x512xbf16>, vector<512x512xbf16>, vector<64x512xf32> -> vector<64x512xf32>
    %c0_67 = arith.constant 0 : index
    %c0_68 = arith.constant 0 : index
    %58 = vector.load %arg9[%c0_67, %c0_68] : memref<1x512xf32, #tpu.memory_space<vmem>>, vector<1x512xf32>
    %59 = vector.broadcast %58 : vector<1x512xf32> to vector<64x512xf32>
    %60 = arith.addf %57, %59 : vector<64x512xf32>
    %cst_69 = arith.constant dense<0.000000e+00> : vector<64xf32>
    %61 = vector.multi_reduction <add>, %60, %cst_69 [1] : vector<64x512xf32> to vector<64xf32>
    %62 = vector.shape_cast %61 : vector<64xf32> to vector<64x1xf32>
    %cst_70 = arith.constant 5.120000e+02 : f32
    %63 = vector.broadcast %cst_70 : f32 to vector<64x1xf32>
    %64 = arith.divf %62, %63 : vector<64x1xf32>
    %65 = arith.negf %64 : vector<64x1xf32>
    %66 = math.exp %65 : vector<64x1xf32>
    %cst_71 = arith.constant 1.000000e+00 : f32
    %67 = vector.broadcast %cst_71 : f32 to vector<64x1xf32>
    %68 = arith.addf %67, %66 : vector<64x1xf32>
    %69 = arith.divf %67, %68 : vector<64x1xf32>
    %70 = arith.negf %69 : vector<64x1xf32>
    %71 = math.exp %70 : vector<64x1xf32>
    %cst_72 = arith.constant 1.000000e+00 : f32
    %72 = vector.broadcast %cst_72 : f32 to vector<64x1xf32>
    %73 = arith.addf %72, %71 : vector<64x1xf32>
    %74 = arith.divf %72, %73 : vector<64x1xf32>
    %75 = arith.addf %69, %74 : vector<64x1xf32>
    %c0_73 = arith.constant 0 : index
    %76 = memref.load %arg1[%c0_73] : memref<1xf32, #tpu.memory_space<smem>>
    %c0_74 = arith.constant 0 : index
    %c0_75 = arith.constant 0 : index
    %77 = vector.load %arg3[%c0_74, %c0_75] : memref<64x512xbf16, #tpu.memory_space<vmem>>, vector<64x512xbf16>
    %78 = arith.extf %77 : vector<64x512xbf16> to vector<64x512xf32>
    %79 = vector.broadcast %76 : f32 to vector<64x512xf32>
    %80 = arith.mulf %79, %78 : vector<64x512xf32>
    %81 = vector.broadcast %75 : vector<64x1xf32> to vector<64x512xf32>
    %82 = arith.mulf %80, %81 : vector<64x512xf32>
    %c0_76 = arith.constant 0 : index
    %c0_77 = arith.constant 0 : index
    %83 = vector.load %arg10[%c0_76, %c0_77] : memref<64x512xf32, #tpu.memory_space<vmem>>, vector<64x512xf32>
    tpu.vector_store %arg10[%c0_76, %c0_77], %82 {strides = array<i32>} : memref<64x512xf32, #tpu.memory_space<vmem>>, vector<64x512xf32>,
    return
  }
  func.func @transform_0(%arg0: i32) -> i32 {
    %c0_i32 = arith.constant 0 : i32
    %c0_i32_0 = arith.constant 0 : i32
    return %c0_i32 : i32
  }
  func.func @transform_1(%arg0: i32) -> (i32, i32, i32, i32) {
    %c0_i32 = arith.constant 0 : i32
    %c0_i32_0 = arith.constant 0 : i32
    %c0_i32_1 = arith.constant 0 : i32
    %c0_i32_2 = arith.constant 0 : i32
    return %arg0, %c0_i32, %c0_i32_0, %c0_i32_1 : i32, i32, i32, i32
  }
  func.func @transform_2(%arg0: i32) -> (i32, i32) {
    %c0_i32 = arith.constant 0 : i32
    %c0_i32_0 = arith.constant 0 : i32
    return %arg0, %c0_i32 : i32, i32
  }
  func.func @transform_3(%arg0: i32) -> (i32, i32) {
    %c0_i32 = arith.constant 0 : i32
    %c0_i32_0 = arith.constant 0 : i32
    %c0_i32_1 = arith.constant 0 : i32
    return %c0_i32, %c0_i32_0 : i32, i32
  }
  func.func @transform_4(%arg0: i32) -> (i32, i32) {
    %c0_i32 = arith.constant 0 : i32
    %c0_i32_0 = arith.constant 0 : i32
    %c0_i32_1 = arith.constant 0 : i32
    return %c0_i32, %c0_i32_0 : i32, i32
  }
  func.func @transform_5(%arg0: i32) -> (i32, i32) {
    %c0_i32 = arith.constant 0 : i32
    %c0_i32_0 = arith.constant 0 : i32
    %c0_i32_1 = arith.constant 0 : i32
    return %c0_i32, %c0_i32_0 : i32, i32
  }
  func.func @transform_6(%arg0: i32) -> (i32, i32) {
    %c0_i32 = arith.constant 0 : i32
    %c0_i32_0 = arith.constant 0 : i32
    %c0_i32_1 = arith.constant 0 : i32
    return %c0_i32, %c0_i32_0 : i32, i32
  }
  func.func @transform_7(%arg0: i32) -> (i32, i32) {
    %c0_i32 = arith.constant 0 : i32
    %c0_i32_0 = arith.constant 0 : i32
    %c0_i32_1 = arith.constant 0 : i32
    return %c0_i32, %c0_i32_0 : i32, i32
  }
  func.func @transform_8(%arg0: i32) -> (i32, i32) {
    %c0_i32 = arith.constant 0 : i32
    %c0_i32_0 = arith.constant 0 : i32
    %c0_i32_1 = arith.constant 0 : i32
    return %c0_i32, %c0_i32_0 : i32, i32
  }
  func.func @transform_9(%arg0: i32) -> (i32, i32) {
    %c0_i32 = arith.constant 0 : i32
    %c0_i32_0 = arith.constant 0 : i32
    return %arg0, %c0_i32 : i32, i32
  }
}

</mosaic_0001>

<bundles_post_ra>
// kernel: ca_forward.3
= control target key start
LH: loop header
LB: loop body
LE: loop exit
PB: predicated region body
PF: predicated region fallthrough
CT: control target
= control target key end

     0   :  { %10 = vsyncpa [#allocation3], 0  ;;  %s1988_s0 = inlined_call_operand.vmem [shape: bf16[128,512], index: 0, kind: input, shape index: {}]   ;;  %s1989_s1 = inlined_call_operand.vmem [shape: bf16[512,256], index: 1, kind: input, shape index: {}]   ;;  %s1990_s2 = inlined_call_operand.hbm [shape: f32[1,256], index: 2, kind: input, shape index: {}]   ;;  %s1991_s3 = inlined_call_operand.hbm [shape: f32[1,256], index: 3, kind: input, shape index: {}]   ;;  %s1992_s4 = inlined_call_operand.hbm [shape: f32[1,256], index: 4, kind: input, shape index: {}]   ;;  %s1993_s5 = inlined_call_operand.vmem [shape: bf16[128,256], index: 5, kind: output, shape index: {}]  }
   0x1   :  { %11 = vsyncpa [#allocation5], 0  ;;  %s1583_s18 = smov 0  }
   0x2 LB: > { %s1142_s19 = sadd.s32 4294967295, %s1548_s18   ;;  %p1144_p0 = scmp.ge.s32.totalorder %s1548_s18, 1  ;;  %s1548_s18 = sphi %s1583_s18, %s17_s18  }
   0x3   : > { %p158_p1 = scmp.lt.s32.totalorder %s1548_s18, 3  ;;  %p1593_p2 = scmp.eq.s32.totalorder %s1142_s19, 0 }
   0x4   : > { %s1550_s22 = smov [#allocation4]   ;;  %s1551_s24 = smov [#allocation2]  }
   0x5   : > { %s1997_s20 = scalar_select %p1593_p2, 1, 0 }
   0x6   : > { %p1597_p3 = pnand %p1144_p0, %p158_p1  ;;  %s185_s23 = sshll.u32 %s1550_s22, 4  ;;  %s186_s23 = int_to_ptr.vmem [resolvable:$true] %s185_s23 }
   0x7   : > { %s174_s25 = sshll.u32 %s1551_s24, 4  ;;  %s1552_s26 = smov [#allocation6]   ;;  %s1609_s25 = int_to_ptr.vmem [resolvable:$true] %s174_s25 }
   0x8   : > { %s1998_s21 = scalar_select %p1597_p3, 1, 0 }
   0x9   : > { %p1303_p4 = pneg %p1597_p3  ;;  %s196_s27 = sshll.u32 %s1552_s26, 4  ;;  %s1611_s27 = int_to_ptr.vmem [resolvable:$true] %s196_s27 }
   0xa   : > { %s1450_s6 = scalar_lea.hbm %s1991_s3, 32 }
   0xb   : > { %p1605_p5 = pnand %p1593_p2, %p1303_p4  ;;  %p1451_p6 = scmp.ne.s32.totalorder %s1991_s3, %s1450_s6 }
   0xc   : > { %p1457_p10 = scmp.lt.u32.totalorder %s1450_s6, %s1991_s3 }
   0xd   : > { %p1621_p7 = pneg %p1605_p5 }
   0xf   : > { %p1453_p8 = pnand %p1621_p7, %p1451_p6 }
  0x11   : > { %p1454_p9 = pneg %p1453_p8 }
  0x13   : > { %p1459_p11 = pnand %p1457_p10, %p1454_p9 }
  0x15   : > { %1462 = shalt.err (!%p1459_p11)
}
  0x16   : > { %s1463_s12 = scalar_lea.vmem %s186_s23, 32  ;;  %p1471_p1 = scmp.lt.s32.totalorder %s186_s23, %s186_s23 }
  0x17   : > { %p1464_p12 = scmp.ne.s32.totalorder %s186_s23, %s1463_s12  ;;  %p1472_p4 = scmp.lt.s32.totalorder %s1463_s12, %s1463_s12 }
  0x19   : > { %p1466_p13 = pnand %p1464_p12, %p1621_p7  ;;  %p1473_p2 = por %p1472_p4, %p1471_p1 }
  0x1b   : > { %p1467_p0 = pneg %p1466_p13 }
  0x1d   : > { %p1474_p3 = pnand %p1473_p2, %p1467_p0 }
  0x1f   : > { %1477 = shalt.err (!%p1474_p3)
}
  0x20   : > { %1309 = dma.hbm_to_vmem [thread:$0]  (!%p1605_p5), %s1991_s3, 32, %s186_s23, [#allocation5]  }
  0x21   : > { %s1478_s17 = scalar_lea.hbm %s1990_s2, 32 }
  0x22   : > { %p1479_p6 = scmp.ne.s32.totalorder %s1990_s2, %s1478_s17  ;;  %p1485_p2 = scmp.lt.u32.totalorder %s1478_s17, %s1990_s2 }
  0x24   : > { %p1481_p8 = pnand %p1479_p6, %p1621_p7 }
  0x26   : > { %p1482_p9 = pneg %p1481_p8 }
  0x28   : > { %p1487_p3 = pnand %p1485_p2, %p1482_p9 }
  0x2a   : > { %1490 = shalt.err (!%p1487_p3)
}
  0x2b   : > { %s1491_s23 = scalar_lea.vmem %s1609_s25, 32  ;;  %p1499_p13 = scmp.lt.s32.totalorder %s1609_s25, %s1609_s25 }
  0x2c   : > { %p1492_p10 = scmp.ne.s32.totalorder %s1609_s25, %s1491_s23  ;;  %p1500_p0 = scmp.lt.s32.totalorder %s1491_s23, %s1491_s23 }
  0x2e   : > { %p1494_p11 = pnand %p1492_p10, %p1621_p7  ;;  %p1501_p1 = por %p1500_p0, %p1499_p13 }
  0x30   : > { %p1495_p12 = pneg %p1494_p11 }
  0x32   : > { %p1502_p4 = pnand %p1501_p1, %p1495_p12 }
  0x34   : > { %1505 = shalt.err (!%p1502_p4)
}
  0x35   : > { %1306 = dma.hbm_to_vmem [thread:$0]  (!%p1605_p5), %s1990_s2, 32, %s1609_s25, [#allocation3]  }
  0x36   : > { %s1506_s10 = scalar_lea.hbm %s1992_s4, 32 }
  0x37   : > { %p1507_p6 = scmp.ne.s32.totalorder %s1992_s4, %s1506_s10  ;;  %p1513_p2 = scmp.lt.u32.totalorder %s1506_s10, %s1992_s4 }
  0x39   : > { %p1509_p8 = pnand %p1507_p6, %p1621_p7 }
  0x3b   : > { %p1510_p9 = pneg %p1509_p8 }
  0x3d   : > { %p1515_p3 = pnand %p1513_p2, %p1510_p9 }
  0x3f   : > { %1518 = shalt.err (!%p1515_p3)
}
  0x40   : > { %s1519_s25 = scalar_lea.vmem %s1611_s27, 32  ;;  %p1527_p13 = scmp.lt.s32.totalorder %s1611_s27, %s1611_s27 }
  0x41   : > { %p1520_p10 = scmp.ne.s32.totalorder %s1611_s27, %s1519_s25  ;;  %p1528_p0 = scmp.lt.s32.totalorder %s1519_s25, %s1519_s25 }
  0x43   : > { %p1522_p11 = pnand %p1520_p10, %p1621_p7  ;;  %p1529_p1 = por %p1528_p0, %p1527_p13 }
  0x45   : > { %p1523_p12 = pneg %p1522_p11 }
  0x47   : > { %p1530_p4 = pnand %p1529_p1, %p1523_p12 }
  0x49   : > { %1533 = shalt.err (!%p1530_p4)
}
  0x4a   : > { %1312 = dma.hbm_to_vmem [thread:$0]  (!%p1605_p5), %s1992_s4, 32, %s1611_s27, [#allocation5]  }
  0x4b   : > { %p2001_p6 = scmp.ne.s32.totalorder %s1998_s21, 0 }
  0x4c   : > { %p2002_p8 = scmp.ne.s32.totalorder (!%p2001_p6), %s1997_s20, 0 }
  0x4d   : > { %219 = sbr.rel (%p2001_p6) target bundleno = 406 (0x196), region = 40 }
  0x54   : > { %1539 = dma.done.wait (%p2002_p8), [#allocation3], 32  }
  0x55   : > { %1541 = vsyncadd (%p2002_p8), [#allocation3], 4294967264 }
  0x56   : > { %1543 = dma.done.wait (%p2002_p8), [#allocation5], 64  }
  0x57   : > { %1545 = vsyncadd (%p2002_p8), [#allocation5], 4294967232  ;;  %v1330_v0 = vld [vmem:[%s1989_s1 + $0x4] ss:$8 sps:$4 sm:$0xff]   ;;  %v1334_v2 = vld [vmem:[%s1989_s1] ss:$8 sps:$4 sm:$0xff]  }
  0x58   : > { %v1332_v1 = vld [vmem:[%s1989_s1 + $0x104] ss:$8 sps:$4 sm:$0xff]   ;;  %763 = vmatprep.subr.bf16.mxu1 %v1330_v0  ;;  %v1335_v3 = vld [vmem:[%s1989_s1 + $0x100] ss:$8 sps:$4 sm:$0xff]   ;;  %v1336_v4 = vld [vmem:[%s1989_s1 + $0x14] ss:$8 sps:$4 sm:$0xff]  }
  0x59   : > { %836 = vmatprep.subr.bf16.mxu0 %v1332_v1  ;;  %764 = vmatpush1.bf16.msra.mxu1 %v1334_v2  ;;  %v1338_v5 = vld [vmem:[%s1989_s1 + $0x114] ss:$8 sps:$4 sm:$0xff]   ;;  %v1340_v6 = vld [vmem:[%s1989_s1 + $0x10] ss:$8 sps:$4 sm:$0xff]   ;;  %v1342_v8 = vld [vmem:[%s1989_s1 + $0x24] ss:$8 sps:$4 sm:$0xff]  }
  0x5a   : > { %837 = vmatpush1.bf16.msra.mxu0 %v1335_v3  ;;  %765 = vmatprep.subr.bf16.mxu1 %v1336_v4  ;;  %v1341_v7 = vld [vmem:[%s1989_s1 + $0x110] ss:$8 sps:$4 sm:$0xff]   ;;  %v1344_v9 = vld [vmem:[%s1989_s1 + $0x124] ss:$8 sps:$4 sm:$0xff]   ;;  %v1346_v10 = vld [vmem:[%s1989_s1 + $0x20] ss:$8 sps:$4 sm:$0xff]  }
  0x5b   : > { %838 = vmatprep.subr.bf16.mxu0 %v1338_v5  ;;  %v1347_v11 = vld [vmem:[%s1989_s1 + $0x120] ss:$8 sps:$4 sm:$0xff]   ;;  %v1348_v12 = vld [vmem:[%s1989_s1 + $0x34] ss:$8 sps:$4 sm:$0xff]   ;;  %v1352_v14 = vld [vmem:[%s1989_s1 + $0x30] ss:$8 sps:$4 sm:$0xff]  }
  0x5c   : > { %v1350_v13 = vld [vmem:[%s1989_s1 + $0x134] ss:$8 sps:$4 sm:$0xff]   ;;  %v1353_v15 = vld [vmem:[%s1989_s1 + $0x130] ss:$8 sps:$4 sm:$0xff]   ;;  %v1354_v16 = vld [vmem:[%s1989_s1 + $0x44] ss:$8 sps:$4 sm:$0xff]  }
  0x5d   : > { %766 = vmatpush1.bf16.msra.mxu1 %v1340_v6  ;;  %v1356_v17 = vld [vmem:[%s1989_s1 + $0x144] ss:$8 sps:$4 sm:$0xff]   ;;  %v1358_v18 = vld [vmem:[%s1989_s1 + $0x40] ss:$8 sps:$4 sm:$0xff]   ;;  %v1360_v20 = vld [vmem:[%s1989_s1 + $0x54] ss:$8 sps:$4 sm:$0xff]  }
  0x5e   : > { %839 = vmatpush1.bf16.msra.mxu0 %v1341_v7  ;;  %767 = vmatprep.subr.bf16.mxu1 %v1342_v8  ;;  %v1359_v19 = vld [vmem:[%s1989_s1 + $0x140] ss:$8 sps:$4 sm:$0xff]   ;;  %v1362_v21 = vld [vmem:[%s1989_s1 + $0x154] ss:$8 sps:$4 sm:$0xff]   ;;  %v1364_v22 = vld [vmem:[%s1989_s1 + $0x50] ss:$8 sps:$4 sm:$0xff]  }
  0x5f   : > { %840 = vmatprep.subr.bf16.mxu0 %v1344_v9  ;;  %v1365_v23 = vld [vmem:[%s1989_s1 + $0x150] ss:$8 sps:$4 sm:$0xff]   ;;  %v1366_v24 = vld [vmem:[%s1989_s1 + $0x64] ss:$8 sps:$4 sm:$0xff]   ;;  %v1370_v26 = vld [vmem:[%s1989_s1 + $0x60] ss:$8 sps:$4 sm:$0xff]  }
  0x60   : > { %v1368_v25 = vld [vmem:[%s1989_s1 + $0x164] ss:$8 sps:$4 sm:$0xff]   ;;  %v1371_v27 = vld [vmem:[%s1989_s1 + $0x160] ss:$8 sps:$4 sm:$0xff]   ;;  %v1372_v28 = vld [vmem:[%s1989_s1 + $0x74] ss:$8 sps:$4 sm:$0xff]  }
  0x61   : > { %768 = vmatpush1.bf16.msra.mxu1 %v1346_v10  ;;  %v1374_v29 = vld [vmem:[%s1989_s1 + $0x174] ss:$8 sps:$4 sm:$0xff]   ;;  %s1153_s8 = sshll.u32 %s1142_s19, 3  ;;  %v1376_v30 = vld [vmem:[%s1989_s1 + $0x70] ss:$8 sps:$4 sm:$0xff]  }
  0x62   : > { %841 = vmatpush1.bf16.msra.mxu0 %v1347_v11  ;;  %769 = vmatprep.subr.bf16.mxu1 %v1348_v12  ;;  %v1377_v31 = vld [vmem:[%s1989_s1 + $0x170] ss:$8 sps:$4 sm:$0xff]   ;;  %v1378_v32 = vld [vmem:[%s1989_s1 + $0x84] ss:$8 sps:$4 sm:$0xff]   ;;  %p258_p5 = scmp.lt.s32.totalorder %s1153_s8, 15 }
  0x63   : > { %842 = vmatprep.subr.bf16.mxu0 %v1350_v13  ;;  %v1380_v33 = vld [vmem:[%s1989_s1 + $0x184] ss:$8 sps:$4 sm:$0xff]   ;;  %v1382_v34 = vld [vmem:[%s1989_s1 + $0x80] ss:$8 sps:$4 sm:$0xff]   ;;  %v1384_v36 = vld [vmem:[%s1989_s1 + $0x94] ss:$8 sps:$4 sm:$0xff]  }
  0x64   : > { %v1383_v35 = vld [vmem:[%s1989_s1 + $0x180] ss:$8 sps:$4 sm:$0xff]   ;;  %v1386_v37 = vld [vmem:[%s1989_s1 + $0x194] ss:$8 sps:$4 sm:$0xff]   ;;  %s2004_s8 = smov (!%p258_p5, %s1153_s8), 15 }
  0x65   : > { %770 = vmatpush1.bf16.msra.mxu1 %v1352_v14  ;;  %v1388_v38 = vld [vmem:[%s1989_s1 + $0x90] ss:$8 sps:$4 sm:$0xff]   ;;  %v1390_v40 = vld [vmem:[%s1989_s1 + $0xa4] ss:$8 sps:$4 sm:$0xff]   ;;  %s1249_s11 = sshll.u32 %s2004_s8, 4 }
  0x66   : > { %843 = vmatpush1.bf16.msra.mxu0 %v1353_v15  ;;  %771 = vmatprep.subr.bf16.mxu1 %v1354_v16  ;;  %v1389_v39 = vld [vmem:[%s1989_s1 + $0x190] ss:$8 sps:$4 sm:$0xff]   ;;  %v1392_v41 = vld [vmem:[%s1989_s1 + $0x1a4] ss:$8 sps:$4 sm:$0xff]   ;;  %v1394_v42 = vld [vmem:[%s1989_s1 + $0xa0] ss:$8 sps:$4 sm:$0xff]   ;;  %s1836_s9 = scalar_lea.vmem %s1988_s0, %s1249_s11  ;;  %v353_v16 = vlaneseq }
  0x67   : > { %844 = vmatprep.subr.bf16.mxu0 %v1356_v17  ;;  %v1395_v43 = vld [vmem:[%s1989_s1 + $0x1a0] ss:$8 sps:$4 sm:$0xff]   ;;  %v1396_v44 = vld [vmem:[%s1989_s1 + $0xb4] ss:$8 sps:$4 sm:$0xff]   ;;  %v1400_v46 = vld [vmem:[%s1989_s1 + $0xb0] ss:$8 sps:$4 sm:$0xff]  }
  0x68   : > { %v1398_v45 = vld [vmem:[%s1989_s1 + $0x1b4] ss:$8 sps:$4 sm:$0xff]   ;;  %v1401_v47 = vld [vmem:[%s1989_s1 + $0x1b0] ss:$8 sps:$4 sm:$0xff]   ;;  %v1402_v48 = vld [vmem:[%s1989_s1 + $0xc4] ss:$8 sps:$4 sm:$0xff]  }
  0x69   : > { %772 = vmatpush1.bf16.msra.mxu1 %v1358_v18  ;;  %v1428_v49 = vld [vmem:[%s1836_s9 + $0x4] ss:$16 sps:$4 sm:$0xff]   ;;  %v1431_v51 = vld [vmem:[%s1836_s9 + $0xc] ss:$16 sps:$4 sm:$0xff]   ;;  %v1406_v52 = vld [vmem:[%s1989_s1 + $0xc0] ss:$8 sps:$4 sm:$0xff]  }
  0x6a   : > { %845 = vmatpush1.bf16.msra.mxu0 %v1359_v19  ;;  %773 = vmatprep.subr.bf16.mxu1 %v1360_v20  ;;  %v1404_v50 = vld [vmem:[%s1989_s1 + $0x1c4] ss:$8 sps:$4 sm:$0xff]   ;;  %v1407_v53 = vld [vmem:[%s1989_s1 + $0x1c0] ss:$8 sps:$4 sm:$0xff]   ;;  %v1408_v54 = vld [vmem:[%s1989_s1 + $0xd4] ss:$8 sps:$4 sm:$0xff]  }
  0x6b   : > { %846 = vmatprep.subr.bf16.mxu0 %v1362_v21  ;;  %795 = vmatprep.mubr.bf16.mxu1 %v1428_v49  ;;  %v1410_v55 = vld [vmem:[%s1989_s1 + $0x1d4] ss:$8 sps:$4 sm:$0xff]   ;;  %v1412_v56 = vld [vmem:[%s1989_s1 + $0xd0] ss:$8 sps:$4 sm:$0xff]   ;;  %v1414_v58 = vld [vmem:[%s1989_s1 + $0xe4] ss:$8 sps:$4 sm:$0xff]  }
  0x6c   : > { %868 = vmatprep.mubr.bf16.mxu0 %v1431_v51  ;;  %v1413_v57 = vld [vmem:[%s1989_s1 + $0x1d0] ss:$8 sps:$4 sm:$0xff]   ;;  %v1416_v59 = vld [vmem:[%s1989_s1 + $0x1e4] ss:$8 sps:$4 sm:$0xff]   ;;  %v1418_v60 = vld [vmem:[%s1989_s1 + $0xe0] ss:$8 sps:$4 sm:$0xff]  }
  0x6d   : > { %774 = vmatpush1.bf16.msra.mxu1 %v1364_v22  ;;  %v1419_v61 = vld [vmem:[%s1989_s1 + $0x1e0] ss:$8 sps:$4 sm:$0xff]   ;;  %v1420_v62 = vld [vmem:[%s1989_s1 + $0xf4] ss:$8 sps:$4 sm:$0xff]   ;;  %v1424_v0 = vld [vmem:[%s1989_s1 + $0xf0] ss:$8 sps:$4 sm:$0xff]  }
  0x6e   : > { %847 = vmatpush1.bf16.msra.mxu0 %v1365_v23  ;;  %775 = vmatprep.subr.bf16.mxu1 %v1366_v24  ;;  %v1422_v63 = vld [vmem:[%s1989_s1 + $0x1f4] ss:$8 sps:$4 sm:$0xff]   ;;  %v1425_v1 = vld [vmem:[%s1989_s1 + $0x1f0] ss:$8 sps:$4 sm:$0xff]   ;;  %v354_v17 = vshrl.u32 %v353_v16, 7 }
  0x6f   : > { %848 = vmatprep.subr.bf16.mxu0 %v1368_v25  ;;  %v1426_v2 = vld [vmem:[%s1836_s9] ss:$16 sps:$4 sm:$0xff]   ;;  %v1429_v3 = vld [vmem:[%s1836_s9 + $0x8] ss:$16 sps:$4 sm:$0xff]   ;;  %v1432_v4 = vld [vmem:[%s1836_s9 + $0x24] ss:$16 sps:$4 sm:$0xff]  }
  0x70   : > { %v1434_v5 = vld [vmem:[%s1836_s9 + $0x2c] ss:$16 sps:$4 sm:$0xff]   ;;  %v1436_v6 = vld [vmem:[%s1836_s9 + $0x20] ss:$16 sps:$4 sm:$0xff]   ;;  %v1437_v7 = vld [vmem:[%s1836_s9 + $0x28] ss:$16 sps:$4 sm:$0xff]  }
  0x71   : > { %776 = vmatpush1.bf16.msra.mxu1 %v1370_v26  ;;  %v1438_v8 = vld [vmem:[%s1836_s9 + $0x44] ss:$16 sps:$4 sm:$0xff]   ;;  %v1440_v9 = vld [vmem:[%s1836_s9 + $0x4c] ss:$16 sps:$4 sm:$0xff]   ;;  %v1442_v10 = vld [vmem:[%s1836_s9 + $0x40] ss:$16 sps:$4 sm:$0xff]  }
  0x72   : > { %849 = vmatpush1.bf16.msra.mxu0 %v1371_v27  ;;  %777 = vmatprep.subr.bf16.mxu1 %v1372_v28  ;;  %v1443_v11 = vld [vmem:[%s1836_s9 + $0x48] ss:$16 sps:$4 sm:$0xff]   ;;  %v1444_v12 = vld [vmem:[%s1836_s9 + $0x64] ss:$16 sps:$4 sm:$0xff]   ;;  %v1446_v13 = vld [vmem:[%s1836_s9 + $0x6c] ss:$16 sps:$4 sm:$0xff]  }
  0x73   : > { %850 = vmatprep.subr.bf16.mxu0 %v1374_v29  ;;  %v1448_v14 = vld [vmem:[%s1836_s9 + $0x60] ss:$16 sps:$4 sm:$0xff]   ;;  %v1449_v15 = vld [vmem:[%s1836_s9 + $0x68] ss:$16 sps:$4 sm:$0xff]   ;;  %v355_v18 = vsub.s32 0, %v354_v17  ;;  %v359_v20 = vsub.s32 1, %v354_v17 }
  0x74   : > { %v351_v19 = vld [vmem:[#allocation2] sm:$0x3]  ;;  %v941_v28 = vld [vmem:[#allocation4] sm:$0x3]  ;;  %s1250_s9 = sshll.u32 %s2004_s8, 3 }
  0x75   : > { %778 = vmatpush1.bf16.msra.mxu1 %v1376_v30  ;;  %v1911_v21 = vrot.slane %v351_v19, %v355_v18  ;;  %v1913_v22 = vrot.slane %v351_v19, %v359_v20  ;;  %s1941_s25 = scalar_lea.vmem %s1993_s5, %s1250_s9 }
  0x76   : > { %851 = vmatpush1.bf16.msra.mxu0 %v1377_v31  ;;  %779 = vmatprep.subr.bf16.mxu1 %v1378_v32 }
  0x77   : > { %852 = vmatprep.subr.bf16.mxu0 %v1380_v33 }
  0x79   : > { %780 = vmatpush1.bf16.msra.mxu1 %v1382_v34 }
  0x7a   : > { %853 = vmatpush1.bf16.msra.mxu0 %v1383_v35  ;;  %781 = vmatprep.subr.bf16.mxu1 %v1384_v36  ;;  %v969_v36 = vld [vmem:[#allocation6] sm:$0x3] }
  0x7b   : > { %854 = vmatprep.subr.bf16.mxu0 %v1386_v37  ;;  %v1925_v49 = vrot.slane %v969_v36, %v359_v20 }
  0x7d   : > { %782 = vmatpush1.bf16.msra.mxu1 %v1388_v38 }
  0x7e   : > { %855 = vmatpush1.bf16.msra.mxu0 %v1389_v39  ;;  %783 = vmatprep.subr.bf16.mxu1 %v1390_v40  ;;  %v1919_v40 = vrot.slane %v941_v28, %v355_v18 }
  0x7f   : > { %856 = vmatprep.subr.bf16.mxu0 %v1392_v41 }
  0x81   : > { %784 = vmatpush1.bf16.msra.mxu1 %v1394_v42 }
  0x82   : > { %857 = vmatpush1.bf16.msra.mxu0 %v1395_v43  ;;  %785 = vmatprep.subr.bf16.mxu1 %v1396_v44  ;;  %v1921_v43 = vrot.slane %v941_v28, %v359_v20 }
  0x83   : > { %858 = vmatprep.subr.bf16.mxu0 %v1398_v45 }
  0x85   : > { %786 = vmatpush1.bf16.msra.mxu1 %v1400_v46  ;;  %v1923_v46 = vrot.slane %v969_v36, %v355_v18 }
  0x86   : > { %859 = vmatpush1.bf16.msra.mxu0 %v1401_v47  ;;  %787 = vmatprep.subr.bf16.mxu1 %v1402_v48 }
  0x87   : > { %860 = vmatprep.subr.bf16.mxu0 %v1404_v50 }
  0x89   : > { %788 = vmatpush1.bf16.msra.mxu1 %v1406_v52 }
  0x8a   : > { %861 = vmatpush1.bf16.msra.mxu0 %v1407_v53  ;;  %789 = vmatprep.subr.bf16.mxu1 %v1408_v54 }
  0x8b   : > { %862 = vmatprep.subr.bf16.mxu0 %v1410_v55 }
  0x8d   : > { %790 = vmatpush1.bf16.msra.mxu1 %v1412_v56 }
  0x8e   : > { %863 = vmatpush1.bf16.msra.mxu0 %v1413_v57  ;;  %791 = vmatprep.subr.bf16.mxu1 %v1414_v58 }
  0x8f   : > { %864 = vmatprep.subr.bf16.mxu0 %v1416_v59 }
  0x91   : > { %792 = vmatpush1.bf16.msra.mxu1 %v1418_v60 }
  0x92   : > { %865 = vmatpush1.bf16.msra.mxu0 %v1419_v61  ;;  %793 = vmatprep.subr.bf16.mxu1 %v1420_v62 }
  0x93   : > { %866 = vmatprep.subr.bf16.mxu0 %v1422_v63 }
  0x95   : > { %794 = vmatpush1.bf16.msra.mxu1 %v1424_v0 }
  0x96   : > { %867 = vmatpush1.bf16.msra.mxu0 %v1425_v1 }
  0x98   : > { %796 = vmatmul.mubr.bf16.vlgmr.msra.gmra.mrb[0].mxu1 %v1426_v2 }
  0x99   : > { %869 = vmatmul.mubr.bf16.vlgmr.msra.gmra.mrb[0].mxu0 %v1429_v3  ;;  %805 = vmatprep.mubr.bf16.mxu1 %v1432_v4 }
  0x9a   : > { %878 = vmatprep.mubr.bf16.mxu0 %v1434_v5 }
  0xa0   : > { %806 = vmatmul.mubr.bf16.gmra.mrb[4].mxu1 %v1436_v6 }
  0xa1   : > { %879 = vmatmul.mubr.bf16.gmra.mrb[4].mxu0 %v1437_v7  ;;  %815 = vmatprep.mubr.bf16.mxu1 %v1438_v8 }
  0xa2   : > { %888 = vmatprep.mubr.bf16.mxu0 %v1440_v9 }
  0xa8   : > { %816 = vmatmul.mubr.bf16.gmra.mrb[8].mxu1 %v1442_v10 }
  0xa9   : > { %889 = vmatmul.mubr.bf16.gmra.mrb[8].mxu0 %v1443_v11  ;;  %825 = vmatprep.mubr.bf16.mxu1 %v1444_v12 }
  0xaa   : > { %898 = vmatprep.mubr.bf16.mxu0 %v1446_v13 }
  0xb0   : > { %826 = vmatmul.mubr.bf16.gmra.mrb[12].mxu1 %v1448_v14 }
  0xb1   : > { %899 = vmatmul.mubr.bf16.gmra.mrb[12].mxu0 %v1449_v15 }
 0x16b   : > { %v797_v23 = vpop.f32.mrb[0].mxu1 }
 0x16c   : > { %v870_v24 = vpop.f32.mrb[0].mxu0  ;;  %v798_v25 = vadd.f32 %v797_v23, %v1911_v21  ;;  %v799_v26 = vpop.f32.mrb[1].mxu1 }
 0x16d   : > { %v872_v27 = vpop.f32.mrb[1].mxu0  ;;  %v800_v29 = vadd.f32 %v799_v26, %v1913_v22  ;;  %v801_v30 = vpop.f32.mrb[2].mxu1 }
 0x16e   : > { %v874_v31 = vpop.f32.mrb[2].mxu0  ;;  %v871_v32 = vadd.f32 %v870_v24, %v798_v25  ;;  %v802_v33 = vadd.f32 %v801_v30, %v1911_v21  ;;  %v803_v34 = vpop.f32.mrb[3].mxu1 }
 0x16f   : > { %v876_v35 = vpop.f32.mrb[3].mxu0  ;;  %v873_v37 = vadd.f32 %v872_v27, %v800_v29  ;;  %v804_v38 = vadd.f32 %v803_v34, %v1913_v22 }
 0x170   : > { %v909_v39 = vmul.f32 0.01, %v871_v32  ;;  %v875_v41 = vadd.f32 %v874_v31, %v802_v33 }
 0x171   : > { %v910_v42 = vmul.f32 0.01, %v873_v37  ;;  %v877_v44 = vadd.f32 %v876_v35, %v804_v38 }
 0x172   : > { %v925_v45 = vmax.f32 %v871_v32, %v909_v39  ;;  %v911_v47 = vmul.f32 0.01, %v875_v41 }
 0x173   : > { %v926_v48 = vmax.f32 %v873_v37, %v910_v42  ;;  %v912_v50 = vmul.f32 0.01, %v877_v44  ;;  %v807_v51 = vpop.f32.mrb[4].mxu1 }
 0x174   : > { %v880_v52 = vpop.f32.mrb[4].mxu0  ;;  %v953_v53 = vmul.f32 %v1919_v40, %v925_v45  ;;  %v927_v54 = vmax.f32 %v875_v41, %v911_v47  ;;  %v808_v55 = vadd.f32 %v807_v51, %v1911_v21  ;;  %v809_v56 = vpop.f32.mrb[5].mxu1 }
 0x175   : > { %v882_v57 = vpop.f32.mrb[5].mxu0  ;;  %v954_v58 = vmul.f32 %v1921_v43, %v926_v48  ;;  %v928_v59 = vmax.f32 %v877_v44, %v912_v50  ;;  %v810_v60 = vadd.f32 %v809_v56, %v1913_v22  ;;  %v811_v61 = vpop.f32.mrb[6].mxu1 }
 0x176   : > { %v884_v62 = vpop.f32.mrb[6].mxu0  ;;  %v981_v63 = vadd.f32 %v1923_v46, %v953_v53  ;;  %v955_v0 = vmul.f32 %v1919_v40, %v927_v54  ;;  %v881_v1 = vadd.f32 %v880_v52, %v808_v55  ;;  %v812_v2 = vadd.f32 %v811_v61, %v1911_v21  ;;  %v813_v3 = vpop.f32.mrb[7].mxu1 }
 0x177   : > { %v886_v4 = vpop.f32.mrb[7].mxu0  ;;  %v982_v5 = vadd.f32 %v1925_v49, %v954_v58  ;;  %v956_v6 = vmul.f32 %v1921_v43, %v928_v59  ;;  %v883_v7 = vadd.f32 %v882_v57, %v810_v60  ;;  %v814_v8 = vadd.f32 %v813_v3, %v1913_v22 }
 0x178   : > { %v983_v9 = vadd.f32 %v1923_v46, %v955_v0  ;;  %v913_v10 = vmul.f32 0.01, %v881_v1  ;;  %v885_v11 = vadd.f32 %v884_v62, %v812_v2 }
 0x179   : > { %v1251_v12 = vpack.c.bf16 %v982_v5, %v981_v63  ;;  %v984_v13 = vadd.f32 %v1925_v49, %v956_v6  ;;  %v914_v14 = vmul.f32 0.01, %v883_v7  ;;  %v887_v15 = vadd.f32 %v886_v4, %v814_v8 }
 0x17a   : > { %v929_v16 = vmax.f32 %v881_v1, %v913_v10  ;;  %v915_v17 = vmul.f32 0.01, %v885_v11 }
 0x17b   : > { %1045 = vst [vmem:[%s1941_s25] sm:$0xff] %v1251_v12  ;;  %v1252_v18 = vpack.c.bf16 %v984_v13, %v983_v9  ;;  %v930_v19 = vmax.f32 %v883_v7, %v914_v14  ;;  %v916_v20 = vmul.f32 0.01, %v887_v15  ;;  %v817_v23 = vpop.f32.mrb[8].mxu1 }
 0x17c   : > { %v890_v24 = vpop.f32.mrb[8].mxu0  ;;  %v957_v25 = vmul.f32 %v1919_v40, %v929_v16  ;;  %v931_v26 = vmax.f32 %v885_v11, %v915_v17  ;;  %v818_v27 = vadd.f32 %v817_v23, %v1911_v21  ;;  %v819_v28 = vpop.f32.mrb[9].mxu1 }
 0x17d   : > { %v892_v29 = vpop.f32.mrb[9].mxu0  ;;  %1046 = vst [vmem:[%s1941_s25 + $0x8] sm:$0xff] %v1252_v18  ;;  %v958_v30 = vmul.f32 %v1921_v43, %v930_v19  ;;  %v932_v31 = vmax.f32 %v887_v15, %v916_v20  ;;  %v820_v32 = vadd.f32 %v819_v28, %v1913_v22  ;;  %v821_v33 = vpop.f32.mrb[10].mxu1 }
 0x17e   : > { %v894_v34 = vpop.f32.mrb[10].mxu0  ;;  %v985_v35 = vadd.f32 %v1923_v46, %v957_v25  ;;  %v959_v36 = vmul.f32 %v1919_v40, %v931_v26  ;;  %v891_v37 = vadd.f32 %v890_v24, %v818_v27  ;;  %v822_v38 = vadd.f32 %v821_v33, %v1911_v21  ;;  %v823_v39 = vpop.f32.mrb[11].mxu1 }
 0x17f   : > { %v896_v41 = vpop.f32.mrb[11].mxu0  ;;  %v986_v42 = vadd.f32 %v1925_v49, %v958_v30  ;;  %v960_v44 = vmul.f32 %v1921_v43, %v932_v31  ;;  %v893_v45 = vadd.f32 %v892_v29, %v820_v32  ;;  %v824_v47 = vadd.f32 %v823_v39, %v1913_v22 }
 0x180   : > { %v987_v48 = vadd.f32 %v1923_v46, %v959_v36  ;;  %v917_v50 = vmul.f32 0.01, %v891_v37  ;;  %v895_v51 = vadd.f32 %v894_v34, %v822_v38 }
 0x181   : > { %v1253_v52 = vpack.c.bf16 %v986_v42, %v985_v35  ;;  %v988_v53 = vadd.f32 %v1925_v49, %v960_v44  ;;  %v918_v54 = vmul.f32 0.01, %v893_v45  ;;  %v897_v55 = vadd.f32 %v896_v41, %v824_v47 }
 0x182   : > { %v933_v56 = vmax.f32 %v891_v37, %v917_v50  ;;  %v919_v57 = vmul.f32 0.01, %v895_v51 }
 0x183   : > { %1047 = vst [vmem:[%s1941_s25 + $0x10] sm:$0xff] %v1253_v52  ;;  %v1254_v58 = vpack.c.bf16 %v988_v53, %v987_v48  ;;  %v934_v59 = vmax.f32 %v893_v45, %v918_v54  ;;  %v920_v60 = vmul.f32 0.01, %v897_v55  ;;  %v827_v61 = vpop.f32.mrb[12].mxu1 }
 0x184   : > { %v900_v62 = vpop.f32.mrb[12].mxu0  ;;  %v961_v63 = vmul.f32 %v1919_v40, %v933_v56  ;;  %v935_v0 = vmax.f32 %v895_v51, %v919_v57  ;;  %v828_v1 = vadd.f32 %v827_v61, %v1911_v21  ;;  %v829_v2 = vpop.f32.mrb[13].mxu1 }
 0x185   : > { %v902_v3 = vpop.f32.mrb[13].mxu0  ;;  %1048 = vst [vmem:[%s1941_s25 + $0x18] sm:$0xff] %v1254_v58  ;;  %v962_v4 = vmul.f32 %v1921_v43, %v934_v59  ;;  %v936_v5 = vmax.f32 %v897_v55, %v920_v60  ;;  %v830_v6 = vadd.f32 %v829_v2, %v1913_v22  ;;  %v831_v7 = vpop.f32.mrb[14].mxu1 }
 0x186   : > { %v904_v8 = vpop.f32.mrb[14].mxu0  ;;  %v989_v9 = vadd.f32 %v1923_v46, %v961_v63  ;;  %v963_v10 = vmul.f32 %v1919_v40, %v935_v0  ;;  %v901_v11 = vadd.f32 %v900_v62, %v828_v1  ;;  %v832_v12 = vadd.f32 %v831_v7, %v1911_v21  ;;  %v833_v13 = vpop.f32.mrb[15].mxu1 }
 0x187   : > { %v906_v14 = vpop.f32.mrb[15].mxu0  ;;  %v990_v15 = vadd.f32 %v1925_v49, %v962_v4  ;;  %v964_v16 = vmul.f32 %v1921_v43, %v936_v5  ;;  %v903_v17 = vadd.f32 %v902_v3, %v830_v6  ;;  %v834_v18 = vadd.f32 %v833_v13, %v1913_v22 }
 0x188   : > { %v991_v19 = vadd.f32 %v1923_v46, %v963_v10  ;;  %v921_v20 = vmul.f32 0.01, %v901_v11  ;;  %v905_v23 = vadd.f32 %v904_v8, %v832_v12 }
 0x189   : > { %v1255_v24 = vpack.c.bf16 %v990_v15, %v989_v9  ;;  %v992_v25 = vadd.f32 %v1925_v49, %v964_v16  ;;  %v922_v26 = vmul.f32 0.01, %v903_v17  ;;  %v907_v21 = vadd.f32 %v906_v14, %v834_v18 }
 0x18a   : > { %v937_v27 = vmax.f32 %v901_v11, %v921_v20  ;;  %v923_v28 = vmul.f32 0.01, %v905_v23 }
 0x18b   : > { %1049 = vst [vmem:[%s1941_s25 + $0x20] sm:$0xff] %v1255_v24  ;;  %v1256_v29 = vpack.c.bf16 %v992_v25, %v991_v19  ;;  %v938_v30 = vmax.f32 %v903_v17, %v922_v26  ;;  %v924_v31 = vmul.f32 0.01, %v907_v21 }
 0x18c   : > { %v965_v22 = vmul.f32 %v1919_v40, %v937_v27  ;;  %v939_v32 = vmax.f32 %v905_v23, %v923_v28 }
 0x18d   : > { %1050 = vst [vmem:[%s1941_s25 + $0x28] sm:$0xff] %v1256_v29  ;;  %v966_v33 = vmul.f32 %v1921_v43, %v938_v30  ;;  %v940_v34 = vmax.f32 %v907_v21, %v924_v31 }
 0x18e   : > { %v993_v35 = vadd.f32 %v1923_v46, %v965_v22  ;;  %v967_v36 = vmul.f32 %v1919_v40, %v939_v32 }
 0x18f   : > { %v994_v37 = vadd.f32 %v1925_v49, %v966_v33  ;;  %v968_v38 = vmul.f32 %v1921_v43, %v940_v34 }
 0x190   : > { %v995_v39 = vadd.f32 %v1923_v46, %v967_v36 }
 0x191   : > { %v1257_v41 = vpack.c.bf16 %v994_v37, %v993_v35  ;;  %v996_v42 = vadd.f32 %v1925_v49, %v968_v38 }
 0x193   : > { %1051 = vst [vmem:[%s1941_s25 + $0x30] sm:$0xff] %v1257_v41  ;;  %v1258_v44 = vpack.c.bf16 %v996_v42, %v995_v39 }
 0x195   : > { %1052 = vst [vmem:[%s1941_s25 + $0x38] sm:$0xff] %v1258_v44 }
 0x196 PF: > { %s17_s18 = sadd.s32 1, %s1548_s18  }
 0x197   : > { %p14_p7 = scmp.ge.s32.totalorder %s17_s18, 4  }
 0x199   :  { %16 = sbr.rel (!%p14_p7) target bundleno = 2 (0x2), region = 83 }
 0x1a0   :  { %1077 = vsyncpa [#allocation3], 1 }
 0x1a1   :  { %1079 = vsyncpa [#allocation3 + $0x1], 1 }
 0x1a2   :  { %1080 = vsyncpa [#allocation5], 1 }

// kernel: ca_forward.4
= control target key start
LH: loop header
LB: loop body
LE: loop exit
PB: predicated region body
PF: predicated region fallthrough
CT: control target
= control target key end

     0   :  { %s5198_s18 = smov 0   ;;  %s6811_s0 = inlined_call_operand.vmem [shape: bf16[2,8,8,256], index: 0, kind: input, shape index: {}]   ;;  %s6812_s1 = inlined_call_operand.vmem [shape: bf16[2304,256], index: 1, kind: input, shape index: {}]   ;;  %s6813_s2 = inlined_call_operand.vmem [shape: f32[1,256], index: 2, kind: input, shape index: {}]   ;;  %s6814_s3 = inlined_call_operand.vmem [shape: f32[1,256], index: 3, kind: input, shape index: {}]   ;;  %s6815_s4 = inlined_call_operand.vmem [shape: f32[1,256], index: 4, kind: input, shape index: {}]   ;;  %s6816_s5 = inlined_call_operand.vmem [shape: bf16[128,256], index: 5, kind: output, shape index: {}]  }
   0x1 LB: > { %s5204_s19 = sadd.s32 4294967295, %s5165_s18   ;;  %p4110_p0 = scmp.ge.s32.totalorder %s5165_s18, 1  ;;  %s5165_s18 = sphi %s5198_s18, %s15_s18  }
   0x2   : > { %p187_p1 = scmp.lt.s32.totalorder %s5165_s18, 3 }
   0x4   : > { %p188_p2 = pnand %p4110_p0, %p187_p1 }
   0x5   : > { %v4705_v0 = vld [vmem:[%s6812_s1 + $0x4] ss:$8 sps:$4 sm:$0xff] (!%p188_p2)   ;;  %v5167_v2 = vmov (!%p188_p2), 0   ;;  %v4709_v3 = vld [vmem:[%s6812_s1] ss:$8 sps:$4 sm:$0xff] (!%p188_p2)   ;;  %p216_p3 = scmp.lt.s32.totalorder (!%p188_p2), %s5204_s19, 1 }
   0x6   : > { %191 = sbr.rel (%p188_p2) target bundleno = 567 (0x237), region = 40  ;;  %v4707_v1 = vld [vmem:[%s6812_s1 + $0x404] ss:$8 sps:$4 sm:$0xff] (!%p188_p2)   ;;  %229 = vst [vmem:[#allocation2] sm:$0xff] (!%p188_p2), %v5167_v2  ;;  %232 = vst [vmem:[#allocation2 + $0x18] sm:$0xff] (!%p188_p2), %v5167_v2  ;;  %3247 = vmatprep.subr.bf16.mxu1 (!%p188_p2), %v4705_v0  ;;  %v303_v46 = vrot.slane (!%p188_p2), %v5167_v2, 7 }
   0x7   : > { %231 = vst [vmem:[#allocation2 + $0x10] sm:$0xff] (!%p188_p2), %v5167_v2  ;;  %234 = vst [vmem:[#allocation2 + $0x28] sm:$0xff] (!%p188_p2), %v5167_v2  ;;  %v4710_v4 = vld [vmem:[%s6812_s1 + $0x400] ss:$8 sps:$4 sm:$0xff] (!%p188_p2)   ;;  %3539 = vmatprep.subr.bf16.mxu0 (!%p188_p2), %v4707_v1  ;;  %v4711_v5 = vld [vmem:[%s6812_s1 + $0x14] ss:$8 sps:$4 sm:$0xff] (!%p188_p2)   ;;  %3248 = vmatpush1.bf16.msra.mxu1 (!%p188_p2), %v4709_v3 }
   0x8   : > { %235 = vst [vmem:[#allocation2 + $0x30] sm:$0xff] (!%p188_p2), %v5167_v2  ;;  %237 = vst [vmem:[#allocation2 + $0x40] sm:$0xff] (!%p188_p2), %v5167_v2  ;;  %3540 = vmatpush1.bf16.msra.mxu0 (!%p188_p2), %v4710_v4  ;;  %v4713_v6 = vld [vmem:[%s6812_s1 + $0x414] ss:$8 sps:$4 sm:$0xff] (!%p188_p2)   ;;  %v4715_v7 = vld [vmem:[%s6812_s1 + $0x10] ss:$8 sps:$4 sm:$0xff] (!%p188_p2)   ;;  %3249 = vmatprep.subr.bf16.mxu1 (!%p188_p2), %v4711_v5 }
   0x9   : > { %238 = vst [vmem:[#allocation2 + $0x48] sm:$0xff] (!%p188_p2), %v5167_v2  ;;  %240 = vst [vmem:[#allocation2 + $0x58] sm:$0xff] (!%p188_p2), %v5167_v2  ;;  %v4716_v8 = vld [vmem:[%s6812_s1 + $0x410] ss:$8 sps:$4 sm:$0xff] (!%p188_p2)   ;;  %3541 = vmatprep.subr.bf16.mxu0 (!%p188_p2), %v4713_v6  ;;  %v4717_v9 = vld [vmem:[%s6812_s1 + $0x24] ss:$8 sps:$4 sm:$0xff] (!%p188_p2)  }
   0xa   : > { %241 = vst [vmem:[#allocation2 + $0x60] sm:$0xff] (!%p188_p2), %v5167_v2  ;;  %243 = vst [vmem:[#allocation2 + $0x70] sm:$0xff] (!%p188_p2), %v5167_v2  ;;  %v4719_v10 = vld [vmem:[%s6812_s1 + $0x424] ss:$8 sps:$4 sm:$0xff] (!%p188_p2)   ;;  %v4721_v11 = vld [vmem:[%s6812_s1 + $0x20] ss:$8 sps:$4 sm:$0xff] (!%p188_p2)  }
   0xb   : > { %244 = vst [vmem:[#allocation2 + $0x78] sm:$0xff] (!%p188_p2), %v5167_v2  ;;  %246 = vst [vmem:[#allocation2 + $0x88] sm:$0xff] (!%p188_p2), %v5167_v2  ;;  %v4722_v12 = vld [vmem:[%s6812_s1 + $0x420] ss:$8 sps:$4 sm:$0xff] (!%p188_p2)   ;;  %3250 = vmatpush1.bf16.msra.mxu1 (!%p188_p2), %v4715_v7  ;;  %v4723_v13 = vld [vmem:[%s6812_s1 + $0x34] ss:$8 sps:$4 sm:$0xff] (!%p188_p2)  }
   0xc   : > { %247 = vst [vmem:[#allocation2 + $0x90] sm:$0xff] (!%p188_p2), %v5167_v2  ;;  %249 = vst [vmem:[#allocation2 + $0xa0] sm:$0xff] (!%p188_p2), %v5167_v2  ;;  %3542 = vmatpush1.bf16.msra.mxu0 (!%p188_p2), %v4716_v8  ;;  %3251 = vmatprep.subr.bf16.mxu1 (!%p188_p2), %v4717_v9  ;;  %v4725_v14 = vld [vmem:[%s6812_s1 + $0x434] ss:$8 sps:$4 sm:$0xff] (!%p188_p2)   ;;  %v4727_v15 = vld [vmem:[%s6812_s1 + $0x30] ss:$8 sps:$4 sm:$0xff] (!%p188_p2)  }
   0xd   : > { %250 = vst [vmem:[#allocation2 + $0xa8] sm:$0xff] %v5167_v2  ;;  %252 = vst [vmem:[#allocation2 + $0xb8] sm:$0xff] %v5167_v2  ;;  %3543 = vmatprep.subr.bf16.mxu0 %v4719_v10  ;;  %v4728_v16 = vld [vmem:[%s6812_s1 + $0x430] ss:$8 sps:$4 sm:$0xff]   ;;  %v4729_v17 = vld [vmem:[%s6812_s1 + $0x44] ss:$8 sps:$4 sm:$0xff]  }
   0xe   : > { %253 = vst [vmem:[#allocation2 + $0xc0] sm:$0xff] %v5167_v2  ;;  %255 = vst [vmem:[#allocation2 + $0xd0] sm:$0xff] %v5167_v2  ;;  %v4731_v18 = vld [vmem:[%s6812_s1 + $0x444] ss:$8 sps:$4 sm:$0xff]   ;;  %v4733_v19 = vld [vmem:[%s6812_s1 + $0x40] ss:$8 sps:$4 sm:$0xff]  }
   0xf   : > { %256 = vst [vmem:[#allocation2 + $0xd8] sm:$0xff] %v5167_v2  ;;  %258 = vst [vmem:[#allocation2 + $0xe8] sm:$0xff] %v5167_v2  ;;  %3252 = vmatpush1.bf16.msra.mxu1 %v4721_v11  ;;  %v4734_v20 = vld [vmem:[%s6812_s1 + $0x440] ss:$8 sps:$4 sm:$0xff]   ;;  %v4735_v21 = vld [vmem:[%s6812_s1 + $0x54] ss:$8 sps:$4 sm:$0xff]  }
  0x10   : > { %3544 = vmatpush1.bf16.msra.mxu0 %v4722_v12  ;;  %3253 = vmatprep.subr.bf16.mxu1 %v4723_v13  ;;  %v4737_v22 = vld [vmem:[%s6812_s1 + $0x454] ss:$8 sps:$4 sm:$0xff]   ;;  %v4739_v23 = vld [vmem:[%s6812_s1 + $0x50] ss:$8 sps:$4 sm:$0xff]   ;;  %v4741_v25 = vld [vmem:[%s6812_s1 + $0x64] ss:$8 sps:$4 sm:$0xff]  }
  0x11   : > { %3545 = vmatprep.subr.bf16.mxu0 %v4725_v14  ;;  %v4740_v24 = vld [vmem:[%s6812_s1 + $0x450] ss:$8 sps:$4 sm:$0xff]   ;;  %v4743_v26 = vld [vmem:[%s6812_s1 + $0x464] ss:$8 sps:$4 sm:$0xff]   ;;  %v4745_v27 = vld [vmem:[%s6812_s1 + $0x60] ss:$8 sps:$4 sm:$0xff]  }
  0x12   : > { %v4746_v28 = vld [vmem:[%s6812_s1 + $0x460] ss:$8 sps:$4 sm:$0xff]   ;;  %v4747_v29 = vld [vmem:[%s6812_s1 + $0x74] ss:$8 sps:$4 sm:$0xff]   ;;  %v4751_v31 = vld [vmem:[%s6812_s1 + $0x70] ss:$8 sps:$4 sm:$0xff]  }
  0x13   : > { %3254 = vmatpush1.bf16.msra.mxu1 %v4727_v15  ;;  %v4749_v30 = vld [vmem:[%s6812_s1 + $0x474] ss:$8 sps:$4 sm:$0xff]   ;;  %v4752_v32 = vld [vmem:[%s6812_s1 + $0x470] ss:$8 sps:$4 sm:$0xff]   ;;  %v4753_v33 = vld [vmem:[%s6812_s1 + $0x84] ss:$8 sps:$4 sm:$0xff]  }
  0x14   : > { %3546 = vmatpush1.bf16.msra.mxu0 %v4728_v16  ;;  %3255 = vmatprep.subr.bf16.mxu1 %v4729_v17  ;;  %v4755_v34 = vld [vmem:[%s6812_s1 + $0x484] ss:$8 sps:$4 sm:$0xff]   ;;  %v4757_v35 = vld [vmem:[%s6812_s1 + $0x80] ss:$8 sps:$4 sm:$0xff]   ;;  %s217_s23 = scalar_select %p216_p3, %s5204_s19, 1 }
  0x15   : > { %3547 = vmatprep.subr.bf16.mxu0 %v4731_v18  ;;  %v4758_v36 = vld [vmem:[%s6812_s1 + $0x480] ss:$8 sps:$4 sm:$0xff]   ;;  %v4759_v37 = vld [vmem:[%s6812_s1 + $0x94] ss:$8 sps:$4 sm:$0xff]   ;;  %v4763_v39 = vld [vmem:[%s6812_s1 + $0x90] ss:$8 sps:$4 sm:$0xff]  }
  0x16   : > { %v4761_v38 = vld [vmem:[%s6812_s1 + $0x494] ss:$8 sps:$4 sm:$0xff]   ;;  %s4510_s30 = sshll.u32 %s217_s23, 6  ;;  %v4764_v40 = vld [vmem:[%s6812_s1 + $0x490] ss:$8 sps:$4 sm:$0xff]   ;;  %s4113_s10 = sshll.u32 %s5204_s19, 3 }
  0x17   : > { %3256 = vmatpush1.bf16.msra.mxu1 %v4733_v19  ;;  %v4765_v41 = vld [vmem:[%s6812_s1 + $0xa4] ss:$8 sps:$4 sm:$0xff]   ;;  %v4769_v43 = vld [vmem:[%s6812_s1 + $0xa0] ss:$8 sps:$4 sm:$0xff]   ;;  %s5365_s20 = scalar_lea.vmem %s6811_s0, %s4510_s30  ;;  %vm292_vm0 = vsmask.f32 256 }
  0x18   : > { %3548 = vmatpush1.bf16.msra.mxu0 %v4734_v20  ;;  %3257 = vmatprep.subr.bf16.mxu1 %v4735_v21  ;;  %v4767_v42 = vld [vmem:[%s6812_s1 + $0x4a4] ss:$8 sps:$4 sm:$0xff]   ;;  %v4770_v44 = vld [vmem:[%s6812_s1 + $0x4a0] ss:$8 sps:$4 sm:$0xff]   ;;  %v4771_v45 = vld [vmem:[%s6812_s1 + $0xb4] ss:$8 sps:$4 sm:$0xff]  }
  0x19   : > { %3549 = vmatprep.subr.bf16.mxu0 %v4737_v22  ;;  %v4773_v47 = vld [vmem:[%s6812_s1 + $0x4b4] ss:$8 sps:$4 sm:$0xff]   ;;  %vm293_vm1 = vsmask.f32 4368  ;;  %v4775_v48 = vld [vmem:[%s6812_s1 + $0xb0] ss:$8 sps:$4 sm:$0xff]  }
  0x1a   : > { %v4776_v49 = vld [vmem:[%s6812_s1 + $0x4b0] ss:$8 sps:$4 sm:$0xff]   ;;  %v5381_v50 = vld [vmem:[%s5365_s20] sm:$0xff]  ;;  %vm5394_vm2 = vmor %vm292_vm0, %vm293_vm1  ;;  %vm511_vm3 = vsmask.f32 3328  ;;  %p6737_p4 = scmp.lt.s32.totalorder %s4113_s10, 15 }
  0x1b   : > { %3258 = vmatpush1.bf16.msra.mxu1 %v4739_v23  ;;  %v4777_v51 = vld [vmem:[%s6812_s1 + $0xc4] ss:$8 sps:$4 sm:$0xff]   ;;  %268 = vst [vmem:[#allocation2 + $0x20] sm:$0xff] %v5381_v50  ;;  %v278_v53 = vld [vmem:[#allocation2 + $0x18] sm:$0x88]  ;;  %v314_v54 = vshrl.u32 %v5381_v50, 16 }
  0x1c   : > { %3550 = vmatpush1.bf16.msra.mxu0 %v4740_v24  ;;  %3259 = vmatprep.subr.bf16.mxu1 %v4741_v25  ;;  %v276_v52 = vld [vmem:[#allocation2] sm:$0x88]  ;;  %v317_v55 = vshll.u32 %v5381_v50, 16  ;;  %v309_v58 = vshrl.u32 %v278_v53, 16  ;;  %v5401_v61 = vld [vmem:[%s5365_s20 + $0x8] sm:$0xff]  ;;  %s6823_s10 = smov (!%p6737_p4, %s4113_s10), 15 }
  0x1d   : > { %3551 = vmatprep.subr.bf16.mxu0 %v4743_v26  ;;  %v4779_v56 = vld [vmem:[%s6812_s1 + $0x4c4] ss:$8 sps:$4 sm:$0xff]   ;;  %v296_v57 = vshrl.u32 %v276_v52, 16  ;;  %v316_v60 = vrot.slane %v314_v54, 7  ;;  %269 = vst [vmem:[#allocation2 + $0x38] sm:$0xff] %v5401_v61  ;;  %v4165_v0 = vcombine.high %v5381_v50, %v5401_v61  ;;  %v4164_v24 = vcombine.low %v5381_v50, %v5401_v61  ;;  %s4511_s19 = sshll.u32 %s6823_s10, 3 }
  0x1e   : > { %v4117_v63 = vrot.slane %v309_v58, 11  ;;  %v4781_v1 = vld [vmem:[%s6812_s1 + $0xc0] ss:$8 sps:$4 sm:$0xff]   ;;  %v4783_v6 = vld [vmem:[%s6812_s1 + $0xd4] ss:$8 sps:$4 sm:$0xff]   ;;  %v327_v25 = vshrl.u32 %v5401_v61, 16  ;;  %s6771_s14 = scalar_lea.vmem %s6816_s5, %s4511_s19 }
  0x1f   : > { %3260 = vmatpush1.bf16.msra.mxu1 %v4745_v27  ;;  %v4116_v62 = vrot.slane %v296_v57, 11  ;;  %v319_v3 = vor.u32 %v317_v55, %v316_v60  ;;  %v4782_v4 = vld [vmem:[%s6812_s1 + $0x4c0] ss:$8 sps:$4 sm:$0xff]   ;;  %v4785_v7 = vld [vmem:[%s6812_s1 + $0x4d4] ss:$8 sps:$4 sm:$0xff]   ;;  %3571 = vmatprep.mubr.bf16.mxu0 %v4165_v0 }
  0x20   : > { %3552 = vmatpush1.bf16.msra.mxu0 %v4746_v28  ;;  %3261 = vmatprep.subr.bf16.mxu1 %v4747_v29  ;;  %v4787_v10 = vld [vmem:[%s6812_s1 + $0xd0] ss:$8 sps:$4 sm:$0xff]   ;;  %v4789_v12 = vld [vmem:[%s6812_s1 + $0xe4] ss:$8 sps:$4 sm:$0xff]   ;;  %v4793_v14 = vld [vmem:[%s6812_s1 + $0xe0] ss:$8 sps:$4 sm:$0xff]  }
  0x21   : > { %3553 = vmatprep.subr.bf16.mxu0 %v4749_v30  ;;  %v307_v5 = vsel %vm5394_vm2, %v4116_v62, %v303_v46  ;;  %v320_v8 = vsel %vm5394_vm2, %v4117_v63, %v319_v3  ;;  %v4788_v11 = vld [vmem:[%s6812_s1 + $0x4d0] ss:$8 sps:$4 sm:$0xff]   ;;  %v4791_v13 = vld [vmem:[%s6812_s1 + $0x4e4] ss:$8 sps:$4 sm:$0xff]   ;;  %v4794_v15 = vld [vmem:[%s6812_s1 + $0x4e0] ss:$8 sps:$4 sm:$0xff]  }
  0x22   : > { %v4125_v9 = vcombine.high %v307_v5, %v320_v8  ;;  %v4795_v16 = vld [vmem:[%s6812_s1 + $0xf4] ss:$8 sps:$4 sm:$0xff]   ;;  %v4799_v18 = vld [vmem:[%s6812_s1 + $0xf0] ss:$8 sps:$4 sm:$0xff]   ;;  %v4803_v20 = vld [vmem:[%s6812_s1 + $0x104] ss:$8 sps:$4 sm:$0xff]   ;;  %v4124_v22 = vcombine.low %v307_v5, %v320_v8 }
  0x23   : > { %3262 = vmatpush1.bf16.msra.mxu1 %v4751_v31  ;;  %v4797_v17 = vld [vmem:[%s6812_s1 + $0x4f4] ss:$8 sps:$4 sm:$0xff]   ;;  %v4800_v19 = vld [vmem:[%s6812_s1 + $0x4f0] ss:$8 sps:$4 sm:$0xff]   ;;  %v4808_v21 = vld [vmem:[%s6812_s1 + $0x504] ss:$8 sps:$4 sm:$0xff]  }
  0x24   : > { %3554 = vmatpush1.bf16.msra.mxu0 %v4752_v32  ;;  %3263 = vmatprep.subr.bf16.mxu1 %v4753_v33  ;;  %v4801_v23 = vld [vmem:[%s6812_s1 + $0x100] ss:$8 sps:$4 sm:$0xff]   ;;  %v4811_v27 = vld [vmem:[%s6812_s1 + $0x114] ss:$8 sps:$4 sm:$0xff]   ;;  %v4809_v29 = vld [vmem:[%s6812_s1 + $0x110] ss:$8 sps:$4 sm:$0xff]  }
  0x25   : > { %3555 = vmatprep.subr.bf16.mxu0 %v4755_v34  ;;  %3279 = vmatprep.mubr.bf16.mxu1 %v4125_v9  ;;  %v4806_v26 = vld [vmem:[%s6812_s1 + $0x500] ss:$8 sps:$4 sm:$0xff]   ;;  %v4814_v28 = vld [vmem:[%s6812_s1 + $0x514] ss:$8 sps:$4 sm:$0xff]   ;;  %v329_v30 = vrot.slane %v327_v25, 7  ;;  %v330_v31 = vshll.u32 %v5401_v61, 16 }
  0x26   : > { %v4812_v32 = vld [vmem:[%s6812_s1 + $0x510] ss:$8 sps:$4 sm:$0xff]   ;;  %v4817_v33 = vld [vmem:[%s6812_s1 + $0x124] ss:$8 sps:$4 sm:$0xff]   ;;  %v4826_v46 = vld [vmem:[%s6812_s1 + $0x534] ss:$8 sps:$4 sm:$0xff]  }
  0x27   : > { %3264 = vmatpush1.bf16.msra.mxu1 %v4757_v35  ;;  %v4820_v34 = vld [vmem:[%s6812_s1 + $0x524] ss:$8 sps:$4 sm:$0xff]   ;;  %v4815_v35 = vld [vmem:[%s6812_s1 + $0x120] ss:$8 sps:$4 sm:$0xff]   ;;  %v4821_v58 = vld [vmem:[%s6812_s1 + $0x130] ss:$8 sps:$4 sm:$0xff]  }
  0x28   : > { %3556 = vmatpush1.bf16.msra.mxu0 %v4758_v36  ;;  %3265 = vmatprep.subr.bf16.mxu1 %v4759_v37  ;;  %v4818_v36 = vld [vmem:[%s6812_s1 + $0x520] ss:$8 sps:$4 sm:$0xff]   ;;  %v5497_v37 = vld [vmem:[%s5365_s20 + $0x10] sm:$0xff]  ;;  %v4832_v3 = vld [vmem:[%s6812_s1 + $0x544] ss:$8 sps:$4 sm:$0xff]  }
  0x29   : > { %3557 = vmatprep.subr.bf16.mxu0 %v4761_v38  ;;  %v280_v38 = vld [vmem:[#allocation2 + $0x30] sm:$0x88]  ;;  %270 = vst [vmem:[#allocation2 + $0x50] sm:$0xff] %v5497_v37  ;;  %v4827_v5 = vld [vmem:[%s6812_s1 + $0x140] ss:$8 sps:$4 sm:$0xff]  }
  0x2a   : > { %v4824_v60 = vld [vmem:[%s6812_s1 + $0x530] ss:$8 sps:$4 sm:$0xff]   ;;  %v284_v8 = vld [vmem:[#allocation2 + $0x60] sm:$0x88]  ;;  %vm512_vm4 = vsmask.f32 7440 }
  0x2b   : > { %3266 = vmatpush1.bf16.msra.mxu1 %v4763_v39  ;;  %v282_v39 = vld [vmem:[#allocation2 + $0x48] sm:$0x88]  ;;  %v286_v9 = vld [vmem:[#allocation2 + $0x78] sm:$0x88]  ;;  %vm5670_vm5 = vmor %vm511_vm3, %vm512_vm4 }
  0x2c   : > { %3558 = vmatpush1.bf16.msra.mxu0 %v4764_v40  ;;  %3267 = vmatprep.subr.bf16.mxu1 %v4765_v41  ;;  %v332_v40 = vor.u32 %v330_v31, %v329_v30  ;;  %v322_v41 = vshrl.u32 %v280_v38, 16  ;;  %v4836_v30 = vld [vmem:[%s6812_s1 + $0x550] ss:$8 sps:$4 sm:$0xff]  }
  0x2d   : > { %3559 = vmatprep.subr.bf16.mxu0 %v4767_v42  ;;  %v335_v42 = vshrl.u32 %v282_v39, 16  ;;  %v5609_v39 = vld [vmem:[%s5365_s20 + $0x30] sm:$0xff] }
  0x2e   : > { %274 = vst [vmem:[#allocation2 + $0xb0] sm:$0xff] %v5609_v39  ;;  %v5040_v59 = vld [vmem:[%s6812_s1 + $0x750] ss:$8 sps:$4 sm:$0xff]  }
  0x2f   : > { %3268 = vmatpush1.bf16.msra.mxu1 %v4769_v43  ;;  %v340_v43 = vshrl.u32 %v5497_v37, 16 }
  0x30   : > { %3560 = vmatpush1.bf16.msra.mxu0 %v4770_v44  ;;  %3269 = vmatprep.subr.bf16.mxu1 %v4771_v45  ;;  %v343_v44 = vshll.u32 %v5497_v37, 16  ;;  %v4823_v45 = vld [vmem:[%s6812_s1 + $0x134] ss:$8 sps:$4 sm:$0xff]  }
  0x31   : > { %3561 = vmatprep.subr.bf16.mxu0 %v4773_v47  ;;  %v5511_v47 = vld [vmem:[%s5365_s20 + $0x18] sm:$0xff]  ;;  %v342_v52 = vrot.slane %v340_v43, 7 }
  0x32   : > { %271 = vst [vmem:[#allocation2 + $0x68] sm:$0xff] %v5511_v47  ;;  %v4167_v53 = vcombine.high %v5497_v37, %v5511_v47  ;;  %v353_v57 = vshrl.u32 %v5511_v47, 16  ;;  %v356_v0 = vshll.u32 %v5511_v47, 16 }
  0x33   : > { %3270 = vmatpush1.bf16.msra.mxu1 %v4775_v48  ;;  %v4134_v48 = vcombine.low %v5401_v61, %v5497_v37  ;;  %v345_v63 = vor.u32 %v343_v44, %v342_v52 }
  0x34   : > { %3562 = vmatpush1.bf16.msra.mxu0 %v4776_v49  ;;  %3271 = vmatprep.subr.bf16.mxu1 %v4777_v51  ;;  %v4118_v49 = vrot.slane %v322_v41, 11  ;;  %v4119_v51 = vrot.slane %v335_v42, 11  ;;  %v290_v41 = vld [vmem:[#allocation2 + $0xa8] sm:$0x88]  ;;  %v918_v42 = vrot.slane %v330_v31, 5 }
  0x35   : > { %3563 = vmatprep.subr.bf16.mxu0 %v4779_v56  ;;  %v4166_v56 = vcombine.low %v5497_v37, %v5511_v47  ;;  %v387_v52 = vshrl.u32 %v290_v41, 16  ;;  %v4133_v41 = vcombine.high %v5167_v2, %v5381_v50  ;;  %v4860_v2 = vld [vmem:[%s6812_s1 + $0x590] ss:$8 sps:$4 sm:$0xff]  }
  0x36   : > { %v333_v62 = vsel %vm5394_vm2, %v4118_v49, %v332_v40  ;;  %v288_v40 = vld [vmem:[#allocation2 + $0x90] sm:$0x88] }
  0x37   : > { %3272 = vmatpush1.bf16.msra.mxu1 %v4781_v1  ;;  %v4829_v1 = vld [vmem:[%s6812_s1 + $0x144] ss:$8 sps:$4 sm:$0xff]   ;;  %v374_v49 = vshrl.u32 %v288_v40, 16  ;;  %v4862_v40 = vld [vmem:[%s6812_s1 + $0x594] ss:$8 sps:$4 sm:$0xff]  }
  0x38   : > { %3564 = vmatpush1.bf16.msra.mxu0 %v4782_v4  ;;  %3273 = vmatprep.subr.bf16.mxu1 %v4783_v6  ;;  %v355_v4 = vrot.slane %v353_v57, 7  ;;  %v346_v6 = vsel %vm5394_vm2, %v4119_v51, %v345_v63  ;;  %v4847_v63 = vld [vmem:[%s6812_s1 + $0x174] ss:$8 sps:$4 sm:$0xff]  }
  0x39   : > { %3565 = vmatprep.subr.bf16.mxu0 %v4785_v7  ;;  %v5548_v7 = vld [vmem:[%s5365_s20 + $0x20] sm:$0xff] }
  0x3a   : > { %272 = vst [vmem:[#allocation2 + $0x80] sm:$0xff] %v5548_v7 }
  0x3b   : > { %3274 = vmatpush1.bf16.msra.mxu1 %v4787_v10  ;;  %v5552_v10 = vrot.slane %v314_v54, 4  ;;  %v4835_v54 = vld [vmem:[%s6812_s1 + $0x154] ss:$8 sps:$4 sm:$0xff]  }
  0x3c   : > { %3566 = vmatpush1.bf16.msra.mxu0 %v4788_v11  ;;  %3275 = vmatprep.subr.bf16.mxu1 %v4789_v12  ;;  %v4830_v11 = vld [vmem:[%s6812_s1 + $0x540] ss:$8 sps:$4 sm:$0xff]   ;;  %v4127_v12 = vcombine.high %v333_v62, %v346_v6 }
  0x3d   : > { %3567 = vmatprep.subr.bf16.mxu0 %v4791_v13  ;;  %v4126_v13 = vcombine.low %v333_v62, %v346_v6  ;;  %v5627_v62 = vld [vmem:[%s5365_s20 + $0x38] sm:$0xff] }
  0x3e   : > { %275 = vst [vmem:[#allocation2 + $0xc8] sm:$0xff] %v5627_v62 }
  0x3f   : > { %3276 = vmatpush1.bf16.msra.mxu1 %v4793_v14  ;;  %v348_v14 = vshrl.u32 %v284_v8, 16 }
  0x40   : > { %3568 = vmatpush1.bf16.msra.mxu0 %v4794_v15  ;;  %3277 = vmatprep.subr.bf16.mxu1 %v4795_v16  ;;  %v5560_v15 = vrot.slane %v317_v55, 5  ;;  %v358_v16 = vor.u32 %v356_v0, %v355_v4  ;;  %v4838_v55 = vld [vmem:[%s6812_s1 + $0x554] ss:$8 sps:$4 sm:$0xff]  }
  0x41   : > { %3569 = vmatprep.subr.bf16.mxu0 %v4797_v17  ;;  %v361_v17 = vshrl.u32 %v286_v9, 16  ;;  %v4850_v4 = vld [vmem:[%s6812_s1 + $0x574] ss:$8 sps:$4 sm:$0xff]  }
  0x42   : > { %v905_v8 = vor.u32 %v5560_v15, %v5552_v10  ;;  %v4170_v15 = vcombine.low %v5609_v39, %v5627_v62 }
  0x43   : > { %3278 = vmatpush1.bf16.msra.mxu1 %v4799_v18  ;;  %v366_v18 = vshrl.u32 %v5548_v7, 16 }
  0x44   : > { %3570 = vmatpush1.bf16.msra.mxu0 %v4800_v19  ;;  %3320 = vmatprep.subr.bf16.mxu1 %v4803_v20  ;;  %v369_v19 = vshll.u32 %v5548_v7, 16  ;;  %v5570_v20 = vld [vmem:[%s5365_s20 + $0x28] sm:$0xff] }
  0x45   : > { %3612 = vmatprep.subr.bf16.mxu0 %v4808_v21  ;;  %v4120_v21 = vrot.slane %v348_v14, 11  ;;  %273 = vst [vmem:[#allocation2 + $0x98] sm:$0xff] %v5570_v20  ;;  %v382_v38 = vshll.u32 %v5570_v20, 16  ;;  %v4138_v9 = vcombine.low %v5570_v20, %v5609_v39 }
  0x46   : > { %3280 = vmatmul.mubr.bf16.vlgmr.msra.gmra.mrb[0].mxu1 %v4124_v22  ;;  %v4169_v22 = vcombine.high %v5548_v7, %v5570_v20 }
  0x47   : > { %3572 = vmatmul.mubr.bf16.vlgmr.msra.gmra.mrb[0].mxu0 %v4164_v24  ;;  %3321 = vmatpush1.bf16.msra.mxu1 %v4801_v23  ;;  %v379_v23 = vshrl.u32 %v5570_v20, 16  ;;  %v4121_v24 = vrot.slane %v361_v17, 11 }
  0x48   : > { %3613 = vmatpush1.bf16.msra.mxu0 %v4806_v26  ;;  %3322 = vmatprep.subr.bf16.mxu1 %v4811_v27  ;;  %v368_v26 = vrot.slane %v366_v18, 7  ;;  %v5583_v27 = vrot.slane %v327_v25, 4 }
  0x49   : > { %3614 = vmatprep.subr.bf16.mxu0 %v4814_v28  ;;  %3581 = vmatprep.mubr.bf16.mxu0 %v4167_v53  ;;  %v4136_v28 = vcombine.low %v5511_v47, %v5548_v7  ;;  %v381_v25 = vrot.slane %v379_v23, 7  ;;  %v4842_v53 = vld [vmem:[%s6812_s1 + $0x560] ss:$8 sps:$4 sm:$0xff]  }
  0x4a   : > { %3289 = vmatprep.mubr.bf16.mxu1 %v4127_v12  ;;  %v4845_v12 = vld [vmem:[%s6812_s1 + $0x170] ss:$8 sps:$4 sm:$0xff]  }
  0x4b   : > { %3323 = vmatpush1.bf16.msra.mxu1 %v4809_v29  ;;  %v4833_v29 = vld [vmem:[%s6812_s1 + $0x150] ss:$8 sps:$4 sm:$0xff]   ;;  %v384_v51 = vor.u32 %v382_v38, %v381_v25 }
  0x4c   : > { %3615 = vmatpush1.bf16.msra.mxu0 %v4812_v32  ;;  %3324 = vmatprep.subr.bf16.mxu1 %v4817_v33  ;;  %v4168_v32 = vcombine.low %v5548_v7, %v5570_v20  ;;  %v4841_v33 = vld [vmem:[%s6812_s1 + $0x164] ss:$8 sps:$4 sm:$0xff]  }
  0x4d   : > { %3616 = vmatprep.subr.bf16.mxu0 %v4820_v34  ;;  %v4844_v34 = vld [vmem:[%s6812_s1 + $0x564] ss:$8 sps:$4 sm:$0xff]  }
  0x4e   : > { %3290 = vmatmul.mubr.bf16.gmra.mrb[4].mxu1 %v4126_v13  ;;  %v4848_v13 = vld [vmem:[%s6812_s1 + $0x570] ss:$8 sps:$4 sm:$0xff]  }
  0x4f   : > { %3325 = vmatpush1.bf16.msra.mxu1 %v4815_v35  ;;  %3582 = vmatmul.mubr.bf16.gmra.mrb[4].mxu0 %v4166_v56  ;;  %v359_v35 = vsel %vm5394_vm2, %v4120_v21, %v358_v16  ;;  %v4856_v16 = vld [vmem:[%s6812_s1 + $0x584] ss:$8 sps:$4 sm:$0xff]  }
  0x50   : > { %3617 = vmatpush1.bf16.msra.mxu0 %v4818_v36  ;;  %3326 = vmatprep.subr.bf16.mxu1 %v4823_v45  ;;  %v371_v36 = vor.u32 %v369_v19, %v368_v26  ;;  %v4839_v45 = vld [vmem:[%s6812_s1 + $0x160] ss:$8 sps:$4 sm:$0xff]  }
  0x51   : > { %3618 = vmatprep.subr.bf16.mxu0 %v4826_v46  ;;  %3591 = vmatprep.mubr.bf16.mxu0 %v4169_v22  ;;  %v885_v21 = vld [vmem:[#allocation2 + $0x40] sm:$0x11]  ;;  %v906_v22 = vrot.slane %v905_v8, 4 }
  0x52   : > { %v372_v46 = vsel %vm5394_vm2, %v4121_v24, %v371_v36  ;;  %v4859_v36 = vld [vmem:[%s6812_s1 + $0x194] ss:$8 sps:$4 sm:$0xff]   ;;  %v4881_v8 = vld [vmem:[%s6812_s1 + $0x5c0] ss:$8 sps:$4 sm:$0xff]  }
  0x53   : > { %3327 = vmatpush1.bf16.msra.mxu1 %v4821_v58  ;;  %v4129_v56 = vcombine.high %v359_v35, %v372_v46  ;;  %v4128_v31 = vcombine.low %v359_v35, %v372_v46  ;;  %v392_v58 = vshrl.u32 %v5609_v39, 16  ;;  %v4857_v46 = vld [vmem:[%s6812_s1 + $0x190] ss:$8 sps:$4 sm:$0xff]  }
  0x54   : > { %3619 = vmatpush1.bf16.msra.mxu0 %v4824_v60  ;;  %3328 = vmatprep.subr.bf16.mxu1 %v4829_v1  ;;  %v395_v60 = vshll.u32 %v5609_v39, 16  ;;  %v4122_v1 = vrot.slane %v374_v49, 11 }
  0x55   : > { %3620 = vmatprep.subr.bf16.mxu0 %v4832_v3  ;;  %v4171_v3 = vcombine.high %v5609_v39, %v5627_v62  ;;  %v394_v6 = vrot.slane %v392_v58, 7  ;;  %3299 = vmatprep.mubr.bf16.mxu1 %v4129_v56  ;;  %v4867_v56 = vld [vmem:[%s6812_s1 + $0x5a0] ss:$8 sps:$4 sm:$0xff]  }
  0x56   : > { %3300 = vmatmul.mubr.bf16.gmra.mrb[8].mxu1 %v4128_v31  ;;  %v385_v10 = vsel %vm5394_vm2, %v4122_v1, %v384_v51  ;;  %v4865_v51 = vld [vmem:[%s6812_s1 + $0x1a4] ss:$8 sps:$4 sm:$0xff]   ;;  %v4873_v31 = vld [vmem:[%s6812_s1 + $0x1b4] ss:$8 sps:$4 sm:$0xff]   ;;  %v4871_v1 = vld [vmem:[%s6812_s1 + $0x1b0] ss:$8 sps:$4 sm:$0xff]  }
  0x57   : > { %3329 = vmatpush1.bf16.msra.mxu1 %v4827_v5  ;;  %3592 = vmatmul.mubr.bf16.gmra.mrb[8].mxu0 %v4168_v32  ;;  %v4123_v5 = vrot.slane %v387_v52, 11  ;;  %v397_v14 = vor.u32 %v395_v60, %v394_v6  ;;  %v4869_v52 = vld [vmem:[%s6812_s1 + $0x5a4] ss:$8 sps:$4 sm:$0xff]   ;;  %v4877_v6 = vld [vmem:[%s6812_s1 + $0x1c0] ss:$8 sps:$4 sm:$0xff]  }
  0x58   : > { %3621 = vmatpush1.bf16.msra.mxu0 %v4830_v11  ;;  %3330 = vmatprep.subr.bf16.mxu1 %v4835_v54  ;;  %v919_v11 = vor.u32 %v918_v42, %v5583_v27  ;;  %v4853_v54 = vld [vmem:[%s6812_s1 + $0x184] ss:$8 sps:$4 sm:$0xff]  }
  0x59   : > { %3622 = vmatprep.subr.bf16.mxu0 %v4838_v55  ;;  %3601 = vmatprep.mubr.bf16.mxu0 %v4171_v3  ;;  %v398_v17 = vsel %vm5394_vm2, %v4123_v5, %v397_v14  ;;  %v883_v55 = vld [vmem:[#allocation2 + $0x28] sm:$0x11]  ;;  %v4874_v3 = vld [vmem:[%s6812_s1 + $0x5b0] ss:$8 sps:$4 sm:$0xff]   ;;  %v943_v14 = vrot.slane %v353_v57, 4 }
  0x5a   : > { %v4131_v24 = vcombine.high %v385_v10, %v398_v17  ;;  %v908_v26 = vshll.u32 %v883_v55, 16  ;;  %v920_v27 = vrot.slane %v919_v11, 4  ;;  %v4130_v32 = vcombine.low %v385_v10, %v398_v17  ;;  %v4883_v5 = vld [vmem:[%s6812_s1 + $0x5c4] ss:$8 sps:$4 sm:$0xff]   ;;  %v4887_v11 = vld [vmem:[%s6812_s1 + $0x1d4] ss:$8 sps:$4 sm:$0xff]  }
  0x5b   : > { %3331 = vmatpush1.bf16.msra.mxu1 %v4833_v29  ;;  %v922_v29 = vshll.u32 %v885_v21, 16  ;;  %v932_v10 = vrot.slane %v343_v44, 5  ;;  %v4897_v44 = vld [vmem:[%s6812_s1 + $0x5e4] ss:$8 sps:$4 sm:$0xff]   ;;  %v4891_v57 = vld [vmem:[%s6812_s1 + $0x1e0] ss:$8 sps:$4 sm:$0xff]  }
  0x5c   : > { %3623 = vmatpush1.bf16.msra.mxu0 %v4836_v30  ;;  %3332 = vmatprep.subr.bf16.mxu1 %v4841_v33  ;;  %v4851_v30 = vld [vmem:[%s6812_s1 + $0x180] ss:$8 sps:$4 sm:$0xff]   ;;  %v4901_v21 = vld [vmem:[%s6812_s1 + $0x1f4] ss:$8 sps:$4 sm:$0xff]  }
  0x5d   : > { %3624 = vmatprep.subr.bf16.mxu0 %v4844_v34  ;;  %v4854_v33 = vld [vmem:[%s6812_s1 + $0x580] ss:$8 sps:$4 sm:$0xff]   ;;  %v910_v34 = vrot.slane %v908_v26, 5  ;;  %v924_v35 = vrot.slane %v922_v29, 5  ;;  %3309 = vmatprep.mubr.bf16.mxu1 %v4131_v24  ;;  %v889_v24 = vld [vmem:[#allocation2 + $0x70] sm:$0x11] }
  0x5e   : > { %3310 = vmatmul.mubr.bf16.gmra.mrb[12].mxu1 %v4130_v32  ;;  %v4895_v55 = vld [vmem:[%s6812_s1 + $0x5e0] ss:$8 sps:$4 sm:$0xff]   ;;  %v4904_v26 = vld [vmem:[%s6812_s1 + $0x5f4] ss:$8 sps:$4 sm:$0xff]   ;;  %v950_v29 = vshll.u32 %v889_v24, 16 }
  0x5f   : > { %3333 = vmatpush1.bf16.msra.mxu1 %v4839_v45  ;;  %3602 = vmatmul.mubr.bf16.gmra.mrb[12].mxu0 %v4170_v15  ;;  %v5687_v42 = vsel %vm5670_vm5, %v906_v22, %v910_v34  ;;  %v5691_v45 = vsel %vm5670_vm5, %v920_v27, %v924_v35  ;;  %v946_v15 = vrot.slane %v356_v0, 5  ;;  %v887_v22 = vld [vmem:[#allocation2 + $0x58] sm:$0x11]  ;;  %v957_v34 = vrot.slane %v366_v18, 4  ;;  %v4907_v18 = vld [vmem:[%s6812_s1 + $0x204] ss:$8 sps:$4 sm:$0xff]  }
  0x60   : > { %3625 = vmatpush1.bf16.msra.mxu0 %v4842_v53  ;;  %3334 = vmatprep.subr.bf16.mxu1 %v4847_v63  ;;  %v4173_v49 = vcombine.high %v5687_v42, %v5691_v45  ;;  %v4863_v53 = vld [vmem:[%s6812_s1 + $0x1a0] ss:$8 sps:$4 sm:$0xff]   ;;  %v4876_v63 = vld [vmem:[%s6812_s1 + $0x5b4] ss:$8 sps:$4 sm:$0xff]   ;;  %v936_v27 = vshll.u32 %v887_v22, 16  ;;  %v960_v35 = vrot.slane %v369_v19, 5 }
  0x61   : > { %3626 = vmatprep.subr.bf16.mxu0 %v4850_v4  ;;  %3352 = vmatprep.mubr.bf16.mxu1 %v4133_v41  ;;  %v4879_v4 = vld [vmem:[%s6812_s1 + $0x1c4] ss:$8 sps:$4 sm:$0xff]   ;;  %v947_v17 = vor.u32 %v946_v15, %v943_v14  ;;  %v952_v41 = vrot.slane %v950_v29, 5  ;;  %v4135_v14 = vcombine.high %v5401_v61, %v5497_v37  ;;  %v4920_v29 = vld [vmem:[%s6812_s1 + $0x620] ss:$8 sps:$4 sm:$0xff]  }
  0x62   : > { %3644 = vmatprep.mubr.bf16.mxu0 %v4173_v49  ;;  %v974_v49 = vrot.slane %v382_v38, 5  ;;  %v4910_v19 = vld [vmem:[%s6812_s1 + $0x604] ss:$8 sps:$4 sm:$0xff]  }
  0x63   : > { %3335 = vmatpush1.bf16.msra.mxu1 %v4845_v12  ;;  %v4890_v12 = vld [vmem:[%s6812_s1 + $0x5d4] ss:$8 sps:$4 sm:$0xff]   ;;  %v4934_v61 = vld [vmem:[%s6812_s1 + $0x644] ss:$8 sps:$4 sm:$0xff]  }
  0x64   : > { %3627 = vmatpush1.bf16.msra.mxu0 %v4848_v13  ;;  %3336 = vmatprep.subr.bf16.mxu1 %v4853_v54  ;;  %v929_v13 = vrot.slane %v340_v43, 4  ;;  %v4885_v54 = vld [vmem:[%s6812_s1 + $0x1d0] ss:$8 sps:$4 sm:$0xff]   ;;  %v4893_v43 = vld [vmem:[%s6812_s1 + $0x1e4] ss:$8 sps:$4 sm:$0xff]  }
  0x65   : > { %3628 = vmatprep.subr.bf16.mxu0 %v4856_v16  ;;  %v4888_v16 = vld [vmem:[%s6812_s1 + $0x5d0] ss:$8 sps:$4 sm:$0xff]  }
  0x66   : > { %v933_v0 = vor.u32 %v932_v10, %v929_v13  ;;  %v4911_v13 = vld [vmem:[%s6812_s1 + $0x210] ss:$8 sps:$4 sm:$0xff]  }
  0x67   : > { %3337 = vmatpush1.bf16.msra.mxu1 %v4851_v30  ;;  %v4899_v30 = vld [vmem:[%s6812_s1 + $0x1f0] ss:$8 sps:$4 sm:$0xff]  }
  0x68   : > { %3629 = vmatpush1.bf16.msra.mxu0 %v4854_v33  ;;  %3338 = vmatprep.subr.bf16.mxu1 %v4859_v36  ;;  %v934_v32 = vrot.slane %v933_v0, 4  ;;  %v948_v33 = vrot.slane %v947_v17, 4  ;;  %v4902_v36 = vld [vmem:[%s6812_s1 + $0x5f0] ss:$8 sps:$4 sm:$0xff]   ;;  %v4922_v0 = vld [vmem:[%s6812_s1 + $0x624] ss:$8 sps:$4 sm:$0xff]  }
  0x69   : > { %3630 = vmatprep.subr.bf16.mxu0 %v4862_v40  ;;  %v938_v40 = vrot.slane %v936_v27, 5  ;;  %v4914_v10 = vld [vmem:[%s6812_s1 + $0x610] ss:$8 sps:$4 sm:$0xff]  }
  0x6a   : > { %v895_v17 = vld [vmem:[#allocation2 + $0xb8] sm:$0x11] }
  0x6b   : > { %3339 = vmatpush1.bf16.msra.mxu1 %v4857_v46  ;;  %v971_v46 = vrot.slane %v379_v23, 4  ;;  %v5797_v23 = vld [vmem:[#allocation2] sm:$0xff]  ;;  %v992_v22 = vshll.u32 %v895_v17, 16 }
  0x6c   : > { %3631 = vmatpush1.bf16.msra.mxu0 %v4860_v2  ;;  %3340 = vmatprep.subr.bf16.mxu1 %v4865_v51  ;;  %v997_v2 = vshrl.u32 %v5627_v62, 16  ;;  %v1000_v51 = vshll.u32 %v5627_v62, 16  ;;  %v4132_v38 = vcombine.low %v5797_v23, %v5381_v50  ;;  %v5811_v62 = vsel %vm5670_vm5, %v934_v32, %v938_v40 }
  0x6d   : > { %3632 = vmatprep.subr.bf16.mxu0 %v4869_v52  ;;  %v4905_v52 = vld [vmem:[%s6812_s1 + $0x200] ss:$8 sps:$4 sm:$0xff]   ;;  %v5815_v50 = vsel %vm5670_vm5, %v948_v33, %v952_v41 }
  0x6e   : > { %v4175_v15 = vcombine.high %v5811_v62, %v5815_v50  ;;  %v4174_v32 = vcombine.low %v5811_v62, %v5815_v50  ;;  %v498_v62 = vld [vmem:[#allocation2 + $0x28] sm:$0x11] }
  0x6f   : > { %3341 = vmatpush1.bf16.msra.mxu1 %v4863_v53  ;;  %v4172_v53 = vcombine.low %v5687_v42, %v5691_v45  ;;  %v4913_v42 = vld [vmem:[%s6812_s1 + $0x214] ss:$8 sps:$4 sm:$0xff]  }
  0x70   : > { %3633 = vmatpush1.bf16.msra.mxu0 %v4867_v56  ;;  %3342 = vmatprep.subr.bf16.mxu1 %v4873_v31  ;;  %v4908_v56 = vld [vmem:[%s6812_s1 + $0x600] ss:$8 sps:$4 sm:$0xff]   ;;  %v4916_v45 = vld [vmem:[%s6812_s1 + $0x614] ss:$8 sps:$4 sm:$0xff]  }
  0x71   : > { %3634 = vmatprep.subr.bf16.mxu0 %v4876_v63  ;;  %v891_v31 = vld [vmem:[#allocation2 + $0x88] sm:$0x11]  ;;  %v961_v63 = vor.u32 %v960_v35, %v957_v34  ;;  %v4928_v35 = vld [vmem:[%s6812_s1 + $0x634] ss:$8 sps:$4 sm:$0xff]  }
  0x73   : > { %3343 = vmatpush1.bf16.msra.mxu1 %v4871_v1  ;;  %v893_v1 = vld [vmem:[#allocation2 + $0xa0] sm:$0x11] }
  0x74   : > { %3635 = vmatpush1.bf16.msra.mxu0 %v4874_v3  ;;  %3344 = vmatprep.subr.bf16.mxu1 %v4879_v4  ;;  %v964_v3 = vshll.u32 %v891_v31, 16  ;;  %v975_v4 = vor.u32 %v974_v49, %v971_v46  ;;  %v994_v46 = vrot.slane %v992_v22, 5  ;;  %v4931_v31 = vld [vmem:[%s6812_s1 + $0x244] ss:$8 sps:$4 sm:$0xff]  }
  0x75   : > { %3636 = vmatprep.subr.bf16.mxu0 %v4883_v5  ;;  %v978_v5 = vshll.u32 %v893_v1, 16 }
  0x77   : > { %3345 = vmatpush1.bf16.msra.mxu1 %v4877_v6  ;;  %v985_v6 = vrot.slane %v392_v58, 4  ;;  %v515_v58 = vshrl.u32 %v5797_v23, 16 }
  0x78   : > { %3637 = vmatpush1.bf16.msra.mxu0 %v4881_v8  ;;  %3346 = vmatprep.subr.bf16.mxu1 %v4887_v11  ;;  %v988_v8 = vrot.slane %v395_v60, 5  ;;  %v999_v11 = vrot.slane %v997_v2, 4  ;;  %v518_v60 = vshll.u32 %v5797_v23, 16  ;;  %v4923_v2 = vld [vmem:[%s6812_s1 + $0x230] ss:$8 sps:$4 sm:$0xff]  }
  0x79   : > { %3638 = vmatprep.subr.bf16.mxu0 %v4890_v12  ;;  %v1002_v12 = vrot.slane %v1000_v51, 5  ;;  %v4926_v51 = vld [vmem:[%s6812_s1 + $0x630] ss:$8 sps:$4 sm:$0xff]  }
  0x7a   : > { %v520_v40 = vrot.slane %v518_v60, 5 }
  0x7b   : > { %3347 = vmatpush1.bf16.msra.mxu1 %v4885_v54  ;;  %v962_v54 = vrot.slane %v961_v63, 4  ;;  %v1003_v24 = vor.u32 %v1002_v12, %v999_v11  ;;  %v496_v63 = vld [vmem:[#allocation2 + $0x10] sm:$0x11]  ;;  %v4929_v11 = vld [vmem:[%s6812_s1 + $0x240] ss:$8 sps:$4 sm:$0xff]  }
  0x7c   : > { %3639 = vmatpush1.bf16.msra.mxu0 %v4888_v16  ;;  %3348 = vmatprep.subr.bf16.mxu1 %v4893_v43  ;;  %v966_v16 = vrot.slane %v964_v3, 5  ;;  %v976_v43 = vrot.slane %v975_v4, 4  ;;  %v1051_v4 = vld [vmem:[#allocation2 + $0x30] sm:$0x88]  ;;  %v524_v12 = vshll.u32 %v496_v63, 16 }
  0x7d   : > { %3640 = vmatprep.subr.bf16.mxu0 %v4897_v44  ;;  %v980_v44 = vrot.slane %v978_v5, 5  ;;  %v1004_v49 = vrot.slane %v1003_v24, 4  ;;  %v1053_v5 = vld [vmem:[#allocation2 + $0x48] sm:$0x88] }
  0x7e   : > { %v5858_v33 = vsel %vm5670_vm5, %v962_v54, %v966_v16 }
  0x7f   : > { %3349 = vmatpush1.bf16.msra.mxu1 %v4891_v57  ;;  %v4919_v57 = vld [vmem:[%s6812_s1 + $0x224] ss:$8 sps:$4 sm:$0xff]   ;;  %v5862_v34 = vsel %vm5670_vm5, %v976_v43, %v980_v44  ;;  %v1081_v43 = vshrl.u32 %v1053_v5, 16  ;;  %v4966_v5 = vld [vmem:[%s6812_s1 + $0x2a0] ss:$8 sps:$4 sm:$0xff]  }
  0x80   : > { %3641 = vmatpush1.bf16.msra.mxu0 %v4895_v55  ;;  %3350 = vmatprep.subr.bf16.mxu1 %v4901_v21  ;;  %v897_v55 = vld [vmem:[#allocation2 + $0xd0] sm:$0x11]  ;;  %v989_v21 = vor.u32 %v988_v8, %v985_v6  ;;  %v4176_v37 = vcombine.low %v5858_v33, %v5862_v34 }
  0x81   : > { %3642 = vmatprep.subr.bf16.mxu0 %v4904_v26  ;;  %v4917_v26 = vld [vmem:[%s6812_s1 + $0x220] ss:$8 sps:$4 sm:$0xff]   ;;  %v1006_v27 = vshll.u32 %v897_v55, 16  ;;  %v5908_v6 = vld [vmem:[#allocation2 + $0x50] sm:$0xff] }
  0x82   : > { %v990_v41 = vrot.slane %v989_v21, 4  ;;  %v1086_v44 = vshrl.u32 %v5908_v6, 16  ;;  %v4940_v21 = vld [vmem:[%s6812_s1 + $0x654] ss:$8 sps:$4 sm:$0xff]  }
  0x83   : > { %3351 = vmatpush1.bf16.msra.mxu1 %v4899_v30  ;;  %v4925_v30 = vld [vmem:[%s6812_s1 + $0x234] ss:$8 sps:$4 sm:$0xff]  }
  0x84   : > { %3643 = vmatpush1.bf16.msra.mxu0 %v4902_v36  ;;  %3393 = vmatprep.subr.bf16.mxu1 %v4907_v18  ;;  %v517_v36 = vrot.slane %v515_v58, 4  ;;  %v1008_v18 = vrot.slane %v1006_v27, 5  ;;  %v1088_v24 = vrot.slane %v1086_v44, 7  ;;  %v4139_v27 = vcombine.high %v5570_v20, %v5609_v39  ;;  %v4953_v20 = vld [vmem:[%s6812_s1 + $0x280] ss:$8 sps:$4 sm:$0xff]  }
  0x85   : > { %3685 = vmatprep.subr.bf16.mxu0 %v4910_v19  ;;  %v5871_v19 = vld [vmem:[#allocation2 + $0x20] sm:$0xff] }
  0x86   : > { %3353 = vmatmul.mubr.bf16.vlgmr.msra.gmra.mrb[0].mxu1 %v4132_v38  ;;  %v4137_v38 = vcombine.high %v5511_v47, %v5548_v7  ;;  %v521_v50 = vor.u32 %v520_v40, %v517_v36  ;;  %v4181_v40 = vrot.slane %v1081_v43, 11  ;;  %v4946_v7 = vld [vmem:[%s6812_s1 + $0x664] ss:$8 sps:$4 sm:$0xff]   ;;  %v4956_v39 = vld [vmem:[%s6812_s1 + $0x680] ss:$8 sps:$4 sm:$0xff]  }
  0x87   : > { %3645 = vmatmul.mubr.bf16.vlgmr.msra.gmra.mrb[0].mxu0 %v4172_v53  ;;  %3394 = vmatpush1.bf16.msra.mxu1 %v4905_v52  ;;  %v4177_v52 = vcombine.high %v5858_v33, %v5862_v34  ;;  %v529_v53 = vshrl.u32 %v5871_v19, 16  ;;  %v4938_v33 = vld [vmem:[%s6812_s1 + $0x650] ss:$8 sps:$4 sm:$0xff]  }
  0x88   : > { %3686 = vmatpush1.bf16.msra.mxu0 %v4908_v56  ;;  %3395 = vmatprep.subr.bf16.mxu1 %v4913_v42  ;;  %v532_v56 = vshll.u32 %v5871_v19, 16  ;;  %v5893_v42 = vld [vmem:[#allocation2 + $0x38] sm:$0xff]  ;;  %v522_v22 = vrot.slane %v521_v50, 4 }
  0x89   : > { %3687 = vmatprep.subr.bf16.mxu0 %v4916_v45  ;;  %3362 = vmatprep.mubr.bf16.mxu1 %v4135_v14  ;;  %v531_v1 = vrot.slane %v529_v53, 4  ;;  %v5906_v45 = vsel %vm5670_vm5, %v1004_v49, %v1008_v18  ;;  %v1073_v8 = vshrl.u32 %v5893_v42, 16  ;;  %v1068_v14 = vshrl.u32 %v1051_v4, 16  ;;  %v4941_v18 = vld [vmem:[%s6812_s1 + $0x260] ss:$8 sps:$4 sm:$0xff]  }
  0x8a   : > { %3654 = vmatprep.mubr.bf16.mxu0 %v4175_v15  ;;  %v534_v3 = vrot.slane %v532_v56, 5  ;;  %v4932_v15 = vld [vmem:[%s6812_s1 + $0x640] ss:$8 sps:$4 sm:$0xff]   ;;  %v1076_v16 = vshll.u32 %v5893_v42, 16  ;;  %v4196_v17 = vcombine.low %v5893_v42, %v5908_v6  ;;  %v4197_v55 = vcombine.high %v5893_v42, %v5908_v6  ;;  %v4950_v50 = vld [vmem:[%s6812_s1 + $0x670] ss:$8 sps:$4 sm:$0xff]  }
  0x8b   : > { %3396 = vmatpush1.bf16.msra.mxu1 %v4911_v13  ;;  %v1075_v54 = vrot.slane %v1073_v8, 7  ;;  %v690_v47 = vrot.slane %v529_v53, 7  ;;  %v4949_v53 = vld [vmem:[%s6812_s1 + $0x274] ss:$8 sps:$4 sm:$0xff]  }
  0x8c   : > { %3688 = vmatpush1.bf16.msra.mxu0 %v4914_v10  ;;  %3397 = vmatprep.subr.bf16.mxu1 %v4919_v57  ;;  %v535_v13 = vor.u32 %v534_v3, %v531_v1  ;;  %v538_v10 = vshll.u32 %v498_v62, 16  ;;  %v4937_v57 = vld [vmem:[%s6812_s1 + $0x254] ss:$8 sps:$4 sm:$0xff]   ;;  %v4947_v62 = vld [vmem:[%s6812_s1 + $0x270] ss:$8 sps:$4 sm:$0xff]  }
  0x8d   : > { %3689 = vmatprep.subr.bf16.mxu0 %v4922_v0  ;;  %v1089_v0 = vshll.u32 %v5908_v6, 16  ;;  %v5949_v36 = vor.u32 %v1076_v16, %v1075_v54  ;;  %v5965_v49 = vor.u32 %v690_v47, %v532_v56  ;;  %v4952_v56 = vld [vmem:[%s6812_s1 + $0x674] ss:$8 sps:$4 sm:$0xff]   ;;  %v4955_v1 = vld [vmem:[%s6812_s1 + $0x284] ss:$8 sps:$4 sm:$0xff]   ;;  %v559_v54 = vrot.slane %v1086_v44, 4 }
  0x8e   : > { %3363 = vmatmul.mubr.bf16.gmra.mrb[4].mxu1 %v4134_v48  ;;  %v5902_v48 = vsel %vm5670_vm5, %v990_v41, %v994_v46  ;;  %v536_v34 = vrot.slane %v535_v13, 4  ;;  %v4943_v41 = vld [vmem:[%s6812_s1 + $0x264] ss:$8 sps:$4 sm:$0xff]   ;;  %v4964_v4 = vld [vmem:[%s6812_s1 + $0x694] ss:$8 sps:$4 sm:$0xff]  }
  0x8f   : > { %3655 = vmatmul.mubr.bf16.gmra.mrb[4].mxu0 %v4174_v32  ;;  %3398 = vmatpush1.bf16.msra.mxu1 %v4917_v26  ;;  %v4935_v26 = vld [vmem:[%s6812_s1 + $0x250] ss:$8 sps:$4 sm:$0xff]   ;;  %v540_v32 = vrot.slane %v538_v10, 5  ;;  %v5956_v46 = vor.u32 %v1089_v0, %v1088_v24  ;;  %v4958_v3 = vld [vmem:[%s6812_s1 + $0x684] ss:$8 sps:$4 sm:$0xff]   ;;  %v562_v43 = vrot.slane %v1089_v0, 5 }
  0x90   : > { %3690 = vmatpush1.bf16.msra.mxu0 %v4920_v29  ;;  %3399 = vmatprep.subr.bf16.mxu1 %v4925_v30  ;;  %v4179_v29 = vcombine.high %v5902_v48, %v5906_v45  ;;  %v526_v30 = vrot.slane %v524_v12, 5  ;;  %v4975_v12 = vld [vmem:[%s6812_s1 + $0x2b4] ss:$8 sps:$4 sm:$0xff]   ;;  %v4973_v10 = vld [vmem:[%s6812_s1 + $0x2b0] ss:$8 sps:$4 sm:$0xff]  }
  0x91   : > { %3691 = vmatprep.subr.bf16.mxu0 %v4928_v35  ;;  %3372 = vmatprep.mubr.bf16.mxu1 %v4137_v38  ;;  %v4180_v35 = vrot.slane %v1068_v14, 11  ;;  %v5979_v38 = vsel %vm5670_vm5, %v536_v34, %v540_v32  ;;  %v4978_v13 = vld [vmem:[%s6812_s1 + $0x6b4] ss:$8 sps:$4 sm:$0xff]   ;;  %v545_v14 = vrot.slane %v1073_v8, 4  ;;  %v500_v8 = vld [vmem:[#allocation2 + $0x40] sm:$0x11] }
  0x92   : > { %3664 = vmatprep.mubr.bf16.mxu0 %v4177_v52  ;;  %v5989_v52 = vsel %vm5394_vm2, %v4181_v40, %v5956_v46  ;;  %v502_v24 = vld [vmem:[#allocation2 + $0x58] sm:$0x11]  ;;  %v4982_v44 = vld [vmem:[%s6812_s1 + $0x2c4] ss:$8 sps:$4 sm:$0xff]   ;;  %v552_v32 = vshll.u32 %v500_v8, 16 }
  0x93   : > { %3400 = vmatpush1.bf16.msra.mxu1 %v4923_v2  ;;  %v4944_v2 = vld [vmem:[%s6812_s1 + $0x660] ss:$8 sps:$4 sm:$0xff]   ;;  %v5984_v19 = vsel %vm5394_vm2, %v4180_v35, %v5949_v36  ;;  %v4985_v0 = vld [vmem:[%s6812_s1 + $0x6c4] ss:$8 sps:$4 sm:$0xff]   ;;  %v1057_v34 = vld [vmem:[#allocation2 + $0x78] sm:$0x88] }
  0x94   : > { %3692 = vmatpush1.bf16.msra.mxu0 %v4926_v51  ;;  %3401 = vmatprep.subr.bf16.mxu1 %v4931_v31  ;;  %v5975_v51 = vsel %vm5670_vm5, %v522_v22, %v526_v30  ;;  %v4189_v63 = vcombine.high %v5984_v19, %v5989_v52  ;;  %v6068_v22 = vld [vmem:[#allocation2 + $0x80] sm:$0xff] }
  0x95   : > { %3693 = vmatprep.subr.bf16.mxu0 %v4934_v61  ;;  %v4141_v31 = vcombine.high %v5975_v51, %v5979_v38  ;;  %v4959_v61 = vld [vmem:[%s6812_s1 + $0x290] ss:$8 sps:$4 sm:$0xff]   ;;  %v1055_v30 = vld [vmem:[#allocation2 + $0x60] sm:$0x88]  ;;  %v1112_v47 = vshrl.u32 %v6068_v22, 16 }
  0x96   : > { %3373 = vmatmul.mubr.bf16.gmra.mrb[8].mxu1 %v4136_v28  ;;  %v4178_v28 = vcombine.low %v5902_v48, %v5906_v45  ;;  %v4968_v48 = vld [vmem:[%s6812_s1 + $0x2a4] ss:$8 sps:$4 sm:$0xff]   ;;  %v4980_v35 = vld [vmem:[%s6812_s1 + $0x2c0] ss:$8 sps:$4 sm:$0xff]  }
  0x97   : > { %3665 = vmatmul.mubr.bf16.gmra.mrb[8].mxu0 %v4176_v37  ;;  %3402 = vmatpush1.bf16.msra.mxu1 %v4929_v11  ;;  %v4962_v37 = vld [vmem:[%s6812_s1 + $0x690] ss:$8 sps:$4 sm:$0xff]   ;;  %v4971_v45 = vld [vmem:[%s6812_s1 + $0x6a4] ss:$8 sps:$4 sm:$0xff]   ;;  %v4969_v11 = vld [vmem:[%s6812_s1 + $0x6a0] ss:$8 sps:$4 sm:$0xff]  }
  0x98   : > { %3694 = vmatpush1.bf16.msra.mxu0 %v4932_v15  ;;  %3403 = vmatprep.subr.bf16.mxu1 %v4937_v57  ;;  %v548_v15 = vrot.slane %v1076_v16, 5  ;;  %v4976_v57 = vld [vmem:[%s6812_s1 + $0x6b0] ss:$8 sps:$4 sm:$0xff]   ;;  %v4983_v40 = vld [vmem:[%s6812_s1 + $0x6c0] ss:$8 sps:$4 sm:$0xff]  }
  0x99   : > { %3695 = vmatprep.subr.bf16.mxu0 %v4940_v21  ;;  %3382 = vmatprep.mubr.bf16.mxu1 %v4139_v27  ;;  %v6066_v21 = vld [vmem:[#allocation2 + $0x68] sm:$0xff] }
  0x9a   : > { %3674 = vmatprep.mubr.bf16.mxu0 %v4179_v29  ;;  %v4199_v16 = vcombine.high %v6066_v21, %v6068_v22  ;;  %v549_v27 = vor.u32 %v548_v15, %v545_v14  ;;  %v563_v29 = vor.u32 %v562_v43, %v559_v54  ;;  %v587_v14 = vrot.slane %v1112_v47, 4 }
  0x9b   : > { %3404 = vmatpush1.bf16.msra.mxu1 %v4935_v26  ;;  %v4198_v26 = vcombine.low %v6066_v21, %v6068_v22 }
  0x9c   : > { %3696 = vmatpush1.bf16.msra.mxu0 %v4938_v33  ;;  %3405 = vmatprep.subr.bf16.mxu1 %v4943_v41  ;;  %v566_v33 = vshll.u32 %v502_v24, 16  ;;  %v1099_v41 = vshrl.u32 %v6066_v21, 16 }
  0x9d   : > { %3697 = vmatprep.subr.bf16.mxu0 %v4946_v7  ;;  %v4989_v7 = vld [vmem:[%s6812_s1 + $0x2d4] ss:$8 sps:$4 sm:$0xff]  }
  0x9e   : > { %3383 = vmatmul.mubr.bf16.gmra.mrb[12].mxu1 %v4138_v9  ;;  %v4961_v9 = vld [vmem:[%s6812_s1 + $0x294] ss:$8 sps:$4 sm:$0xff]  }
  0x9f   : > { %3675 = vmatmul.mubr.bf16.gmra.mrb[12].mxu0 %v4178_v28  ;;  %3406 = vmatpush1.bf16.msra.mxu1 %v4941_v18  ;;  %v4992_v28 = vld [vmem:[%s6812_s1 + $0x6d4] ss:$8 sps:$4 sm:$0xff]   ;;  %v1094_v18 = vshrl.u32 %v1055_v30, 16 }
  0xa0   : > { %3698 = vmatpush1.bf16.msra.mxu0 %v4944_v2  ;;  %3407 = vmatprep.subr.bf16.mxu1 %v4949_v53  ;;  %v4987_v2 = vld [vmem:[%s6812_s1 + $0x2d0] ss:$8 sps:$4 sm:$0xff]  }
  0xa1   : > { %3699 = vmatprep.subr.bf16.mxu0 %v4952_v56  ;;  %3425 = vmatprep.mubr.bf16.mxu1 %v4141_v31  ;;  %v4990_v53 = vld [vmem:[%s6812_s1 + $0x6d0] ss:$8 sps:$4 sm:$0xff]   ;;  %v550_v56 = vrot.slane %v549_v27, 4  ;;  %v564_v31 = vrot.slane %v563_v29, 4 }
  0xa2   : > { %3717 = vmatprep.mubr.bf16.mxu0 %v4189_v63  ;;  %v1102_v63 = vshll.u32 %v6066_v21, 16 }
  0xa3   : > { %3408 = vmatpush1.bf16.msra.mxu1 %v4947_v62  ;;  %v1107_v62 = vshrl.u32 %v1057_v34, 16  ;;  %v1059_v34 = vld [vmem:[#allocation2 + $0x90] sm:$0x88] }
  0xa4   : > { %3700 = vmatpush1.bf16.msra.mxu0 %v4950_v50  ;;  %3409 = vmatprep.subr.bf16.mxu1 %v4955_v1  ;;  %v4996_v50 = vld [vmem:[%s6812_s1 + $0x2e4] ss:$8 sps:$4 sm:$0xff]   ;;  %v554_v1 = vrot.slane %v552_v32, 5 }
  0xa5   : > { %3701 = vmatprep.subr.bf16.mxu0 %v4958_v3  ;;  %v568_v3 = vrot.slane %v566_v33, 5  ;;  %v4183_v30 = vrot.slane %v1107_v62, 11  ;;  %v4188_v62 = vcombine.low %v5984_v19, %v5989_v52  ;;  %v510_v19 = vld [vmem:[#allocation2 + $0xb8] sm:$0x11]  ;;  %v5012_v52 = vld [vmem:[%s6812_s1 + $0x704] ss:$8 sps:$4 sm:$0xff]  }
  0xa6   : > { %v6132_v8 = vsel %vm5670_vm5, %v550_v56, %v554_v1  ;;  %v1120_v1 = vshrl.u32 %v1059_v34, 16 }
  0xa7   : > { %3410 = vmatpush1.bf16.msra.mxu1 %v4953_v20  ;;  %v1115_v20 = vshll.u32 %v6068_v22, 16  ;;  %v6136_v24 = vsel %vm5670_vm5, %v564_v31, %v568_v3  ;;  %v4140_v31 = vcombine.low %v5975_v51, %v5979_v38  ;;  %v508_v3 = vld [vmem:[#allocation2 + $0xa0] sm:$0x11] }
  0xa8   : > { %3702 = vmatpush1.bf16.msra.mxu0 %v4956_v39  ;;  %3411 = vmatprep.subr.bf16.mxu1 %v4961_v9  ;;  %v1101_v39 = vrot.slane %v1099_v41, 7  ;;  %v1114_v9 = vrot.slane %v1112_v47, 7 }
  0xa9   : > { %3703 = vmatprep.subr.bf16.mxu0 %v4964_v4  ;;  %v573_v4 = vrot.slane %v1099_v41, 4  ;;  %v590_v15 = vrot.slane %v1115_v20, 5 }
  0xaa   : > { %v6140_v29 = vor.u32 %v1102_v63, %v1101_v39  ;;  %v6142_v32 = vor.u32 %v1115_v20, %v1114_v9 }
  0xab   : > { %3412 = vmatpush1.bf16.msra.mxu1 %v4959_v61  ;;  %v576_v61 = vrot.slane %v1102_v63, 5  ;;  %v5009_v63 = vld [vmem:[%s6812_s1 + $0x304] ss:$8 sps:$4 sm:$0xff]  }
  0xac   : > { %3704 = vmatpush1.bf16.msra.mxu0 %v4962_v37  ;;  %3413 = vmatprep.subr.bf16.mxu1 %v4968_v48  ;;  %v6105_v37 = vld [vmem:[#allocation2 + $0x98] sm:$0xff]  ;;  %v4999_v48 = vld [vmem:[%s6812_s1 + $0x6e4] ss:$8 sps:$4 sm:$0xff]  }
  0xad   : > { %3705 = vmatprep.subr.bf16.mxu0 %v4971_v45  ;;  %v4182_v45 = vrot.slane %v1094_v18, 11  ;;  %v1128_v27 = vshll.u32 %v6105_v37, 16  ;;  %v577_v33 = vor.u32 %v576_v61, %v573_v4  ;;  %v5007_v61 = vld [vmem:[%s6812_s1 + $0x300] ss:$8 sps:$4 sm:$0xff]  }
  0xaf   : > { %3414 = vmatpush1.bf16.msra.mxu1 %v4966_v5  ;;  %v6110_v5 = vld [vmem:[#allocation2 + $0xb0] sm:$0xff]  ;;  %v604_v47 = vrot.slane %v1128_v27, 5  ;;  %v6167_v23 = vsel %vm5394_vm2, %v4182_v45, %v6140_v29  ;;  %v6174_v51 = vrot.slane %v577_v33, 4 }
  0xb0   : > { %3706 = vmatpush1.bf16.msra.mxu0 %v4969_v11  ;;  %3415 = vmatprep.subr.bf16.mxu1 %v4975_v12  ;;  %v1166_v11 = vrot.slane %v515_v58, 7  ;;  %v4994_v12 = vld [vmem:[%s6812_s1 + $0x2e0] ss:$8 sps:$4 sm:$0xff]   ;;  %v4201_v54 = vcombine.high %v6105_v37, %v6110_v5  ;;  %v4200_v43 = vcombine.low %v6105_v37, %v6110_v5  ;;  %v5003_v58 = vld [vmem:[%s6812_s1 + $0x2f4] ss:$8 sps:$4 sm:$0xff]   ;;  %v1141_v9 = vshll.u32 %v6110_v5, 16 }
  0xb1   : > { %3707 = vmatprep.subr.bf16.mxu0 %v4978_v13  ;;  %v4997_v13 = vld [vmem:[%s6812_s1 + $0x6e0] ss:$8 sps:$4 sm:$0xff]  }
  0xb2   : > { %v6153_v56 = vor.u32 %v1166_v11, %v518_v60  ;;  %v6172_v60 = vsel %vm5394_vm2, %v4183_v30, %v6142_v32  ;;  %v5018_v30 = vld [vmem:[%s6812_s1 + $0x714] ss:$8 sps:$4 sm:$0xff]  }
  0xb3   : > { %3416 = vmatpush1.bf16.msra.mxu1 %v4973_v10  ;;  %v504_v10 = vld [vmem:[#allocation2 + $0x70] sm:$0x11]  ;;  %v4191_v33 = vcombine.high %v6167_v23, %v6172_v60  ;;  %v4190_v34 = vcombine.low %v6167_v23, %v6172_v60  ;;  %v678_v60 = vld [vmem:[#allocation2 + $0xa8] sm:$0x88] }
  0xb4   : > { %3708 = vmatpush1.bf16.msra.mxu0 %v4976_v57  ;;  %3417 = vmatprep.subr.bf16.mxu1 %v4982_v44  ;;  %v5006_v57 = vld [vmem:[%s6812_s1 + $0x6f4] ss:$8 sps:$4 sm:$0xff]   ;;  %v506_v44 = vld [vmem:[#allocation2 + $0x88] sm:$0x11]  ;;  %v580_v18 = vshll.u32 %v504_v10, 16 }
  0xb5   : > { %3709 = vmatprep.subr.bf16.mxu0 %v4985_v0  ;;  %v1125_v0 = vshrl.u32 %v6105_v37, 16  ;;  %v1063_v10 = vld [vmem:[#allocation2 + $0xc0] sm:$0x88] }
  0xb6   : > { %v582_v45 = vrot.slane %v580_v18, 5  ;;  %v1146_v18 = vshrl.u32 %v1063_v10, 16 }
  0xb7   : > { %3418 = vmatpush1.bf16.msra.mxu1 %v4980_v35  ;;  %v1061_v35 = vld [vmem:[#allocation2 + $0xa8] sm:$0x88]  ;;  %v601_v41 = vrot.slane %v1125_v0, 4  ;;  %v1127_v20 = vrot.slane %v1125_v0, 7 }
  0xb8   : > { %3710 = vmatpush1.bf16.msra.mxu0 %v4983_v40  ;;  %3419 = vmatprep.subr.bf16.mxu1 %v4989_v7  ;;  %v1138_v40 = vshrl.u32 %v6110_v5, 16  ;;  %v5001_v7 = vld [vmem:[%s6812_s1 + $0x2f0] ss:$8 sps:$4 sm:$0xff]   ;;  %v1133_v38 = vshrl.u32 %v1061_v35, 16  ;;  %v6193_v0 = vld [vmem:[#allocation2 + $0xc8] sm:$0xff]  ;;  %v4184_v35 = vrot.slane %v1120_v1, 11 }
  0xb9   : > { %3711 = vmatprep.subr.bf16.mxu0 %v4992_v28  ;;  %v5004_v28 = vld [vmem:[%s6812_s1 + $0x6f0] ss:$8 sps:$4 sm:$0xff]   ;;  %v605_v4 = vor.u32 %v604_v47, %v601_v41  ;;  %v6202_v41 = vor.u32 %v1128_v27, %v1127_v20  ;;  %v6217_v27 = vsel %vm5670_vm5, %v6174_v51, %v582_v45  ;;  %v5024_v20 = vld [vmem:[%s6812_s1 + $0x724] ss:$8 sps:$4 sm:$0xff]  }
  0xba   : > { %v1140_v39 = vrot.slane %v1138_v40, 7  ;;  %v5016_v1 = vld [vmem:[%s6812_s1 + $0x710] ss:$8 sps:$4 sm:$0xff]  }
  0xbb   : > { %3420 = vmatpush1.bf16.msra.mxu1 %v4987_v2  ;;  %v591_v2 = vor.u32 %v590_v15, %v587_v14  ;;  %v5015_v14 = vld [vmem:[%s6812_s1 + $0x314] ss:$8 sps:$4 sm:$0xff]   ;;  %v4142_v15 = vcombine.low %v6132_v8, %v6136_v24 }
  0xbc   : > { %3712 = vmatpush1.bf16.msra.mxu0 %v4990_v53  ;;  %3421 = vmatprep.subr.bf16.mxu1 %v4996_v50  ;;  %v594_v53 = vshll.u32 %v506_v44, 16  ;;  %v4143_v50 = vcombine.high %v6132_v8, %v6136_v24  ;;  %v622_v44 = vshll.u32 %v510_v19, 16  ;;  %v6204_v47 = vor.u32 %v1141_v9, %v1140_v39 }
  0xbd   : > { %3713 = vmatprep.subr.bf16.mxu0 %v4999_v48  ;;  %v5010_v48 = vld [vmem:[%s6812_s1 + $0x700] ss:$8 sps:$4 sm:$0xff]   ;;  %v6186_v11 = vrot.slane %v591_v2, 4  ;;  %v666_v2 = vld [vmem:[#allocation2 + $0x18] sm:$0x88] }
  0xbe   : > { %v683_v19 = vshrl.u32 %v666_v2, 16  ;;  %v6239_v2 = vsel %vm5394_vm2, %v4184_v35, %v6202_v41 }
  0xbf   : > { %3422 = vmatpush1.bf16.msra.mxu1 %v4994_v12  ;;  %v596_v12 = vrot.slane %v594_v53, 5  ;;  %v5013_v53 = vld [vmem:[%s6812_s1 + $0x310] ss:$8 sps:$4 sm:$0xff]  }
  0xc0   : > { %3714 = vmatpush1.bf16.msra.mxu0 %v4997_v13  ;;  %3423 = vmatprep.subr.bf16.mxu1 %v5003_v58  ;;  %v615_v13 = vrot.slane %v1138_v40, 4  ;;  %v608_v58 = vshll.u32 %v508_v3, 16  ;;  %v4185_v40 = vrot.slane %v1133_v38, 11  ;;  %v1151_v3 = vshrl.u32 %v6193_v0, 16  ;;  %v668_v38 = vld [vmem:[#allocation2 + $0x30] sm:$0x88] }
  0xc1   : > { %3715 = vmatprep.subr.bf16.mxu0 %v5006_v57  ;;  %v618_v57 = vrot.slane %v1141_v9, 5  ;;  %v696_v45 = vshrl.u32 %v668_v38, 16 }
  0xc2   : > { %v610_v39 = vrot.slane %v608_v58, 5  ;;  %v672_v58 = vld [vmem:[#allocation2 + $0x60] sm:$0x88] }
  0xc3   : > { %3424 = vmatpush1.bf16.msra.mxu1 %v5001_v7  ;;  %v6206_v7 = vrot.slane %v605_v4, 4  ;;  %v619_v9 = vor.u32 %v618_v57, %v615_v13  ;;  %v6231_v4 = vrot.slane %v622_v44, 5  ;;  %v6244_v13 = vsel %vm5394_vm2, %v4185_v40, %v6204_v47  ;;  %v5022_v57 = vld [vmem:[%s6812_s1 + $0x720] ss:$8 sps:$4 sm:$0xff]  }
  0xc4   : > { %3716 = vmatpush1.bf16.msra.mxu0 %v5004_v28  ;;  %3466 = vmatprep.subr.bf16.mxu1 %v5009_v63  ;;  %v1065_v28 = vld [vmem:[#allocation2 + $0xd8] sm:$0x88]  ;;  %v6222_v63 = vsel %vm5670_vm5, %v6186_v11, %v596_v12  ;;  %v1154_v12 = vshll.u32 %v6193_v0, 16  ;;  %v1153_v44 = vrot.slane %v1151_v3, 7  ;;  %v722_v40 = vshrl.u32 %v672_v58, 16 }
  0xc5   : > { %3758 = vmatprep.subr.bf16.mxu0 %v5012_v52  ;;  %v5021_v52 = vld [vmem:[%s6812_s1 + $0x324] ss:$8 sps:$4 sm:$0xff]   ;;  %v1159_v10 = vshrl.u32 %v1065_v28, 16  ;;  %v5027_v28 = vld [vmem:[%s6812_s1 + $0x334] ss:$8 sps:$4 sm:$0xff]   ;;  %v6265_v38 = vrot.slane %v619_v9, 4  ;;  %v4192_v8 = vcombine.low %v6239_v2, %v6244_v13  ;;  %v611_v24 = vsel %vm5670_vm5, %v6206_v7, %v610_v39 }
  0xc6   : > { %3426 = vmatmul.mubr.bf16.vlgmr.msra.gmra.mrb[0].mxu1 %v4140_v31  ;;  %v4148_v31 = vrot.slane %v683_v19, 11  ;;  %v4186_v19 = vrot.slane %v1146_v18, 11  ;;  %v674_v18 = vld [vmem:[#allocation2 + $0x78] sm:$0x88]  ;;  %v1156_v58 = vor.u32 %v1154_v12, %v1153_v44  ;;  %v761_v39 = vshrl.u32 %v678_v60, 16 }
  0xc7   : > { %3718 = vmatmul.mubr.bf16.vlgmr.msra.gmra.mrb[0].mxu0 %v4188_v62  ;;  %3467 = vmatpush1.bf16.msra.mxu1 %v5007_v61  ;;  %v4145_v62 = vcombine.high %v6217_v27, %v6222_v63  ;;  %v4149_v61 = vrot.slane %v696_v45, 11  ;;  %v5052_v60 = vld [vmem:[%s6812_s1 + $0x770] ss:$8 sps:$4 sm:$0xff]  }
  0xc8   : > { %3759 = vmatpush1.bf16.msra.mxu0 %v5010_v48  ;;  %3468 = vmatprep.subr.bf16.mxu1 %v5015_v14  ;;  %v670_v48 = vld [vmem:[#allocation2 + $0x48] sm:$0x88] }
  0xc9   : > { %3760 = vmatprep.subr.bf16.mxu0 %v5018_v30  ;;  %v5019_v14 = vld [vmem:[%s6812_s1 + $0x320] ss:$8 sps:$4 sm:$0xff]   ;;  %3435 = vmatprep.mubr.bf16.mxu1 %v4143_v50  ;;  %v6260_v30 = vsel %vm5394_vm2, %v4148_v31, %v5965_v49  ;;  %v709_v35 = vshrl.u32 %v670_v48, 16  ;;  %v6270_v50 = vsel %vm5394_vm2, %v4149_v61, %v5949_v36  ;;  %v5030_v49 = vld [vmem:[%s6812_s1 + $0x734] ss:$8 sps:$4 sm:$0xff]   ;;  %v4151_v31 = vrot.slane %v722_v40, 11 }
  0xca   : > { %3727 = vmatprep.mubr.bf16.mxu0 %v4191_v33  ;;  %v4156_v33 = vcombine.low %v6260_v30, %v6270_v50  ;;  %v4157_v45 = vcombine.high %v6260_v30, %v6270_v50  ;;  %v4193_v36 = vcombine.high %v6239_v2, %v6244_v13  ;;  %v735_v61 = vshrl.u32 %v674_v18, 16  ;;  %v5025_v48 = vld [vmem:[%s6812_s1 + $0x330] ss:$8 sps:$4 sm:$0xff]   ;;  %v5033_v40 = vld [vmem:[%s6812_s1 + $0x344] ss:$8 sps:$4 sm:$0xff]  }
  0xcb   : > { %3469 = vmatpush1.bf16.msra.mxu1 %v5013_v53  ;;  %v4150_v9 = vrot.slane %v709_v35, 11  ;;  %v4187_v53 = vrot.slane %v1159_v10, 11  ;;  %v5028_v10 = vld [vmem:[%s6812_s1 + $0x730] ss:$8 sps:$4 sm:$0xff]   ;;  %v1157_v13 = vsel %vm5394_vm2, %v4186_v19, %v1156_v58  ;;  %v5031_v19 = vld [vmem:[%s6812_s1 + $0x340] ss:$8 sps:$4 sm:$0xff]  }
  0xcc   : > { %3761 = vmatpush1.bf16.msra.mxu0 %v5016_v1  ;;  %3470 = vmatprep.subr.bf16.mxu1 %v5021_v52  ;;  %v676_v1 = vld [vmem:[#allocation2 + $0x90] sm:$0x88]  ;;  %v6294_v52 = vsel %vm5394_vm2, %v4151_v31, %v6140_v29  ;;  %v4152_v44 = vrot.slane %v735_v61, 11  ;;  %v5113_v50 = vld [vmem:[%s6812_s1 + $0x820] ss:$8 sps:$4 sm:$0xff]  }
  0xcd   : > { %3762 = vmatprep.subr.bf16.mxu0 %v5024_v20  ;;  %v6289_v35 = vsel %vm5394_vm2, %v4150_v9, %v5956_v46  ;;  %v748_v20 = vshrl.u32 %v676_v1, 16  ;;  %v4144_v9 = vcombine.low %v6217_v27, %v6222_v63  ;;  %v625_v27 = vsel %vm5670_vm5, %v6265_v38, %v6231_v4  ;;  %v5042_v31 = vld [vmem:[%s6812_s1 + $0x754] ss:$8 sps:$4 sm:$0xff]  }
  0xce   : > { %3436 = vmatmul.mubr.bf16.gmra.mrb[4].mxu1 %v4142_v15  ;;  %v4159_v46 = vcombine.high %v6289_v35, %v6294_v52  ;;  %v4158_v29 = vcombine.low %v6289_v35, %v6294_v52  ;;  %v680_v15 = vld [vmem:[#allocation2 + $0xc0] sm:$0x88]  ;;  %v6329_v63 = vsel %vm5394_vm2, %v4152_v44, %v6142_v32 }
  0xcf   : > { %3728 = vmatmul.mubr.bf16.gmra.mrb[4].mxu0 %v4190_v34  ;;  %3471 = vmatpush1.bf16.msra.mxu1 %v5019_v14  ;;  %v4153_v23 = vrot.slane %v748_v20, 11  ;;  %v5036_v34 = vld [vmem:[%s6812_s1 + $0x744] ss:$8 sps:$4 sm:$0xff]   ;;  %v774_v2 = vshrl.u32 %v680_v15, 16  ;;  %v1170_v14 = vsel %vm5394_vm2, %v4187_v53, %v6153_v56  ;;  %v5034_v56 = vld [vmem:[%s6812_s1 + $0x740] ss:$8 sps:$4 sm:$0xff]  }
  0xd0   : > { %3763 = vmatpush1.bf16.msra.mxu0 %v5022_v57  ;;  %3472 = vmatprep.subr.bf16.mxu1 %v5027_v28  ;;  %v4195_v18 = vcombine.high %v1157_v13, %v1170_v14  ;;  %v6384_v20 = vrot.slane %v1151_v3, 4  ;;  %v4194_v44 = vcombine.low %v1157_v13, %v1170_v14  ;;  %v1276_v15 = vld [vmem:[#allocation2 + $0xa0] sm:$0x11] }
  0xd1   : > { %3764 = vmatprep.subr.bf16.mxu0 %v5030_v49  ;;  %3445 = vmatprep.mubr.bf16.mxu1 %v4145_v62  ;;  %v6339_v4 = vsel %vm5394_vm2, %v4153_v23, %v6202_v41  ;;  %v4154_v62 = vrot.slane %v761_v39, 11  ;;  %v4155_v28 = vrot.slane %v774_v2, 11  ;;  %v4147_v41 = vcombine.high %v611_v24, %v625_v27  ;;  %v5039_v49 = vld [vmem:[%s6812_s1 + $0x354] ss:$8 sps:$4 sm:$0xff]   ;;  %v5049_v23 = vld [vmem:[%s6812_s1 + $0x370] ss:$8 sps:$4 sm:$0xff]  }
  0xd2   : > { %3737 = vmatprep.mubr.bf16.mxu0 %v4193_v36  ;;  %v4161_v32 = vcombine.high %v6329_v63, %v6339_v4  ;;  %v4160_v57 = vcombine.low %v6329_v63, %v6339_v4  ;;  %v5060_v39 = vld [vmem:[%s6812_s1 + $0x784] ss:$8 sps:$4 sm:$0xff]   ;;  %v1272_v2 = vld [vmem:[#allocation2 + $0x70] sm:$0x11]  ;;  %v1349_v13 = vshll.u32 %v1276_v15, 16 }
  0xd3   : > { %3473 = vmatpush1.bf16.msra.mxu1 %v5025_v48  ;;  %v6360_v36 = vsel %vm5394_vm2, %v4154_v62, %v6204_v47  ;;  %v6364_v53 = vsel %vm5394_vm2, %v4155_v28, %v1156_v58  ;;  %v5037_v48 = vld [vmem:[%s6812_s1 + $0x350] ss:$8 sps:$4 sm:$0xff]   ;;  %v5045_v47 = vld [vmem:[%s6812_s1 + $0x364] ss:$8 sps:$4 sm:$0xff]   ;;  %v5055_v28 = vld [vmem:[%s6812_s1 + $0x380] ss:$8 sps:$4 sm:$0xff]  }
  0xd4   : > { %3765 = vmatpush1.bf16.msra.mxu0 %v5028_v10  ;;  %3474 = vmatprep.subr.bf16.mxu1 %v5033_v40  ;;  %v4163_v1 = vcombine.high %v6360_v36, %v6364_v53  ;;  %v4162_v61 = vcombine.low %v6360_v36, %v6364_v53  ;;  %v5048_v58 = vld [vmem:[%s6812_s1 + $0x764] ss:$8 sps:$4 sm:$0xff]   ;;  %v6388_v10 = vrot.slane %v1154_v12, 5  ;;  %v4146_v40 = vcombine.low %v611_v24, %v625_v27  ;;  %v5051_v12 = vld [vmem:[%s6812_s1 + $0x374] ss:$8 sps:$4 sm:$0xff]  }
  0xd5   : > { %3766 = vmatprep.subr.bf16.mxu0 %v5036_v34  ;;  %v5054_v24 = vld [vmem:[%s6812_s1 + $0x774] ss:$8 sps:$4 sm:$0xff]   ;;  %v5057_v27 = vld [vmem:[%s6812_s1 + $0x384] ss:$8 sps:$4 sm:$0xff]   ;;  %v5127_v4 = vld [vmem:[%s6812_s1 + $0x860] ss:$8 sps:$4 sm:$0xff]  }
  0xd6   : > { %3446 = vmatmul.mubr.bf16.gmra.mrb[8].mxu1 %v4144_v9  ;;  %v5043_v9 = vld [vmem:[%s6812_s1 + $0x360] ss:$8 sps:$4 sm:$0xff]   ;;  %v1374_v3 = vor.u32 %v6388_v10, %v6384_v20  ;;  %v1278_v34 = vld [vmem:[#allocation2 + $0xb8] sm:$0x11]  ;;  %v5123_v35 = vld [vmem:[%s6812_s1 + $0x844] ss:$8 sps:$4 sm:$0xff]  }
  0xd7   : > { %3738 = vmatmul.mubr.bf16.gmra.mrb[8].mxu0 %v4192_v8  ;;  %3475 = vmatpush1.bf16.msra.mxu1 %v5031_v19  ;;  %v5046_v8 = vld [vmem:[%s6812_s1 + $0x760] ss:$8 sps:$4 sm:$0xff]   ;;  %v1363_v14 = vshll.u32 %v1278_v34, 16  ;;  %v1321_v19 = vshll.u32 %v1272_v2, 16  ;;  %v5078_v15 = vld [vmem:[%s6812_s1 + $0x7b4] ss:$8 sps:$4 sm:$0xff]  }
  0xd8   : > { %3767 = vmatpush1.bf16.msra.mxu0 %v5034_v56  ;;  %3476 = vmatprep.subr.bf16.mxu1 %v5039_v49  ;;  %v1274_v62 = vld [vmem:[#allocation2 + $0x88] sm:$0x11]  ;;  %v5073_v34 = vld [vmem:[%s6812_s1 + $0x3b0] ss:$8 sps:$4 sm:$0xff]   ;;  %v5138_v53 = vld [vmem:[%s6812_s1 + $0x894] ss:$8 sps:$4 sm:$0xff]  }
  0xd9   : > { %3768 = vmatprep.subr.bf16.mxu0 %v5042_v31  ;;  %3455 = vmatprep.mubr.bf16.mxu1 %v4147_v41  ;;  %v1335_v56 = vshll.u32 %v1274_v62, 16  ;;  %v5058_v41 = vld [vmem:[%s6812_s1 + $0x780] ss:$8 sps:$4 sm:$0xff]   ;;  %v1365_v49 = vrot.slane %v1363_v14, 5  ;;  %v5066_v31 = vld [vmem:[%s6812_s1 + $0x794] ss:$8 sps:$4 sm:$0xff]  }
  0xda   : > { %3747 = vmatprep.mubr.bf16.mxu0 %v4195_v18  ;;  %v1323_v18 = vrot.slane %v1321_v19, 5  ;;  %v5084_v2 = vld [vmem:[%s6812_s1 + $0x7c4] ss:$8 sps:$4 sm:$0xff]   ;;  %v5082_v14 = vld [vmem:[%s6812_s1 + $0x7c0] ss:$8 sps:$4 sm:$0xff]  }
  0xdb   : > { %3477 = vmatpush1.bf16.msra.mxu1 %v5037_v48  ;;  %v1337_v48 = vrot.slane %v1335_v56, 5  ;;  %v5087_v62 = vld [vmem:[%s6812_s1 + $0x3d4] ss:$8 sps:$4 sm:$0xff]   ;;  %v5085_v19 = vld [vmem:[%s6812_s1 + $0x3d0] ss:$8 sps:$4 sm:$0xff]  }
  0xdc   : > { %3769 = vmatpush1.bf16.msra.mxu0 %v5040_v59  ;;  %3478 = vmatprep.subr.bf16.mxu1 %v5045_v47  ;;  %v6442_v47 = vsel %vm5670_vm5, %v6265_v38, %v1365_v49  ;;  %v5064_v38 = vld [vmem:[%s6812_s1 + $0x790] ss:$8 sps:$4 sm:$0xff]   ;;  %v5091_v49 = vld [vmem:[%s6812_s1 + $0x3e0] ss:$8 sps:$4 sm:$0xff]   ;;  %v5129_v63 = vld [vmem:[%s6812_s1 + $0x864] ss:$8 sps:$4 sm:$0xff]  }
  0xdd   : > { %3770 = vmatprep.subr.bf16.mxu0 %v5048_v58  ;;  %v5088_v56 = vld [vmem:[%s6812_s1 + $0x7d0] ss:$8 sps:$4 sm:$0xff]   ;;  %v5133_v36 = vld [vmem:[%s6812_s1 + $0x880] ss:$8 sps:$4 sm:$0xff]  }
  0xde   : > { %3456 = vmatmul.mubr.bf16.gmra.mrb[12].mxu1 %v4146_v40 }
  0xdf   : > { %3748 = vmatmul.mubr.bf16.gmra.mrb[12].mxu0 %v4194_v44  ;;  %3479 = vmatpush1.bf16.msra.mxu1 %v5043_v9  ;;  %v6451_v44 = vsel %vm5670_vm5, %v6174_v51, %v1323_v18  ;;  %v6462_v9 = vsel %vm5670_vm5, %v6186_v11, %v1337_v48  ;;  %v5069_v51 = vld [vmem:[%s6812_s1 + $0x3a4] ss:$8 sps:$4 sm:$0xff]   ;;  %v5067_v11 = vld [vmem:[%s6812_s1 + $0x3a0] ss:$8 sps:$4 sm:$0xff]   ;;  %v5102_v18 = vld [vmem:[%s6812_s1 + $0x7f4] ss:$8 sps:$4 sm:$0xff]  }
  0xe0   : > { %3771 = vmatpush1.bf16.msra.mxu0 %v5046_v8  ;;  %3480 = vmatprep.subr.bf16.mxu1 %v5051_v12  ;;  %v5072_v8 = vld [vmem:[%s6812_s1 + $0x7a4] ss:$8 sps:$4 sm:$0xff]   ;;  %v4207_v12 = vcombine.high %v6451_v44, %v6462_v9  ;;  %v5097_v48 = vld [vmem:[%s6812_s1 + $0x3f0] ss:$8 sps:$4 sm:$0xff]  }
  0xe1   : > { %3772 = vmatprep.subr.bf16.mxu0 %v5054_v24  ;;  %3498 = vmatprep.mubr.bf16.mxu1 %v4157_v45  ;;  %v1351_v45 = vrot.slane %v1349_v13, 5  ;;  %v4206_v24 = vcombine.low %v6451_v44, %v6462_v9  ;;  %v5079_v13 = vld [vmem:[%s6812_s1 + $0x3c0] ss:$8 sps:$4 sm:$0xff]  }
  0xe2   : > { %3790 = vmatprep.mubr.bf16.mxu0 %v4197_v55  ;;  %v5063_v55 = vld [vmem:[%s6812_s1 + $0x394] ss:$8 sps:$4 sm:$0xff]  }
  0xe3   : > { %3481 = vmatpush1.bf16.msra.mxu1 %v5049_v23  ;;  %v6437_v59 = vsel %vm5670_vm5, %v6206_v7, %v1351_v45  ;;  %v5061_v7 = vld [vmem:[%s6812_s1 + $0x390] ss:$8 sps:$4 sm:$0xff]   ;;  %v5070_v23 = vld [vmem:[%s6812_s1 + $0x7a0] ss:$8 sps:$4 sm:$0xff]   ;;  %v5096_v45 = vld [vmem:[%s6812_s1 + $0x7e4] ss:$8 sps:$4 sm:$0xff]  }
  0xe4   : > { %3773 = vmatpush1.bf16.msra.mxu0 %v5052_v60  ;;  %3482 = vmatprep.subr.bf16.mxu1 %v5057_v27  ;;  %v4208_v58 = vcombine.low %v6437_v59, %v6442_v47  ;;  %v4209_v40 = vcombine.high %v6437_v59, %v6442_v47  ;;  %v5075_v60 = vld [vmem:[%s6812_s1 + $0x3b4] ss:$8 sps:$4 sm:$0xff]   ;;  %v5076_v27 = vld [vmem:[%s6812_s1 + $0x7b0] ss:$8 sps:$4 sm:$0xff]  }
  0xe5   : > { %3774 = vmatprep.subr.bf16.mxu0 %v5060_v39  ;;  %v5081_v39 = vld [vmem:[%s6812_s1 + $0x3c4] ss:$8 sps:$4 sm:$0xff]  }
  0xe7   : > { %3483 = vmatpush1.bf16.msra.mxu1 %v5055_v28  ;;  %v5090_v28 = vld [vmem:[%s6812_s1 + $0x7d4] ss:$8 sps:$4 sm:$0xff]  }
  0xe8   : > { %3775 = vmatpush1.bf16.msra.mxu0 %v5058_v41  ;;  %3484 = vmatprep.subr.bf16.mxu1 %v5063_v55  ;;  %v5093_v41 = vld [vmem:[%s6812_s1 + $0x3e4] ss:$8 sps:$4 sm:$0xff]   ;;  %v5094_v55 = vld [vmem:[%s6812_s1 + $0x7e0] ss:$8 sps:$4 sm:$0xff]  }
  0xe9   : > { %3776 = vmatprep.subr.bf16.mxu0 %v5066_v31  ;;  %v5099_v31 = vld [vmem:[%s6812_s1 + $0x3f4] ss:$8 sps:$4 sm:$0xff]  }
  0xeb   : > { %3485 = vmatpush1.bf16.msra.mxu1 %v5061_v7  ;;  %v5100_v7 = vld [vmem:[%s6812_s1 + $0x7f0] ss:$8 sps:$4 sm:$0xff]  }
  0xec   : > { %3777 = vmatpush1.bf16.msra.mxu0 %v5064_v38  ;;  %3486 = vmatprep.subr.bf16.mxu1 %v5069_v51  ;;  %v5107_v38 = vld [vmem:[%s6812_s1 + $0x804] ss:$8 sps:$4 sm:$0xff]   ;;  %v5105_v51 = vld [vmem:[%s6812_s1 + $0x800] ss:$8 sps:$4 sm:$0xff]  }
  0xed   : > { %3778 = vmatprep.subr.bf16.mxu0 %v5072_v8  ;;  %v5110_v8 = vld [vmem:[%s6812_s1 + $0x814] ss:$8 sps:$4 sm:$0xff]  }
  0xef   : > { %3487 = vmatpush1.bf16.msra.mxu1 %v5067_v11  ;;  %v5108_v11 = vld [vmem:[%s6812_s1 + $0x810] ss:$8 sps:$4 sm:$0xff]  }
  0xf0   : > { %3779 = vmatpush1.bf16.msra.mxu0 %v5070_v23  ;;  %3488 = vmatprep.subr.bf16.mxu1 %v5075_v60  ;;  %v1267_v23 = vld [vmem:[#allocation2 + $0x38] sm:$0xff]  ;;  %v1269_v60 = vld [vmem:[#allocation2 + $0x50] sm:$0xff] }
  0xf1   : > { %3780 = vmatprep.subr.bf16.mxu0 %v5078_v15  ;;  %v5115_v15 = vld [vmem:[%s6812_s1 + $0x824] ss:$8 sps:$4 sm:$0xff]   ;;  %v1284_v42 = vshrl.u32 %v1267_v23, 16  ;;  %v1287_v6 = vshll.u32 %v1267_v23, 16  ;;  %v1301_v30 = vshll.u32 %v1269_v60, 16 }
  0xf2   : > { %v1280_v23 = vld [vmem:[#allocation2 + $0xd0] sm:$0x11] }
  0xf3   : > { %3489 = vmatpush1.bf16.msra.mxu1 %v5073_v34 }
  0xf4   : > { %3781 = vmatpush1.bf16.msra.mxu0 %v5076_v27  ;;  %3490 = vmatprep.subr.bf16.mxu1 %v5081_v39  ;;  %v1303_v27 = vrot.slane %v1301_v30, 5  ;;  %v5116_v39 = vld [vmem:[%s6812_s1 + $0x830] ss:$8 sps:$4 sm:$0xff]  }
  0xf5   : > { %3782 = vmatprep.subr.bf16.mxu0 %v5084_v2  ;;  %v1268_v2 = vld [vmem:[#allocation2 + $0x40] sm:$0x11] }
  0xf6   : > { %v1293_v22 = vshll.u32 %v1268_v2, 16 }
  0xf7   : > { %3491 = vmatpush1.bf16.msra.mxu1 %v5079_v13  ;;  %v1270_v13 = vld [vmem:[#allocation2 + $0x58] sm:$0x11] }
  0xf8   : > { %3783 = vmatpush1.bf16.msra.mxu0 %v5082_v14  ;;  %3492 = vmatprep.subr.bf16.mxu1 %v5087_v62  ;;  %v1307_v52 = vshll.u32 %v1270_v13, 16  ;;  %v6597_v14 = vld [vmem:[#allocation2] sm:$0xff] }
  0xf9   : > { %3784 = vmatprep.subr.bf16.mxu0 %v5090_v28  ;;  %v1295_v28 = vrot.slane %v1293_v22, 5  ;;  %v4202_v37 = vcombine.low %v6193_v0, %v6597_v14  ;;  %v1797_v22 = vlaneseq }
  0xfb   : > { %3493 = vmatpush1.bf16.msra.mxu1 %v5085_v19 }
  0xfc   : > { %3785 = vmatpush1.bf16.msra.mxu0 %v5088_v56  ;;  %3494 = vmatprep.subr.bf16.mxu1 %v5093_v41  ;;  %v1309_v56 = vrot.slane %v1307_v52, 5  ;;  %v5124_v41 = vld [vmem:[%s6812_s1 + $0x850] ss:$8 sps:$4 sm:$0xff]   ;;  %v1798_v52 = vshrl.u32 %v1797_v22, 7 }
  0xfd   : > { %3786 = vmatprep.subr.bf16.mxu0 %v5096_v45  ;;  %v5135_v45 = vld [vmem:[%s6812_s1 + $0x884] ss:$8 sps:$4 sm:$0xff]  }
  0xff   : > { %3495 = vmatpush1.bf16.msra.mxu1 %v5091_v49  ;;  %v5139_v49 = vld [vmem:[%s6812_s1 + $0x8a0] ss:$8 sps:$4 sm:$0xff]  }
 0x100   : > { %3787 = vmatpush1.bf16.msra.mxu0 %v5094_v55  ;;  %3496 = vmatprep.subr.bf16.mxu1 %v5099_v31  ;;  %v5144_v55 = vld [vmem:[%s6812_s1 + $0x8b4] ss:$8 sps:$4 sm:$0xff]   ;;  %v5142_v31 = vld [vmem:[%s6812_s1 + $0x8b0] ss:$8 sps:$4 sm:$0xff]  }
 0x101   : > { %3788 = vmatprep.subr.bf16.mxu0 %v5102_v18  ;;  %v5147_v18 = vld [vmem:[%s6812_s1 + $0x8c4] ss:$8 sps:$4 sm:$0xff]  }
 0x103   : > { %3497 = vmatpush1.bf16.msra.mxu1 %v5097_v48  ;;  %v1382_v48 = vshrl.u32 %v6597_v14, 16 }
 0x104   : > { %3789 = vmatpush1.bf16.msra.mxu0 %v5100_v7  ;;  %4520 = vmatprep.subr.bf16.mxu1 %v5107_v38  ;;  %v1385_v7 = vshll.u32 %v6597_v14, 16 }
 0x105   : > { %3831 = vmatprep.subr.bf16.mxu0 %v5107_v38  ;;  %v5145_v38 = vld [vmem:[%s6812_s1 + $0x8c0] ss:$8 sps:$4 sm:$0xff]  }
 0x106   : > { %3499 = vmatmul.mubr.bf16.vlgmr.msra.gmra.mrb[0].mxu1 %v4156_v33  ;;  %v5118_v33 = vld [vmem:[%s6812_s1 + $0x834] ss:$8 sps:$4 sm:$0xff]  }
 0x107   : > { %3791 = vmatmul.mubr.bf16.vlgmr.msra.gmra.mrb[0].mxu0 %v4196_v17  ;;  %4536 = vmatpush1.bf16.msra.mxu1 %v5105_v51  ;;  %v1298_v17 = vshrl.u32 %v1269_v60, 16  ;;  %v1282_v60 = vld [vmem:[#allocation2 + $0xe8] sm:$0x11] }
 0x108   : > { %3832 = vmatpush1.bf16.msra.mxu0 %v5105_v51  ;;  %4521 = vmatprep.subr.bf16.mxu1 %v5110_v8  ;;  %v5150_v51 = vld [vmem:[%s6812_s1 + $0x8d4] ss:$8 sps:$4 sm:$0xff]   ;;  %v1391_v30 = vshll.u32 %v1282_v60, 16 }
 0x109   : > { %3833 = vmatprep.subr.bf16.mxu0 %v5110_v8  ;;  %3508 = vmatprep.mubr.bf16.mxu1 %v4159_v46  ;;  %v1289_v46 = vrot.slane %v1287_v6, 5  ;;  %v1300_v34 = vrot.slane %v1298_v17, 4  ;;  %v1384_v8 = vrot.slane %v1382_v48, 4  ;;  %v1377_v6 = vshll.u32 %v1280_v23, 16 }
 0x10a   : > { %3800 = vmatprep.mubr.bf16.mxu0 %v4199_v16  ;;  %v1286_v16 = vrot.slane %v1284_v42, 4  ;;  %v5153_v42 = vld [vmem:[%s6812_s1 + $0x8e4] ss:$8 sps:$4 sm:$0xff]  }
 0x10b   : > { %4537 = vmatpush1.bf16.msra.mxu1 %v5108_v11 }
 0x10c   : > { %3834 = vmatpush1.bf16.msra.mxu0 %v5108_v11  ;;  %4522 = vmatprep.subr.bf16.mxu1 %v5115_v15  ;;  %v1290_v21 = vor.u32 %v1289_v46, %v1286_v16  ;;  %v1387_v11 = vrot.slane %v1385_v7, 5  ;;  %v1375_v16 = vrot.slane %v1374_v3, 4  ;;  %v1379_v46 = vrot.slane %v1377_v6, 5 }
 0x10d   : > { %3835 = vmatprep.subr.bf16.mxu0 %v5115_v15  ;;  %v5148_v15 = vld [vmem:[%s6812_s1 + $0x8d0] ss:$8 sps:$4 sm:$0xff]  }
 0x10e   : > { %3509 = vmatmul.mubr.bf16.gmra.mrb[4].mxu1 %v4158_v29  ;;  %v5121_v29 = vld [vmem:[%s6812_s1 + $0x840] ss:$8 sps:$4 sm:$0xff]   ;;  %v1291_v62 = vrot.slane %v1290_v21, 4  ;;  %v1388_v17 = vor.u32 %v1387_v11, %v1384_v8  ;;  %v1380_v2 = vsel %vm5670_vm5, %v1375_v16, %v1379_v46 }
 0x10f   : > { %3801 = vmatmul.mubr.bf16.gmra.mrb[4].mxu0 %v4198_v26  ;;  %4538 = vmatpush1.bf16.msra.mxu1 %v5113_v50  ;;  %v1304_v26 = vor.u32 %v1303_v27, %v1300_v34  ;;  %v1393_v27 = vrot.slane %v1391_v30, 5 }
 0x110   : > { %3836 = vmatpush1.bf16.msra.mxu0 %v5113_v50  ;;  %4523 = vmatprep.subr.bf16.mxu1 %v5118_v33  ;;  %v6620_v5 = vsel %vm5670_vm5, %v1291_v62, %v1295_v28  ;;  %v5151_v50 = vld [vmem:[%s6812_s1 + $0x8e0] ss:$8 sps:$4 sm:$0xff]   ;;  %v1389_v34 = vrot.slane %v1388_v17, 4 }
 0x111   : > { %3837 = vmatprep.subr.bf16.mxu0 %v5118_v33  ;;  %3518 = vmatprep.mubr.bf16.mxu1 %v4161_v32  ;;  %v5126_v32 = vld [vmem:[%s6812_s1 + $0x854] ss:$8 sps:$4 sm:$0xff]   ;;  %v1305_v19 = vrot.slane %v1304_v26, 4 }
 0x112   : > { %3810 = vmatprep.mubr.bf16.mxu0 %v4201_v54  ;;  %v4203_v54 = vcombine.high %v6193_v0, %v6597_v14  ;;  %v5132_v0 = vld [vmem:[%s6812_s1 + $0x874] ss:$8 sps:$4 sm:$0xff]   ;;  %v1394_v13 = vsel %vm5670_vm5, %v1389_v34, %v1393_v27  ;;  %v1803_v14 = vsub.s32 1, %v1798_v52 }
 0x113   : > { %4539 = vmatpush1.bf16.msra.mxu1 %v5116_v39  ;;  %v5156_v33 = vld [vmem:[%s6812_s1 + $0x8f4] ss:$8 sps:$4 sm:$0xff]   ;;  %v4211_v10 = vcombine.high %v1380_v2, %v1394_v13  ;;  %v4210_v3 = vcombine.low %v1380_v2, %v1394_v13 }
 0x114   : > { %3838 = vmatpush1.bf16.msra.mxu0 %v5116_v39  ;;  %4524 = vmatprep.subr.bf16.mxu1 %v5123_v35  ;;  %v5154_v39 = vld [vmem:[%s6812_s1 + $0x8f0] ss:$8 sps:$4 sm:$0xff]  }
 0x115   : > { %3839 = vmatprep.subr.bf16.mxu0 %v5123_v35 }
 0x116   : > { %3519 = vmatmul.mubr.bf16.gmra.mrb[8].mxu1 %v4160_v57 }
 0x117   : > { %3811 = vmatmul.mubr.bf16.gmra.mrb[8].mxu0 %v4200_v43  ;;  %4540 = vmatpush1.bf16.msra.mxu1 %v5121_v29  ;;  %v6624_v43 = vsel %vm5670_vm5, %v1305_v19, %v1309_v56 }
 0x118   : > { %3840 = vmatpush1.bf16.msra.mxu0 %v5121_v29  ;;  %4525 = vmatprep.subr.bf16.mxu1 %v5126_v32  ;;  %v4205_v57 = vcombine.high %v6620_v5, %v6624_v43  ;;  %v4204_v20 = vcombine.low %v6620_v5, %v6624_v43 }
 0x119   : > { %3841 = vmatprep.subr.bf16.mxu0 %v5126_v32  ;;  %3528 = vmatprep.mubr.bf16.mxu1 %v4163_v1  ;;  %v5130_v1 = vld [vmem:[%s6812_s1 + $0x870] ss:$8 sps:$4 sm:$0xff]  }
 0x11a   : > { %3820 = vmatprep.mubr.bf16.mxu0 %v4203_v54 }
 0x11b   : > { %4541 = vmatpush1.bf16.msra.mxu1 %v5124_v41 }
 0x11c   : > { %3842 = vmatpush1.bf16.msra.mxu0 %v5124_v41  ;;  %4526 = vmatprep.subr.bf16.mxu1 %v5129_v63 }
 0x11d   : > { %3843 = vmatprep.subr.bf16.mxu0 %v5129_v63 }
 0x11e   : > { %3529 = vmatmul.mubr.bf16.gmra.mrb[12].mxu1 %v4162_v61  ;;  %v5136_v61 = vld [vmem:[%s6812_s1 + $0x890] ss:$8 sps:$4 sm:$0xff]  }
 0x11f   : > { %3821 = vmatmul.mubr.bf16.gmra.mrb[12].mxu0 %v4202_v37  ;;  %4542 = vmatpush1.bf16.msra.mxu1 %v5127_v4 }
 0x120   : > { %3844 = vmatpush1.bf16.msra.mxu0 %v5127_v4  ;;  %4527 = vmatprep.subr.bf16.mxu1 %v5132_v0 }
 0x121   : > { %3845 = vmatprep.subr.bf16.mxu0 %v5132_v0  ;;  %3863 = vmatprep.mubr.bf16.mxu0 %v4205_v57 }
 0x122   : > { %3883 = vmatprep.mubr.bf16.mxu1 %v4209_v40  ;;  %v5141_v40 = vld [vmem:[%s6812_s1 + $0x8a4] ss:$8 sps:$4 sm:$0xff]  }
 0x123   : > { %4543 = vmatpush1.bf16.msra.mxu1 %v5130_v1 }
 0x124   : > { %3846 = vmatpush1.bf16.msra.mxu0 %v5130_v1  ;;  %4528 = vmatprep.subr.bf16.mxu1 %v5135_v45 }
 0x125   : > { %3847 = vmatprep.subr.bf16.mxu0 %v5135_v45 }
 0x127   : > { %4544 = vmatpush1.bf16.msra.mxu1 %v5133_v36 }
 0x128   : > { %3848 = vmatpush1.bf16.msra.mxu0 %v5133_v36  ;;  %4529 = vmatprep.subr.bf16.mxu1 %v5138_v53 }
 0x129   : > { %3849 = vmatprep.subr.bf16.mxu0 %v5138_v53 }
 0x12b   : > { %4545 = vmatpush1.bf16.msra.mxu1 %v5136_v61 }
 0x12c   : > { %3850 = vmatpush1.bf16.msra.mxu0 %v5136_v61  ;;  %4530 = vmatprep.subr.bf16.mxu1 %v5141_v40 }
 0x12d   : > { %3851 = vmatprep.subr.bf16.mxu0 %v5141_v40 }
 0x12f   : > { %4546 = vmatpush1.bf16.msra.mxu1 %v5139_v49 }
 0x130   : > { %3852 = vmatpush1.bf16.msra.mxu0 %v5139_v49  ;;  %4531 = vmatprep.subr.bf16.mxu1 %v5144_v55 }
 0x131   : > { %3853 = vmatprep.subr.bf16.mxu0 %v5144_v55 }
 0x133   : > { %4547 = vmatpush1.bf16.msra.mxu1 %v5142_v31 }
 0x134   : > { %3854 = vmatpush1.bf16.msra.mxu0 %v5142_v31  ;;  %4532 = vmatprep.subr.bf16.mxu1 %v5147_v18 }
 0x135   : > { %3855 = vmatprep.subr.bf16.mxu0 %v5147_v18 }
 0x137   : > { %4548 = vmatpush1.bf16.msra.mxu1 %v5145_v38 }
 0x138   : > { %3856 = vmatpush1.bf16.msra.mxu0 %v5145_v38  ;;  %4533 = vmatprep.subr.bf16.mxu1 %v5150_v51 }
 0x139   : > { %3857 = vmatprep.subr.bf16.mxu0 %v5150_v51 }
 0x13b   : > { %4549 = vmatpush1.bf16.msra.mxu1 %v5148_v15 }
 0x13c   : > { %3858 = vmatpush1.bf16.msra.mxu0 %v5148_v15  ;;  %4534 = vmatprep.subr.bf16.mxu1 %v5153_v42  ;;  %v3936_v15 = vld [vmem:[%s6814_s3] sm:$0x3] }
 0x13d   : > { %3859 = vmatprep.subr.bf16.mxu0 %v5153_v42  ;;  %v3964_v42 = vld [vmem:[%s6815_s4] sm:$0x3] }
 0x13f   : > { %4550 = vmatpush1.bf16.msra.mxu1 %v5151_v50 }
 0x140   : > { %3860 = vmatpush1.bf16.msra.mxu0 %v5151_v50  ;;  %4535 = vmatprep.subr.bf16.mxu1 %v5156_v33  ;;  %v6733_v50 = vrot.slane %v3936_v15, %v1803_v14 }
 0x141   : > { %3861 = vmatprep.subr.bf16.mxu0 %v5156_v33 }
 0x143   : > { %4551 = vmatpush1.bf16.msra.mxu1 %v5154_v39 }
 0x144   : > { %3862 = vmatpush1.bf16.msra.mxu0 %v5154_v39  ;;  %v6741_v39 = vrot.slane %v3964_v42, %v1803_v14 }
 0x146   : > { %3884 = vmatmul.mubr.bf16.vlgmr.msra.gmra.mrb[16].mxu1 %v4208_v58  ;;  %v1799_v58 = vsub.s32 0, %v1798_v52 }
 0x147   : > { %3864 = vmatmul.mubr.bf16.vlgmr.msra.gmra.mrb[0].mxu0 %v4204_v20  ;;  %3893 = vmatprep.mubr.bf16.mxu1 %v4211_v10 }
 0x148   : > { %3873 = vmatprep.mubr.bf16.mxu0 %v4207_v12  ;;  %v1795_v12 = vld [vmem:[%s6813_s2] sm:$0x3]  ;;  %v6729_v17 = vrot.slane %v3936_v15, %v1799_v58  ;;  %v6731_v30 = vrot.slane %v3964_v42, %v1799_v58 }
 0x149   : > { %v1800_v54 = vrot.slane %v1795_v12, %v1799_v58  ;;  %v1804_v44 = vrot.slane %v1795_v12, %v1803_v14 }
 0x14e   : > { %3894 = vmatmul.mubr.bf16.gmra.mrb[20].mxu1 %v4210_v3 }
 0x14f   : > { %3874 = vmatmul.mubr.bf16.gmra.mrb[4].mxu0 %v4206_v24 }
 0x1d9   : > { %v3500_v25 = vpop.f32.mrb[0].mxu1 }
 0x1da   : > { %v3502_v35 = vpop.f32.mrb[1].mxu1  ;;  %v4552_v6 = vadd.f32 %v3500_v25, %v1800_v54 }
 0x1db   : > { %v3504_v21 = vpop.f32.mrb[2].mxu1  ;;  %v4554_v33 = vadd.f32 %v3502_v35, %v1804_v44 }
 0x1dc   : > { %v3506_v26 = vpop.f32.mrb[3].mxu1  ;;  %v4556_v16 = vadd.f32 %v3504_v21, %v1800_v54 }
 0x1dd   : > { %v4558_v46 = vadd.f32 %v3506_v26, %v1804_v44 }
 0x1e1   : > { %v3510_v29 = vpop.f32.mrb[4].mxu1 }
 0x1e2   : > { %v3512_v59 = vpop.f32.mrb[5].mxu1  ;;  %v4560_v2 = vadd.f32 %v3510_v29, %v1800_v54 }
 0x1e3   : > { %v3514_v47 = vpop.f32.mrb[6].mxu1  ;;  %v6743_v13 = vadd.f32 %v3512_v59, %v1804_v44 }
 0x1e4   : > { %v3516_v32 = vpop.f32.mrb[7].mxu1  ;;  %v6745_v35 = vadd.f32 %v3514_v47, %v1800_v54 }
 0x1e5   : > { %v6747_v21 = vadd.f32 %v3516_v32, %v1804_v44 }
 0x1e9   : > { %v3520_v9 = vpop.f32.mrb[8].mxu1 }
 0x1ea   : > { %v3812_v24 = vpop.f32.mrb[8].mxu0  ;;  %v4568_v62 = vadd.f32 %v3520_v9, %v1800_v54  ;;  %v3522_v28 = vpop.f32.mrb[9].mxu1 }
 0x1eb   : > { %v3814_v19 = vpop.f32.mrb[9].mxu0  ;;  %v4571_v56 = vadd.f32 %v3522_v28, %v1804_v44  ;;  %v3524_v41 = vpop.f32.mrb[10].mxu1 }
 0x1ec   : > { %v3816_v63 = vpop.f32.mrb[10].mxu0  ;;  %v4569_v37 = vadd.f32 %v4568_v62, %v3812_v24  ;;  %v4574_v5 = vadd.f32 %v3524_v41, %v1800_v54  ;;  %v3526_v43 = vpop.f32.mrb[11].mxu1 }
 0x1ed   : > { %v3818_v4 = vpop.f32.mrb[11].mxu0  ;;  %v4572_v0 = vadd.f32 %v4571_v56, %v3814_v19  ;;  %v4577_v57 = vadd.f32 %v3526_v43, %v1804_v44 }
 0x1ee   : > { %v4575_v1 = vadd.f32 %v4574_v5, %v3816_v63 }
 0x1ef   : > { %v4578_v45 = vadd.f32 %v4577_v57, %v3818_v4 }
 0x1f1   : > { %v3530_v36 = vpop.f32.mrb[12].mxu1 }
 0x1f2   : > { %v3822_v53 = vpop.f32.mrb[12].mxu0  ;;  %v4580_v61 = vadd.f32 %v3530_v36, %v1800_v54  ;;  %v3532_v40 = vpop.f32.mrb[13].mxu1 }
 0x1f3   : > { %v3824_v49 = vpop.f32.mrb[13].mxu0  ;;  %v4583_v55 = vadd.f32 %v3532_v40, %v1804_v44  ;;  %v3534_v31 = vpop.f32.mrb[14].mxu1 }
 0x1f4   : > { %v3826_v18 = vpop.f32.mrb[14].mxu0  ;;  %v6714_v48 = vadd.f32 %v4580_v61, %v3822_v53  ;;  %v4586_v7 = vadd.f32 %v3534_v31, %v1800_v54  ;;  %v3536_v38 = vpop.f32.mrb[15].mxu1 }
 0x1f5   : > { %v3828_v51 = vpop.f32.mrb[15].mxu0  ;;  %v6716_v8 = vadd.f32 %v4583_v55, %v3824_v49  ;;  %v4589_v11 = vadd.f32 %v3536_v38, %v1804_v44 }
 0x1f6   : > { %v6718_v23 = vadd.f32 %v4586_v7, %v3826_v18 }
 0x1f7   : > { %v6720_v60 = vadd.f32 %v4589_v11, %v3828_v51 }
 0x219   : > { %v3885_v27 = vpop.f32.mrb[16].mxu1 }
 0x21a   : > { %v3865_v34 = vpop.f32.mrb[0].mxu0  ;;  %v4570_v10 = vadd.f32 %v4569_v37, %v3885_v27  ;;  %v3887_v25 = vpop.f32.mrb[17].mxu1 }
 0x21b   : > { %v4553_v20 = vadd.f32 %v4552_v6, %v3865_v34  ;;  %v3867_v3 = vpop.f32.mrb[1].mxu0  ;;  %v4573_v26 = vadd.f32 %v4572_v0, %v3887_v25  ;;  %v3889_v58 = vpop.f32.mrb[18].mxu1 }
 0x21c   : > { %v4555_v22 = vadd.f32 %v4554_v33, %v3867_v3  ;;  %v3869_v52 = vpop.f32.mrb[2].mxu0  ;;  %v3912_v14 = vmul.f32 0.01, %v4570_v10  ;;  %v4576_v29 = vadd.f32 %v4575_v1, %v3889_v58  ;;  %v3891_v24 = vpop.f32.mrb[19].mxu1 }
 0x21d   : > { %v3904_v12 = vmul.f32 0.01, %v4553_v20  ;;  %v4557_v9 = vadd.f32 %v4556_v16, %v3869_v52  ;;  %v3871_v59 = vpop.f32.mrb[3].mxu0  ;;  %v3913_v47 = vmul.f32 0.01, %v4573_v26  ;;  %v4579_v32 = vadd.f32 %v4578_v45, %v3891_v24 }
 0x21e   : > { %v3905_v62 = vmul.f32 0.01, %v4555_v22  ;;  %v4559_v54 = vadd.f32 %v4558_v46, %v3871_v59  ;;  %v3928_v28 = vmax.f32 %v4570_v10, %v3912_v14  ;;  %v3914_v56 = vmul.f32 0.01, %v4576_v29 }
 0x21f   : > { %v3920_v44 = vmax.f32 %v4553_v20, %v3904_v12  ;;  %v3906_v19 = vmul.f32 0.01, %v4557_v9  ;;  %v3929_v63 = vmax.f32 %v4573_v26, %v3913_v47  ;;  %v3915_v5 = vmul.f32 0.01, %v4579_v32 }
 0x220   : > { %v3921_v41 = vmax.f32 %v4555_v22, %v3905_v62  ;;  %v3907_v37 = vmul.f32 0.01, %v4559_v54  ;;  %v3956_v4 = vmul.f32 %v6729_v17, %v3928_v28  ;;  %v3930_v57 = vmax.f32 %v4576_v29, %v3914_v56 }
 0x221   : > { %v3948_v43 = vmul.f32 %v6729_v17, %v3920_v44  ;;  %v3922_v0 = vmax.f32 %v4557_v9, %v3906_v19  ;;  %v3957_v36 = vmul.f32 %v6733_v50, %v3929_v63  ;;  %v3931_v53 = vmax.f32 %v4579_v32, %v3915_v5  ;;  %v3895_v40 = vpop.f32.mrb[20].mxu1 }
 0x222   : > { %v3949_v1 = vmul.f32 %v6733_v50, %v3921_v41  ;;  %v3923_v45 = vmax.f32 %v4559_v54, %v3907_v37  ;;  %v3875_v61 = vpop.f32.mrb[4].mxu0  ;;  %v3984_v55 = vadd.f32 %v6731_v30, %v3956_v4  ;;  %v3958_v18 = vmul.f32 %v6729_v17, %v3930_v57  ;;  %v3897_v38 = vpop.f32.mrb[21].mxu1 }
 0x223   : > { %v3976_v49 = vadd.f32 %v6731_v30, %v3948_v43  ;;  %v3950_v31 = vmul.f32 %v6729_v17, %v3922_v0  ;;  %v3877_v7 = vpop.f32.mrb[5].mxu0  ;;  %v3985_v11 = vadd.f32 %v6741_v39, %v3957_v36  ;;  %v3959_v42 = vmul.f32 %v6733_v50, %v3931_v53  ;;  %v3899_v33 = vpop.f32.mrb[22].mxu1 }
 0x224   : > { %v3977_v51 = vadd.f32 %v6741_v39, %v3949_v1  ;;  %v3951_v15 = vmul.f32 %v6733_v50, %v3923_v45  ;;  %v3879_v6 = vpop.f32.mrb[6].mxu0  ;;  %v3986_v46 = vadd.f32 %v6731_v30, %v3958_v18  ;;  %v4561_v34 = vadd.f32 %v4560_v2, %v3875_v61  ;;  %v3901_v10 = vpop.f32.mrb[23].mxu1 }
 0x225   : > { %v3978_v16 = vadd.f32 %v6731_v30, %v3950_v31  ;;  %v4582_v27 = vadd.f32 %v6714_v48, %v3895_v40  ;;  %v3881_v20 = vpop.f32.mrb[7].mxu0  ;;  %v4516_v25 = vpack.c.bf16 %v3985_v11, %v3984_v55  ;;  %v3987_v26 = vadd.f32 %v6741_v39, %v3959_v42 }
 0x226   : > { %v4512_v3 = vpack.c.bf16 %v3977_v51, %v3976_v49  ;;  %v3979_v22 = vadd.f32 %v6741_v39, %v3951_v15  ;;  %v3908_v52 = vmul.f32 0.01, %v4561_v34  ;;  %v4563_v12 = vadd.f32 %v6743_v13, %v3877_v7 }
 0x227   : > { %v3916_v58 = vmul.f32 0.01, %v4582_v27  ;;  %v4585_v14 = vadd.f32 %v6716_v8, %v3897_v38  ;;  %4044 = vst [vmem:[%s6771_s14 + $0x20] sm:$0xff] %v4516_v25  ;;  %v4517_v48 = vpack.c.bf16 %v3987_v26, %v3986_v46  ;;  %v4565_v9 = vadd.f32 %v6745_v35, %v3879_v6 }
 0x228   : > { %4040 = vst [vmem:[%s6771_s14] sm:$0xff] %v4512_v3  ;;  %v4513_v2 = vpack.c.bf16 %v3979_v22, %v3978_v16  ;;  %v4588_v29 = vadd.f32 %v6718_v23, %v3899_v33  ;;  %v3924_v59 = vmax.f32 %v4561_v34, %v3908_v52  ;;  %v3909_v62 = vmul.f32 0.01, %v4563_v12 }
 0x229   : > { %v3932_v24 = vmax.f32 %v4582_v27, %v3916_v58  ;;  %v3917_v47 = vmul.f32 0.01, %v4585_v14  ;;  %4045 = vst [vmem:[%s6771_s14 + $0x28] sm:$0xff] %v4517_v48  ;;  %v3910_v54 = vmul.f32 0.01, %v4565_v9  ;;  %v4567_v13 = vadd.f32 %v6747_v21, %v3881_v20 }
 0x22a   : > { %4041 = vst [vmem:[%s6771_s14 + $0x8] sm:$0xff] %v4513_v2  ;;  %v3918_v32 = vmul.f32 0.01, %v4588_v29  ;;  %v4591_v8 = vadd.f32 %v6720_v60, %v3901_v10  ;;  %v3952_v44 = vmul.f32 %v6729_v17, %v3924_v59  ;;  %v3925_v19 = vmax.f32 %v4563_v12, %v3909_v62 }
 0x22b   : > { %v3960_v28 = vmul.f32 %v6729_v17, %v3932_v24  ;;  %v3933_v35 = vmax.f32 %v4585_v14, %v3917_v47  ;;  %v3926_v56 = vmax.f32 %v4565_v9, %v3910_v54  ;;  %v3911_v41 = vmul.f32 0.01, %v4567_v13 }
 0x22c   : > { %v3934_v23 = vmax.f32 %v4588_v29, %v3918_v32  ;;  %v3919_v63 = vmul.f32 0.01, %v4591_v8  ;;  %v3980_v37 = vadd.f32 %v6731_v30, %v3952_v44  ;;  %v3953_v43 = vmul.f32 %v6733_v50, %v3925_v19 }
 0x22d   : > { %v3988_v5 = vadd.f32 %v6731_v30, %v3960_v28  ;;  %v3961_v21 = vmul.f32 %v6733_v50, %v3933_v35  ;;  %v3954_v60 = vmul.f32 %v6729_v17, %v3926_v56  ;;  %v3927_v0 = vmax.f32 %v4567_v13, %v3911_v41 }
 0x22e   : > { %v3962_v4 = vmul.f32 %v6729_v17, %v3934_v23  ;;  %v3935_v57 = vmax.f32 %v4591_v8, %v3919_v63  ;;  %v3981_v1 = vadd.f32 %v6741_v39, %v3953_v43 }
 0x22f   : > { %v3989_v36 = vadd.f32 %v6741_v39, %v3961_v21  ;;  %v3982_v45 = vadd.f32 %v6731_v30, %v3954_v60  ;;  %v3955_v61 = vmul.f32 %v6733_v50, %v3927_v0 }
 0x230   : > { %v3990_v53 = vadd.f32 %v6731_v30, %v3962_v4  ;;  %v3963_v40 = vmul.f32 %v6733_v50, %v3935_v57  ;;  %v4514_v49 = vpack.c.bf16 %v3981_v1, %v3980_v37 }
 0x231   : > { %v4518_v55 = vpack.c.bf16 %v3989_v36, %v3988_v5  ;;  %v3983_v17 = vadd.f32 %v6741_v39, %v3955_v61 }
 0x232   : > { %v3991_v31 = vadd.f32 %v6741_v39, %v3963_v40  ;;  %4042 = vst [vmem:[%s6771_s14 + $0x10] sm:$0xff] %v4514_v49 }
 0x233   : > { %4046 = vst [vmem:[%s6771_s14 + $0x30] sm:$0xff] %v4518_v55  ;;  %v4515_v18 = vpack.c.bf16 %v3983_v17, %v3982_v45 }
 0x234   : > { %v4519_v7 = vpack.c.bf16 %v3991_v31, %v3990_v53 }
 0x235   : > { %4043 = vst [vmem:[%s6771_s14 + $0x18] sm:$0xff] %v4515_v18 }
 0x236   : > { %4047 = vst [vmem:[%s6771_s14 + $0x38] sm:$0xff] %v4519_v7 }
 0x237 PF: > { %s15_s18 = sadd.s32 1, %s5165_s18  }
 0x238   : > { %p12_p5 = scmp.ge.s32.totalorder %s15_s18, 4  }
 0x23a   :  { %14 = sbr.rel (!%p12_p5) target bundleno = 1 (0x1), region = 72 }

// kernel: ca_forward.5
= control target key start
LH: loop header
LB: loop body
LE: loop exit
PB: predicated region body
PF: predicated region fallthrough
CT: control target
= control target key end

     0   :  { %s13655_s0 = inlined_call_operand.<no memory space> [shape: f32[1], index: 0, kind: input, shape index: {}]   ;;  %s13656_s1 = inlined_call_operand.vmem [shape: bf16[2,8,8,256], index: 1, kind: input, shape index: {}]   ;;  %s13657_s2 = inlined_call_operand.vmem [shape: bf16[128,512], index: 2, kind: input, shape index: {}]   ;;  %s13658_s3 = inlined_call_operand.vmem [shape: bf16[2304,512], index: 3, kind: input, shape index: {}]   ;;  %s13659_s4 = inlined_call_operand.vmem [shape: f32[1,512], index: 4, kind: input, shape index: {}]   ;;  %s13660_s5 = inlined_call_operand.vmem [shape: f32[1,512], index: 5, kind: input, shape index: {}]   ;;  %s13661_s6 = inlined_call_operand.vmem [shape: f32[1,512], index: 6, kind: input, shape index: {}]   ;;  %s13662_s7 = inlined_call_operand.vmem [shape: bf16[512,512], index: 7, kind: input, shape index: {}]   ;;  %s13663_s8 = inlined_call_operand.vmem [shape: f32[1,512], index: 8, kind: input, shape index: {}]   ;;  %s13664_s9 = inlined_call_operand.hbm [shape: f32[128,512], index: 9, kind: output, shape index: {}]  }
   0x1   :  { %14 = sst [smem:[#allocation4]] %s13655_s0 }
   0x2   :  { %15 = vsyncpa [#allocation6], 0 }
   0x3   :  { %17 = vsyncpa [#allocation6 + $0x1], 0  ;;  %s10580_s11 = smov 0   ;;  %s10582_s12 = smov 0  }
   0x4   :  { %s10584_s13 = smov 0   ;;  %s10586_s14 = smov 0  }
   0x5 LB: > { %s10601_s0 = sadd.s32 4294967295, %s10521_s14   ;;  %s8087_s15 = sadd.s32 4294967294, %s10521_s14   ;;  %s10521_s14 = sphi %s10586_s14, %s13674_s14   ;;  %s10517_s13 = sphi %s10584_s13, %s13673_s13   ;;  %s10513_s12 = sphi %s10582_s12, %s13672_s12   ;;  %s10509_s11 = sphi %s10580_s11, %s13671_s11  }
   0x6   : > { %s10605_s16 = sadd.s32 1, %s10521_s14   ;;  %s229_s17 = sadd.s32 1, %s10517_s13 }
   0x7   : > { %s226_s18 = ssub.s32 %s10521_s14, %s10605_s16  ;;  %p239_p0 = scmp.ne.s32.totalorder %s10517_s13, %s10513_s12 }
   0x8   : > { %p227_p1 = scmp.eq.s32.totalorder %s226_s18, 0  ;;  %p240_p2 = scmp.eq.s32.totalorder %s10601_s0, 1 }
   0x9   : > { %p245_p3 = scmp.ne.s32.totalorder %s10513_s12, %s10509_s11  ;;  %p246_p4 = scmp.eq.s32.totalorder %s8087_s15, 1 }
   0xa   : > { %s10616_s19 = scalar_select %p227_p1, %s10517_s13, %s229_s17  }
   0xb   : > { %p10618_p5 = por %p240_p2, %p239_p0  ;;  %p10622_p6 = por %p246_p4, %p245_p3 }
   0xc   : > { %p8090_p7 = scmp.ge.s32.totalorder %s10521_s14, 1  ;;  %p303_p8 = scmp.lt.s32.totalorder %s10521_s14, 3 }
   0xe   : > { %p304_p9 = pnand %p8090_p7, %p303_p8 }
   0xf   : > { %v9317_v0 = vld [vmem:[%s13658_s3 + $0x4] ss:$16 sps:$4 sm:$0xff] (!%p304_p9)   ;;  %v9319_v1 = vld [vmem:[%s13658_s3 + $0xc] ss:$16 sps:$4 sm:$0xff] (!%p304_p9)   ;;  %v10523_v2 = vmov (!%p304_p9), 0   ;;  %p345_p10 = scmp.lt.s32.totalorder (!%p304_p9), %s10601_s0, 1 }
  0x10   : > { %307 = sbr.rel (%p304_p9) target bundleno = 1357 (0x54d), region = 56  ;;  %359 = vst [vmem:[#allocation2] sm:$0xff] (!%p304_p9), %v10523_v2  ;;  %362 = vst [vmem:[#allocation2 + $0x18] sm:$0xff] (!%p304_p9), %v10523_v2  ;;  %5115 = vmatprep.subr.bf16.mxu0 (!%p304_p9), %v9317_v0  ;;  %v9321_v3 = vld [vmem:[%s13658_s3] ss:$16 sps:$4 sm:$0xff] (!%p304_p9)   ;;  %5772 = vmatprep.subr.bf16.mxu1 (!%p304_p9), %v9319_v1  ;;  %v433_v46 = vrot.slane (!%p304_p9), %v10523_v2, 7 }
  0x11   : > { %361 = vst [vmem:[#allocation2 + $0x10] sm:$0xff] (!%p304_p9), %v10523_v2  ;;  %364 = vst [vmem:[#allocation2 + $0x28] sm:$0xff] (!%p304_p9), %v10523_v2  ;;  %v9322_v4 = vld [vmem:[%s13658_s3 + $0x8] ss:$16 sps:$4 sm:$0xff] (!%p304_p9)   ;;  %v9323_v5 = vld [vmem:[%s13658_s3 + $0x24] ss:$16 sps:$4 sm:$0xff] (!%p304_p9)   ;;  %5116 = vmatpush1.bf16.msra.mxu0 (!%p304_p9), %v9321_v3 }
  0x12   : > { %365 = vst [vmem:[#allocation2 + $0x30] sm:$0xff] (!%p304_p9), %v10523_v2  ;;  %367 = vst [vmem:[#allocation2 + $0x40] sm:$0xff] (!%p304_p9), %v10523_v2  ;;  %5773 = vmatpush1.bf16.msra.mxu1 (!%p304_p9), %v9322_v4  ;;  %v9325_v6 = vld [vmem:[%s13658_s3 + $0x2c] ss:$16 sps:$4 sm:$0xff] (!%p304_p9)   ;;  %v9327_v7 = vld [vmem:[%s13658_s3 + $0x20] ss:$16 sps:$4 sm:$0xff] (!%p304_p9)   ;;  %5117 = vmatprep.subr.bf16.mxu0 (!%p304_p9), %v9323_v5 }
  0x13   : > { %368 = vst [vmem:[#allocation2 + $0x48] sm:$0xff] (!%p304_p9), %v10523_v2  ;;  %370 = vst [vmem:[#allocation2 + $0x58] sm:$0xff] (!%p304_p9), %v10523_v2  ;;  %v9328_v8 = vld [vmem:[%s13658_s3 + $0x28] ss:$16 sps:$4 sm:$0xff] (!%p304_p9)   ;;  %5774 = vmatprep.subr.bf16.mxu1 (!%p304_p9), %v9325_v6  ;;  %v9329_v9 = vld [vmem:[%s13658_s3 + $0x44] ss:$16 sps:$4 sm:$0xff] (!%p304_p9)  }
  0x14   : > { %371 = vst [vmem:[#allocation2 + $0x60] sm:$0xff] (!%p304_p9), %v10523_v2  ;;  %373 = vst [vmem:[#allocation2 + $0x70] sm:$0xff] (!%p304_p9), %v10523_v2  ;;  %v9331_v10 = vld [vmem:[%s13658_s3 + $0x4c] ss:$16 sps:$4 sm:$0xff] (!%p304_p9)   ;;  %v9333_v11 = vld [vmem:[%s13658_s3 + $0x40] ss:$16 sps:$4 sm:$0xff] (!%p304_p9)  }
  0x15   : > { %374 = vst [vmem:[#allocation2 + $0x78] sm:$0xff] (!%p304_p9), %v10523_v2  ;;  %376 = vst [vmem:[#allocation2 + $0x88] sm:$0xff] (!%p304_p9), %v10523_v2  ;;  %v9334_v12 = vld [vmem:[%s13658_s3 + $0x48] ss:$16 sps:$4 sm:$0xff] (!%p304_p9)   ;;  %5118 = vmatpush1.bf16.msra.mxu0 (!%p304_p9), %v9327_v7  ;;  %v9335_v13 = vld [vmem:[%s13658_s3 + $0x64] ss:$16 sps:$4 sm:$0xff] (!%p304_p9)  }
  0x16   : > { %377 = vst [vmem:[#allocation2 + $0x90] sm:$0xff] (!%p304_p9), %v10523_v2  ;;  %379 = vst [vmem:[#allocation2 + $0xa0] sm:$0xff] (!%p304_p9), %v10523_v2  ;;  %5775 = vmatpush1.bf16.msra.mxu1 (!%p304_p9), %v9328_v8  ;;  %5119 = vmatprep.subr.bf16.mxu0 (!%p304_p9), %v9329_v9  ;;  %v9337_v14 = vld [vmem:[%s13658_s3 + $0x6c] ss:$16 sps:$4 sm:$0xff] (!%p304_p9)   ;;  %v9339_v15 = vld [vmem:[%s13658_s3 + $0x60] ss:$16 sps:$4 sm:$0xff] (!%p304_p9)  }
  0x17   : > { %380 = vst [vmem:[#allocation2 + $0xa8] sm:$0xff] %v10523_v2  ;;  %382 = vst [vmem:[#allocation2 + $0xb8] sm:$0xff] %v10523_v2  ;;  %5776 = vmatprep.subr.bf16.mxu1 %v9331_v10  ;;  %v9340_v16 = vld [vmem:[%s13658_s3 + $0x68] ss:$16 sps:$4 sm:$0xff]   ;;  %v9341_v17 = vld [vmem:[%s13658_s3 + $0x84] ss:$16 sps:$4 sm:$0xff]  }
  0x18   : > { %383 = vst [vmem:[#allocation2 + $0xc0] sm:$0xff] %v10523_v2  ;;  %385 = vst [vmem:[#allocation2 + $0xd0] sm:$0xff] %v10523_v2  ;;  %v9343_v18 = vld [vmem:[%s13658_s3 + $0x8c] ss:$16 sps:$4 sm:$0xff]   ;;  %v9345_v19 = vld [vmem:[%s13658_s3 + $0x80] ss:$16 sps:$4 sm:$0xff]  }
  0x19   : > { %386 = vst [vmem:[#allocation2 + $0xd8] sm:$0xff] %v10523_v2  ;;  %388 = vst [vmem:[#allocation2 + $0xe8] sm:$0xff] %v10523_v2  ;;  %5120 = vmatpush1.bf16.msra.mxu0 %v9333_v11  ;;  %v9346_v20 = vld [vmem:[%s13658_s3 + $0x88] ss:$16 sps:$4 sm:$0xff]   ;;  %v9347_v21 = vld [vmem:[%s13658_s3 + $0xa4] ss:$16 sps:$4 sm:$0xff]  }
  0x1a   : > { %5777 = vmatpush1.bf16.msra.mxu1 %v9334_v12  ;;  %5121 = vmatprep.subr.bf16.mxu0 %v9335_v13  ;;  %v9349_v22 = vld [vmem:[%s13658_s3 + $0xac] ss:$16 sps:$4 sm:$0xff]   ;;  %v9351_v23 = vld [vmem:[%s13658_s3 + $0xa0] ss:$16 sps:$4 sm:$0xff]   ;;  %v9352_v24 = vld [vmem:[%s13658_s3 + $0xa8] ss:$16 sps:$4 sm:$0xff]  }
  0x1b   : > { %5778 = vmatprep.subr.bf16.mxu1 %v9337_v14  ;;  %v9353_v25 = vld [vmem:[%s13658_s3 + $0xc4] ss:$16 sps:$4 sm:$0xff]   ;;  %v9355_v26 = vld [vmem:[%s13658_s3 + $0xcc] ss:$16 sps:$4 sm:$0xff]   ;;  %v9357_v27 = vld [vmem:[%s13658_s3 + $0xc0] ss:$16 sps:$4 sm:$0xff]  }
  0x1c   : > { %v9358_v28 = vld [vmem:[%s13658_s3 + $0xc8] ss:$16 sps:$4 sm:$0xff]   ;;  %v9359_v29 = vld [vmem:[%s13658_s3 + $0xe4] ss:$16 sps:$4 sm:$0xff]   ;;  %v9361_v30 = vld [vmem:[%s13658_s3 + $0xec] ss:$16 sps:$4 sm:$0xff]  }
  0x1d   : > { %5122 = vmatpush1.bf16.msra.mxu0 %v9339_v15  ;;  %v9363_v31 = vld [vmem:[%s13658_s3 + $0xe0] ss:$16 sps:$4 sm:$0xff]   ;;  %v9364_v32 = vld [vmem:[%s13658_s3 + $0xe8] ss:$16 sps:$4 sm:$0xff]   ;;  %v9365_v33 = vld [vmem:[%s13658_s3 + $0x104] ss:$16 sps:$4 sm:$0xff]  }
  0x1e   : > { %5779 = vmatpush1.bf16.msra.mxu1 %v9340_v16  ;;  %5123 = vmatprep.subr.bf16.mxu0 %v9341_v17  ;;  %v9367_v34 = vld [vmem:[%s13658_s3 + $0x10c] ss:$16 sps:$4 sm:$0xff]   ;;  %v9369_v35 = vld [vmem:[%s13658_s3 + $0x100] ss:$16 sps:$4 sm:$0xff]   ;;  %v9370_v36 = vld [vmem:[%s13658_s3 + $0x108] ss:$16 sps:$4 sm:$0xff]  }
  0x1f   : > { %5780 = vmatprep.subr.bf16.mxu1 %v9343_v18  ;;  %s346_s29 = scalar_select %p345_p10, %s10601_s0, 1  ;;  %v9371_v37 = vld [vmem:[%s13658_s3 + $0x124] ss:$16 sps:$4 sm:$0xff]   ;;  %v9373_v38 = vld [vmem:[%s13658_s3 + $0x12c] ss:$16 sps:$4 sm:$0xff]  }
  0x20   : > { %v9375_v39 = vld [vmem:[%s13658_s3 + $0x120] ss:$16 sps:$4 sm:$0xff]   ;;  %v9376_v40 = vld [vmem:[%s13658_s3 + $0x128] ss:$16 sps:$4 sm:$0xff]   ;;  %v9377_v41 = vld [vmem:[%s13658_s3 + $0x144] ss:$16 sps:$4 sm:$0xff]  }
  0x21   : > { %5124 = vmatpush1.bf16.msra.mxu0 %v9345_v19  ;;  %s8919_s23 = sshll.u32 %s346_s29, 6  ;;  %v9379_v42 = vld [vmem:[%s13658_s3 + $0x14c] ss:$16 sps:$4 sm:$0xff]   ;;  %v9381_v43 = vld [vmem:[%s13658_s3 + $0x140] ss:$16 sps:$4 sm:$0xff]   ;;  %s8094_s10 = sshll.u32 %s10601_s0, 3 }
  0x22   : > { %5781 = vmatpush1.bf16.msra.mxu1 %v9346_v20  ;;  %5125 = vmatprep.subr.bf16.mxu0 %v9347_v21  ;;  %v9382_v44 = vld [vmem:[%s13658_s3 + $0x148] ss:$16 sps:$4 sm:$0xff]   ;;  %s10785_s24 = scalar_lea.vmem %s13656_s1, %s8919_s23  ;;  %vm422_vm0 = vsmask.f32 256  ;;  %v9383_v45 = vld [vmem:[%s13658_s3 + $0x164] ss:$16 sps:$4 sm:$0xff]  }
  0x23   : > { %5782 = vmatprep.subr.bf16.mxu1 %v9349_v22  ;;  %v9385_v47 = vld [vmem:[%s13658_s3 + $0x16c] ss:$16 sps:$4 sm:$0xff]   ;;  %vm423_vm1 = vsmask.f32 4368  ;;  %v9387_v48 = vld [vmem:[%s13658_s3 + $0x160] ss:$16 sps:$4 sm:$0xff]  }
  0x24   : > { %v9388_v49 = vld [vmem:[%s13658_s3 + $0x168] ss:$16 sps:$4 sm:$0xff]   ;;  %v10801_v50 = vld [vmem:[%s10785_s24] sm:$0xff]  ;;  %v9391_v56 = vld [vmem:[%s13658_s3 + $0x18c] ss:$16 sps:$4 sm:$0xff]   ;;  %p351_p11 = scmp.lt.s32.totalorder %s8094_s10, 15 }
  0x25   : > { %5126 = vmatpush1.bf16.msra.mxu0 %v9351_v23  ;;  %v9389_v51 = vld [vmem:[%s13658_s3 + $0x184] ss:$16 sps:$4 sm:$0xff]   ;;  %398 = vst [vmem:[#allocation2 + $0x20] sm:$0xff] %v10801_v50  ;;  %v408_v53 = vld [vmem:[#allocation2 + $0x18] sm:$0x88]  ;;  %v444_v54 = vshrl.u32 %v10801_v50, 16  ;;  %vm10814_vm2 = vmor %vm422_vm0, %vm423_vm1 }
  0x26   : > { %5783 = vmatpush1.bf16.msra.mxu1 %v9352_v24  ;;  %5127 = vmatprep.subr.bf16.mxu0 %v9353_v25  ;;  %v406_v52 = vld [vmem:[#allocation2] sm:$0x88]  ;;  %v447_v55 = vshll.u32 %v10801_v50, 16  ;;  %v439_v58 = vshrl.u32 %v408_v53, 16  ;;  %v9394_v1 = vld [vmem:[%s13658_s3 + $0x188] ss:$16 sps:$4 sm:$0xff]  }
  0x27   : > { %5784 = vmatprep.subr.bf16.mxu1 %v9355_v26  ;;  %v426_v57 = vshrl.u32 %v406_v52, 16  ;;  %v446_v60 = vrot.slane %v444_v54, 7  ;;  %v9393_v63 = vld [vmem:[%s13658_s3 + $0x180] ss:$16 sps:$4 sm:$0xff]   ;;  %v9395_v4 = vld [vmem:[%s13658_s3 + $0x1a4] ss:$16 sps:$4 sm:$0xff]  }
  0x28   : > { %v8098_v62 = vrot.slane %v439_v58, 11  ;;  %v9397_v5 = vld [vmem:[%s13658_s3 + $0x1ac] ss:$16 sps:$4 sm:$0xff]   ;;  %v9399_v8 = vld [vmem:[%s13658_s3 + $0x1a0] ss:$16 sps:$4 sm:$0xff]   ;;  %s13676_s10 = smov (!%p351_p11, %s8094_s10), 15 }
  0x29   : > { %5128 = vmatpush1.bf16.msra.mxu0 %v9357_v27  ;;  %v8097_v61 = vrot.slane %v426_v57, 11  ;;  %v449_v0 = vor.u32 %v447_v55, %v446_v60  ;;  %v9400_v9 = vld [vmem:[%s13658_s3 + $0x1a8] ss:$16 sps:$4 sm:$0xff]   ;;  %v9401_v10 = vld [vmem:[%s13658_s3 + $0x1c4] ss:$16 sps:$4 sm:$0xff]   ;;  %s8920_s15 = sshll.u32 %s13676_s10, 4 }
  0x2a   : > { %5785 = vmatpush1.bf16.msra.mxu1 %v9358_v28  ;;  %5129 = vmatprep.subr.bf16.mxu0 %v9359_v29  ;;  %v9403_v11 = vld [vmem:[%s13658_s3 + $0x1cc] ss:$16 sps:$4 sm:$0xff]   ;;  %v9405_v12 = vld [vmem:[%s13658_s3 + $0x1c0] ss:$16 sps:$4 sm:$0xff]   ;;  %v9406_v13 = vld [vmem:[%s13658_s3 + $0x1c8] ss:$16 sps:$4 sm:$0xff]   ;;  %s13494_s22 = scalar_lea.vmem %s13657_s2, %s8920_s15 }
  0x2b   : > { %5786 = vmatprep.subr.bf16.mxu1 %v9361_v30  ;;  %v437_v3 = vsel %vm10814_vm2, %v8097_v61, %v433_v46  ;;  %v450_v6 = vsel %vm10814_vm2, %v8098_v62, %v449_v0  ;;  %v9407_v14 = vld [vmem:[%s13658_s3 + $0x1e4] ss:$16 sps:$4 sm:$0xff]   ;;  %v9409_v15 = vld [vmem:[%s13658_s3 + $0x1ec] ss:$16 sps:$4 sm:$0xff]   ;;  %v9411_v16 = vld [vmem:[%s13658_s3 + $0x1e0] ss:$16 sps:$4 sm:$0xff]  }
  0x2c   : > { %v8106_v7 = vcombine.high %v437_v3, %v450_v6  ;;  %v9412_v17 = vld [vmem:[%s13658_s3 + $0x1e8] ss:$16 sps:$4 sm:$0xff]   ;;  %v9415_v18 = vld [vmem:[%s13658_s3 + $0x204] ss:$16 sps:$4 sm:$0xff]   ;;  %v9418_v19 = vld [vmem:[%s13658_s3 + $0x20c] ss:$16 sps:$4 sm:$0xff]   ;;  %v8105_v20 = vcombine.low %v437_v3, %v450_v6 }
  0x2d   : > { %5130 = vmatpush1.bf16.msra.mxu0 %v9363_v31  ;;  %v9413_v21 = vld [vmem:[%s13658_s3 + $0x200] ss:$16 sps:$4 sm:$0xff]   ;;  %v9416_v22 = vld [vmem:[%s13658_s3 + $0x208] ss:$16 sps:$4 sm:$0xff]   ;;  %v9421_v23 = vld [vmem:[%s13658_s3 + $0x224] ss:$16 sps:$4 sm:$0xff]  }
  0x2e   : > { %5787 = vmatpush1.bf16.msra.mxu1 %v9364_v32  ;;  %5131 = vmatprep.subr.bf16.mxu0 %v9365_v33  ;;  %v9424_v24 = vld [vmem:[%s13658_s3 + $0x22c] ss:$16 sps:$4 sm:$0xff]   ;;  %v9419_v25 = vld [vmem:[%s13658_s3 + $0x220] ss:$16 sps:$4 sm:$0xff]   ;;  %v9422_v26 = vld [vmem:[%s13658_s3 + $0x228] ss:$16 sps:$4 sm:$0xff]  }
  0x2f   : > { %5788 = vmatprep.subr.bf16.mxu1 %v9367_v34  ;;  %5147 = vmatprep.mubr.bf16.mxu0 %v8106_v7  ;;  %v9427_v27 = vld [vmem:[%s13658_s3 + $0x244] ss:$16 sps:$4 sm:$0xff]   ;;  %v9430_v28 = vld [vmem:[%s13658_s3 + $0x24c] ss:$16 sps:$4 sm:$0xff]   ;;  %v9425_v29 = vld [vmem:[%s13658_s3 + $0x240] ss:$16 sps:$4 sm:$0xff]  }
  0x30   : > { %5804 = vmatprep.mubr.bf16.mxu1 %v8106_v7  ;;  %v9428_v30 = vld [vmem:[%s13658_s3 + $0x248] ss:$16 sps:$4 sm:$0xff]   ;;  %v9433_v31 = vld [vmem:[%s13658_s3 + $0x264] ss:$16 sps:$4 sm:$0xff]   ;;  %v9442_v54 = vld [vmem:[%s13658_s3 + $0x28c] ss:$16 sps:$4 sm:$0xff]  }
  0x31   : > { %5132 = vmatpush1.bf16.msra.mxu0 %v9369_v35  ;;  %v10904_v32 = vld [vmem:[%s10785_s24 + $0x8] sm:$0xff]  ;;  %v10907_v33 = vld [vmem:[%s10785_s24 + $0x10] sm:$0xff]  ;;  %v10945_v60 = vld [vmem:[%s10785_s24 + $0x18] sm:$0xff]  ;;  %vm641_vm3 = vsmask.f32 3328  ;;  %s7852_s29 = sld [smem:[#allocation4]] }
  0x32   : > { %5789 = vmatpush1.bf16.msra.mxu1 %v9370_v36  ;;  %5133 = vmatprep.subr.bf16.mxu0 %v9371_v37  ;;  %v410_v34 = vld [vmem:[#allocation2 + $0x30] sm:$0x88]  ;;  %399 = vst [vmem:[#allocation2 + $0x38] sm:$0xff] %v10904_v32  ;;  %400 = vst [vmem:[#allocation2 + $0x50] sm:$0xff] %v10907_v33  ;;  %v412_v35 = vld [vmem:[#allocation2 + $0x48] sm:$0x88] }
  0x33   : > { %5790 = vmatprep.subr.bf16.mxu1 %v9373_v38  ;;  %v452_v36 = vshrl.u32 %v410_v34, 16  ;;  %v457_v37 = vshrl.u32 %v10904_v32, 16  ;;  %v460_v38 = vshll.u32 %v10904_v32, 16  ;;  %v9437_v55 = vld [vmem:[%s13658_s3 + $0x280] ss:$16 sps:$4 sm:$0xff]   ;;  %401 = vst [vmem:[#allocation2 + $0x68] sm:$0xff] %v10945_v60 }
  0x34   : > { %v414_v0 = vld [vmem:[#allocation2 + $0x60] sm:$0x88]  ;;  %v483_v3 = vshrl.u32 %v10945_v60, 16  ;;  %vm642_vm4 = vsmask.f32 7440  ;;  %s342_s25 = sand.u32 1, %s10513_s12  }
  0x35   : > { %5134 = vmatpush1.bf16.msra.mxu0 %v9375_v39  ;;  %v470_v39 = vshrl.u32 %v10907_v33, 16  ;;  %vm11201_vm5 = vmor %vm641_vm3, %vm642_vm4  ;;  %v10039_v59 = vld [vmem:[%s13658_s3 + $0xec4] ss:$16 sps:$4 sm:$0xff]   ;;  %s8091_s26 = sshll.u32 %s342_s25, 8  ;;  %s8922_s28 = sshll.u32 %s10601_s0, 12 }
  0x36   : > { %5791 = vmatpush1.bf16.msra.mxu1 %v9376_v40  ;;  %5135 = vmatprep.subr.bf16.mxu0 %v9377_v41  ;;  %v9436_v40 = vld [vmem:[%s13658_s3 + $0x26c] ss:$16 sps:$4 sm:$0xff]   ;;  %v465_v41 = vshrl.u32 %v412_v35, 16  ;;  %s13532_s27 = scalar_lea.vmem [#allocation5], %s8091_s26  ;;  %s13604_s10 = scalar_lea.hbm %s13664_s9, %s8922_s28 }
  0x37   : > { %5792 = vmatprep.subr.bf16.mxu1 %v9379_v42  ;;  %v473_v42 = vshll.u32 %v10907_v33, 16  ;;  %v472_v46 = vrot.slane %v470_v39, 7  ;;  %s8013_s30 = sshll.u32 %s13532_s27, 4  ;;  %s13614_s0 = scalar_lea.sflag [#allocation6], %s342_s25  ;;  %s13606_s30 = int_to_ptr.vmem [resolvable:$true] %s8013_s30 }
  0x38   : > { %s10459_s15 = scalar_lea.vmem %s13606_s30, 4096 }
  0x39   : > { %5136 = vmatpush1.bf16.msra.mxu0 %v9381_v43  ;;  %v10920_v43 = vcombine.low %v10904_v32, %v10907_v33  ;;  %v475_v53 = vor.u32 %v473_v42, %v472_v46  ;;  %p10460_p12 = scmp.ne.s32.totalorder %s13606_s30, %s10459_s15 }
  0x3a   : > { %5793 = vmatpush1.bf16.msra.mxu1 %v9382_v44  ;;  %5137 = vmatprep.subr.bf16.mxu0 %v9383_v45  ;;  %v8099_v44 = vrot.slane %v452_v36, 11  ;;  %v459_v45 = vrot.slane %v457_v37, 7  ;;  %v9457_v36 = vld [vmem:[%s13658_s3 + $0x2e4] ss:$16 sps:$4 sm:$0xff]  }
  0x3b   : > { %5794 = vmatprep.subr.bf16.mxu1 %v9385_v47  ;;  %v9431_v47 = vld [vmem:[%s13658_s3 + $0x260] ss:$16 sps:$4 sm:$0xff]   ;;  %p10461_p13 = pnand %p10460_p12, %p10618_p5 }
  0x3c   : > { %v462_v52 = vor.u32 %v460_v38, %v459_v45 }
  0x3d   : > { %5138 = vmatpush1.bf16.msra.mxu0 %v9387_v48  ;;  %v9434_v48 = vld [vmem:[%s13658_s3 + $0x268] ss:$16 sps:$4 sm:$0xff]   ;;  %p10462_p0 = pneg %p10461_p13 }
  0x3e   : > { %5795 = vmatpush1.bf16.msra.mxu1 %v9388_v49  ;;  %5139 = vmatprep.subr.bf16.mxu0 %v9389_v51  ;;  %v8100_v49 = vrot.slane %v465_v41, 11  ;;  %v9439_v51 = vld [vmem:[%s13658_s3 + $0x284] ss:$16 sps:$4 sm:$0xff]   ;;  %v463_v57 = vsel %vm10814_vm2, %v8099_v44, %v462_v52  ;;  %v9460_v41 = vld [vmem:[%s13658_s3 + $0x2ec] ss:$16 sps:$4 sm:$0xff]  }
  0x3f   : > { %5796 = vmatprep.subr.bf16.mxu1 %v9391_v56  ;;  %v9440_v56 = vld [vmem:[%s13658_s3 + $0x288] ss:$16 sps:$4 sm:$0xff]  }
  0x40   : > { %v476_v58 = vsel %vm10814_vm2, %v8100_v49, %v475_v53  ;;  %v9463_v53 = vld [vmem:[%s13658_s3 + $0x304] ss:$16 sps:$4 sm:$0xff]  }
  0x41   : > { %5140 = vmatpush1.bf16.msra.mxu0 %v9393_v63  ;;  %v8108_v61 = vcombine.high %v463_v57, %v476_v58  ;;  %v8107_v62 = vcombine.low %v463_v57, %v476_v58  ;;  %v10948_v63 = vld [vmem:[%s10785_s24 + $0x20] sm:$0xff] }
  0x42   : > { %5797 = vmatpush1.bf16.msra.mxu1 %v9394_v1  ;;  %5141 = vmatprep.subr.bf16.mxu0 %v9395_v4  ;;  %v416_v1 = vld [vmem:[#allocation2 + $0x78] sm:$0x88]  ;;  %402 = vst [vmem:[#allocation2 + $0x80] sm:$0xff] %v10948_v63  ;;  %v478_v4 = vshrl.u32 %v414_v0, 16  ;;  %v496_v7 = vshrl.u32 %v10948_v63, 16 }
  0x43   : > { %5798 = vmatprep.subr.bf16.mxu1 %v9397_v5  ;;  %v486_v5 = vshll.u32 %v10945_v60, 16  ;;  %v491_v6 = vshrl.u32 %v416_v1, 16  ;;  %v9461_v57 = vld [vmem:[%s13658_s3 + $0x300] ss:$16 sps:$4 sm:$0xff]   ;;  %v9469_v0 = vld [vmem:[%s13658_s3 + $0x324] ss:$16 sps:$4 sm:$0xff]  }
  0x44   : > { %v9472_v1 = vld [vmem:[%s13658_s3 + $0x32c] ss:$16 sps:$4 sm:$0xff]  }
  0x45   : > { %5142 = vmatpush1.bf16.msra.mxu0 %v9399_v8  ;;  %v9445_v8 = vld [vmem:[%s13658_s3 + $0x2a4] ss:$16 sps:$4 sm:$0xff]  }
  0x46   : > { %5799 = vmatpush1.bf16.msra.mxu1 %v9400_v9  ;;  %5143 = vmatprep.subr.bf16.mxu0 %v9401_v10  ;;  %v9448_v9 = vld [vmem:[%s13658_s3 + $0x2ac] ss:$16 sps:$4 sm:$0xff]   ;;  %v485_v10 = vrot.slane %v483_v3, 7  ;;  %v8114_v3 = vcombine.high %v10523_v2, %v10801_v50 }
  0x47   : > { %5800 = vmatprep.subr.bf16.mxu1 %v9403_v11  ;;  %v499_v11 = vshll.u32 %v10948_v63, 16  ;;  %v9478_v2 = vld [vmem:[%s13658_s3 + $0x34c] ss:$16 sps:$4 sm:$0xff]  }
  0x49   : > { %5144 = vmatpush1.bf16.msra.mxu0 %v9405_v12  ;;  %v10964_v12 = vcombine.low %v10945_v60, %v10948_v63 }
  0x4a   : > { %5801 = vmatpush1.bf16.msra.mxu1 %v9406_v13  ;;  %5145 = vmatprep.subr.bf16.mxu0 %v9407_v14  ;;  %v8101_v13 = vrot.slane %v478_v4, 11  ;;  %v8102_v14 = vrot.slane %v491_v6, 11  ;;  %v9467_v4 = vld [vmem:[%s13658_s3 + $0x320] ss:$16 sps:$4 sm:$0xff]   ;;  %v9475_v6 = vld [vmem:[%s13658_s3 + $0x344] ss:$16 sps:$4 sm:$0xff]  }
  0x4b   : > { %5802 = vmatprep.subr.bf16.mxu1 %v9409_v15  ;;  %v498_v15 = vrot.slane %v496_v7, 7  ;;  %v9473_v7 = vld [vmem:[%s13658_s3 + $0x340] ss:$16 sps:$4 sm:$0xff]  }
  0x4d   : > { %5146 = vmatpush1.bf16.msra.mxu0 %v9411_v16  ;;  %v488_v16 = vor.u32 %v486_v5, %v485_v10  ;;  %v9470_v5 = vld [vmem:[%s13658_s3 + $0x328] ss:$16 sps:$4 sm:$0xff]   ;;  %v9484_v10 = vld [vmem:[%s13658_s3 + $0x36c] ss:$16 sps:$4 sm:$0xff]  }
  0x4e   : > { %5803 = vmatpush1.bf16.msra.mxu1 %v9412_v17  ;;  %5188 = vmatprep.subr.bf16.mxu0 %v9415_v18  ;;  %v9443_v17 = vld [vmem:[%s13658_s3 + $0x2a0] ss:$16 sps:$4 sm:$0xff]   ;;  %v9446_v18 = vld [vmem:[%s13658_s3 + $0x2a8] ss:$16 sps:$4 sm:$0xff]  }
  0x4f   : > { %5845 = vmatprep.subr.bf16.mxu1 %v9418_v19  ;;  %v501_v19 = vor.u32 %v499_v11, %v498_v15  ;;  %v9479_v11 = vld [vmem:[%s13658_s3 + $0x360] ss:$16 sps:$4 sm:$0xff]   ;;  %v9490_v15 = vld [vmem:[%s13658_s3 + $0x38c] ss:$16 sps:$4 sm:$0xff]  }
  0x50   : > { %5148 = vmatmul.mubr.bf16.vlgmr.msra.gmra.mrb[0].mxu0 %v8105_v20 }
  0x51   : > { %5805 = vmatmul.mubr.bf16.vlgmr.msra.gmra.mrb[0].mxu1 %v8105_v20  ;;  %5189 = vmatpush1.bf16.msra.mxu0 %v9413_v21  ;;  %v9451_v20 = vld [vmem:[%s13658_s3 + $0x2c4] ss:$16 sps:$4 sm:$0xff]   ;;  %v9454_v21 = vld [vmem:[%s13658_s3 + $0x2cc] ss:$16 sps:$4 sm:$0xff]  }
  0x52   : > { %5846 = vmatpush1.bf16.msra.mxu1 %v9416_v22  ;;  %5190 = vmatprep.subr.bf16.mxu0 %v9421_v23  ;;  %v489_v22 = vsel %vm10814_vm2, %v8101_v13, %v488_v16  ;;  %v9449_v23 = vld [vmem:[%s13658_s3 + $0x2c0] ss:$16 sps:$4 sm:$0xff]   ;;  %v9482_v13 = vld [vmem:[%s13658_s3 + $0x368] ss:$16 sps:$4 sm:$0xff]  }
  0x53   : > { %5847 = vmatprep.subr.bf16.mxu1 %v9424_v24  ;;  %5157 = vmatprep.mubr.bf16.mxu0 %v8108_v61  ;;  %v9452_v24 = vld [vmem:[%s13658_s3 + $0x2c8] ss:$16 sps:$4 sm:$0xff]   ;;  %v9485_v16 = vld [vmem:[%s13658_s3 + $0x380] ss:$16 sps:$4 sm:$0xff]  }
  0x54   : > { %5814 = vmatprep.mubr.bf16.mxu1 %v8108_v61 }
  0x55   : > { %5191 = vmatpush1.bf16.msra.mxu0 %v9419_v25  ;;  %v502_v25 = vsel %vm10814_vm2, %v8102_v14, %v501_v19  ;;  %v9487_v14 = vld [vmem:[%s13658_s3 + $0x384] ss:$16 sps:$4 sm:$0xff]   ;;  %v9496_v19 = vld [vmem:[%s13658_s3 + $0x3ac] ss:$16 sps:$4 sm:$0xff]  }
  0x56   : > { %5848 = vmatpush1.bf16.msra.mxu1 %v9422_v26  ;;  %5192 = vmatprep.subr.bf16.mxu0 %v9427_v27  ;;  %v10989_v26 = vld [vmem:[%s10785_s24 + $0x28] sm:$0xff]  ;;  %v10992_v27 = vld [vmem:[%s10785_s24 + $0x30] sm:$0xff] }
  0x57   : > { %5849 = vmatprep.subr.bf16.mxu1 %v9430_v28  ;;  %v418_v28 = vld [vmem:[#allocation2 + $0x90] sm:$0x88]  ;;  %403 = vst [vmem:[#allocation2 + $0x98] sm:$0xff] %v10989_v26  ;;  %404 = vst [vmem:[#allocation2 + $0xb0] sm:$0xff] %v10992_v27  ;;  %v509_v35 = vshrl.u32 %v10989_v26, 16  ;;  %v512_v37 = vshll.u32 %v10989_v26, 16  ;;  %v11008_v45 = vcombine.low %v10989_v26, %v10992_v27 }
  0x58   : > { %5158 = vmatmul.mubr.bf16.gmra.mrb[4].mxu0 %v8107_v62  ;;  %v504_v34 = vshrl.u32 %v418_v28, 16  ;;  %v522_v39 = vshrl.u32 %v10992_v27, 16  ;;  %v9505_v28 = vld [vmem:[%s13658_s3 + $0x3e4] ss:$16 sps:$4 sm:$0xff]  }
  0x59   : > { %5193 = vmatpush1.bf16.msra.mxu0 %v9425_v29  ;;  %5815 = vmatmul.mubr.bf16.gmra.mrb[4].mxu1 %v8107_v62  ;;  %v8110_v29 = vcombine.high %v489_v22, %v502_v25  ;;  %v511_v44 = vrot.slane %v509_v35, 7  ;;  %v9464_v62 = vld [vmem:[%s13658_s3 + $0x308] ss:$16 sps:$4 sm:$0xff]   ;;  %v9514_v35 = vld [vmem:[%s13658_s3 + $0x40c] ss:$16 sps:$4 sm:$0xff]  }
  0x5a   : > { %5850 = vmatpush1.bf16.msra.mxu1 %v9428_v30  ;;  %5194 = vmatprep.subr.bf16.mxu0 %v9433_v31  ;;  %v8109_v30 = vcombine.low %v489_v22, %v502_v25  ;;  %v420_v31 = vld [vmem:[#allocation2 + $0xa8] sm:$0x88]  ;;  %v8103_v42 = vrot.slane %v504_v34, 11  ;;  %v9499_v22 = vld [vmem:[%s13658_s3 + $0x3c4] ss:$16 sps:$4 sm:$0xff]  }
  0x5b   : > { %5851 = vmatprep.subr.bf16.mxu1 %v9436_v40  ;;  %v517_v38 = vshrl.u32 %v420_v31, 16  ;;  %v525_v40 = vshll.u32 %v10992_v27, 16  ;;  %5167 = vmatprep.mubr.bf16.mxu0 %v8110_v29  ;;  %v514_v49 = vor.u32 %v512_v37, %v511_v44  ;;  %v9500_v25 = vld [vmem:[%s13658_s3 + $0x3c8] ss:$16 sps:$4 sm:$0xff]   ;;  %v9511_v34 = vld [vmem:[%s13658_s3 + $0x404] ss:$16 sps:$4 sm:$0xff]  }
  0x5c   : > { %5824 = vmatprep.mubr.bf16.mxu1 %v8110_v29  ;;  %v9508_v29 = vld [vmem:[%s13658_s3 + $0x3ec] ss:$16 sps:$4 sm:$0xff]   ;;  %v9506_v31 = vld [vmem:[%s13658_s3 + $0x3e8] ss:$16 sps:$4 sm:$0xff]  }
  0x5d   : > { %5195 = vmatpush1.bf16.msra.mxu0 %v9431_v47  ;;  %v8104_v46 = vrot.slane %v517_v38, 11  ;;  %v524_v47 = vrot.slane %v522_v39, 7  ;;  %v9509_v38 = vld [vmem:[%s13658_s3 + $0x400] ss:$16 sps:$4 sm:$0xff]   ;;  %v9512_v39 = vld [vmem:[%s13658_s3 + $0x408] ss:$16 sps:$4 sm:$0xff]  }
  0x5e   : > { %5852 = vmatpush1.bf16.msra.mxu1 %v9434_v48  ;;  %5196 = vmatprep.subr.bf16.mxu0 %v9439_v51  ;;  %v9455_v48 = vld [vmem:[%s13658_s3 + $0x2e0] ss:$16 sps:$4 sm:$0xff]   ;;  %v9458_v51 = vld [vmem:[%s13658_s3 + $0x2e8] ss:$16 sps:$4 sm:$0xff]  }
  0x5f   : > { %5853 = vmatprep.subr.bf16.mxu1 %v9442_v54  ;;  %v527_v52 = vor.u32 %v525_v40, %v524_v47  ;;  %v9466_v54 = vld [vmem:[%s13658_s3 + $0x30c] ss:$16 sps:$4 sm:$0xff]   ;;  %v9517_v40 = vld [vmem:[%s13658_s3 + $0x424] ss:$16 sps:$4 sm:$0xff]   ;;  %v9518_v44 = vld [vmem:[%s13658_s3 + $0x428] ss:$16 sps:$4 sm:$0xff]  }
  0x60   : > { %5168 = vmatmul.mubr.bf16.gmra.mrb[8].mxu0 %v8109_v30 }
  0x61   : > { %5197 = vmatpush1.bf16.msra.mxu0 %v9437_v55  ;;  %5825 = vmatmul.mubr.bf16.gmra.mrb[8].mxu1 %v8109_v30  ;;  %v515_v55 = vsel %vm10814_vm2, %v8103_v42, %v514_v49  ;;  %v9503_v30 = vld [vmem:[%s13658_s3 + $0x3e0] ss:$16 sps:$4 sm:$0xff]   ;;  %v9524_v49 = vld [vmem:[%s13658_s3 + $0x448] ss:$16 sps:$4 sm:$0xff]  }
  0x62   : > { %5854 = vmatpush1.bf16.msra.mxu1 %v9440_v56  ;;  %5198 = vmatprep.subr.bf16.mxu0 %v9445_v8  ;;  %v528_v56 = vsel %vm10814_vm2, %v8104_v46, %v527_v52  ;;  %v9476_v8 = vld [vmem:[%s13658_s3 + $0x348] ss:$16 sps:$4 sm:$0xff]   ;;  %v9515_v42 = vld [vmem:[%s13658_s3 + $0x420] ss:$16 sps:$4 sm:$0xff]   ;;  %v9523_v46 = vld [vmem:[%s13658_s3 + $0x444] ss:$16 sps:$4 sm:$0xff]  }
  0x63   : > { %5855 = vmatprep.subr.bf16.mxu1 %v9448_v9  ;;  %v8112_v58 = vcombine.high %v515_v55, %v528_v56  ;;  %v8111_v61 = vcombine.low %v515_v55, %v528_v56  ;;  %v9481_v9 = vld [vmem:[%s13658_s3 + $0x364] ss:$16 sps:$4 sm:$0xff]  }
  0x64   : > { %v627_v52 = vld [vmem:[#allocation2 + $0x20] sm:$0xff] }
  0x65   : > { %5199 = vmatpush1.bf16.msra.mxu0 %v9443_v17  ;;  %5177 = vmatprep.mubr.bf16.mxu0 %v8112_v58  ;;  %v9488_v17 = vld [vmem:[%s13658_s3 + $0x388] ss:$16 sps:$4 sm:$0xff]   ;;  %v659_v55 = vshrl.u32 %v627_v52, 16  ;;  %v662_v56 = vshll.u32 %v627_v52, 16  ;;  %v9577_v52 = vld [vmem:[%s13658_s3 + $0x560] ss:$16 sps:$4 sm:$0xff]  }
  0x66   : > { %5856 = vmatpush1.bf16.msra.mxu1 %v9446_v18  ;;  %5200 = vmatprep.subr.bf16.mxu0 %v9451_v20  ;;  %v9493_v18 = vld [vmem:[%s13658_s3 + $0x3a4] ss:$16 sps:$4 sm:$0xff]   ;;  %v9491_v20 = vld [vmem:[%s13658_s3 + $0x3a0] ss:$16 sps:$4 sm:$0xff]  }
  0x67   : > { %5857 = vmatprep.subr.bf16.mxu1 %v9454_v21  ;;  %5834 = vmatprep.mubr.bf16.mxu1 %v8112_v58  ;;  %v9494_v21 = vld [vmem:[%s13658_s3 + $0x3a8] ss:$16 sps:$4 sm:$0xff]  }
  0x68   : > { %5178 = vmatmul.mubr.bf16.gmra.mrb[12].mxu0 %v8111_v61  ;;  %v9530_v58 = vld [vmem:[%s13658_s3 + $0x468] ss:$16 sps:$4 sm:$0xff]  }
  0x69   : > { %5201 = vmatpush1.bf16.msra.mxu0 %v9449_v23  ;;  %5835 = vmatmul.mubr.bf16.gmra.mrb[12].mxu1 %v8111_v61  ;;  %v9502_v23 = vld [vmem:[%s13658_s3 + $0x3cc] ss:$16 sps:$4 sm:$0xff]   ;;  %v8118_v61 = vcombine.high %v10945_v60, %v10948_v63  ;;  %v820_v63 = vrot.slane %v659_v55, 7 }
  0x6a   : > { %5858 = vmatpush1.bf16.msra.mxu1 %v9452_v24  ;;  %5202 = vmatprep.subr.bf16.mxu0 %v9457_v36  ;;  %v9497_v24 = vld [vmem:[%s13658_s3 + $0x3c0] ss:$16 sps:$4 sm:$0xff]   ;;  %v9538_v60 = vld [vmem:[%s13658_s3 + $0x48c] ss:$16 sps:$4 sm:$0xff]  }
  0x6b   : > { %5859 = vmatprep.subr.bf16.mxu1 %v9460_v41  ;;  %5220 = vmatprep.mubr.bf16.mxu0 %v8114_v3  ;;  %v10455_v36 = vld [vmem:[#allocation2] sm:$0xff]  ;;  %v8116_v41 = vcombine.high %v10904_v32, %v10907_v33  ;;  %v9526_v32 = vld [vmem:[%s13658_s3 + $0x44c] ss:$16 sps:$4 sm:$0xff]  }
  0x6c   : > { %5877 = vmatprep.mubr.bf16.mxu1 %v8114_v3  ;;  %v8113_v37 = vcombine.low %v10455_v36, %v10801_v50  ;;  %v9520_v50 = vld [vmem:[%s13658_s3 + $0x42c] ss:$16 sps:$4 sm:$0xff]   ;;  %v645_v33 = vshrl.u32 %v10455_v36, 16  ;;  %v648_v47 = vshll.u32 %v10455_v36, 16  ;;  %v626_v3 = vld [vmem:[#allocation2 + $0x10] sm:$0x11] }
  0x6d   : > { %5203 = vmatpush1.bf16.msra.mxu0 %v9455_v48  ;;  %v9521_v48 = vld [vmem:[%s13658_s3 + $0x440] ss:$16 sps:$4 sm:$0xff]   ;;  %v9560_v36 = vld [vmem:[%s13658_s3 + $0x508] ss:$16 sps:$4 sm:$0xff]  }
  0x6e   : > { %5860 = vmatpush1.bf16.msra.mxu1 %v9458_v51  ;;  %5204 = vmatprep.subr.bf16.mxu0 %v9463_v53  ;;  %v9529_v51 = vld [vmem:[%s13658_s3 + $0x464] ss:$16 sps:$4 sm:$0xff]   ;;  %v9532_v53 = vld [vmem:[%s13658_s3 + $0x46c] ss:$16 sps:$4 sm:$0xff]  }
  0x6f   : > { %5861 = vmatprep.subr.bf16.mxu1 %v9466_v54  ;;  %v647_v54 = vrot.slane %v645_v33, 4  ;;  %v9579_v33 = vld [vmem:[%s13658_s3 + $0x564] ss:$16 sps:$4 sm:$0xff]  }
  0x71   : > { %5205 = vmatpush1.bf16.msra.mxu0 %v9461_v57  ;;  %v9527_v57 = vld [vmem:[%s13658_s3 + $0x460] ss:$16 sps:$4 sm:$0xff]  }
  0x72   : > { %5862 = vmatpush1.bf16.msra.mxu1 %v9464_v62  ;;  %5206 = vmatprep.subr.bf16.mxu0 %v9469_v0  ;;  %v650_v62 = vrot.slane %v648_v47, 5  ;;  %v661_v0 = vrot.slane %v659_v55, 4  ;;  %v9582_v47 = vld [vmem:[%s13658_s3 + $0x56c] ss:$16 sps:$4 sm:$0xff]  }
  0x73   : > { %5863 = vmatprep.subr.bf16.mxu1 %v9472_v1  ;;  %v664_v1 = vrot.slane %v662_v56, 5 }
  0x75   : > { %5207 = vmatpush1.bf16.msra.mxu0 %v9467_v4  ;;  %v628_v4 = vld [vmem:[#allocation2 + $0x28] sm:$0x11] }
  0x76   : > { %5864 = vmatpush1.bf16.msra.mxu1 %v9470_v5  ;;  %5208 = vmatprep.subr.bf16.mxu0 %v9475_v6  ;;  %v9535_v5 = vld [vmem:[%s13658_s3 + $0x484] ss:$16 sps:$4 sm:$0xff]   ;;  %v9533_v6 = vld [vmem:[%s13658_s3 + $0x480] ss:$16 sps:$4 sm:$0xff]  }
  0x77   : > { %5865 = vmatprep.subr.bf16.mxu1 %v9478_v2  ;;  %v654_v2 = vshll.u32 %v626_v3, 16  ;;  %v9593_v3 = vld [vmem:[%s13658_s3 + $0x5a4] ss:$16 sps:$4 sm:$0xff]  }
  0x79   : > { %5209 = vmatpush1.bf16.msra.mxu0 %v9473_v7  ;;  %v665_v7 = vor.u32 %v664_v1, %v661_v0  ;;  %v9587_v1 = vld [vmem:[%s13658_s3 + $0x588] ss:$16 sps:$4 sm:$0xff]  }
  0x7a   : > { %5866 = vmatpush1.bf16.msra.mxu1 %v9476_v8  ;;  %5210 = vmatprep.subr.bf16.mxu0 %v9481_v9  ;;  %v668_v8 = vshll.u32 %v628_v4, 16  ;;  %v11182_v9 = vor.u32 %v820_v63, %v662_v56  ;;  %v9586_v56 = vld [vmem:[%s13658_s3 + $0x584] ss:$16 sps:$4 sm:$0xff]   ;;  %v9596_v4 = vld [vmem:[%s13658_s3 + $0x5ac] ss:$16 sps:$4 sm:$0xff]  }
  0x7b   : > { %5867 = vmatprep.subr.bf16.mxu1 %v9484_v10  ;;  %v9536_v10 = vld [vmem:[%s13658_s3 + $0x488] ss:$16 sps:$4 sm:$0xff]  }
  0x7d   : > { %5211 = vmatpush1.bf16.msra.mxu0 %v9479_v11  ;;  %v9541_v11 = vld [vmem:[%s13658_s3 + $0x4a4] ss:$16 sps:$4 sm:$0xff]  }
  0x7e   : > { %5868 = vmatpush1.bf16.msra.mxu1 %v9482_v13  ;;  %5212 = vmatprep.subr.bf16.mxu0 %v9487_v14  ;;  %v9544_v13 = vld [vmem:[%s13658_s3 + $0x4ac] ss:$16 sps:$4 sm:$0xff]   ;;  %v9539_v14 = vld [vmem:[%s13658_s3 + $0x4a0] ss:$16 sps:$4 sm:$0xff]  }
  0x7f   : > { %5869 = vmatprep.subr.bf16.mxu1 %v9490_v15  ;;  %v8120_v15 = vcombine.high %v10989_v26, %v10992_v27  ;;  %v9550_v26 = vld [vmem:[%s13658_s3 + $0x4cc] ss:$16 sps:$4 sm:$0xff]   ;;  %v9545_v27 = vld [vmem:[%s13658_s3 + $0x4c0] ss:$16 sps:$4 sm:$0xff]  }
  0x81   : > { %5213 = vmatpush1.bf16.msra.mxu0 %v9485_v16  ;;  %v10228_v16 = vld [vmem:[%s13662_s7 + $0x8c] ss:$16 sps:$4 sm:$0xff]  }
  0x82   : > { %5870 = vmatpush1.bf16.msra.mxu1 %v9488_v17  ;;  %5214 = vmatprep.subr.bf16.mxu0 %v9493_v18  ;;  %v656_v18 = vrot.slane %v654_v2, 5 }
  0x83   : > { %5871 = vmatprep.subr.bf16.mxu1 %v9496_v19  ;;  %v666_v19 = vrot.slane %v665_v7, 4 }
  0x85   : > { %5215 = vmatpush1.bf16.msra.mxu0 %v9491_v20  ;;  %v670_v20 = vrot.slane %v668_v8, 5 }
  0x86   : > { %5872 = vmatpush1.bf16.msra.mxu1 %v9494_v21  ;;  %5216 = vmatprep.subr.bf16.mxu0 %v9499_v22  ;;  %v9542_v21 = vld [vmem:[%s13658_s3 + $0x4a8] ss:$16 sps:$4 sm:$0xff]  }
  0x87   : > { %5873 = vmatprep.subr.bf16.mxu1 %v9502_v23  ;;  %v11223_v23 = vsel %vm11201_vm5, %v666_v19, %v670_v20  ;;  %v9603_v19 = vld [vmem:[%s13658_s3 + $0x5cc] ss:$16 sps:$4 sm:$0xff]   ;;  %v9598_v20 = vld [vmem:[%s13658_s3 + $0x5c0] ss:$16 sps:$4 sm:$0xff]  }
  0x89   : > { %5217 = vmatpush1.bf16.msra.mxu0 %v9497_v24  ;;  %v9548_v24 = vld [vmem:[%s13658_s3 + $0x4c8] ss:$16 sps:$4 sm:$0xff]  }
  0x8a   : > { %5874 = vmatpush1.bf16.msra.mxu1 %v9500_v25  ;;  %5218 = vmatprep.subr.bf16.mxu0 %v9505_v28  ;;  %v9553_v25 = vld [vmem:[%s13658_s3 + $0x4e4] ss:$16 sps:$4 sm:$0xff]   ;;  %v9556_v28 = vld [vmem:[%s13658_s3 + $0x4ec] ss:$16 sps:$4 sm:$0xff]  }
  0x8b   : > { %5875 = vmatprep.subr.bf16.mxu1 %v9508_v29 }
  0x8d   : > { %5219 = vmatpush1.bf16.msra.mxu0 %v9503_v30  ;;  %v9551_v30 = vld [vmem:[%s13658_s3 + $0x4e0] ss:$16 sps:$4 sm:$0xff]  }
  0x8e   : > { %5876 = vmatpush1.bf16.msra.mxu1 %v9506_v31  ;;  %5261 = vmatprep.subr.bf16.mxu0 %v9511_v34  ;;  %v9554_v31 = vld [vmem:[%s13658_s3 + $0x4e8] ss:$16 sps:$4 sm:$0xff]   ;;  %v9559_v34 = vld [vmem:[%s13658_s3 + $0x504] ss:$16 sps:$4 sm:$0xff]  }
  0x8f   : > { %5918 = vmatprep.subr.bf16.mxu1 %v9514_v35  ;;  %v9562_v35 = vld [vmem:[%s13658_s3 + $0x50c] ss:$16 sps:$4 sm:$0xff]  }
  0x90   : > { %5221 = vmatmul.mubr.bf16.vlgmr.msra.gmra.mrb[0].mxu0 %v8113_v37 }
  0x91   : > { %5878 = vmatmul.mubr.bf16.vlgmr.msra.gmra.mrb[0].mxu1 %v8113_v37  ;;  %5262 = vmatpush1.bf16.msra.mxu0 %v9509_v38  ;;  %v9565_v37 = vld [vmem:[%s13658_s3 + $0x524] ss:$16 sps:$4 sm:$0xff]   ;;  %v9568_v38 = vld [vmem:[%s13658_s3 + $0x52c] ss:$16 sps:$4 sm:$0xff]  }
  0x92   : > { %5919 = vmatpush1.bf16.msra.mxu1 %v9512_v39  ;;  %5263 = vmatprep.subr.bf16.mxu0 %v9517_v40  ;;  %v9563_v39 = vld [vmem:[%s13658_s3 + $0x520] ss:$16 sps:$4 sm:$0xff]   ;;  %v9566_v40 = vld [vmem:[%s13658_s3 + $0x528] ss:$16 sps:$4 sm:$0xff]  }
  0x93   : > { %5920 = vmatprep.subr.bf16.mxu1 %v9520_v50  ;;  %5230 = vmatprep.mubr.bf16.mxu0 %v8116_v41  ;;  %v9572_v50 = vld [vmem:[%s13658_s3 + $0x544] ss:$16 sps:$4 sm:$0xff]  }
  0x94   : > { %5887 = vmatprep.mubr.bf16.mxu1 %v8116_v41  ;;  %v9575_v41 = vld [vmem:[%s13658_s3 + $0x54c] ss:$16 sps:$4 sm:$0xff]  }
  0x95   : > { %5264 = vmatpush1.bf16.msra.mxu0 %v9515_v42  ;;  %v631_v42 = vld [vmem:[#allocation2 + $0x50] sm:$0xff] }
  0x96   : > { %5921 = vmatpush1.bf16.msra.mxu1 %v9518_v44  ;;  %5265 = vmatprep.subr.bf16.mxu0 %v9523_v46  ;;  %v9570_v44 = vld [vmem:[%s13658_s3 + $0x540] ss:$16 sps:$4 sm:$0xff]   ;;  %v9573_v46 = vld [vmem:[%s13658_s3 + $0x548] ss:$16 sps:$4 sm:$0xff]  }
  0x97   : > { %5922 = vmatprep.subr.bf16.mxu1 %v9526_v32  ;;  %v687_v32 = vshrl.u32 %v631_v42, 16 }
  0x98   : > { %5231 = vmatmul.mubr.bf16.gmra.mrb[4].mxu0 %v10920_v43 }
  0x99   : > { %5888 = vmatmul.mubr.bf16.gmra.mrb[4].mxu1 %v10920_v43  ;;  %5266 = vmatpush1.bf16.msra.mxu0 %v9521_v48  ;;  %v651_v43 = vor.u32 %v650_v62, %v647_v54  ;;  %v690_v48 = vshll.u32 %v631_v42, 16  ;;  %v635_v54 = vld [vmem:[#allocation2 + $0x80] sm:$0xff]  ;;  %v689_v7 = vrot.slane %v687_v32, 4 }
  0x9a   : > { %5923 = vmatpush1.bf16.msra.mxu1 %v9524_v49  ;;  %5267 = vmatprep.subr.bf16.mxu0 %v9529_v51  ;;  %v846_v49 = vrot.slane %v687_v32, 7  ;;  %v11286_v51 = vld [vmem:[#allocation2 + $0x38] sm:$0xff]  ;;  %v715_v0 = vshrl.u32 %v635_v54, 16 }
  0x9b   : > { %5924 = vmatprep.subr.bf16.mxu1 %v9532_v53  ;;  %5240 = vmatprep.mubr.bf16.mxu0 %v8118_v61  ;;  %v652_v17 = vrot.slane %v651_v43, 4  ;;  %v9580_v53 = vld [vmem:[%s13658_s3 + $0x568] ss:$16 sps:$4 sm:$0xff]   ;;  %v676_v62 = vshll.u32 %v11286_v51, 16  ;;  %v9591_v43 = vld [vmem:[%s13658_s3 + $0x5a0] ss:$16 sps:$4 sm:$0xff]  }
  0x9c   : > { %5897 = vmatprep.mubr.bf16.mxu1 %v8118_v61  ;;  %v11294_v55 = vor.u32 %v846_v49, %v690_v48  ;;  %v9584_v61 = vld [vmem:[%s13658_s3 + $0x580] ss:$16 sps:$4 sm:$0xff]   ;;  %v872_v63 = vrot.slane %v715_v0, 7  ;;  %v692_v8 = vrot.slane %v690_v48, 5  ;;  %v9616_v48 = vld [vmem:[%s13658_s3 + $0x60c] ss:$16 sps:$4 sm:$0xff]  }
  0x9d   : > { %5268 = vmatpush1.bf16.msra.mxu0 %v9527_v57  ;;  %v11219_v22 = vsel %vm11201_vm5, %v652_v17, %v656_v18  ;;  %v9589_v57 = vld [vmem:[%s13658_s3 + $0x58c] ss:$16 sps:$4 sm:$0xff]   ;;  %v678_v2 = vrot.slane %v676_v62, 5  ;;  %v11330_v17 = vld [vmem:[#allocation2 + $0xb0] sm:$0xff] }
  0x9e   : > { %5925 = vmatpush1.bf16.msra.mxu1 %v9530_v58  ;;  %5269 = vmatprep.subr.bf16.mxu0 %v9535_v5  ;;  %v8122_v29 = vcombine.high %v11219_v22, %v11223_v23  ;;  %v673_v58 = vshrl.u32 %v11286_v51, 16  ;;  %v630_v5 = vld [vmem:[#allocation2 + $0x40] sm:$0x11]  ;;  %v9652_v51 = vld [vmem:[%s13658_s3 + $0x6cc] ss:$16 sps:$4 sm:$0xff]  }
  0x9f   : > { %5926 = vmatprep.subr.bf16.mxu1 %v9538_v60  ;;  %v718_v60 = vshll.u32 %v635_v54, 16  ;;  %v9600_v18 = vld [vmem:[%s13658_s3 + $0x5c4] ss:$16 sps:$4 sm:$0xff]  }
  0xa0   : > { %5241 = vmatmul.mubr.bf16.gmra.mrb[8].mxu0 %v10964_v12 }
  0xa1   : > { %5898 = vmatmul.mubr.bf16.gmra.mrb[8].mxu1 %v10964_v12  ;;  %5270 = vmatpush1.bf16.msra.mxu0 %v9533_v6  ;;  %v9547_v12 = vld [vmem:[%s13658_s3 + $0x4c4] ss:$16 sps:$4 sm:$0xff]   ;;  %v675_v6 = vrot.slane %v673_v58, 4 }
  0xa2   : > { %5927 = vmatpush1.bf16.msra.mxu1 %v9536_v10  ;;  %5271 = vmatprep.subr.bf16.mxu0 %v9541_v11  ;;  %v11323_v10 = vld [vmem:[#allocation2 + $0x68] sm:$0xff]  ;;  %v11325_v11 = vor.u32 %v872_v63, %v718_v60  ;;  %v9617_v63 = vld [vmem:[%s13658_s3 + $0x620] ss:$16 sps:$4 sm:$0xff]  }
  0xa3   : > { %5928 = vmatprep.subr.bf16.mxu1 %v9544_v13  ;;  %5250 = vmatprep.mubr.bf16.mxu0 %v8120_v15  ;;  %v9594_v13 = vld [vmem:[%s13658_s3 + $0x5a8] ss:$16 sps:$4 sm:$0xff]  }
  0xa4   : > { %5907 = vmatprep.mubr.bf16.mxu1 %v8120_v15  ;;  %v682_v15 = vshll.u32 %v630_v5, 16 }
  0xa5   : > { %5272 = vmatpush1.bf16.msra.mxu0 %v9539_v14  ;;  %v632_v14 = vld [vmem:[#allocation2 + $0x58] sm:$0x11] }
  0xa6   : > { %5929 = vmatpush1.bf16.msra.mxu1 %v9542_v21  ;;  %5273 = vmatprep.subr.bf16.mxu0 %v9547_v12  ;;  %v9601_v21 = vld [vmem:[%s13658_s3 + $0x5c8] ss:$16 sps:$4 sm:$0xff]   ;;  %v701_v12 = vshrl.u32 %v11323_v10, 16 }
  0xa7   : > { %5930 = vmatprep.subr.bf16.mxu1 %v9550_v26  ;;  %v704_v26 = vshll.u32 %v11323_v10, 16 }
  0xa8   : > { %5251 = vmatmul.mubr.bf16.gmra.mrb[12].mxu0 %v11008_v45 }
  0xa9   : > { %5908 = vmatmul.mubr.bf16.gmra.mrb[12].mxu1 %v11008_v45  ;;  %5274 = vmatpush1.bf16.msra.mxu0 %v9545_v27  ;;  %v9557_v45 = vld [vmem:[%s13658_s3 + $0x500] ss:$16 sps:$4 sm:$0xff]   ;;  %v9607_v27 = vld [vmem:[%s13658_s3 + $0x5e4] ss:$16 sps:$4 sm:$0xff]  }
  0xaa   : > { %5931 = vmatpush1.bf16.msra.mxu1 %v9548_v24  ;;  %5275 = vmatprep.subr.bf16.mxu0 %v9553_v25  ;;  %v679_v24 = vor.u32 %v678_v2, %v675_v6  ;;  %v693_v25 = vor.u32 %v692_v8, %v689_v7  ;;  %v638_v7 = vld [vmem:[#allocation2 + $0xa0] sm:$0x11] }
  0xab   : > { %5932 = vmatprep.subr.bf16.mxu1 %v9556_v28  ;;  %5293 = vmatprep.mubr.bf16.mxu0 %v8122_v29  ;;  %v696_v28 = vshll.u32 %v632_v14, 16 }
  0xac   : > { %5950 = vmatprep.mubr.bf16.mxu1 %v8122_v29  ;;  %v743_v29 = vshrl.u32 %v11330_v17, 16  ;;  %v680_v42 = vrot.slane %v679_v24, 4  ;;  %v738_v24 = vshll.u32 %v638_v7, 16 }
  0xad   : > { %5276 = vmatpush1.bf16.msra.mxu0 %v9551_v30  ;;  %v9610_v30 = vld [vmem:[%s13658_s3 + $0x5ec] ss:$16 sps:$4 sm:$0xff]  }
  0xae   : > { %5933 = vmatpush1.bf16.msra.mxu1 %v9554_v31  ;;  %5277 = vmatprep.subr.bf16.mxu0 %v9559_v34  ;;  %v684_v31 = vrot.slane %v682_v15, 5  ;;  %v634_v34 = vld [vmem:[#allocation2 + $0x70] sm:$0x11]  ;;  %v745_v14 = vrot.slane %v743_v29, 4 }
  0xaf   : > { %5934 = vmatprep.subr.bf16.mxu1 %v9562_v35  ;;  %v636_v35 = vld [vmem:[#allocation2 + $0x88] sm:$0x11]  ;;  %v710_v49 = vshll.u32 %v634_v34, 16 }
  0xb0   : > { %v9626_v34 = vld [vmem:[%s13658_s3 + $0x648] ss:$16 sps:$4 sm:$0xff]  }
  0xb1   : > { %5278 = vmatpush1.bf16.msra.mxu0 %v9557_v45  ;;  %v746_v45 = vshll.u32 %v11330_v17, 16  ;;  %v712_v5 = vrot.slane %v710_v49, 5  ;;  %v9620_v17 = vld [vmem:[%s13658_s3 + $0x628] ss:$16 sps:$4 sm:$0xff]   ;;  %v833_v49 = vrot.slane %v673_v58, 7 }
  0xb2   : > { %5935 = vmatpush1.bf16.msra.mxu1 %v9560_v36  ;;  %5279 = vmatprep.subr.bf16.mxu0 %v9565_v37  ;;  %v898_v36 = vrot.slane %v743_v29, 7  ;;  %v9605_v37 = vld [vmem:[%s13658_s3 + $0x5e0] ss:$16 sps:$4 sm:$0xff]   ;;  %v9643_v58 = vld [vmem:[%s13658_s3 + $0x6a4] ss:$16 sps:$4 sm:$0xff]  }
  0xb3   : > { %5936 = vmatprep.subr.bf16.mxu1 %v9568_v38  ;;  %v703_v38 = vrot.slane %v701_v12, 4  ;;  %v748_v15 = vrot.slane %v746_v45, 5 }
  0xb4   : > { %v11364_v32 = vor.u32 %v898_v36, %v746_v45  ;;  %v9634_v45 = vld [vmem:[%s13658_s3 + $0x66c] ss:$16 sps:$4 sm:$0xff]   ;;  %v9629_v36 = vld [vmem:[%s13658_s3 + $0x660] ss:$16 sps:$4 sm:$0xff]  }
  0xb5   : > { %5280 = vmatpush1.bf16.msra.mxu0 %v9563_v39  ;;  %v706_v39 = vrot.slane %v704_v26, 5  ;;  %v749_v29 = vor.u32 %v748_v15, %v745_v14  ;;  %v9658_v14 = vld [vmem:[%s13658_s3 + $0x6ec] ss:$16 sps:$4 sm:$0xff]   ;;  %v9653_v15 = vld [vmem:[%s13658_s3 + $0x6e0] ss:$16 sps:$4 sm:$0xff]  }
  0xb6   : > { %5937 = vmatpush1.bf16.msra.mxu1 %v9566_v40  ;;  %5281 = vmatprep.subr.bf16.mxu0 %v9572_v50  ;;  %v717_v40 = vrot.slane %v715_v0, 4  ;;  %v720_v50 = vrot.slane %v718_v60, 5 }
  0xb7   : > { %5938 = vmatprep.subr.bf16.mxu1 %v9575_v41  ;;  %v9608_v41 = vld [vmem:[%s13658_s3 + $0x5e8] ss:$16 sps:$4 sm:$0xff]   ;;  %v707_v54 = vor.u32 %v706_v39, %v703_v38 }
  0xb9   : > { %5282 = vmatpush1.bf16.msra.mxu0 %v9570_v44  ;;  %v694_v44 = vrot.slane %v693_v25, 4  ;;  %v708_v6 = vrot.slane %v707_v54, 4 }
  0xba   : > { %5939 = vmatpush1.bf16.msra.mxu1 %v9573_v46  ;;  %5283 = vmatprep.subr.bf16.mxu0 %v9579_v33  ;;  %v698_v46 = vrot.slane %v696_v28, 5  ;;  %v9613_v33 = vld [vmem:[%s13658_s3 + $0x604] ss:$16 sps:$4 sm:$0xff]  }
  0xbb   : > { %5940 = vmatprep.subr.bf16.mxu1 %v9582_v47  ;;  %v11369_v47 = vld [vmem:[#allocation2 + $0x98] sm:$0xff] }
  0xbc   : > { %v699_v0 = vsel %vm11201_vm5, %v694_v44, %v698_v46  ;;  %v798_v44 = vld [vmem:[#allocation2 + $0x30] sm:$0x88] }
  0xbd   : > { %5284 = vmatpush1.bf16.msra.mxu0 %v9577_v52  ;;  %v724_v52 = vshll.u32 %v636_v35, 16  ;;  %v9631_v35 = vld [vmem:[%s13658_s3 + $0x664] ss:$16 sps:$4 sm:$0xff]  }
  0xbe   : > { %5941 = vmatpush1.bf16.msra.mxu1 %v9580_v53  ;;  %5285 = vmatprep.subr.bf16.mxu0 %v9586_v56  ;;  %v8121_v53 = vcombine.low %v11219_v22, %v11223_v23  ;;  %v721_v56 = vor.u32 %v720_v50, %v717_v40  ;;  %v9614_v22 = vld [vmem:[%s13658_s3 + $0x608] ss:$16 sps:$4 sm:$0xff]   ;;  %v9619_v23 = vld [vmem:[%s13658_s3 + $0x624] ss:$16 sps:$4 sm:$0xff]   ;;  %v740_v40 = vrot.slane %v738_v24, 5  ;;  %v750_v50 = vrot.slane %v749_v29, 4 }
  0xbf   : > { %5942 = vmatprep.subr.bf16.mxu1 %v9589_v57  ;;  %v9611_v57 = vld [vmem:[%s13658_s3 + $0x600] ss:$16 sps:$4 sm:$0xff]   ;;  %v726_v60 = vrot.slane %v724_v52, 5  ;;  %v9637_v46 = vld [vmem:[%s13658_s3 + $0x684] ss:$16 sps:$4 sm:$0xff]  }
  0xc0   : > { %v722_v2 = vrot.slane %v721_v56, 4  ;;  %v826_v56 = vshrl.u32 %v798_v44, 16  ;;  %v9670_v24 = vld [vmem:[%s13658_s3 + $0x72c] ss:$16 sps:$4 sm:$0xff]   ;;  %v9668_v29 = vld [vmem:[%s13658_s3 + $0x728] ss:$16 sps:$4 sm:$0xff]  }
  0xc1   : > { %5286 = vmatpush1.bf16.msra.mxu0 %v9584_v61  ;;  %v685_v61 = vsel %vm11201_vm5, %v680_v42, %v684_v31  ;;  %v9623_v31 = vld [vmem:[%s13658_s3 + $0x640] ss:$16 sps:$4 sm:$0xff]   ;;  %v796_v42 = vld [vmem:[#allocation2 + $0x18] sm:$0x88] }
  0xc2   : > { %5943 = vmatpush1.bf16.msra.mxu1 %v9587_v1  ;;  %5287 = vmatprep.subr.bf16.mxu0 %v9593_v3  ;;  %v729_v1 = vshrl.u32 %v11369_v47, 16  ;;  %v732_v3 = vshll.u32 %v11369_v47, 16  ;;  %v727_v25 = vsel %vm11201_vm5, %v722_v2, %v726_v60  ;;  %v813_v54 = vshrl.u32 %v796_v42, 16  ;;  %v9641_v60 = vld [vmem:[%s13658_s3 + $0x6a0] ss:$16 sps:$4 sm:$0xff]  }
  0xc3   : > { %5944 = vmatprep.subr.bf16.mxu1 %v9596_v4  ;;  %v9622_v4 = vld [vmem:[%s13658_s3 + $0x62c] ss:$16 sps:$4 sm:$0xff]   ;;  %v9691_v42 = vld [vmem:[%s13658_s3 + $0x7a4] ss:$16 sps:$4 sm:$0xff]   ;;  %v9719_v47 = vld [vmem:[%s13658_s3 + $0x840] ss:$16 sps:$4 sm:$0xff]  }
  0xc4   : > { %v731_v8 = vrot.slane %v729_v1, 4  ;;  %v9694_v44 = vld [vmem:[%s13658_s3 + $0x7ac] ss:$16 sps:$4 sm:$0xff]  }
  0xc5   : > { %5288 = vmatpush1.bf16.msra.mxu0 %v9591_v43  ;;  %v8124_v43 = vcombine.high %v685_v61, %v699_v0 }
  0xc6   : > { %5945 = vmatpush1.bf16.msra.mxu1 %v9594_v13  ;;  %5289 = vmatprep.subr.bf16.mxu0 %v9600_v18  ;;  %v734_v13 = vrot.slane %v732_v3, 5  ;;  %v640_v18 = vld [vmem:[#allocation2 + $0xb8] sm:$0x11] }
  0xc7   : > { %5946 = vmatprep.subr.bf16.mxu1 %v9603_v19  ;;  %v9625_v19 = vld [vmem:[%s13658_s3 + $0x644] ss:$16 sps:$4 sm:$0xff]  }
  0xc8   : > { %v735_v28 = vor.u32 %v734_v13, %v731_v8  ;;  %v9655_v13 = vld [vmem:[%s13658_s3 + $0x6e4] ss:$16 sps:$4 sm:$0xff]  }
  0xc9   : > { %5290 = vmatpush1.bf16.msra.mxu0 %v9598_v20  ;;  %v9628_v20 = vld [vmem:[%s13658_s3 + $0x64c] ss:$16 sps:$4 sm:$0xff]  }
  0xca   : > { %5947 = vmatpush1.bf16.msra.mxu1 %v9601_v21  ;;  %5291 = vmatprep.subr.bf16.mxu0 %v9607_v27  ;;  %v8123_v21 = vcombine.low %v685_v61, %v699_v0  ;;  %v713_v27 = vsel %vm11201_vm5, %v708_v6, %v712_v5  ;;  %v736_v39 = vrot.slane %v735_v28, 4  ;;  %v9638_v61 = vld [vmem:[%s13658_s3 + $0x688] ss:$16 sps:$4 sm:$0xff]   ;;  %v9646_v0 = vld [vmem:[%s13658_s3 + $0x6ac] ss:$16 sps:$4 sm:$0xff]   ;;  %v836_v5 = vor.u32 %v833_v49, %v676_v62 }
  0xcb   : > { %5948 = vmatprep.subr.bf16.mxu1 %v9610_v30  ;;  %v752_v30 = vshll.u32 %v640_v18, 16  ;;  %v8126_v38 = vcombine.high %v713_v27, %v727_v25  ;;  %v9647_v62 = vld [vmem:[%s13658_s3 + $0x6c0] ss:$16 sps:$4 sm:$0xff]   ;;  %v9650_v6 = vld [vmem:[%s13658_s3 + $0x6c8] ss:$16 sps:$4 sm:$0xff]  }
  0xcc   : > { %v741_v52 = vsel %vm11201_vm5, %v736_v39, %v740_v40  ;;  %v9661_v18 = vld [vmem:[%s13658_s3 + $0x704] ss:$16 sps:$4 sm:$0xff]   ;;  %v9665_v28 = vld [vmem:[%s13658_s3 + $0x720] ss:$16 sps:$4 sm:$0xff]   ;;  %v9688_v40 = vld [vmem:[%s13658_s3 + $0x78c] ss:$16 sps:$4 sm:$0xff]  }
  0xcd   : > { %5292 = vmatpush1.bf16.msra.mxu0 %v9605_v37  ;;  %v9632_v37 = vld [vmem:[%s13658_s3 + $0x668] ss:$16 sps:$4 sm:$0xff]   ;;  %v9685_v39 = vld [vmem:[%s13658_s3 + $0x784] ss:$16 sps:$4 sm:$0xff]  }
  0xce   : > { %5949 = vmatpush1.bf16.msra.mxu1 %v9608_v41  ;;  %5334 = vmatprep.subr.bf16.mxu0 %v9613_v33  ;;  %v754_v41 = vrot.slane %v752_v30, 5  ;;  %v9640_v33 = vld [vmem:[%s13658_s3 + $0x68c] ss:$16 sps:$4 sm:$0xff]   ;;  %v9673_v30 = vld [vmem:[%s13658_s3 + $0x744] ss:$16 sps:$4 sm:$0xff]  }
  0xcf   : > { %5991 = vmatprep.subr.bf16.mxu1 %v9616_v48  ;;  %v8125_v48 = vcombine.low %v713_v27, %v727_v25  ;;  %v9667_v27 = vld [vmem:[%s13658_s3 + $0x724] ss:$16 sps:$4 sm:$0xff]   ;;  %v11518_v25 = vld [vmem:[%s10785_s24 + $0x38] sm:$0xff] }
  0xd0   : > { %5294 = vmatmul.mubr.bf16.vlgmr.msra.gmra.mrb[0].mxu0 %v8121_v53  ;;  %405 = vst [vmem:[#allocation2 + $0xc8] sm:$0xff] %v11518_v25  ;;  %v802_v49 = vld [vmem:[#allocation2 + $0x60] sm:$0x88] }
  0xd1   : > { %5951 = vmatmul.mubr.bf16.vlgmr.msra.gmra.mrb[0].mxu1 %v8121_v53  ;;  %5335 = vmatpush1.bf16.msra.mxu0 %v9611_v57  ;;  %v755_v53 = vsel %vm11201_vm5, %v750_v50, %v754_v41  ;;  %v9635_v57 = vld [vmem:[%s13658_s3 + $0x680] ss:$16 sps:$4 sm:$0xff]   ;;  %v9686_v41 = vld [vmem:[%s13658_s3 + $0x788] ss:$16 sps:$4 sm:$0xff]  }
  0xd2   : > { %5992 = vmatpush1.bf16.msra.mxu1 %v9614_v22  ;;  %5336 = vmatprep.subr.bf16.mxu0 %v9619_v23  ;;  %v8128_v22 = vcombine.high %v741_v52, %v755_v53  ;;  %v8129_v23 = vrot.slane %v813_v54, 11  ;;  %v8127_v2 = vcombine.low %v741_v52, %v755_v53  ;;  %v9683_v50 = vld [vmem:[%s13658_s3 + $0x780] ss:$16 sps:$4 sm:$0xff]   ;;  %v9697_v52 = vld [vmem:[%s13658_s3 + $0x7c4] ss:$16 sps:$4 sm:$0xff]   ;;  %v859_v54 = vrot.slane %v701_v12, 7 }
  0xd3   : > { %5993 = vmatprep.subr.bf16.mxu1 %v9622_v4  ;;  %5303 = vmatprep.mubr.bf16.mxu0 %v8124_v43  ;;  %v8130_v4 = vrot.slane %v826_v56, 11  ;;  %v9700_v53 = vld [vmem:[%s13658_s3 + $0x7cc] ss:$16 sps:$4 sm:$0xff]   ;;  %v9695_v56 = vld [vmem:[%s13658_s3 + $0x7c0] ss:$16 sps:$4 sm:$0xff]  }
  0xd4   : > { %5960 = vmatprep.mubr.bf16.mxu1 %v8124_v43  ;;  %v9649_v43 = vld [vmem:[%s13658_s3 + $0x6c4] ss:$16 sps:$4 sm:$0xff]   ;;  %v11479_v7 = vsel %vm10814_vm2, %v8129_v23, %v11182_v9  ;;  %v9706_v12 = vld [vmem:[%s13658_s3 + $0x7ec] ss:$16 sps:$4 sm:$0xff]  }
  0xd5   : > { %5337 = vmatpush1.bf16.msra.mxu0 %v9617_v63  ;;  %v9644_v63 = vld [vmem:[%s13658_s3 + $0x6a8] ss:$16 sps:$4 sm:$0xff]   ;;  %v11483_v8 = vsel %vm10814_vm2, %v8130_v4, %v836_v5 }
  0xd6   : > { %5994 = vmatpush1.bf16.msra.mxu1 %v9620_v17  ;;  %5338 = vmatprep.subr.bf16.mxu0 %v9625_v19  ;;  %v8138_v9 = vcombine.high %v11479_v7, %v11483_v8  ;;  %v9656_v17 = vld [vmem:[%s13658_s3 + $0x6e8] ss:$16 sps:$4 sm:$0xff]   ;;  %v9664_v19 = vld [vmem:[%s13658_s3 + $0x70c] ss:$16 sps:$4 sm:$0xff]  }
  0xd7   : > { %5995 = vmatprep.subr.bf16.mxu1 %v9628_v20  ;;  %v9659_v20 = vld [vmem:[%s13658_s3 + $0x700] ss:$16 sps:$4 sm:$0xff]   ;;  %v804_v23 = vld [vmem:[#allocation2 + $0x78] sm:$0x88] }
  0xd8   : > { %5304 = vmatmul.mubr.bf16.gmra.mrb[4].mxu0 %v8123_v21 }
  0xd9   : > { %5961 = vmatmul.mubr.bf16.gmra.mrb[4].mxu1 %v8123_v21  ;;  %5339 = vmatpush1.bf16.msra.mxu0 %v9623_v31  ;;  %v9662_v21 = vld [vmem:[%s13658_s3 + $0x708] ss:$16 sps:$4 sm:$0xff]   ;;  %v9676_v31 = vld [vmem:[%s13658_s3 + $0x74c] ss:$16 sps:$4 sm:$0xff]  }
  0xda   : > { %5996 = vmatpush1.bf16.msra.mxu1 %v9626_v34  ;;  %5340 = vmatprep.subr.bf16.mxu0 %v9631_v35  ;;  %v9671_v34 = vld [vmem:[%s13658_s3 + $0x740] ss:$16 sps:$4 sm:$0xff]   ;;  %v9674_v35 = vld [vmem:[%s13658_s3 + $0x748] ss:$16 sps:$4 sm:$0xff]  }
  0xdb   : > { %5997 = vmatprep.subr.bf16.mxu1 %v9634_v45  ;;  %5313 = vmatprep.mubr.bf16.mxu0 %v8126_v38  ;;  %v9679_v45 = vld [vmem:[%s13658_s3 + $0x764] ss:$16 sps:$4 sm:$0xff]  }
  0xdc   : > { %5970 = vmatprep.mubr.bf16.mxu1 %v8126_v38  ;;  %v9680_v38 = vld [vmem:[%s13658_s3 + $0x768] ss:$16 sps:$4 sm:$0xff]  }
  0xdd   : > { %5341 = vmatpush1.bf16.msra.mxu0 %v9629_v36  ;;  %v9682_v36 = vld [vmem:[%s13658_s3 + $0x76c] ss:$16 sps:$4 sm:$0xff]  }
  0xde   : > { %5998 = vmatpush1.bf16.msra.mxu1 %v9632_v37  ;;  %5342 = vmatprep.subr.bf16.mxu0 %v9637_v46  ;;  %v9677_v37 = vld [vmem:[%s13658_s3 + $0x760] ss:$16 sps:$4 sm:$0xff]  }
  0xdf   : > { %5999 = vmatprep.subr.bf16.mxu1 %v9640_v33  ;;  %v9689_v46 = vld [vmem:[%s13658_s3 + $0x7a0] ss:$16 sps:$4 sm:$0xff]   ;;  %v9692_v33 = vld [vmem:[%s13658_s3 + $0x7a8] ss:$16 sps:$4 sm:$0xff]  }
  0xe0   : > { %5314 = vmatmul.mubr.bf16.gmra.mrb[8].mxu0 %v8125_v48 }
  0xe1   : > { %5971 = vmatmul.mubr.bf16.gmra.mrb[8].mxu1 %v8125_v48  ;;  %5343 = vmatpush1.bf16.msra.mxu0 %v9635_v57  ;;  %v800_v48 = vld [vmem:[#allocation2 + $0x48] sm:$0x88] }
  0xe2   : > { %6000 = vmatpush1.bf16.msra.mxu1 %v9638_v61  ;;  %5344 = vmatprep.subr.bf16.mxu0 %v9643_v58  ;;  %v839_v57 = vshrl.u32 %v800_v48, 16  ;;  %v852_v61 = vshrl.u32 %v802_v49, 16  ;;  %v9698_v58 = vld [vmem:[%s13658_s3 + $0x7c8] ss:$16 sps:$4 sm:$0xff]   ;;  %v9731_v48 = vld [vmem:[%s13658_s3 + $0x880] ss:$16 sps:$4 sm:$0xff]  }
  0xe3   : > { %6001 = vmatprep.subr.bf16.mxu1 %v9646_v0  ;;  %5323 = vmatprep.mubr.bf16.mxu0 %v8128_v22  ;;  %v9703_v0 = vld [vmem:[%s13658_s3 + $0x7e4] ss:$16 sps:$4 sm:$0xff]  }
  0xe4   : > { %5980 = vmatprep.mubr.bf16.mxu1 %v8128_v22  ;;  %v9701_v22 = vld [vmem:[%s13658_s3 + $0x7e0] ss:$16 sps:$4 sm:$0xff]   ;;  %v8131_v4 = vrot.slane %v839_v57, 11  ;;  %v8132_v5 = vrot.slane %v852_v61, 11  ;;  %v9742_v57 = vld [vmem:[%s13658_s3 + $0x8ac] ss:$16 sps:$4 sm:$0xff]  }
  0xe5   : > { %5345 = vmatpush1.bf16.msra.mxu0 %v9641_v60  ;;  %v862_v60 = vor.u32 %v859_v54, %v704_v26  ;;  %v885_v26 = vrot.slane %v729_v1, 7  ;;  %v9710_v1 = vld [vmem:[%s13658_s3 + $0x808] ss:$16 sps:$4 sm:$0xff]   ;;  %v9737_v61 = vld [vmem:[%s13658_s3 + $0x8a0] ss:$16 sps:$4 sm:$0xff]  }
  0xe6   : > { %6002 = vmatpush1.bf16.msra.mxu1 %v9644_v63  ;;  %5346 = vmatprep.subr.bf16.mxu0 %v9649_v43  ;;  %v806_v63 = vld [vmem:[#allocation2 + $0x90] sm:$0x88]  ;;  %v9704_v43 = vld [vmem:[%s13658_s3 + $0x7e8] ss:$16 sps:$4 sm:$0xff]  }
  0xe7   : > { %6003 = vmatprep.subr.bf16.mxu1 %v9652_v51  ;;  %v9709_v51 = vld [vmem:[%s13658_s3 + $0x804] ss:$16 sps:$4 sm:$0xff]   ;;  %v878_v10 = vshrl.u32 %v806_v63, 16  ;;  %v9734_v54 = vld [vmem:[%s13658_s3 + $0x888] ss:$16 sps:$4 sm:$0xff]  }
  0xe8   : > { %5324 = vmatmul.mubr.bf16.gmra.mrb[12].mxu0 %v8127_v2  ;;  %v9754_v63 = vld [vmem:[%s13658_s3 + $0x8ec] ss:$16 sps:$4 sm:$0xff]  }
  0xe9   : > { %5981 = vmatmul.mubr.bf16.gmra.mrb[12].mxu1 %v8127_v2  ;;  %5347 = vmatpush1.bf16.msra.mxu0 %v9647_v62  ;;  %v9712_v62 = vld [vmem:[%s13658_s3 + $0x80c] ss:$16 sps:$4 sm:$0xff]   ;;  %v8137_v2 = vcombine.low %v11479_v7, %v11483_v8  ;;  %v9715_v7 = vld [vmem:[%s13658_s3 + $0x824] ss:$16 sps:$4 sm:$0xff]  }
  0xea   : > { %6004 = vmatpush1.bf16.msra.mxu1 %v9650_v6  ;;  %5348 = vmatprep.subr.bf16.mxu0 %v9655_v13  ;;  %v865_v6 = vshrl.u32 %v804_v23, 16  ;;  %v9707_v13 = vld [vmem:[%s13658_s3 + $0x800] ss:$16 sps:$4 sm:$0xff]   ;;  %v9718_v8 = vld [vmem:[%s13658_s3 + $0x82c] ss:$16 sps:$4 sm:$0xff]  }
  0xeb   : > { %6005 = vmatprep.subr.bf16.mxu1 %v9658_v14  ;;  %5366 = vmatprep.mubr.bf16.mxu0 %v8138_v9  ;;  %v850_v14 = vsel %vm10814_vm2, %v8131_v4, %v11294_v55  ;;  %v9713_v55 = vld [vmem:[%s13658_s3 + $0x820] ss:$16 sps:$4 sm:$0xff]  }
  0xec   : > { %6023 = vmatprep.mubr.bf16.mxu1 %v8138_v9  ;;  %v863_v9 = vsel %vm10814_vm2, %v8132_v5, %v862_v60  ;;  %v11707_v4 = vld [vmem:[#allocation2 + $0x20] sm:$0xff]  ;;  %v9746_v5 = vld [vmem:[%s13658_s3 + $0x8c8] ss:$16 sps:$4 sm:$0xff]  }
  0xed   : > { %5349 = vmatpush1.bf16.msra.mxu0 %v9653_v15  ;;  %v9716_v15 = vld [vmem:[%s13658_s3 + $0x828] ss:$16 sps:$4 sm:$0xff]   ;;  %v9751_v60 = vld [vmem:[%s13658_s3 + $0x8e4] ss:$16 sps:$4 sm:$0xff]  }
  0xee   : > { %6006 = vmatpush1.bf16.msra.mxu1 %v9656_v17  ;;  %5350 = vmatprep.subr.bf16.mxu0 %v9661_v18  ;;  %v8140_v17 = vcombine.high %v850_v14, %v863_v9  ;;  %v8133_v18 = vrot.slane %v865_v6, 11  ;;  %v9752_v6 = vld [vmem:[%s13658_s3 + $0x8e8] ss:$16 sps:$4 sm:$0xff]  }
  0xef   : > { %6007 = vmatprep.subr.bf16.mxu1 %v9664_v19  ;;  %v8134_v19 = vrot.slane %v878_v10, 11  ;;  %v9757_v10 = vld [vmem:[%s13658_s3 + $0x904] ss:$16 sps:$4 sm:$0xff]  }
  0xf1   : > { %5351 = vmatpush1.bf16.msra.mxu0 %v9659_v20  ;;  %v888_v20 = vor.u32 %v885_v26, %v732_v3  ;;  %v8139_v3 = vcombine.low %v850_v14, %v863_v9  ;;  %v9760_v26 = vld [vmem:[%s13658_s3 + $0x90c] ss:$16 sps:$4 sm:$0xff]   ;;  %v9763_v14 = vld [vmem:[%s13658_s3 + $0x924] ss:$16 sps:$4 sm:$0xff]  }
  0xf2   : > { %6008 = vmatpush1.bf16.msra.mxu1 %v9662_v21  ;;  %5352 = vmatprep.subr.bf16.mxu0 %v9667_v27  ;;  %v808_v21 = vld [vmem:[#allocation2 + $0xa8] sm:$0x88]  ;;  %v909_v27 = vshrl.u32 %v11518_v25, 16 }
  0xf3   : > { %6009 = vmatprep.subr.bf16.mxu1 %v9670_v24  ;;  %v810_v24 = vld [vmem:[#allocation2 + $0xc0] sm:$0x88]  ;;  %v9766_v9 = vld [vmem:[%s13658_s3 + $0x92c] ss:$16 sps:$4 sm:$0xff]  }
  0xf5   : > { %5353 = vmatpush1.bf16.msra.mxu0 %v9665_v28  ;;  %v9721_v28 = vld [vmem:[%s13658_s3 + $0x844] ss:$16 sps:$4 sm:$0xff]  }
  0xf6   : > { %6010 = vmatpush1.bf16.msra.mxu1 %v9668_v29  ;;  %5354 = vmatprep.subr.bf16.mxu0 %v9673_v30  ;;  %v9724_v29 = vld [vmem:[%s13658_s3 + $0x84c] ss:$16 sps:$4 sm:$0xff]   ;;  %v876_v30 = vsel %vm10814_vm2, %v8133_v18, %v11325_v11  ;;  %v9775_v18 = vld [vmem:[%s13658_s3 + $0x964] ss:$16 sps:$4 sm:$0xff]  }
  0xf7   : > { %6011 = vmatprep.subr.bf16.mxu1 %v9676_v31  ;;  %v889_v31 = vsel %vm10814_vm2, %v8134_v19, %v888_v20  ;;  %v9730_v11 = vld [vmem:[%s13658_s3 + $0x86c] ss:$16 sps:$4 sm:$0xff]   ;;  %v9773_v20 = vld [vmem:[%s13658_s3 + $0x960] ss:$16 sps:$4 sm:$0xff]  }
  0xf8   : > { %v8141_v49 = vcombine.low %v876_v30, %v889_v31  ;;  %v9778_v19 = vld [vmem:[%s13658_s3 + $0x96c] ss:$16 sps:$4 sm:$0xff]  }
  0xf9   : > { %5355 = vmatpush1.bf16.msra.mxu0 %v9671_v34  ;;  %v891_v34 = vshrl.u32 %v808_v21, 16  ;;  %v9776_v21 = vld [vmem:[%s13658_s3 + $0x968] ss:$16 sps:$4 sm:$0xff]  }
  0xfa   : > { %6012 = vmatpush1.bf16.msra.mxu1 %v9674_v35  ;;  %5356 = vmatprep.subr.bf16.mxu0 %v9679_v45  ;;  %v904_v35 = vshrl.u32 %v810_v24, 16  ;;  %v911_v45 = vrot.slane %v909_v27, 7  ;;  %v9781_v27 = vld [vmem:[%s13658_s3 + $0x984] ss:$16 sps:$4 sm:$0xff]   ;;  %v9784_v24 = vld [vmem:[%s13658_s3 + $0x98c] ss:$16 sps:$4 sm:$0xff]  }
  0xfb   : > { %6013 = vmatprep.subr.bf16.mxu1 %v9682_v36  ;;  %v912_v36 = vshll.u32 %v11518_v25, 16 }
  0xfd   : > { %5357 = vmatpush1.bf16.msra.mxu0 %v9677_v37  ;;  %v9722_v37 = vld [vmem:[%s13658_s3 + $0x848] ss:$16 sps:$4 sm:$0xff]  }
  0xfe   : > { %6014 = vmatpush1.bf16.msra.mxu1 %v9680_v38  ;;  %5358 = vmatprep.subr.bf16.mxu0 %v9685_v39  ;;  %v9727_v38 = vld [vmem:[%s13658_s3 + $0x864] ss:$16 sps:$4 sm:$0xff]   ;;  %v8142_v39 = vcombine.high %v876_v30, %v889_v31  ;;  %v9785_v30 = vld [vmem:[%s13658_s3 + $0x9a0] ss:$16 sps:$4 sm:$0xff]   ;;  %v9788_v31 = vld [vmem:[%s13658_s3 + $0x9a8] ss:$16 sps:$4 sm:$0xff]  }
  0xff   : > { %6015 = vmatprep.subr.bf16.mxu1 %v9688_v40  ;;  %v9725_v40 = vld [vmem:[%s13658_s3 + $0x860] ss:$16 sps:$4 sm:$0xff]  }
 0x101   : > { %5359 = vmatpush1.bf16.msra.mxu0 %v9683_v50  ;;  %v9728_v50 = vld [vmem:[%s13658_s3 + $0x868] ss:$16 sps:$4 sm:$0xff]  }
 0x102   : > { %6016 = vmatpush1.bf16.msra.mxu1 %v9686_v41  ;;  %5360 = vmatprep.subr.bf16.mxu0 %v9691_v42  ;;  %v8135_v41 = vrot.slane %v891_v34, 11  ;;  %v8136_v42 = vrot.slane %v904_v35, 11  ;;  %v9793_v34 = vld [vmem:[%s13658_s3 + $0x9c4] ss:$16 sps:$4 sm:$0xff]   ;;  %v9796_v35 = vld [vmem:[%s13658_s3 + $0x9cc] ss:$16 sps:$4 sm:$0xff]  }
 0x103   : > { %6017 = vmatprep.subr.bf16.mxu1 %v9694_v44  ;;  %v914_v44 = vor.u32 %v912_v36, %v911_v45  ;;  %v9791_v45 = vld [vmem:[%s13658_s3 + $0x9c0] ss:$16 sps:$4 sm:$0xff]   ;;  %v11809_v36 = vld [vmem:[#allocation2 + $0x38] sm:$0xff] }
 0x105   : > { %5361 = vmatpush1.bf16.msra.mxu0 %v9689_v46  ;;  %v9733_v46 = vld [vmem:[%s13658_s3 + $0x884] ss:$16 sps:$4 sm:$0xff]  }
 0x106   : > { %6018 = vmatpush1.bf16.msra.mxu1 %v9692_v33  ;;  %5362 = vmatprep.subr.bf16.mxu0 %v9697_v52  ;;  %v9736_v33 = vld [vmem:[%s13658_s3 + $0x88c] ss:$16 sps:$4 sm:$0xff]   ;;  %v902_v52 = vsel %vm10814_vm2, %v8135_v41, %v11364_v32  ;;  %v1046_v41 = vshll.u32 %v11809_v36, 16 }
 0x107   : > { %6019 = vmatprep.subr.bf16.mxu1 %v9700_v53  ;;  %v915_v53 = vsel %vm10814_vm2, %v8136_v42, %v914_v44  ;;  %v9807_v44 = vld [vmem:[%s13658_s3 + $0xa04] ss:$16 sps:$4 sm:$0xff]  }
 0x108   : > { %v8144_v32 = vcombine.high %v902_v52, %v915_v53  ;;  %v8143_v23 = vcombine.low %v902_v52, %v915_v53  ;;  %v11840_v52 = vld [vmem:[#allocation2 + $0x68] sm:$0xff]  ;;  %v9805_v53 = vld [vmem:[%s13658_s3 + $0xa00] ss:$16 sps:$4 sm:$0xff]  }
 0x109   : > { %5363 = vmatpush1.bf16.msra.mxu0 %v9695_v56  ;;  %v9739_v56 = vld [vmem:[%s13658_s3 + $0x8a4] ss:$16 sps:$4 sm:$0xff]  }
 0x10a   : > { %6020 = vmatpush1.bf16.msra.mxu1 %v9698_v58  ;;  %5364 = vmatprep.subr.bf16.mxu0 %v9703_v0  ;;  %v9740_v58 = vld [vmem:[%s13658_s3 + $0x8a8] ss:$16 sps:$4 sm:$0xff]   ;;  %v9745_v0 = vld [vmem:[%s13658_s3 + $0x8c4] ss:$16 sps:$4 sm:$0xff]  }
 0x10b   : > { %6021 = vmatprep.subr.bf16.mxu1 %v9706_v12  ;;  %v9748_v12 = vld [vmem:[%s13658_s3 + $0x8cc] ss:$16 sps:$4 sm:$0xff]  }
 0x10d   : > { %5365 = vmatpush1.bf16.msra.mxu0 %v9701_v22  ;;  %v9743_v22 = vld [vmem:[%s13658_s3 + $0x8c0] ss:$16 sps:$4 sm:$0xff]  }
 0x10e   : > { %6022 = vmatpush1.bf16.msra.mxu1 %v9704_v43  ;;  %5407 = vmatprep.subr.bf16.mxu0 %v9709_v51  ;;  %v11718_v43 = vld [vmem:[#allocation2 + $0x38] sm:$0xff] }
 0x10f   : > { %6064 = vmatprep.subr.bf16.mxu1 %v9712_v62  ;;  %v8146_v51 = vcombine.high %v11707_v4, %v11718_v43  ;;  %v9749_v62 = vld [vmem:[%s13658_s3 + $0x8e0] ss:$16 sps:$4 sm:$0xff]  }
 0x110   : > { %5367 = vmatmul.mubr.bf16.vlgmr.msra.gmra.mrb[0].mxu0 %v8137_v2 }
 0x111   : > { %6024 = vmatmul.mubr.bf16.vlgmr.msra.gmra.mrb[0].mxu1 %v8137_v2  ;;  %5408 = vmatpush1.bf16.msra.mxu0 %v9707_v13  ;;  %v9755_v2 = vld [vmem:[%s13658_s3 + $0x900] ss:$16 sps:$4 sm:$0xff]   ;;  %v9758_v13 = vld [vmem:[%s13658_s3 + $0x908] ss:$16 sps:$4 sm:$0xff]  }
 0x112   : > { %6065 = vmatpush1.bf16.msra.mxu1 %v9710_v1  ;;  %5409 = vmatprep.subr.bf16.mxu0 %v9715_v7  ;;  %v9761_v1 = vld [vmem:[%s13658_s3 + $0x920] ss:$16 sps:$4 sm:$0xff]   ;;  %v9764_v7 = vld [vmem:[%s13658_s3 + $0x928] ss:$16 sps:$4 sm:$0xff]  }
 0x113   : > { %6066 = vmatprep.subr.bf16.mxu1 %v9718_v8  ;;  %5376 = vmatprep.mubr.bf16.mxu0 %v8140_v17  ;;  %v9769_v8 = vld [vmem:[%s13658_s3 + $0x944] ss:$16 sps:$4 sm:$0xff]  }
 0x114   : > { %6033 = vmatprep.mubr.bf16.mxu1 %v8140_v17  ;;  %v9770_v17 = vld [vmem:[%s13658_s3 + $0x948] ss:$16 sps:$4 sm:$0xff]  }
 0x115   : > { %5410 = vmatpush1.bf16.msra.mxu0 %v9713_v55  ;;  %v9772_v55 = vld [vmem:[%s13658_s3 + $0x94c] ss:$16 sps:$4 sm:$0xff]  }
 0x116   : > { %6067 = vmatpush1.bf16.msra.mxu1 %v9716_v15  ;;  %5411 = vmatprep.subr.bf16.mxu0 %v9721_v28  ;;  %v9767_v15 = vld [vmem:[%s13658_s3 + $0x940] ss:$16 sps:$4 sm:$0xff]  }
 0x117   : > { %6068 = vmatprep.subr.bf16.mxu1 %v9724_v29  ;;  %v9779_v28 = vld [vmem:[%s13658_s3 + $0x980] ss:$16 sps:$4 sm:$0xff]   ;;  %v9782_v29 = vld [vmem:[%s13658_s3 + $0x988] ss:$16 sps:$4 sm:$0xff]  }
 0x118   : > { %5377 = vmatmul.mubr.bf16.gmra.mrb[4].mxu0 %v8139_v3 }
 0x119   : > { %6034 = vmatmul.mubr.bf16.gmra.mrb[4].mxu1 %v8139_v3  ;;  %5412 = vmatpush1.bf16.msra.mxu0 %v9719_v47  ;;  %v9787_v47 = vld [vmem:[%s13658_s3 + $0x9a4] ss:$16 sps:$4 sm:$0xff]   ;;  %v9790_v3 = vld [vmem:[%s13658_s3 + $0x9ac] ss:$16 sps:$4 sm:$0xff]  }
 0x11a   : > { %6069 = vmatpush1.bf16.msra.mxu1 %v9722_v37  ;;  %5413 = vmatprep.subr.bf16.mxu0 %v9727_v38  ;;  %v9794_v37 = vld [vmem:[%s13658_s3 + $0x9c8] ss:$16 sps:$4 sm:$0xff]   ;;  %v9799_v38 = vld [vmem:[%s13658_s3 + $0x9e4] ss:$16 sps:$4 sm:$0xff]  }
 0x11b   : > { %6070 = vmatprep.subr.bf16.mxu1 %v9730_v11  ;;  %5386 = vmatprep.mubr.bf16.mxu0 %v8142_v39  ;;  %v9802_v11 = vld [vmem:[%s13658_s3 + $0x9ec] ss:$16 sps:$4 sm:$0xff]  }
 0x11c   : > { %6043 = vmatprep.mubr.bf16.mxu1 %v8142_v39  ;;  %v1043_v39 = vshrl.u32 %v11809_v36, 16  ;;  %v9843_v36 = vld [vmem:[%s13658_s3 + $0xac4] ss:$16 sps:$4 sm:$0xff]  }
 0x11d   : > { %5414 = vmatpush1.bf16.msra.mxu0 %v9725_v40  ;;  %v9797_v40 = vld [vmem:[%s13658_s3 + $0x9e0] ss:$16 sps:$4 sm:$0xff]  }
 0x11e   : > { %6071 = vmatpush1.bf16.msra.mxu1 %v9728_v50  ;;  %5415 = vmatprep.subr.bf16.mxu0 %v9733_v46  ;;  %v9800_v50 = vld [vmem:[%s13658_s3 + $0x9e8] ss:$16 sps:$4 sm:$0xff]   ;;  %v1205_v42 = vrot.slane %v1043_v39, 7  ;;  %v9810_v46 = vld [vmem:[%s13658_s3 + $0xa0c] ss:$16 sps:$4 sm:$0xff]  }
 0x11f   : > { %6072 = vmatprep.subr.bf16.mxu1 %v9736_v33  ;;  %v11834_v33 = vld [vmem:[#allocation2 + $0x50] sm:$0xff] }
 0x120   : > { %5387 = vmatmul.mubr.bf16.gmra.mrb[8].mxu0 %v8141_v49 }
 0x121   : > { %6044 = vmatmul.mubr.bf16.gmra.mrb[8].mxu1 %v8141_v49  ;;  %5416 = vmatpush1.bf16.msra.mxu0 %v9731_v48  ;;  %v11836_v48 = vor.u32 %v1205_v42, %v1046_v41  ;;  %v8145_v49 = vcombine.low %v11707_v4, %v11718_v43  ;;  %v9820_v43 = vld [vmem:[%s13658_s3 + $0xa48] ss:$16 sps:$4 sm:$0xff]  }
 0x122   : > { %6073 = vmatpush1.bf16.msra.mxu1 %v9734_v54  ;;  %5417 = vmatprep.subr.bf16.mxu0 %v9739_v56  ;;  %v9808_v54 = vld [vmem:[%s13658_s3 + $0xa08] ss:$16 sps:$4 sm:$0xff]   ;;  %v9813_v56 = vld [vmem:[%s13658_s3 + $0xa24] ss:$16 sps:$4 sm:$0xff]  }
 0x123   : > { %6074 = vmatprep.subr.bf16.mxu1 %v9742_v57  ;;  %5396 = vmatprep.mubr.bf16.mxu0 %v8144_v32  ;;  %v9816_v57 = vld [vmem:[%s13658_s3 + $0xa2c] ss:$16 sps:$4 sm:$0xff]  }
 0x124   : > { %6053 = vmatprep.mubr.bf16.mxu1 %v8144_v32  ;;  %v8148_v32 = vcombine.high %v11834_v33, %v11840_v52 }
 0x125   : > { %5418 = vmatpush1.bf16.msra.mxu0 %v9737_v61  ;;  %v9811_v61 = vld [vmem:[%s13658_s3 + $0xa20] ss:$16 sps:$4 sm:$0xff]  }
 0x126   : > { %6075 = vmatpush1.bf16.msra.mxu1 %v9740_v58  ;;  %5419 = vmatprep.subr.bf16.mxu0 %v9745_v0  ;;  %v9814_v58 = vld [vmem:[%s13658_s3 + $0xa28] ss:$16 sps:$4 sm:$0xff]   ;;  %v9819_v0 = vld [vmem:[%s13658_s3 + $0xa44] ss:$16 sps:$4 sm:$0xff]  }
 0x127   : > { %6076 = vmatprep.subr.bf16.mxu1 %v9748_v12  ;;  %v9822_v12 = vld [vmem:[%s13658_s3 + $0xa4c] ss:$16 sps:$4 sm:$0xff]  }
 0x128   : > { %5397 = vmatmul.mubr.bf16.gmra.mrb[12].mxu0 %v8143_v23 }
 0x129   : > { %6054 = vmatmul.mubr.bf16.gmra.mrb[12].mxu1 %v8143_v23  ;;  %5420 = vmatpush1.bf16.msra.mxu0 %v9743_v22  ;;  %v1029_v22 = vshrl.u32 %v11707_v4, 16  ;;  %v1032_v23 = vshll.u32 %v11707_v4, 16  ;;  %v9825_v4 = vld [vmem:[%s13658_s3 + $0xa64] ss:$16 sps:$4 sm:$0xff]  }
 0x12a   : > { %6077 = vmatpush1.bf16.msra.mxu1 %v9746_v5  ;;  %5421 = vmatprep.subr.bf16.mxu0 %v9751_v60  ;;  %v9817_v5 = vld [vmem:[%s13658_s3 + $0xa40] ss:$16 sps:$4 sm:$0xff]   ;;  %v8147_v60 = vcombine.low %v11834_v33, %v11840_v52 }
 0x12b   : > { %6078 = vmatprep.subr.bf16.mxu1 %v9754_v63  ;;  %5439 = vmatprep.mubr.bf16.mxu0 %v8146_v51  ;;  %v11875_v63 = vld [vmem:[#allocation2 + $0x80] sm:$0xff] }
 0x12c   : > { %6096 = vmatprep.mubr.bf16.mxu1 %v8146_v51  ;;  %v9828_v51 = vld [vmem:[%s13658_s3 + $0xa6c] ss:$16 sps:$4 sm:$0xff]  }
 0x12d   : > { %5422 = vmatpush1.bf16.msra.mxu0 %v9749_v62  ;;  %v9823_v62 = vld [vmem:[%s13658_s3 + $0xa60] ss:$16 sps:$4 sm:$0xff]  }
 0x12e   : > { %6079 = vmatpush1.bf16.msra.mxu1 %v9752_v6  ;;  %5423 = vmatprep.subr.bf16.mxu0 %v9757_v10  ;;  %v9826_v6 = vld [vmem:[%s13658_s3 + $0xa68] ss:$16 sps:$4 sm:$0xff]  }
 0x12f   : > { %6080 = vmatprep.subr.bf16.mxu1 %v9760_v26  ;;  %v10457_v10 = vld [vmem:[#allocation2 + $0x98] sm:$0xff] }
 0x130   : > { %v8150_v26 = vcombine.high %v11875_v63, %v10457_v10 }
 0x131   : > { %5424 = vmatpush1.bf16.msra.mxu0 %v9755_v2  ;;  %v1031_v2 = vrot.slane %v1029_v22, 4  ;;  %v11988_v22 = vld [vmem:[#allocation2 + $0x98] sm:$0xff] }
 0x132   : > { %6081 = vmatpush1.bf16.msra.mxu1 %v9758_v13  ;;  %5425 = vmatprep.subr.bf16.mxu0 %v9763_v14  ;;  %v1034_v13 = vrot.slane %v1032_v23, 5  ;;  %v1013_v14 = vld [vmem:[#allocation2 + $0x28] sm:$0x11]  ;;  %v9866_v23 = vld [vmem:[%s13658_s3 + $0xb40] ss:$16 sps:$4 sm:$0xff]  }
 0x133   : > { %6082 = vmatprep.subr.bf16.mxu1 %v9766_v9  ;;  %v1045_v9 = vrot.slane %v1043_v39, 4 }
 0x135   : > { %5426 = vmatpush1.bf16.msra.mxu0 %v9761_v1  ;;  %v1048_v1 = vrot.slane %v1046_v41, 5  ;;  %v9852_v41 = vld [vmem:[%s13658_s3 + $0xaec] ss:$16 sps:$4 sm:$0xff]  }
 0x136   : > { %6083 = vmatpush1.bf16.msra.mxu1 %v9764_v7  ;;  %5427 = vmatprep.subr.bf16.mxu0 %v9769_v8  ;;  %v1015_v7 = vld [vmem:[#allocation2 + $0x40] sm:$0x11] }
 0x137   : > { %6084 = vmatprep.subr.bf16.mxu1 %v9772_v55  ;;  %v9831_v8 = vld [vmem:[%s13658_s3 + $0xa84] ss:$16 sps:$4 sm:$0xff]   ;;  %v9834_v55 = vld [vmem:[%s13658_s3 + $0xa8c] ss:$16 sps:$4 sm:$0xff]  }
 0x139   : > { %5428 = vmatpush1.bf16.msra.mxu0 %v9767_v15  ;;  %v9829_v15 = vld [vmem:[%s13658_s3 + $0xa80] ss:$16 sps:$4 sm:$0xff]  }
 0x13a   : > { %6085 = vmatpush1.bf16.msra.mxu1 %v9770_v17  ;;  %5429 = vmatprep.subr.bf16.mxu0 %v9775_v18  ;;  %v1035_v17 = vor.u32 %v1034_v13, %v1031_v2  ;;  %v8149_v18 = vcombine.low %v11875_v63, %v10457_v10  ;;  %v1102_v10 = vshll.u32 %v11988_v22, 16  ;;  %v9885_v2 = vld [vmem:[%s13658_s3 + $0xb8c] ss:$16 sps:$4 sm:$0xff]   ;;  %v1057_v13 = vshrl.u32 %v11834_v33, 16 }
 0x13b   : > { %6086 = vmatprep.subr.bf16.mxu1 %v9778_v19  ;;  %v11903_v19 = vld [vmem:[#allocation2 + $0xb0] sm:$0xff] }
 0x13d   : > { %5430 = vmatpush1.bf16.msra.mxu0 %v9773_v20  ;;  %v1038_v20 = vshll.u32 %v1013_v14, 16  ;;  %v1060_v14 = vshll.u32 %v11834_v33, 16  ;;  %v9946_v33 = vld [vmem:[%s13658_s3 + $0xccc] ss:$16 sps:$4 sm:$0xff]  }
 0x13e   : > { %6087 = vmatpush1.bf16.msra.mxu1 %v9776_v21  ;;  %5431 = vmatprep.subr.bf16.mxu0 %v9781_v27  ;;  %v1049_v21 = vor.u32 %v1048_v1, %v1045_v9  ;;  %v1052_v27 = vshll.u32 %v1015_v7, 16  ;;  %v12020_v9 = vld [vmem:[#allocation2 + $0xc8] sm:$0xff]  ;;  %v9880_v1 = vld [vmem:[%s13658_s3 + $0xb80] ss:$16 sps:$4 sm:$0xff]   ;;  %v1071_v7 = vshrl.u32 %v11840_v52, 16 }
 0x13f   : > { %6088 = vmatprep.subr.bf16.mxu1 %v9784_v24  ;;  %v9832_v24 = vld [vmem:[%s13658_s3 + $0xa88] ss:$16 sps:$4 sm:$0xff]  }
 0x141   : > { %5432 = vmatpush1.bf16.msra.mxu0 %v9779_v28  ;;  %v9837_v28 = vld [vmem:[%s13658_s3 + $0xaa4] ss:$16 sps:$4 sm:$0xff]  }
 0x142   : > { %6089 = vmatpush1.bf16.msra.mxu1 %v9782_v29  ;;  %5433 = vmatprep.subr.bf16.mxu0 %v9787_v47  ;;  %v9840_v29 = vld [vmem:[%s13658_s3 + $0xaac] ss:$16 sps:$4 sm:$0xff]   ;;  %v9835_v47 = vld [vmem:[%s13658_s3 + $0xaa0] ss:$16 sps:$4 sm:$0xff]  }
 0x143   : > { %6090 = vmatprep.subr.bf16.mxu1 %v9790_v3  ;;  %v8152_v3 = vcombine.high %v11903_v19, %v11518_v25 }
 0x145   : > { %5434 = vmatpush1.bf16.msra.mxu0 %v9785_v30  ;;  %v1036_v30 = vrot.slane %v1035_v17, 4  ;;  %v9889_v17 = vld [vmem:[%s13658_s3 + $0xba4] ss:$16 sps:$4 sm:$0xff]  }
 0x146   : > { %6091 = vmatpush1.bf16.msra.mxu1 %v9788_v31  ;;  %5435 = vmatprep.subr.bf16.mxu0 %v9793_v34  ;;  %v1040_v31 = vrot.slane %v1038_v20, 5  ;;  %v1050_v34 = vrot.slane %v1049_v21, 4  ;;  %v1062_v20 = vrot.slane %v1060_v14, 5  ;;  %v9887_v21 = vld [vmem:[%s13658_s3 + $0xba0] ss:$16 sps:$4 sm:$0xff]  }
 0x147   : > { %6092 = vmatprep.subr.bf16.mxu1 %v9796_v35  ;;  %v1054_v35 = vrot.slane %v1052_v27, 5  ;;  %v1073_v27 = vrot.slane %v1071_v7, 4 }
 0x148   : > { %v11935_v39 = vsel %vm11201_vm5, %v1036_v30, %v1040_v31  ;;  %v1085_v30 = vshrl.u32 %v11875_v63, 16  ;;  %v1130_v31 = vshll.u32 %v12020_v9, 16 }
 0x149   : > { %5436 = vmatpush1.bf16.msra.mxu0 %v9791_v45  ;;  %v9838_v45 = vld [vmem:[%s13658_s3 + $0xaa8] ss:$16 sps:$4 sm:$0xff]  }
 0x14a   : > { %6093 = vmatpush1.bf16.msra.mxu1 %v9794_v37  ;;  %5437 = vmatprep.subr.bf16.mxu0 %v9799_v38  ;;  %v9846_v37 = vld [vmem:[%s13658_s3 + $0xacc] ss:$16 sps:$4 sm:$0xff]   ;;  %v9841_v38 = vld [vmem:[%s13658_s3 + $0xac0] ss:$16 sps:$4 sm:$0xff]  }
 0x14b   : > { %6094 = vmatprep.subr.bf16.mxu1 %v9802_v11  ;;  %v8151_v11 = vcombine.low %v11903_v19, %v11518_v25  ;;  %v9849_v25 = vld [vmem:[%s13658_s3 + $0xae4] ss:$16 sps:$4 sm:$0xff]  }
 0x14d   : > { %5438 = vmatpush1.bf16.msra.mxu0 %v9797_v40  ;;  %v11939_v40 = vsel %vm11201_vm5, %v1050_v34, %v1054_v35  ;;  %v9895_v35 = vld [vmem:[%s13658_s3 + $0xbc4] ss:$16 sps:$4 sm:$0xff]  }
 0x14e   : > { %6095 = vmatpush1.bf16.msra.mxu1 %v9800_v50  ;;  %5480 = vmatprep.subr.bf16.mxu0 %v9807_v44  ;;  %v9844_v50 = vld [vmem:[%s13658_s3 + $0xac8] ss:$16 sps:$4 sm:$0xff]   ;;  %v8154_v42 = vcombine.high %v11935_v39, %v11939_v40  ;;  %v9847_v44 = vld [vmem:[%s13658_s3 + $0xae0] ss:$16 sps:$4 sm:$0xff]  }
 0x14f   : > { %6137 = vmatprep.subr.bf16.mxu1 %v9810_v46  ;;  %v9850_v46 = vld [vmem:[%s13658_s3 + $0xae8] ss:$16 sps:$4 sm:$0xff]  }
 0x150   : > { %5440 = vmatmul.mubr.bf16.vlgmr.msra.gmra.mrb[0].mxu0 %v8145_v49 }
 0x151   : > { %6097 = vmatmul.mubr.bf16.vlgmr.msra.gmra.mrb[0].mxu1 %v8145_v49  ;;  %5481 = vmatpush1.bf16.msra.mxu0 %v9805_v53  ;;  %v9855_v49 = vld [vmem:[%s13658_s3 + $0xb04] ss:$16 sps:$4 sm:$0xff]   ;;  %v9858_v53 = vld [vmem:[%s13658_s3 + $0xb0c] ss:$16 sps:$4 sm:$0xff]  }
 0x152   : > { %6138 = vmatpush1.bf16.msra.mxu1 %v9808_v54  ;;  %5482 = vmatprep.subr.bf16.mxu0 %v9813_v56  ;;  %v9853_v54 = vld [vmem:[%s13658_s3 + $0xb00] ss:$16 sps:$4 sm:$0xff]   ;;  %v9856_v56 = vld [vmem:[%s13658_s3 + $0xb08] ss:$16 sps:$4 sm:$0xff]  }
 0x153   : > { %6139 = vmatprep.subr.bf16.mxu1 %v9816_v57  ;;  %5449 = vmatprep.mubr.bf16.mxu0 %v8148_v32  ;;  %v9861_v57 = vld [vmem:[%s13658_s3 + $0xb24] ss:$16 sps:$4 sm:$0xff]  }
 0x154   : > { %6106 = vmatprep.mubr.bf16.mxu1 %v8148_v32  ;;  %v9864_v32 = vld [vmem:[%s13658_s3 + $0xb2c] ss:$16 sps:$4 sm:$0xff]  }
 0x155   : > { %5483 = vmatpush1.bf16.msra.mxu0 %v9811_v61  ;;  %v9859_v61 = vld [vmem:[%s13658_s3 + $0xb20] ss:$16 sps:$4 sm:$0xff]  }
 0x156   : > { %6140 = vmatpush1.bf16.msra.mxu1 %v9814_v58  ;;  %5484 = vmatprep.subr.bf16.mxu0 %v9819_v0  ;;  %v9862_v58 = vld [vmem:[%s13658_s3 + $0xb28] ss:$16 sps:$4 sm:$0xff]   ;;  %v9868_v0 = vld [vmem:[%s13658_s3 + $0xb44] ss:$16 sps:$4 sm:$0xff]  }
 0x157   : > { %6141 = vmatprep.subr.bf16.mxu1 %v9822_v12  ;;  %v9871_v12 = vld [vmem:[%s13658_s3 + $0xb4c] ss:$16 sps:$4 sm:$0xff]  }
 0x158   : > { %5450 = vmatmul.mubr.bf16.gmra.mrb[4].mxu0 %v8147_v60 }
 0x159   : > { %6107 = vmatmul.mubr.bf16.gmra.mrb[4].mxu1 %v8147_v60  ;;  %5485 = vmatpush1.bf16.msra.mxu0 %v9817_v5  ;;  %v9869_v5 = vld [vmem:[%s13658_s3 + $0xb48] ss:$16 sps:$4 sm:$0xff]   ;;  %v9875_v60 = vld [vmem:[%s13658_s3 + $0xb64] ss:$16 sps:$4 sm:$0xff]  }
 0x15a   : > { %6142 = vmatpush1.bf16.msra.mxu1 %v9820_v43  ;;  %5486 = vmatprep.subr.bf16.mxu0 %v9825_v4  ;;  %v9878_v43 = vld [vmem:[%s13658_s3 + $0xb6c] ss:$16 sps:$4 sm:$0xff]   ;;  %v1099_v4 = vshrl.u32 %v11988_v22, 16 }
 0x15b   : > { %6143 = vmatprep.subr.bf16.mxu1 %v9828_v51  ;;  %5459 = vmatprep.mubr.bf16.mxu0 %v8150_v26  ;;  %v9873_v51 = vld [vmem:[%s13658_s3 + $0xb60] ss:$16 sps:$4 sm:$0xff]   ;;  %v9910_v22 = vld [vmem:[%s13658_s3 + $0xc0c] ss:$16 sps:$4 sm:$0xff]  }
 0x15c   : > { %6116 = vmatprep.mubr.bf16.mxu1 %v8150_v26  ;;  %v1257_v26 = vrot.slane %v1099_v4, 7 }
 0x15d   : > { %5487 = vmatpush1.bf16.msra.mxu0 %v9823_v62  ;;  %v9876_v62 = vld [vmem:[%s13658_s3 + $0xb68] ss:$16 sps:$4 sm:$0xff]  }
 0x15e   : > { %6144 = vmatpush1.bf16.msra.mxu1 %v9826_v6  ;;  %5488 = vmatprep.subr.bf16.mxu0 %v9831_v8  ;;  %v9882_v6 = vld [vmem:[%s13658_s3 + $0xb84] ss:$16 sps:$4 sm:$0xff]   ;;  %v1074_v8 = vshll.u32 %v11840_v52, 16  ;;  %v1059_v52 = vrot.slane %v1057_v13, 4 }
 0x15f   : > { %6145 = vmatprep.subr.bf16.mxu1 %v9834_v55  ;;  %v12027_v55 = vor.u32 %v1257_v26, %v1102_v10 }
 0x160   : > { %5460 = vmatmul.mubr.bf16.gmra.mrb[8].mxu0 %v8149_v18 }
 0x161   : > { %6117 = vmatmul.mubr.bf16.gmra.mrb[8].mxu1 %v8149_v18  ;;  %5489 = vmatpush1.bf16.msra.mxu0 %v9829_v15  ;;  %v9883_v15 = vld [vmem:[%s13658_s3 + $0xb88] ss:$16 sps:$4 sm:$0xff]   ;;  %v9892_v18 = vld [vmem:[%s13658_s3 + $0xbac] ss:$16 sps:$4 sm:$0xff]  }
 0x162   : > { %6146 = vmatpush1.bf16.msra.mxu1 %v9832_v24  ;;  %5490 = vmatprep.subr.bf16.mxu0 %v9837_v28  ;;  %v1076_v24 = vrot.slane %v1074_v8, 5  ;;  %v1127_v28 = vshrl.u32 %v12020_v9, 16 }
 0x163   : > { %6147 = vmatprep.subr.bf16.mxu1 %v9840_v29  ;;  %5469 = vmatprep.mubr.bf16.mxu0 %v8152_v3  ;;  %v9890_v29 = vld [vmem:[%s13658_s3 + $0xba8] ss:$16 sps:$4 sm:$0xff]  }
 0x164   : > { %6126 = vmatprep.mubr.bf16.mxu1 %v8152_v3  ;;  %v1019_v3 = vld [vmem:[#allocation2 + $0x70] sm:$0x11]  ;;  %v1283_v34 = vrot.slane %v1127_v28, 7 }
 0x165   : > { %5491 = vmatpush1.bf16.msra.mxu0 %v9835_v47  ;;  %v1017_v47 = vld [vmem:[#allocation2 + $0x58] sm:$0x11] }
 0x166   : > { %6148 = vmatpush1.bf16.msra.mxu1 %v9838_v45  ;;  %5492 = vmatprep.subr.bf16.mxu0 %v9843_v36  ;;  %v9898_v45 = vld [vmem:[%s13658_s3 + $0xbcc] ss:$16 sps:$4 sm:$0xff]   ;;  %v1088_v36 = vshll.u32 %v11875_v63, 16  ;;  %v9901_v63 = vld [vmem:[%s13658_s3 + $0xbe4] ss:$16 sps:$4 sm:$0xff]  }
 0x167   : > { %6149 = vmatprep.subr.bf16.mxu1 %v9846_v37  ;;  %v9893_v37 = vld [vmem:[%s13658_s3 + $0xbc0] ss:$16 sps:$4 sm:$0xff]  }
 0x168   : > { %5470 = vmatmul.mubr.bf16.gmra.mrb[12].mxu0 %v8151_v11 }
 0x169   : > { %6127 = vmatmul.mubr.bf16.gmra.mrb[12].mxu1 %v8151_v11  ;;  %5493 = vmatpush1.bf16.msra.mxu0 %v9841_v38  ;;  %v9896_v38 = vld [vmem:[%s13658_s3 + $0xbc8] ss:$16 sps:$4 sm:$0xff]   ;;  %v1063_v11 = vor.u32 %v1062_v20, %v1059_v52 }
 0x16a   : > { %6150 = vmatpush1.bf16.msra.mxu1 %v9844_v50  ;;  %5494 = vmatprep.subr.bf16.mxu0 %v9849_v25  ;;  %v1066_v50 = vshll.u32 %v1017_v47, 16  ;;  %v1077_v25 = vor.u32 %v1076_v24, %v1073_v27  ;;  %v1129_v24 = vrot.slane %v1127_v28, 4  ;;  %v1025_v47 = vld [vmem:[#allocation2 + $0xb8] sm:$0x11] }
 0x16b   : > { %6151 = vmatprep.subr.bf16.mxu1 %v9852_v41  ;;  %5512 = vmatprep.mubr.bf16.mxu0 %v8154_v42  ;;  %v12068_v41 = vor.u32 %v1283_v34, %v1130_v31  ;;  %v9922_v34 = vld [vmem:[%s13658_s3 + $0xc4c] ss:$16 sps:$4 sm:$0xff]  }
 0x16c   : > { %6169 = vmatprep.mubr.bf16.mxu1 %v8154_v42  ;;  %v1080_v42 = vshll.u32 %v1019_v3, 16  ;;  %v1027_v3 = vld [vmem:[#allocation2 + $0xd0] sm:$0x11] }
 0x16d   : > { %5495 = vmatpush1.bf16.msra.mxu0 %v9847_v44  ;;  %v9904_v44 = vld [vmem:[%s13658_s3 + $0xbec] ss:$16 sps:$4 sm:$0xff]  }
 0x16e   : > { %6152 = vmatpush1.bf16.msra.mxu1 %v9850_v46  ;;  %5496 = vmatprep.subr.bf16.mxu0 %v9855_v49  ;;  %v1087_v46 = vrot.slane %v1085_v30, 4  ;;  %v1021_v49 = vld [vmem:[#allocation2 + $0x88] sm:$0x11]  ;;  %v9919_v30 = vld [vmem:[%s13658_s3 + $0xc44] ss:$16 sps:$4 sm:$0xff]  }
 0x16f   : > { %6153 = vmatprep.subr.bf16.mxu1 %v9858_v53  ;;  %v1023_v53 = vld [vmem:[#allocation2 + $0xa0] sm:$0x11] }
 0x171   : > { %5497 = vmatpush1.bf16.msra.mxu0 %v9853_v54  ;;  %v1090_v54 = vrot.slane %v1088_v36, 5 }
 0x172   : > { %6154 = vmatpush1.bf16.msra.mxu1 %v9856_v56  ;;  %5498 = vmatprep.subr.bf16.mxu0 %v9861_v57  ;;  %v1064_v56 = vrot.slane %v1063_v11, 4  ;;  %v1068_v57 = vrot.slane %v1066_v50, 5  ;;  %v9920_v11 = vld [vmem:[%s13658_s3 + $0xc48] ss:$16 sps:$4 sm:$0xff]   ;;  %v9925_v50 = vld [vmem:[%s13658_s3 + $0xc64] ss:$16 sps:$4 sm:$0xff]  }
 0x173   : > { %6155 = vmatprep.subr.bf16.mxu1 %v9864_v32  ;;  %v1078_v32 = vrot.slane %v1077_v25, 4  ;;  %v9928_v25 = vld [vmem:[%s13658_s3 + $0xc6c] ss:$16 sps:$4 sm:$0xff]  }
 0x175   : > { %5499 = vmatpush1.bf16.msra.mxu0 %v9859_v61  ;;  %v1082_v61 = vrot.slane %v1080_v42, 5  ;;  %v9923_v42 = vld [vmem:[%s13658_s3 + $0xc60] ss:$16 sps:$4 sm:$0xff]  }
 0x176   : > { %6156 = vmatpush1.bf16.msra.mxu1 %v9862_v58  ;;  %5500 = vmatprep.subr.bf16.mxu0 %v9868_v0  ;;  %v1101_v58 = vrot.slane %v1099_v4, 4  ;;  %v1104_v0 = vrot.slane %v1102_v10, 5  ;;  %v1094_v4 = vshll.u32 %v1021_v49, 16  ;;  %v1069_v10 = vsel %vm11201_vm5, %v1064_v56, %v1068_v57  ;;  %v1181_v56 = vld [vmem:[#allocation2 + $0x30] sm:$0x88] }
 0x177   : > { %6157 = vmatprep.subr.bf16.mxu1 %v9871_v12  ;;  %v9899_v12 = vld [vmem:[%s13658_s3 + $0xbe0] ss:$16 sps:$4 sm:$0xff]   ;;  %v1083_v26 = vsel %vm11201_vm5, %v1078_v32, %v1082_v61  ;;  %v1183_v57 = vld [vmem:[#allocation2 + $0x48] sm:$0x88]  ;;  %v9931_v32 = vld [vmem:[%s13658_s3 + $0xc84] ss:$16 sps:$4 sm:$0xff]  }
 0x178   : > { %v1096_v52 = vrot.slane %v1094_v4, 5  ;;  %v8155_v28 = vcombine.low %v1069_v10, %v1083_v26  ;;  %v9934_v61 = vld [vmem:[%s13658_s3 + $0xc8c] ss:$16 sps:$4 sm:$0xff]  }
 0x179   : > { %5501 = vmatpush1.bf16.msra.mxu0 %v9866_v23  ;;  %v9902_v23 = vld [vmem:[%s13658_s3 + $0xbe8] ss:$16 sps:$4 sm:$0xff]   ;;  %v9940_v4 = vld [vmem:[%s13658_s3 + $0xcac] ss:$16 sps:$4 sm:$0xff]  }
 0x17a   : > { %6158 = vmatpush1.bf16.msra.mxu1 %v9869_v5  ;;  %5502 = vmatprep.subr.bf16.mxu0 %v9875_v60  ;;  %v9907_v5 = vld [vmem:[%s13658_s3 + $0xc04] ss:$16 sps:$4 sm:$0xff]   ;;  %v1091_v60 = vor.u32 %v1090_v54, %v1087_v46 }
 0x17b   : > { %6159 = vmatprep.subr.bf16.mxu1 %v9878_v43  ;;  %v1113_v43 = vshrl.u32 %v11903_v19, 16 }
 0x17c   : > { %v1092_v7 = vrot.slane %v1091_v60, 4  ;;  %v9929_v60 = vld [vmem:[%s13658_s3 + $0xc80] ss:$16 sps:$4 sm:$0xff]  }
 0x17d   : > { %5503 = vmatpush1.bf16.msra.mxu0 %v9873_v51  ;;  %v1108_v51 = vshll.u32 %v1023_v53, 16  ;;  %v1115_v8 = vrot.slane %v1113_v43, 4  ;;  %v9932_v43 = vld [vmem:[%s13658_s3 + $0xc88] ss:$16 sps:$4 sm:$0xff]  }
 0x17e   : > { %6160 = vmatpush1.bf16.msra.mxu1 %v9876_v62  ;;  %5504 = vmatprep.subr.bf16.mxu0 %v9882_v6  ;;  %v1116_v62 = vshll.u32 %v11903_v19, 16  ;;  %v8153_v6 = vcombine.low %v11935_v39, %v11939_v40  ;;  %v9908_v19 = vld [vmem:[%s13658_s3 + $0xc08] ss:$16 sps:$4 sm:$0xff]   ;;  %v9913_v39 = vld [vmem:[%s13658_s3 + $0xc24] ss:$16 sps:$4 sm:$0xff]   ;;  %v1097_v9 = vsel %vm11201_vm5, %v1092_v7, %v1096_v52 }
 0x17f   : > { %6161 = vmatprep.subr.bf16.mxu1 %v9885_v2  ;;  %v1105_v2 = vor.u32 %v1104_v0, %v1101_v58  ;;  %v9916_v40 = vld [vmem:[%s13658_s3 + $0xc2c] ss:$16 sps:$4 sm:$0xff]   ;;  %v1110_v20 = vrot.slane %v1108_v51, 5  ;;  %v1218_v0 = vrot.slane %v1057_v13, 7  ;;  %v9937_v13 = vld [vmem:[%s13658_s3 + $0xca4] ss:$16 sps:$4 sm:$0xff]  }
 0x180   : > { %v9944_v7 = vld [vmem:[%s13658_s3 + $0xcc8] ss:$16 sps:$4 sm:$0xff]   ;;  %v9955_v52 = vld [vmem:[%s13658_s3 + $0xd04] ss:$16 sps:$4 sm:$0xff]  }
 0x181   : > { %5505 = vmatpush1.bf16.msra.mxu0 %v9880_v1  ;;  %v9905_v1 = vld [vmem:[%s13658_s3 + $0xc00] ss:$16 sps:$4 sm:$0xff]   ;;  %v1106_v27 = vrot.slane %v1105_v2, 4  ;;  %v9938_v2 = vld [vmem:[%s13658_s3 + $0xca8] ss:$16 sps:$4 sm:$0xff]  }
 0x182   : > { %6162 = vmatpush1.bf16.msra.mxu1 %v9883_v15  ;;  %5506 = vmatprep.subr.bf16.mxu0 %v9889_v17  ;;  %v9911_v15 = vld [vmem:[%s13658_s3 + $0xc20] ss:$16 sps:$4 sm:$0xff]   ;;  %v9914_v17 = vld [vmem:[%s13658_s3 + $0xc28] ss:$16 sps:$4 sm:$0xff]  }
 0x183   : > { %6163 = vmatprep.subr.bf16.mxu1 %v9892_v18  ;;  %v8156_v18 = vcombine.high %v1069_v10, %v1083_v26  ;;  %v1221_v10 = vor.u32 %v1218_v0, %v1060_v14  ;;  %v9935_v26 = vld [vmem:[%s13658_s3 + $0xca0] ss:$16 sps:$4 sm:$0xff]  }
 0x185   : > { %5507 = vmatpush1.bf16.msra.mxu0 %v9887_v21  ;;  %v1118_v21 = vrot.slane %v1116_v62, 5 }
 0x186   : > { %6164 = vmatpush1.bf16.msra.mxu1 %v9890_v29  ;;  %5508 = vmatprep.subr.bf16.mxu0 %v9895_v35  ;;  %v1132_v29 = vrot.slane %v1130_v31, 5  ;;  %v1111_v35 = vsel %vm11201_vm5, %v1106_v27, %v1110_v20  ;;  %v9958_v20 = vld [vmem:[%s13658_s3 + $0xd0c] ss:$16 sps:$4 sm:$0xff]   ;;  %v9956_v27 = vld [vmem:[%s13658_s3 + $0xd08] ss:$16 sps:$4 sm:$0xff]  }
 0x187   : > { %6165 = vmatprep.subr.bf16.mxu1 %v9898_v45  ;;  %v1119_v31 = vor.u32 %v1118_v21, %v1115_v8  ;;  %v1122_v45 = vshll.u32 %v1025_v47, 16  ;;  %v8157_v58 = vcombine.low %v1097_v9, %v1111_v35  ;;  %v9952_v8 = vld [vmem:[%s13658_s3 + $0xcec] ss:$16 sps:$4 sm:$0xff]   ;;  %v9953_v21 = vld [vmem:[%s13658_s3 + $0xd00] ss:$16 sps:$4 sm:$0xff]  }
 0x188   : > { %v1133_v36 = vor.u32 %v1132_v29, %v1129_v24  ;;  %v9961_v24 = vld [vmem:[%s13658_s3 + $0xd24] ss:$16 sps:$4 sm:$0xff]   ;;  %v9964_v29 = vld [vmem:[%s13658_s3 + $0xd2c] ss:$16 sps:$4 sm:$0xff]   ;;  %v9959_v47 = vld [vmem:[%s13658_s3 + $0xd20] ss:$16 sps:$4 sm:$0xff]  }
 0x189   : > { %5509 = vmatpush1.bf16.msra.mxu0 %v9893_v37  ;;  %v1136_v37 = vshll.u32 %v1027_v3, 16  ;;  %v1120_v46 = vrot.slane %v1119_v31, 4  ;;  %v1124_v49 = vrot.slane %v1122_v45, 5  ;;  %v9962_v3 = vld [vmem:[%s13658_s3 + $0xd28] ss:$16 sps:$4 sm:$0xff]  }
 0x18a   : > { %6166 = vmatpush1.bf16.msra.mxu1 %v9896_v38  ;;  %5510 = vmatprep.subr.bf16.mxu0 %v9901_v63  ;;  %v9917_v38 = vld [vmem:[%s13658_s3 + $0xc40] ss:$16 sps:$4 sm:$0xff]   ;;  %v9926_v63 = vld [vmem:[%s13658_s3 + $0xc68] ss:$16 sps:$4 sm:$0xff]   ;;  %v1134_v53 = vrot.slane %v1133_v36, 4 }
 0x18b   : > { %6167 = vmatprep.subr.bf16.mxu1 %v9904_v44  ;;  %v8158_v44 = vcombine.high %v1097_v9, %v1111_v35  ;;  %v1138_v54 = vrot.slane %v1136_v37, 5  ;;  %v9968_v9 = vld [vmem:[%s13658_s3 + $0xd48] ss:$16 sps:$4 sm:$0xff]   ;;  %v9973_v31 = vld [vmem:[%s13658_s3 + $0xd64] ss:$16 sps:$4 sm:$0xff]  }
 0x18c   : > { %v9976_v35 = vld [vmem:[%s13658_s3 + $0xd6c] ss:$16 sps:$4 sm:$0xff]   ;;  %v9971_v45 = vld [vmem:[%s13658_s3 + $0xd60] ss:$16 sps:$4 sm:$0xff]   ;;  %v9974_v36 = vld [vmem:[%s13658_s3 + $0xd68] ss:$16 sps:$4 sm:$0xff]  }
 0x18d   : > { %5511 = vmatpush1.bf16.msra.mxu0 %v9899_v12  ;;  %v1125_v12 = vsel %vm11201_vm5, %v1120_v46, %v1124_v49  ;;  %v9979_v37 = vld [vmem:[%s13658_s3 + $0xd84] ss:$16 sps:$4 sm:$0xff]   ;;  %v9983_v49 = vld [vmem:[%s13658_s3 + $0xda0] ss:$16 sps:$4 sm:$0xff]  }
 0x18e   : > { %6168 = vmatpush1.bf16.msra.mxu1 %v9902_v23  ;;  %5553 = vmatprep.subr.bf16.mxu0 %v9907_v5  ;;  %v1139_v23 = vsel %vm11201_vm5, %v1134_v53, %v1138_v54  ;;  %v1198_v5 = vshrl.u32 %v1181_v56, 16  ;;  %v1185_v46 = vld [vmem:[#allocation2 + $0x60] sm:$0x88]  ;;  %v9986_v56 = vld [vmem:[%s13658_s3 + $0xda8] ss:$16 sps:$4 sm:$0xff]  }
 0x18f   : > { %6210 = vmatprep.subr.bf16.mxu1 %v9910_v22  ;;  %v1211_v22 = vshrl.u32 %v1183_v57, 16  ;;  %v8160_v51 = vcombine.high %v1125_v12, %v1139_v23  ;;  %v8159_v14 = vcombine.low %v1125_v12, %v1139_v23  ;;  %v1187_v57 = vld [vmem:[#allocation2 + $0x78] sm:$0x88]  ;;  %v9989_v23 = vld [vmem:[%s13658_s3 + $0xdc0] ss:$16 sps:$4 sm:$0xff]  }
 0x190   : > { %5513 = vmatmul.mubr.bf16.vlgmr.msra.gmra.mrb[0].mxu0 %v8153_v6  ;;  %v8161_v62 = vrot.slane %v1198_v5, 11  ;;  %v1237_v5 = vshrl.u32 %v1187_v57, 16 }
 0x191   : > { %6170 = vmatmul.mubr.bf16.vlgmr.msra.gmra.mrb[0].mxu1 %v8153_v6  ;;  %5554 = vmatpush1.bf16.msra.mxu0 %v9905_v1  ;;  %v8162_v6 = vrot.slane %v1211_v22, 11  ;;  %v9943_v1 = vld [vmem:[%s13658_s3 + $0xcc4] ss:$16 sps:$4 sm:$0xff]  }
 0x192   : > { %6211 = vmatpush1.bf16.msra.mxu1 %v9908_v19  ;;  %5555 = vmatprep.subr.bf16.mxu0 %v9913_v39  ;;  %v12189_v19 = vsel %vm10814_vm2, %v8161_v62, %v11836_v48  ;;  %v9949_v48 = vld [vmem:[%s13658_s3 + $0xce4] ss:$16 sps:$4 sm:$0xff]   ;;  %v9995_v62 = vld [vmem:[%s13658_s3 + $0xde0] ss:$16 sps:$4 sm:$0xff]  }
 0x193   : > { %6212 = vmatprep.subr.bf16.mxu1 %v9916_v40  ;;  %5522 = vmatprep.mubr.bf16.mxu0 %v8156_v18  ;;  %v12193_v39 = vsel %vm10814_vm2, %v8162_v6, %v1221_v10  ;;  %v9941_v40 = vld [vmem:[%s13658_s3 + $0xcc0] ss:$16 sps:$4 sm:$0xff]  }
 0x194   : > { %6179 = vmatprep.mubr.bf16.mxu1 %v8156_v18  ;;  %v9950_v18 = vld [vmem:[%s13658_s3 + $0xce8] ss:$16 sps:$4 sm:$0xff]  }
 0x195   : > { %5556 = vmatpush1.bf16.msra.mxu0 %v9911_v15  ;;  %v8170_v15 = vcombine.high %v12189_v19, %v12193_v39 }
 0x196   : > { %6213 = vmatpush1.bf16.msra.mxu1 %v9914_v17  ;;  %5557 = vmatprep.subr.bf16.mxu0 %v9919_v30  ;;  %v9947_v17 = vld [vmem:[%s13658_s3 + $0xce0] ss:$16 sps:$4 sm:$0xff]   ;;  %v9967_v30 = vld [vmem:[%s13658_s3 + $0xd44] ss:$16 sps:$4 sm:$0xff]  }
 0x197   : > { %6214 = vmatprep.subr.bf16.mxu1 %v9922_v34  ;;  %v9970_v34 = vld [vmem:[%s13658_s3 + $0xd4c] ss:$16 sps:$4 sm:$0xff]  }
 0x198   : > { %5523 = vmatmul.mubr.bf16.gmra.mrb[4].mxu0 %v8155_v28 }
 0x199   : > { %6180 = vmatmul.mubr.bf16.gmra.mrb[4].mxu1 %v8155_v28  ;;  %5558 = vmatpush1.bf16.msra.mxu0 %v9917_v38  ;;  %v9965_v28 = vld [vmem:[%s13658_s3 + $0xd40] ss:$16 sps:$4 sm:$0xff]   ;;  %v9982_v38 = vld [vmem:[%s13658_s3 + $0xd8c] ss:$16 sps:$4 sm:$0xff]  }
 0x19a   : > { %6215 = vmatpush1.bf16.msra.mxu1 %v9920_v11  ;;  %5559 = vmatprep.subr.bf16.mxu0 %v9925_v50  ;;  %v9977_v11 = vld [vmem:[%s13658_s3 + $0xd80] ss:$16 sps:$4 sm:$0xff]   ;;  %v9980_v50 = vld [vmem:[%s13658_s3 + $0xd88] ss:$16 sps:$4 sm:$0xff]  }
 0x19b   : > { %6216 = vmatprep.subr.bf16.mxu1 %v9928_v25  ;;  %5532 = vmatprep.mubr.bf16.mxu0 %v8158_v44  ;;  %v12275_v25 = vld [vmem:[#allocation2 + $0x68] sm:$0xff] }
 0x19c   : > { %6189 = vmatprep.mubr.bf16.mxu1 %v8158_v44  ;;  %v9988_v44 = vld [vmem:[%s13658_s3 + $0xdac] ss:$16 sps:$4 sm:$0xff]   ;;  %v1229_v53 = vshrl.u32 %v12275_v25, 16  ;;  %v1232_v12 = vshll.u32 %v12275_v25, 16 }
 0x19d   : > { %5560 = vmatpush1.bf16.msra.mxu0 %v9923_v42  ;;  %v9985_v42 = vld [vmem:[%s13658_s3 + $0xda4] ss:$16 sps:$4 sm:$0xff]  }
 0x19e   : > { %6217 = vmatpush1.bf16.msra.mxu1 %v9926_v63  ;;  %5561 = vmatprep.subr.bf16.mxu0 %v9931_v32  ;;  %v12280_v63 = vld [vmem:[#allocation2 + $0x80] sm:$0xff]  ;;  %v1231_v0 = vrot.slane %v1229_v53, 7 }
 0x19f   : > { %6218 = vmatprep.subr.bf16.mxu1 %v9934_v61  ;;  %v1242_v54 = vshrl.u32 %v12280_v63, 16  ;;  %v9991_v32 = vld [vmem:[%s13658_s3 + $0xdc4] ss:$16 sps:$4 sm:$0xff]   ;;  %v9994_v61 = vld [vmem:[%s13658_s3 + $0xdcc] ss:$16 sps:$4 sm:$0xff]  }
 0x1a0   : > { %5533 = vmatmul.mubr.bf16.gmra.mrb[8].mxu0 %v8157_v58  ;;  %v1234_v10 = vor.u32 %v1232_v12, %v1231_v0 }
 0x1a1   : > { %6190 = vmatmul.mubr.bf16.gmra.mrb[8].mxu1 %v8157_v58  ;;  %5562 = vmatpush1.bf16.msra.mxu0 %v9929_v60  ;;  %v1224_v58 = vshrl.u32 %v1185_v46, 16  ;;  %v1244_v22 = vrot.slane %v1242_v54, 7  ;;  %v1245_v60 = vshll.u32 %v12280_v63, 16  ;;  %v10021_v46 = vld [vmem:[%s13658_s3 + $0xe64] ss:$16 sps:$4 sm:$0xff]  }
 0x1a2   : > { %6219 = vmatpush1.bf16.msra.mxu1 %v9932_v43  ;;  %5563 = vmatprep.subr.bf16.mxu0 %v9937_v13  ;;  %v9992_v43 = vld [vmem:[%s13658_s3 + $0xdc8] ss:$16 sps:$4 sm:$0xff]   ;;  %v12311_v13 = vld [vmem:[#allocation2 + $0xb0] sm:$0xff] }
 0x1a3   : > { %6220 = vmatprep.subr.bf16.mxu1 %v9940_v4  ;;  %5542 = vmatprep.mubr.bf16.mxu0 %v8160_v51  ;;  %v9997_v4 = vld [vmem:[%s13658_s3 + $0xde4] ss:$16 sps:$4 sm:$0xff]   ;;  %v8163_v6 = vrot.slane %v1224_v58, 11  ;;  %v10022_v58 = vld [vmem:[%s13658_s3 + $0xe68] ss:$16 sps:$4 sm:$0xff]  }
 0x1a4   : > { %6199 = vmatprep.mubr.bf16.mxu1 %v8160_v51  ;;  %v10000_v51 = vld [vmem:[%s13658_s3 + $0xdec] ss:$16 sps:$4 sm:$0xff]  }
 0x1a5   : > { %5564 = vmatpush1.bf16.msra.mxu0 %v9935_v26  ;;  %v1189_v26 = vld [vmem:[#allocation2 + $0x90] sm:$0x88] }
 0x1a6   : > { %6221 = vmatpush1.bf16.msra.mxu1 %v9938_v2  ;;  %5565 = vmatprep.subr.bf16.mxu0 %v9943_v1  ;;  %v8164_v2 = vrot.slane %v1237_v5, 11  ;;  %v1247_v1 = vor.u32 %v1245_v60, %v1244_v22  ;;  %v10030_v5 = vld [vmem:[%s13658_s3 + $0xe8c] ss:$16 sps:$4 sm:$0xff]  }
 0x1a7   : > { %6222 = vmatprep.subr.bf16.mxu1 %v9946_v33  ;;  %v1268_v33 = vshrl.u32 %v12311_v13, 16 }
 0x1a8   : > { %5543 = vmatmul.mubr.bf16.gmra.mrb[12].mxu0 %v8159_v14 }
 0x1a9   : > { %6200 = vmatmul.mubr.bf16.gmra.mrb[12].mxu1 %v8159_v14  ;;  %5566 = vmatpush1.bf16.msra.mxu0 %v9941_v40  ;;  %v9998_v14 = vld [vmem:[%s13658_s3 + $0xde8] ss:$16 sps:$4 sm:$0xff]  }
 0x1aa   : > { %6223 = vmatpush1.bf16.msra.mxu1 %v9944_v7  ;;  %5567 = vmatprep.subr.bf16.mxu0 %v9949_v48  ;;  %v1191_v40 = vld [vmem:[#allocation2 + $0xa8] sm:$0x88]  ;;  %v10003_v7 = vld [vmem:[%s13658_s3 + $0xe04] ss:$16 sps:$4 sm:$0xff]  }
 0x1ab   : > { %6224 = vmatprep.subr.bf16.mxu1 %v9952_v8  ;;  %5585 = vmatprep.mubr.bf16.mxu0 %v8170_v15  ;;  %v10006_v48 = vld [vmem:[%s13658_s3 + $0xe0c] ss:$16 sps:$4 sm:$0xff]   ;;  %v8169_v8 = vcombine.low %v12189_v19, %v12193_v39  ;;  %v1248_v39 = vsel %vm10814_vm2, %v8164_v2, %v1247_v1 }
 0x1ac   : > { %6242 = vmatprep.mubr.bf16.mxu1 %v8170_v15  ;;  %v10001_v15 = vld [vmem:[%s13658_s3 + $0xe00] ss:$16 sps:$4 sm:$0xff]   ;;  %v10012_v19 = vld [vmem:[%s13658_s3 + $0xe2c] ss:$16 sps:$4 sm:$0xff]  }
 0x1ad   : > { %5568 = vmatpush1.bf16.msra.mxu0 %v9947_v17  ;;  %v10004_v17 = vld [vmem:[%s13658_s3 + $0xe08] ss:$16 sps:$4 sm:$0xff]  }
 0x1ae   : > { %6225 = vmatpush1.bf16.msra.mxu1 %v9950_v18  ;;  %5569 = vmatprep.subr.bf16.mxu0 %v9955_v52  ;;  %v1235_v18 = vsel %vm10814_vm2, %v8163_v6, %v1234_v10  ;;  %v1250_v52 = vshrl.u32 %v1189_v26, 16  ;;  %v10033_v6 = vld [vmem:[%s13658_s3 + $0xea4] ss:$16 sps:$4 sm:$0xff]   ;;  %v10036_v10 = vld [vmem:[%s13658_s3 + $0xeac] ss:$16 sps:$4 sm:$0xff]  }
 0x1af   : > { %6226 = vmatprep.subr.bf16.mxu1 %v9958_v20  ;;  %v10009_v20 = vld [vmem:[%s13658_s3 + $0xe24] ss:$16 sps:$4 sm:$0xff]  }
 0x1b1   : > { %5570 = vmatpush1.bf16.msra.mxu0 %v9953_v21  ;;  %v1263_v21 = vshrl.u32 %v1191_v40, 16  ;;  %v10031_v40 = vld [vmem:[%s13658_s3 + $0xea0] ss:$16 sps:$4 sm:$0xff]  }
 0x1b2   : > { %6227 = vmatpush1.bf16.msra.mxu1 %v9956_v27  ;;  %5571 = vmatprep.subr.bf16.mxu0 %v9961_v24  ;;  %v1270_v27 = vrot.slane %v1268_v33, 7  ;;  %v1271_v24 = vshll.u32 %v12311_v13, 16 }
 0x1b3   : > { %6228 = vmatprep.subr.bf16.mxu1 %v9964_v29  ;;  %v10007_v29 = vld [vmem:[%s13658_s3 + $0xe20] ss:$16 sps:$4 sm:$0xff]  }
 0x1b5   : > { %5572 = vmatpush1.bf16.msra.mxu0 %v9959_v47  ;;  %v10010_v47 = vld [vmem:[%s13658_s3 + $0xe28] ss:$16 sps:$4 sm:$0xff]  }
 0x1b6   : > { %6229 = vmatpush1.bf16.msra.mxu1 %v9962_v3  ;;  %5573 = vmatprep.subr.bf16.mxu0 %v9967_v30  ;;  %v8172_v3 = vcombine.high %v1235_v18, %v1248_v39  ;;  %v8165_v30 = vrot.slane %v1250_v52, 11  ;;  %v10045_v52 = vld [vmem:[%s13658_s3 + $0xee4] ss:$16 sps:$4 sm:$0xff]  }
 0x1b7   : > { %6230 = vmatprep.subr.bf16.mxu1 %v9970_v34  ;;  %v1193_v34 = vld [vmem:[#allocation2 + $0xc0] sm:$0x88] }
 0x1b9   : > { %5574 = vmatpush1.bf16.msra.mxu0 %v9965_v28  ;;  %v1195_v28 = vld [vmem:[#allocation2 + $0xd8] sm:$0x88] }
 0x1ba   : > { %6231 = vmatpush1.bf16.msra.mxu1 %v9968_v9  ;;  %5575 = vmatprep.subr.bf16.mxu0 %v9973_v31  ;;  %v10015_v9 = vld [vmem:[%s13658_s3 + $0xe44] ss:$16 sps:$4 sm:$0xff]   ;;  %v10018_v31 = vld [vmem:[%s13658_s3 + $0xe4c] ss:$16 sps:$4 sm:$0xff]   ;;  %v1289_v57 = vshrl.u32 %v1195_v28, 16 }
 0x1bb   : > { %6232 = vmatprep.subr.bf16.mxu1 %v9976_v35  ;;  %v8166_v35 = vrot.slane %v1263_v21, 11  ;;  %v10046_v21 = vld [vmem:[%s13658_s3 + $0xee8] ss:$16 sps:$4 sm:$0xff]   ;;  %v10055_v28 = vld [vmem:[%s13658_s3 + $0xf20] ss:$16 sps:$4 sm:$0xff]  }
 0x1bd   : > { %5576 = vmatpush1.bf16.msra.mxu0 %v9971_v45  ;;  %v1273_v45 = vor.u32 %v1271_v24, %v1270_v27  ;;  %v10051_v27 = vld [vmem:[%s13658_s3 + $0xf04] ss:$16 sps:$4 sm:$0xff]  }
 0x1be   : > { %6233 = vmatpush1.bf16.msra.mxu1 %v9974_v36  ;;  %5577 = vmatprep.subr.bf16.mxu0 %v9979_v37  ;;  %v12371_v36 = vld [vmem:[#allocation2] sm:$0xff] }
 0x1bf   : > { %6234 = vmatprep.subr.bf16.mxu1 %v9982_v38  ;;  %v1294_v37 = vshrl.u32 %v12371_v36, 16  ;;  %v10013_v38 = vld [vmem:[%s13658_s3 + $0xe40] ss:$16 sps:$4 sm:$0xff]  }
 0x1c1   : > { %5578 = vmatpush1.bf16.msra.mxu0 %v9977_v11  ;;  %v10016_v11 = vld [vmem:[%s13658_s3 + $0xe48] ss:$16 sps:$4 sm:$0xff]  }
 0x1c2   : > { %6235 = vmatpush1.bf16.msra.mxu1 %v9980_v50  ;;  %5579 = vmatprep.subr.bf16.mxu0 %v9985_v42  ;;  %v8171_v50 = vcombine.low %v1235_v18, %v1248_v39  ;;  %v1261_v42 = vsel %vm10814_vm2, %v8165_v30, %v12027_v55  ;;  %v10019_v55 = vld [vmem:[%s13658_s3 + $0xe60] ss:$16 sps:$4 sm:$0xff]   ;;  %v10040_v18 = vld [vmem:[%s13658_s3 + $0xec8] ss:$16 sps:$4 sm:$0xff]   ;;  %v10057_v30 = vld [vmem:[%s13658_s3 + $0xf24] ss:$16 sps:$4 sm:$0xff]  }
 0x1c3   : > { %6236 = vmatprep.subr.bf16.mxu1 %v9988_v44  ;;  %v1276_v44 = vshrl.u32 %v1193_v34, 16  ;;  %v10043_v39 = vld [vmem:[%s13658_s3 + $0xee0] ss:$16 sps:$4 sm:$0xff]   ;;  %v10060_v34 = vld [vmem:[%s13658_s3 + $0xf2c] ss:$16 sps:$4 sm:$0xff]  }
 0x1c5   : > { %5580 = vmatpush1.bf16.msra.mxu0 %v9983_v49  ;;  %v10024_v49 = vld [vmem:[%s13658_s3 + $0xe6c] ss:$16 sps:$4 sm:$0xff]   ;;  %v8167_v22 = vrot.slane %v1276_v44, 11  ;;  %v10070_v44 = vld [vmem:[%s13658_s3 + $0xf68] ss:$16 sps:$4 sm:$0xff]  }
 0x1c6   : > { %6237 = vmatpush1.bf16.msra.mxu1 %v9986_v56  ;;  %5581 = vmatprep.subr.bf16.mxu0 %v9991_v32  ;;  %v1274_v56 = vsel %vm10814_vm2, %v8166_v35, %v1273_v45  ;;  %v1296_v32 = vrot.slane %v1294_v37, 7  ;;  %v10066_v35 = vld [vmem:[%s13658_s3 + $0xf4c] ss:$16 sps:$4 sm:$0xff]   ;;  %v10061_v45 = vld [vmem:[%s13658_s3 + $0xf40] ss:$16 sps:$4 sm:$0xff]  }
 0x1c7   : > { %6238 = vmatprep.subr.bf16.mxu1 %v9994_v61  ;;  %v1297_v61 = vshll.u32 %v12371_v36, 16  ;;  %v8174_v0 = vcombine.high %v1261_v42, %v1274_v56  ;;  %v8173_v26 = vcombine.low %v1261_v42, %v1274_v56  ;;  %v1287_v2 = vsel %vm10814_vm2, %v8167_v22, %v12068_v41  ;;  %v10034_v41 = vld [vmem:[%s13658_s3 + $0xea8] ss:$16 sps:$4 sm:$0xff]   ;;  %v10067_v42 = vld [vmem:[%s13658_s3 + $0xf60] ss:$16 sps:$4 sm:$0xff]  }
 0x1c8   : > { %v10073_v56 = vld [vmem:[%s13658_s3 + $0xf80] ss:$16 sps:$4 sm:$0xff]  }
 0x1c9   : > { %5582 = vmatpush1.bf16.msra.mxu0 %v9989_v23  ;;  %v10027_v23 = vld [vmem:[%s13658_s3 + $0xe84] ss:$16 sps:$4 sm:$0xff]   ;;  %v10085_v22 = vld [vmem:[%s13658_s3 + $0xfc0] ss:$16 sps:$4 sm:$0xff]  }
 0x1ca   : > { %6239 = vmatpush1.bf16.msra.mxu1 %v9992_v43  ;;  %5583 = vmatprep.subr.bf16.mxu0 %v9997_v4  ;;  %v8168_v43 = vrot.slane %v1289_v57, 11  ;;  %v1299_v4 = vor.u32 %v1297_v61, %v1296_v32  ;;  %v10076_v57 = vld [vmem:[%s13658_s3 + $0xf88] ss:$16 sps:$4 sm:$0xff]   ;;  %v10081_v32 = vld [vmem:[%s13658_s3 + $0xfa4] ss:$16 sps:$4 sm:$0xff]  }
 0x1cb   : > { %6240 = vmatprep.subr.bf16.mxu1 %v10000_v51  ;;  %v10025_v51 = vld [vmem:[%s13658_s3 + $0xe80] ss:$16 sps:$4 sm:$0xff]  }
 0x1cc   : > { %v1300_v1 = vsel %vm10814_vm2, %v8168_v43, %v1299_v4  ;;  %v10088_v43 = vld [vmem:[%s13658_s3 + $0xfc8] ss:$16 sps:$4 sm:$0xff]   ;;  %v10093_v4 = vld [vmem:[%s13658_s3 + $0xfe4] ss:$16 sps:$4 sm:$0xff]  }
 0x1cd   : > { %5584 = vmatpush1.bf16.msra.mxu0 %v9995_v62  ;;  %v10028_v62 = vld [vmem:[%s13658_s3 + $0xe88] ss:$16 sps:$4 sm:$0xff]  }
 0x1ce   : > { %6241 = vmatpush1.bf16.msra.mxu1 %v9998_v14  ;;  %5626 = vmatprep.subr.bf16.mxu0 %v10003_v7  ;;  %v8176_v14 = vcombine.high %v1287_v2, %v1300_v1  ;;  %v10042_v7 = vld [vmem:[%s13658_s3 + $0xecc] ss:$16 sps:$4 sm:$0xff]  }
 0x1cf   : > { %6283 = vmatprep.subr.bf16.mxu1 %v10006_v48  ;;  %v8175_v48 = vcombine.low %v1287_v2, %v1300_v1  ;;  %v10099_v1 = vld [vmem:[%s13658_s3 + $0x1000] ss:$16 sps:$4 sm:$0xff]  }
 0x1d0   : > { %5586 = vmatmul.mubr.bf16.vlgmr.msra.gmra.mrb[0].mxu0 %v8169_v8 }
 0x1d1   : > { %6243 = vmatmul.mubr.bf16.vlgmr.msra.gmra.mrb[0].mxu1 %v8169_v8  ;;  %5627 = vmatpush1.bf16.msra.mxu0 %v10001_v15  ;;  %v12437_v8 = vld [vmem:[#allocation2 + $0x38] sm:$0xff]  ;;  %v12439_v15 = vld [vmem:[#allocation2 + $0x50] sm:$0xff] }
 0x1d2   : > { %6284 = vmatpush1.bf16.msra.mxu1 %v10004_v17  ;;  %5628 = vmatprep.subr.bf16.mxu0 %v10009_v20  ;;  %v10037_v17 = vld [vmem:[%s13658_s3 + $0xec0] ss:$16 sps:$4 sm:$0xff]   ;;  %v10048_v20 = vld [vmem:[%s13658_s3 + $0xeec] ss:$16 sps:$4 sm:$0xff]   ;;  %v8177_v2 = vcombine.low %v12437_v8, %v12439_v15 }
 0x1d3   : > { %6285 = vmatprep.subr.bf16.mxu1 %v10012_v19  ;;  %5595 = vmatprep.mubr.bf16.mxu0 %v8172_v3  ;;  %v8178_v19 = vcombine.high %v12437_v8, %v12439_v15 }
 0x1d4   : > { %6252 = vmatprep.mubr.bf16.mxu1 %v8172_v3  ;;  %v10052_v3 = vld [vmem:[%s13658_s3 + $0xf08] ss:$16 sps:$4 sm:$0xff]  }
 0x1d5   : > { %5629 = vmatpush1.bf16.msra.mxu0 %v10007_v29  ;;  %v10054_v29 = vld [vmem:[%s13658_s3 + $0xf0c] ss:$16 sps:$4 sm:$0xff]  }
 0x1d6   : > { %6286 = vmatpush1.bf16.msra.mxu1 %v10010_v47  ;;  %5630 = vmatprep.subr.bf16.mxu0 %v10015_v9  ;;  %v10049_v47 = vld [vmem:[%s13658_s3 + $0xf00] ss:$16 sps:$4 sm:$0xff]   ;;  %v10058_v9 = vld [vmem:[%s13658_s3 + $0xf28] ss:$16 sps:$4 sm:$0xff]  }
 0x1d7   : > { %6287 = vmatprep.subr.bf16.mxu1 %v10018_v31  ;;  %v10063_v31 = vld [vmem:[%s13658_s3 + $0xf44] ss:$16 sps:$4 sm:$0xff]  }
 0x1d8   : > { %5596 = vmatmul.mubr.bf16.gmra.mrb[4].mxu0 %v8171_v50 }
 0x1d9   : > { %6253 = vmatmul.mubr.bf16.gmra.mrb[4].mxu1 %v8171_v50  ;;  %5631 = vmatpush1.bf16.msra.mxu0 %v10013_v38  ;;  %v10064_v38 = vld [vmem:[%s13658_s3 + $0xf48] ss:$16 sps:$4 sm:$0xff]   ;;  %v10072_v50 = vld [vmem:[%s13658_s3 + $0xf6c] ss:$16 sps:$4 sm:$0xff]  }
 0x1da   : > { %6288 = vmatpush1.bf16.msra.mxu1 %v10016_v11  ;;  %5632 = vmatprep.subr.bf16.mxu0 %v10021_v46  ;;  %v10069_v11 = vld [vmem:[%s13658_s3 + $0xf64] ss:$16 sps:$4 sm:$0xff]  }
 0x1db   : > { %6289 = vmatprep.subr.bf16.mxu1 %v10024_v49  ;;  %5605 = vmatprep.mubr.bf16.mxu0 %v8174_v0  ;;  %v10075_v46 = vld [vmem:[%s13658_s3 + $0xf84] ss:$16 sps:$4 sm:$0xff]   ;;  %v10078_v49 = vld [vmem:[%s13658_s3 + $0xf8c] ss:$16 sps:$4 sm:$0xff]  }
 0x1dc   : > { %6262 = vmatprep.mubr.bf16.mxu1 %v8174_v0  ;;  %v10082_v0 = vld [vmem:[%s13658_s3 + $0xfa8] ss:$16 sps:$4 sm:$0xff]  }
 0x1dd   : > { %5633 = vmatpush1.bf16.msra.mxu0 %v10019_v55  ;;  %v10084_v55 = vld [vmem:[%s13658_s3 + $0xfac] ss:$16 sps:$4 sm:$0xff]  }
 0x1de   : > { %6290 = vmatpush1.bf16.msra.mxu1 %v10022_v58  ;;  %5634 = vmatprep.subr.bf16.mxu0 %v10027_v23  ;;  %v10079_v58 = vld [vmem:[%s13658_s3 + $0xfa0] ss:$16 sps:$4 sm:$0xff]   ;;  %v10087_v23 = vld [vmem:[%s13658_s3 + $0xfc4] ss:$16 sps:$4 sm:$0xff]  }
 0x1df   : > { %6291 = vmatprep.subr.bf16.mxu1 %v10030_v5  ;;  %v10090_v5 = vld [vmem:[%s13658_s3 + $0xfcc] ss:$16 sps:$4 sm:$0xff]  }
 0x1e0   : > { %5606 = vmatmul.mubr.bf16.gmra.mrb[8].mxu0 %v8173_v26 }
 0x1e1   : > { %6263 = vmatmul.mubr.bf16.gmra.mrb[8].mxu1 %v8173_v26  ;;  %5635 = vmatpush1.bf16.msra.mxu0 %v10025_v51  ;;  %v10096_v51 = vld [vmem:[%s13658_s3 + $0xfec] ss:$16 sps:$4 sm:$0xff]  }
 0x1e2   : > { %6292 = vmatpush1.bf16.msra.mxu1 %v10028_v62  ;;  %5636 = vmatprep.subr.bf16.mxu0 %v10033_v6  ;;  %v10091_v62 = vld [vmem:[%s13658_s3 + $0xfe0] ss:$16 sps:$4 sm:$0xff]   ;;  %v10094_v6 = vld [vmem:[%s13658_s3 + $0xfe8] ss:$16 sps:$4 sm:$0xff]   ;;  %v10104_v26 = vld [vmem:[%s13658_s3 + $0x100c] ss:$16 sps:$4 sm:$0xff]  }
 0x1e3   : > { %6293 = vmatprep.subr.bf16.mxu1 %v10036_v10  ;;  %5615 = vmatprep.mubr.bf16.mxu0 %v8176_v14  ;;  %v10101_v10 = vld [vmem:[%s13658_s3 + $0x1004] ss:$16 sps:$4 sm:$0xff]  }
 0x1e4   : > { %6272 = vmatprep.mubr.bf16.mxu1 %v8176_v14  ;;  %v10102_v14 = vld [vmem:[%s13658_s3 + $0x1008] ss:$16 sps:$4 sm:$0xff]  }
 0x1e5   : > { %5637 = vmatpush1.bf16.msra.mxu0 %v10031_v40  ;;  %v10107_v40 = vld [vmem:[%s13658_s3 + $0x1024] ss:$16 sps:$4 sm:$0xff]  }
 0x1e6   : > { %6294 = vmatpush1.bf16.msra.mxu1 %v10034_v41  ;;  %5638 = vmatprep.subr.bf16.mxu0 %v10039_v59  ;;  %v10110_v41 = vld [vmem:[%s13658_s3 + $0x102c] ss:$16 sps:$4 sm:$0xff]   ;;  %v8180_v59 = vcombine.high %v12275_v25, %v12280_v63 }
 0x1e7   : > { %6295 = vmatprep.subr.bf16.mxu1 %v10042_v7  ;;  %v10105_v7 = vld [vmem:[%s13658_s3 + $0x1020] ss:$16 sps:$4 sm:$0xff]  }
 0x1e8   : > { %5616 = vmatmul.mubr.bf16.gmra.mrb[12].mxu0 %v8175_v48 }
 0x1e9   : > { %6273 = vmatmul.mubr.bf16.gmra.mrb[12].mxu1 %v8175_v48  ;;  %5639 = vmatpush1.bf16.msra.mxu0 %v10037_v17  ;;  %v10108_v48 = vld [vmem:[%s13658_s3 + $0x1028] ss:$16 sps:$4 sm:$0xff]   ;;  %v10113_v17 = vld [vmem:[%s13658_s3 + $0x1044] ss:$16 sps:$4 sm:$0xff]  }
 0x1ea   : > { %6296 = vmatpush1.bf16.msra.mxu1 %v10040_v18  ;;  %5640 = vmatprep.subr.bf16.mxu0 %v10045_v52  ;;  %v10116_v18 = vld [vmem:[%s13658_s3 + $0x104c] ss:$16 sps:$4 sm:$0xff]   ;;  %v8179_v52 = vcombine.low %v12275_v25, %v12280_v63  ;;  %v10183_v25 = vld [vmem:[%s13658_s3 + $0x11a4] ss:$16 sps:$4 sm:$0xff]  }
 0x1eb   : > { %6297 = vmatprep.subr.bf16.mxu1 %v10048_v20  ;;  %5658 = vmatprep.mubr.bf16.mxu0 %v8178_v19  ;;  %v12593_v20 = vld [vmem:[#allocation2 + $0x98] sm:$0xff] }
 0x1ec   : > { %6315 = vmatprep.mubr.bf16.mxu1 %v8178_v19  ;;  %v1414_v19 = vshrl.u32 %v12437_v8, 16  ;;  %v10186_v63 = vld [vmem:[%s13658_s3 + $0x11ac] ss:$16 sps:$4 sm:$0xff]  }
 0x1ed   : > { %5641 = vmatpush1.bf16.msra.mxu0 %v10043_v39  ;;  %v1417_v39 = vshll.u32 %v12437_v8, 16  ;;  %v10119_v8 = vld [vmem:[%s13658_s3 + $0x1064] ss:$16 sps:$4 sm:$0xff]  }
 0x1ee   : > { %6298 = vmatpush1.bf16.msra.mxu1 %v10046_v21  ;;  %5642 = vmatprep.subr.bf16.mxu0 %v10051_v27  ;;  %v1428_v21 = vshrl.u32 %v12439_v15, 16  ;;  %v1431_v27 = vshll.u32 %v12439_v15, 16  ;;  %v10122_v15 = vld [vmem:[%s13658_s3 + $0x106c] ss:$16 sps:$4 sm:$0xff]  }
 0x1ef   : > { %6299 = vmatprep.subr.bf16.mxu1 %v10054_v29  ;;  %v10111_v29 = vld [vmem:[%s13658_s3 + $0x1040] ss:$16 sps:$4 sm:$0xff]  }
 0x1f1   : > { %5643 = vmatpush1.bf16.msra.mxu0 %v10049_v47  ;;  %v10114_v47 = vld [vmem:[%s13658_s3 + $0x1048] ss:$16 sps:$4 sm:$0xff]  }
 0x1f2   : > { %6300 = vmatpush1.bf16.msra.mxu1 %v10052_v3  ;;  %5644 = vmatprep.subr.bf16.mxu0 %v10057_v30  ;;  %v8182_v3 = vcombine.high %v12593_v20, %v12311_v13  ;;  %v10117_v30 = vld [vmem:[%s13658_s3 + $0x1060] ss:$16 sps:$4 sm:$0xff]  }
 0x1f3   : > { %6301 = vmatprep.subr.bf16.mxu1 %v10060_v34  ;;  %v1416_v34 = vrot.slane %v1414_v19, 4  ;;  %v10147_v19 = vld [vmem:[%s13658_s3 + $0x1100] ss:$16 sps:$4 sm:$0xff]  }
 0x1f5   : > { %5645 = vmatpush1.bf16.msra.mxu0 %v10055_v28  ;;  %v1419_v28 = vrot.slane %v1417_v39, 5  ;;  %v10150_v39 = vld [vmem:[%s13658_s3 + $0x1108] ss:$16 sps:$4 sm:$0xff]  }
 0x1f6   : > { %6302 = vmatpush1.bf16.msra.mxu1 %v10058_v9  ;;  %5646 = vmatprep.subr.bf16.mxu0 %v10063_v31  ;;  %v1430_v9 = vrot.slane %v1428_v21, 4  ;;  %v1433_v31 = vrot.slane %v1431_v27, 5  ;;  %v10155_v21 = vld [vmem:[%s13658_s3 + $0x1124] ss:$16 sps:$4 sm:$0xff]   ;;  %v10158_v27 = vld [vmem:[%s13658_s3 + $0x112c] ss:$16 sps:$4 sm:$0xff]  }
 0x1f7   : > { %6303 = vmatprep.subr.bf16.mxu1 %v10066_v35  ;;  %v10120_v35 = vld [vmem:[%s13658_s3 + $0x1068] ss:$16 sps:$4 sm:$0xff]  }
 0x1f9   : > { %5647 = vmatpush1.bf16.msra.mxu0 %v10061_v45  ;;  %v1398_v45 = vld [vmem:[#allocation2 + $0x40] sm:$0x11] }
 0x1fa   : > { %6304 = vmatpush1.bf16.msra.mxu1 %v10064_v38  ;;  %5648 = vmatprep.subr.bf16.mxu0 %v10069_v11  ;;  %v1400_v38 = vld [vmem:[#allocation2 + $0x58] sm:$0x11]  ;;  %v10125_v11 = vld [vmem:[%s13658_s3 + $0x1084] ss:$16 sps:$4 sm:$0xff]  }
 0x1fb   : > { %6305 = vmatprep.subr.bf16.mxu1 %v10072_v50  ;;  %v10128_v50 = vld [vmem:[%s13658_s3 + $0x108c] ss:$16 sps:$4 sm:$0xff]  }
 0x1fd   : > { %5649 = vmatpush1.bf16.msra.mxu0 %v10067_v42  ;;  %v8181_v42 = vcombine.low %v12593_v20, %v12311_v13 }
 0x1fe   : > { %6306 = vmatpush1.bf16.msra.mxu1 %v10070_v44  ;;  %5650 = vmatprep.subr.bf16.mxu0 %v10075_v46  ;;  %v12627_v44 = vld [vmem:[#allocation2 + $0xc8] sm:$0xff]  ;;  %v1420_v46 = vor.u32 %v1419_v28, %v1416_v34  ;;  %v10169_v34 = vld [vmem:[%s13658_s3 + $0x1164] ss:$16 sps:$4 sm:$0xff]  }
 0x1ff   : > { %6307 = vmatprep.subr.bf16.mxu1 %v10078_v49  ;;  %v1423_v49 = vshll.u32 %v1398_v45, 16  ;;  %v10172_v28 = vld [vmem:[%s13658_s3 + $0x116c] ss:$16 sps:$4 sm:$0xff]  }
 0x200   : > { %v10180_v45 = vld [vmem:[%s13658_s3 + $0x118c] ss:$16 sps:$4 sm:$0xff]  }
 0x201   : > { %5651 = vmatpush1.bf16.msra.mxu0 %v10073_v56  ;;  %v1434_v56 = vor.u32 %v1433_v31, %v1430_v9  ;;  %v10167_v9 = vld [vmem:[%s13658_s3 + $0x1160] ss:$16 sps:$4 sm:$0xff]   ;;  %v10170_v31 = vld [vmem:[%s13658_s3 + $0x1168] ss:$16 sps:$4 sm:$0xff]  }
 0x202   : > { %6308 = vmatpush1.bf16.msra.mxu1 %v10076_v57  ;;  %5652 = vmatprep.subr.bf16.mxu0 %v10081_v32  ;;  %v1437_v57 = vshll.u32 %v1400_v38, 16  ;;  %v10123_v32 = vld [vmem:[%s13658_s3 + $0x1080] ss:$16 sps:$4 sm:$0xff]   ;;  %v1444_v38 = vrot.slane %v1229_v53, 4  ;;  %v10178_v53 = vld [vmem:[%s13658_s3 + $0x1188] ss:$16 sps:$4 sm:$0xff]  }
 0x203   : > { %6309 = vmatprep.subr.bf16.mxu1 %v10084_v55  ;;  %v10126_v55 = vld [vmem:[%s13658_s3 + $0x1088] ss:$16 sps:$4 sm:$0xff]  }
 0x205   : > { %5653 = vmatpush1.bf16.msra.mxu0 %v10079_v58  ;;  %v10131_v58 = vld [vmem:[%s13658_s3 + $0x10a4] ss:$16 sps:$4 sm:$0xff]  }
 0x206   : > { %6310 = vmatpush1.bf16.msra.mxu1 %v10082_v0  ;;  %5654 = vmatprep.subr.bf16.mxu0 %v10087_v23  ;;  %v10134_v0 = vld [vmem:[%s13658_s3 + $0x10ac] ss:$16 sps:$4 sm:$0xff]   ;;  %v8184_v23 = vcombine.high %v12627_v44, %v12371_v36 }
 0x207   : > { %6311 = vmatprep.subr.bf16.mxu1 %v10090_v5  ;;  %v1421_v5 = vrot.slane %v1420_v46, 4  ;;  %v1461_v46 = vrot.slane %v1245_v60, 5 }
 0x209   : > { %5655 = vmatpush1.bf16.msra.mxu0 %v10085_v22  ;;  %v1425_v22 = vrot.slane %v1423_v49, 5  ;;  %v10175_v49 = vld [vmem:[%s13658_s3 + $0x1180] ss:$16 sps:$4 sm:$0xff]  }
 0x20a   : > { %6312 = vmatpush1.bf16.msra.mxu1 %v10088_v43  ;;  %5656 = vmatprep.subr.bf16.mxu0 %v10093_v4  ;;  %v1435_v43 = vrot.slane %v1434_v56, 4  ;;  %v1439_v4 = vrot.slane %v1437_v57, 5  ;;  %v1404_v56 = vld [vmem:[#allocation2 + $0x88] sm:$0x11] }
 0x20b   : > { %6313 = vmatprep.subr.bf16.mxu1 %v10096_v51  ;;  %v10129_v51 = vld [vmem:[%s13658_s3 + $0x10a0] ss:$16 sps:$4 sm:$0xff]   ;;  %v1465_v57 = vshll.u32 %v1404_v56, 16  ;;  %v10213_v56 = vld [vmem:[%s13662_s7 + $0x44] ss:$16 sps:$4 sm:$0xff]  }
 0x20d   : > { %5657 = vmatpush1.bf16.msra.mxu0 %v10091_v62  ;;  %v10132_v62 = vld [vmem:[%s13658_s3 + $0x10a8] ss:$16 sps:$4 sm:$0xff]  }
 0x20e   : > { %6314 = vmatpush1.bf16.msra.mxu1 %v10094_v6  ;;  %5699 = vmatprep.subr.bf16.mxu0 %v10101_v10  ;;  %v10137_v6 = vld [vmem:[%s13658_s3 + $0x10c4] ss:$16 sps:$4 sm:$0xff]   ;;  %v10140_v10 = vld [vmem:[%s13658_s3 + $0x10cc] ss:$16 sps:$4 sm:$0xff]  }
 0x20f   : > { %6356 = vmatprep.subr.bf16.mxu1 %v10104_v26  ;;  %v8183_v26 = vcombine.low %v12627_v44, %v12371_v36  ;;  %v10210_v36 = vld [vmem:[%s13662_s7 + $0x2c] ss:$16 sps:$4 sm:$0xff]  }
 0x210   : > { %5659 = vmatmul.mubr.bf16.vlgmr.msra.gmra.mrb[0].mxu0 %v8177_v2 }
 0x211   : > { %6316 = vmatmul.mubr.bf16.vlgmr.msra.gmra.mrb[0].mxu1 %v8177_v2  ;;  %5700 = vmatpush1.bf16.msra.mxu0 %v10099_v1  ;;  %v12659_v2 = vsel %vm11201_vm5, %v1421_v5, %v1425_v22  ;;  %v12663_v1 = vsel %vm11201_vm5, %v1435_v43, %v1439_v4  ;;  %v10187_v43 = vld [vmem:[%s13658_s3 + $0x11c0] ss:$16 sps:$4 sm:$0xff]  }
 0x212   : > { %6357 = vmatpush1.bf16.msra.mxu1 %v10102_v14  ;;  %5701 = vmatprep.subr.bf16.mxu0 %v10107_v40  ;;  %v10135_v14 = vld [vmem:[%s13658_s3 + $0x10c0] ss:$16 sps:$4 sm:$0xff]   ;;  %v10138_v40 = vld [vmem:[%s13658_s3 + $0x10c8] ss:$16 sps:$4 sm:$0xff]  }
 0x213   : > { %6358 = vmatprep.subr.bf16.mxu1 %v10110_v41  ;;  %5668 = vmatprep.mubr.bf16.mxu0 %v8180_v59  ;;  %v10143_v41 = vld [vmem:[%s13658_s3 + $0x10e4] ss:$16 sps:$4 sm:$0xff]  }
 0x214   : > { %6325 = vmatprep.mubr.bf16.mxu1 %v8180_v59  ;;  %v10146_v59 = vld [vmem:[%s13658_s3 + $0x10ec] ss:$16 sps:$4 sm:$0xff]  }
 0x215   : > { %5702 = vmatpush1.bf16.msra.mxu0 %v10105_v7  ;;  %v8186_v7 = vcombine.high %v12659_v2, %v12663_v1 }
 0x216   : > { %6359 = vmatpush1.bf16.msra.mxu1 %v10108_v48  ;;  %5703 = vmatprep.subr.bf16.mxu0 %v10113_v17  ;;  %v10141_v48 = vld [vmem:[%s13658_s3 + $0x10e0] ss:$16 sps:$4 sm:$0xff]   ;;  %v10144_v17 = vld [vmem:[%s13658_s3 + $0x10e8] ss:$16 sps:$4 sm:$0xff]  }
 0x217   : > { %6360 = vmatprep.subr.bf16.mxu1 %v10116_v18  ;;  %v10149_v18 = vld [vmem:[%s13658_s3 + $0x1104] ss:$16 sps:$4 sm:$0xff]  }
 0x218   : > { %5669 = vmatmul.mubr.bf16.gmra.mrb[4].mxu0 %v8179_v52 }
 0x219   : > { %6326 = vmatmul.mubr.bf16.gmra.mrb[4].mxu1 %v8179_v52  ;;  %5704 = vmatpush1.bf16.msra.mxu0 %v10111_v29  ;;  %v10152_v52 = vld [vmem:[%s13658_s3 + $0x110c] ss:$16 sps:$4 sm:$0xff]   ;;  %v10153_v29 = vld [vmem:[%s13658_s3 + $0x1120] ss:$16 sps:$4 sm:$0xff]  }
 0x21a   : > { %6361 = vmatpush1.bf16.msra.mxu1 %v10114_v47  ;;  %5705 = vmatprep.subr.bf16.mxu0 %v10119_v8  ;;  %v10156_v47 = vld [vmem:[%s13658_s3 + $0x1128] ss:$16 sps:$4 sm:$0xff]   ;;  %v10163_v8 = vld [vmem:[%s13658_s3 + $0x1144] ss:$16 sps:$4 sm:$0xff]  }
 0x21b   : > { %6362 = vmatprep.subr.bf16.mxu1 %v10122_v15  ;;  %5678 = vmatprep.mubr.bf16.mxu0 %v8182_v3  ;;  %v10166_v15 = vld [vmem:[%s13658_s3 + $0x114c] ss:$16 sps:$4 sm:$0xff]  }
 0x21c   : > { %6335 = vmatprep.mubr.bf16.mxu1 %v8182_v3  ;;  %v10161_v3 = vld [vmem:[%s13658_s3 + $0x1140] ss:$16 sps:$4 sm:$0xff]  }
 0x21d   : > { %5706 = vmatpush1.bf16.msra.mxu0 %v10117_v30  ;;  %v10164_v30 = vld [vmem:[%s13658_s3 + $0x1148] ss:$16 sps:$4 sm:$0xff]  }
 0x21e   : > { %6363 = vmatpush1.bf16.msra.mxu1 %v10120_v35  ;;  %5707 = vmatprep.subr.bf16.mxu0 %v10125_v11  ;;  %v10177_v35 = vld [vmem:[%s13658_s3 + $0x1184] ss:$16 sps:$4 sm:$0xff]   ;;  %v1447_v11 = vrot.slane %v1232_v12, 5 }
 0x21f   : > { %6364 = vmatprep.subr.bf16.mxu1 %v10128_v50  ;;  %v1402_v50 = vld [vmem:[#allocation2 + $0x70] sm:$0x11] }
 0x220   : > { %5679 = vmatmul.mubr.bf16.gmra.mrb[8].mxu0 %v8181_v42  ;;  %v1451_v12 = vshll.u32 %v1402_v50, 16 }
 0x221   : > { %6336 = vmatmul.mubr.bf16.gmra.mrb[8].mxu1 %v8181_v42  ;;  %5708 = vmatpush1.bf16.msra.mxu0 %v10123_v32  ;;  %v1458_v42 = vrot.slane %v1242_v54, 4  ;;  %v1448_v54 = vor.u32 %v1447_v11, %v1444_v38  ;;  %v1470_v32 = vshrl.u32 %v12593_v20, 16  ;;  %v10207_v38 = vld [vmem:[%s13662_s7 + $0x24] ss:$16 sps:$4 sm:$0xff]  }
 0x222   : > { %6365 = vmatpush1.bf16.msra.mxu1 %v10126_v55  ;;  %5709 = vmatprep.subr.bf16.mxu0 %v10131_v58  ;;  %v1473_v55 = vshll.u32 %v12593_v20, 16  ;;  %v10181_v58 = vld [vmem:[%s13658_s3 + $0x11a0] ss:$16 sps:$4 sm:$0xff]   ;;  %v10192_v20 = vld [vmem:[%s13658_s3 + $0x11cc] ss:$16 sps:$4 sm:$0xff]   ;;  %v1453_v22 = vrot.slane %v1451_v12, 5 }
 0x223   : > { %6366 = vmatprep.subr.bf16.mxu1 %v10134_v0  ;;  %5688 = vmatprep.mubr.bf16.mxu0 %v8184_v23  ;;  %v1462_v60 = vor.u32 %v1461_v46, %v1458_v42  ;;  %v10184_v0 = vld [vmem:[%s13658_s3 + $0x11a8] ss:$16 sps:$4 sm:$0xff]   ;;  %v1449_v5 = vrot.slane %v1448_v54, 4 }
 0x224   : > { %6345 = vmatprep.mubr.bf16.mxu1 %v8184_v23  ;;  %v10189_v23 = vld [vmem:[%s13658_s3 + $0x11c4] ss:$16 sps:$4 sm:$0xff]  }
 0x225   : > { %5710 = vmatpush1.bf16.msra.mxu0 %v10129_v51  ;;  %v1463_v4 = vrot.slane %v1462_v60, 4  ;;  %v1467_v51 = vrot.slane %v1465_v57, 5 }
 0x226   : > { %6367 = vmatpush1.bf16.msra.mxu1 %v10132_v62  ;;  %5711 = vmatprep.subr.bf16.mxu0 %v10137_v6  ;;  %v1472_v62 = vrot.slane %v1470_v32, 4  ;;  %v1475_v6 = vrot.slane %v1473_v55, 5  ;;  %v10211_v55 = vld [vmem:[%s13662_s7 + $0x40] ss:$16 sps:$4 sm:$0xff]  }
 0x227   : > { %6368 = vmatprep.subr.bf16.mxu1 %v10140_v10  ;;  %v10190_v10 = vld [vmem:[%s13658_s3 + $0x11c8] ss:$16 sps:$4 sm:$0xff]   ;;  %v1468_v13 = vsel %vm11201_vm5, %v1463_v4, %v1467_v51  ;;  %v10225_v4 = vld [vmem:[%s13662_s7 + $0x84] ss:$16 sps:$4 sm:$0xff]  }
 0x228   : > { %5689 = vmatmul.mubr.bf16.gmra.mrb[12].mxu0 %v8183_v26 }
 0x229   : > { %6346 = vmatmul.mubr.bf16.gmra.mrb[12].mxu1 %v8183_v26  ;;  %5712 = vmatpush1.bf16.msra.mxu0 %v10135_v14  ;;  %v1406_v26 = vld [vmem:[#allocation2 + $0xa0] sm:$0x11]  ;;  %v1486_v14 = vrot.slane %v1268_v33, 4  ;;  %v1454_v33 = vsel %vm11201_vm5, %v1449_v5, %v1453_v22 }
 0x22a   : > { %6369 = vmatpush1.bf16.msra.mxu1 %v10138_v40  ;;  %5713 = vmatprep.subr.bf16.mxu0 %v10143_v41  ;;  %v1489_v40 = vrot.slane %v1271_v24, 5  ;;  %v10195_v41 = vld [vmem:[%s13658_s3 + $0x11e4] ss:$16 sps:$4 sm:$0xff]   ;;  %v1476_v24 = vor.u32 %v1475_v6, %v1472_v62  ;;  %v10217_v22 = vld [vmem:[%s13662_s7 + $0x60] ss:$16 sps:$4 sm:$0xff]  }
 0x22b   : > { %6370 = vmatprep.subr.bf16.mxu1 %v10146_v59  ;;  %5731 = vmatprep.mubr.bf16.mxu0 %v8186_v7  ;;  %v10198_v59 = vld [vmem:[%s13658_s3 + $0x11ec] ss:$16 sps:$4 sm:$0xff]   ;;  %v10223_v6 = vld [vmem:[%s13662_s7 + $0x80] ss:$16 sps:$4 sm:$0xff]  }
 0x22c   : > { %6388 = vmatprep.mubr.bf16.mxu1 %v8186_v7  ;;  %v1408_v7 = vld [vmem:[#allocation2 + $0xb8] sm:$0x11] }
 0x22d   : > { %5714 = vmatpush1.bf16.msra.mxu0 %v10141_v48  ;;  %v10193_v48 = vld [vmem:[%s13658_s3 + $0x11e0] ss:$16 sps:$4 sm:$0xff]  }
 0x22e   : > { %6371 = vmatpush1.bf16.msra.mxu1 %v10144_v17  ;;  %5715 = vmatprep.subr.bf16.mxu0 %v10149_v18  ;;  %v1479_v17 = vshll.u32 %v1406_v26, 16  ;;  %v10196_v18 = vld [vmem:[%s13658_s3 + $0x11e8] ss:$16 sps:$4 sm:$0xff]   ;;  %v10231_v26 = vld [vmem:[%s13662_s7 + $0xa4] ss:$16 sps:$4 sm:$0xff]  }
 0x22f   : > { %6372 = vmatprep.subr.bf16.mxu1 %v10152_v52  ;;  %v1490_v52 = vor.u32 %v1489_v40, %v1486_v14  ;;  %v10234_v14 = vld [vmem:[%s13662_s7 + $0xac] ss:$16 sps:$4 sm:$0xff]   ;;  %v10229_v40 = vld [vmem:[%s13662_s7 + $0xa0] ss:$16 sps:$4 sm:$0xff]  }
 0x231   : > { %5716 = vmatpush1.bf16.msra.mxu0 %v10147_v19  ;;  %v1493_v19 = vshll.u32 %v1408_v7, 16  ;;  %v10240_v7 = vld [vmem:[%s13662_s7 + $0xcc] ss:$16 sps:$4 sm:$0xff]  }
 0x232   : > { %6373 = vmatpush1.bf16.msra.mxu1 %v10150_v39  ;;  %5717 = vmatprep.subr.bf16.mxu0 %v10155_v21  ;;  %v1498_v39 = vshrl.u32 %v12627_v44, 16  ;;  %v1501_v21 = vshll.u32 %v12627_v44, 16 }
 0x233   : > { %6374 = vmatprep.subr.bf16.mxu1 %v10158_v27  ;;  %v10201_v27 = vld [vmem:[%s13662_s7 + $0x4] ss:$16 sps:$4 sm:$0xff]   ;;  %v1495_v44 = vrot.slane %v1493_v19, 5 }
 0x234   : > { %v10249_v19 = vld [vmem:[%s13662_s7 + $0x104] ss:$16 sps:$4 sm:$0xff]  }
 0x235   : > { %5718 = vmatpush1.bf16.msra.mxu0 %v10153_v29  ;;  %v10204_v29 = vld [vmem:[%s13662_s7 + $0xc] ss:$16 sps:$4 sm:$0xff]  }
 0x236   : > { %6375 = vmatpush1.bf16.msra.mxu1 %v10156_v47  ;;  %5719 = vmatprep.subr.bf16.mxu0 %v10163_v8  ;;  %v8185_v47 = vcombine.low %v12659_v2, %v12663_v1  ;;  %v8188_v8 = vcombine.high %v1454_v33, %v1468_v13  ;;  %v10199_v2 = vld [vmem:[%s13662_s7] ss:$16 sps:$4 sm:$0xff]   ;;  %v10202_v1 = vld [vmem:[%s13662_s7 + $0x8] ss:$16 sps:$4 sm:$0xff]  }
 0x237   : > { %6376 = vmatprep.subr.bf16.mxu1 %v10166_v15  ;;  %v1477_v15 = vrot.slane %v1476_v24, 4  ;;  %v10243_v24 = vld [vmem:[%s13662_s7 + $0xe4] ss:$16 sps:$4 sm:$0xff]  }
 0x239   : > { %5720 = vmatpush1.bf16.msra.mxu0 %v10161_v3  ;;  %v1481_v3 = vrot.slane %v1479_v17, 5  ;;  %v10246_v17 = vld [vmem:[%s13662_s7 + $0xec] ss:$16 sps:$4 sm:$0xff]  }
 0x23a   : > { %6377 = vmatpush1.bf16.msra.mxu1 %v10164_v30  ;;  %5721 = vmatprep.subr.bf16.mxu0 %v10169_v34  ;;  %v1491_v30 = vrot.slane %v1490_v52, 4  ;;  %v1410_v34 = vld [vmem:[#allocation2 + $0xd0] sm:$0x11]  ;;  %v10244_v52 = vld [vmem:[%s13662_s7 + $0xe8] ss:$16 sps:$4 sm:$0xff]  }
 0x23b   : > { %6378 = vmatprep.subr.bf16.mxu1 %v10172_v28  ;;  %v1500_v28 = vrot.slane %v1498_v39, 4  ;;  %v1482_v11 = vsel %vm11201_vm5, %v1477_v15, %v1481_v3  ;;  %v10252_v39 = vld [vmem:[%s13662_s7 + $0x10c] ss:$16 sps:$4 sm:$0xff]   ;;  %v10256_v15 = vld [vmem:[%s13662_s7 + $0x128] ss:$16 sps:$4 sm:$0xff]  }
 0x23c   : > { %v1496_v50 = vsel %vm11201_vm5, %v1491_v30, %v1495_v44  ;;  %v10261_v3 = vld [vmem:[%s13662_s7 + $0x144] ss:$16 sps:$4 sm:$0xff]   ;;  %v10264_v30 = vld [vmem:[%s13662_s7 + $0x14c] ss:$16 sps:$4 sm:$0xff]   ;;  %v10259_v44 = vld [vmem:[%s13662_s7 + $0x140] ss:$16 sps:$4 sm:$0xff]  }
 0x23d   : > { %5722 = vmatpush1.bf16.msra.mxu0 %v10167_v9  ;;  %v1503_v9 = vrot.slane %v1501_v21, 5  ;;  %v8190_v54 = vcombine.high %v1482_v11, %v1496_v50  ;;  %v8189_v51 = vcombine.low %v1482_v11, %v1496_v50  ;;  %v10247_v21 = vld [vmem:[%s13662_s7 + $0x100] ss:$16 sps:$4 sm:$0xff]   ;;  %v10280_v11 = vld [vmem:[%s13662_s7 + $0x1a8] ss:$16 sps:$4 sm:$0xff]  }
 0x23e   : > { %6379 = vmatpush1.bf16.msra.mxu1 %v10170_v31  ;;  %5723 = vmatprep.subr.bf16.mxu0 %v10177_v35  ;;  %v1514_v31 = vrot.slane %v1294_v37, 4  ;;  %v1517_v35 = vrot.slane %v1297_v61, 5  ;;  %v1507_v61 = vshll.u32 %v1410_v34, 16  ;;  %v10262_v34 = vld [vmem:[%s13662_s7 + $0x148] ss:$16 sps:$4 sm:$0xff]  }
 0x23f   : > { %6380 = vmatprep.subr.bf16.mxu1 %v10180_v45  ;;  %v1412_v45 = vld [vmem:[#allocation2 + $0xe8] sm:$0x11]  ;;  %v1504_v37 = vor.u32 %v1503_v9, %v1500_v28  ;;  %v10267_v28 = vld [vmem:[%s13662_s7 + $0x164] ss:$16 sps:$4 sm:$0xff]  }
 0x240   : > { %v1518_v42 = vor.u32 %v1517_v35, %v1514_v31  ;;  %v1521_v46 = vshll.u32 %v1412_v45, 16  ;;  %v1509_v60 = vrot.slane %v1507_v61, 5  ;;  %v10270_v9 = vld [vmem:[%s13662_s7 + $0x16c] ss:$16 sps:$4 sm:$0xff]   ;;  %v10265_v31 = vld [vmem:[%s13662_s7 + $0x160] ss:$16 sps:$4 sm:$0xff]  }
 0x241   : > { %5724 = vmatpush1.bf16.msra.mxu0 %v10175_v49  ;;  %v10205_v49 = vld [vmem:[%s13662_s7 + $0x20] ss:$16 sps:$4 sm:$0xff]   ;;  %v1505_v12 = vrot.slane %v1504_v37, 4  ;;  %v10268_v35 = vld [vmem:[%s13662_s7 + $0x168] ss:$16 sps:$4 sm:$0xff]  }
 0x242   : > { %6381 = vmatpush1.bf16.msra.mxu1 %v10178_v53  ;;  %5725 = vmatprep.subr.bf16.mxu0 %v10183_v25  ;;  %v10208_v53 = vld [vmem:[%s13662_s7 + $0x28] ss:$16 sps:$4 sm:$0xff]   ;;  %v10216_v25 = vld [vmem:[%s13662_s7 + $0x4c] ss:$16 sps:$4 sm:$0xff]   ;;  %v1519_v57 = vrot.slane %v1518_v42, 4  ;;  %v1523_v32 = vrot.slane %v1521_v46, 5 }
 0x243   : > { %6382 = vmatprep.subr.bf16.mxu1 %v10186_v63  ;;  %v8187_v63 = vcombine.low %v1454_v33, %v1468_v13  ;;  %v10235_v33 = vld [vmem:[%s13662_s7 + $0xc0] ss:$16 sps:$4 sm:$0xff]   ;;  %v10238_v13 = vld [vmem:[%s13662_s7 + $0xc8] ss:$16 sps:$4 sm:$0xff]   ;;  %v10282_v37 = vld [vmem:[%s13662_s7 + $0x1ac] ss:$16 sps:$4 sm:$0xff]  }
 0x244   : > { %v1524_v5 = vsel %vm11201_vm5, %v1519_v57, %v1523_v32  ;;  %v10271_v45 = vld [vmem:[%s13662_s7 + $0x180] ss:$16 sps:$4 sm:$0xff]   ;;  %v10285_v50 = vld [vmem:[%s13662_s7 + $0x1c4] ss:$16 sps:$4 sm:$0xff]   ;;  %v10288_v42 = vld [vmem:[%s13662_s7 + $0x1cc] ss:$16 sps:$4 sm:$0xff]  }
 0x245   : > { %5726 = vmatpush1.bf16.msra.mxu0 %v10181_v58  ;;  %v10214_v58 = vld [vmem:[%s13662_s7 + $0x48] ss:$16 sps:$4 sm:$0xff]   ;;  %v10277_v61 = vld [vmem:[%s13662_s7 + $0x1a0] ss:$16 sps:$4 sm:$0xff]  }
 0x246   : > { %6383 = vmatpush1.bf16.msra.mxu1 %v10184_v0  ;;  %5727 = vmatprep.subr.bf16.mxu0 %v10189_v23  ;;  %v10219_v0 = vld [vmem:[%s13662_s7 + $0x64] ss:$16 sps:$4 sm:$0xff]   ;;  %v10222_v23 = vld [vmem:[%s13662_s7 + $0x6c] ss:$16 sps:$4 sm:$0xff]   ;;  %v10283_v46 = vld [vmem:[%s13662_s7 + $0x1c0] ss:$16 sps:$4 sm:$0xff]  }
 0x247   : > { %6384 = vmatprep.subr.bf16.mxu1 %v10192_v20  ;;  %v1510_v20 = vsel %vm11201_vm5, %v1505_v12, %v1509_v60  ;;  %v10300_v12 = vld [vmem:[%s13662_s7 + $0x20c] ss:$16 sps:$4 sm:$0xff]   ;;  %v2215_v60 = vlaneseq }
 0x248   : > { %v8192_v62 = vcombine.high %v1510_v20, %v1524_v5 }
 0x249   : > { %5728 = vmatpush1.bf16.msra.mxu0 %v10187_v43  ;;  %v10220_v43 = vld [vmem:[%s13662_s7 + $0x68] ss:$16 sps:$4 sm:$0xff]   ;;  %v2216_v57 = vshrl.u32 %v2215_v60, 7 }
 0x24a   : > { %6385 = vmatpush1.bf16.msra.mxu1 %v10190_v10  ;;  %5729 = vmatprep.subr.bf16.mxu0 %v10195_v41  ;;  %v10226_v10 = vld [vmem:[%s13662_s7 + $0x88] ss:$16 sps:$4 sm:$0xff]  }
 0x24b   : > { %6386 = vmatprep.subr.bf16.mxu1 %v10198_v59  ;;  %v10232_v41 = vld [vmem:[%s13662_s7 + $0xa8] ss:$16 sps:$4 sm:$0xff]   ;;  %v10237_v59 = vld [vmem:[%s13662_s7 + $0xc4] ss:$16 sps:$4 sm:$0xff]   ;;  %v13013_v32 = vsub.s32 0, %v2216_v57 }
 0x24d   : > { %5730 = vmatpush1.bf16.msra.mxu0 %v10193_v48  ;;  %v8191_v48 = vcombine.low %v1510_v20, %v1524_v5  ;;  %v6493_v5 = vld [vmem:[%s13660_s5] sm:$0xf] }
 0x24e   : > { %6387 = vmatpush1.bf16.msra.mxu1 %v10196_v18  ;;  %7407 = vmatprep.subr.bf16.mxu0 %v10201_v27  ;;  %v10241_v18 = vld [vmem:[%s13662_s7 + $0xe0] ss:$16 sps:$4 sm:$0xff]   ;;  %v10250_v27 = vld [vmem:[%s13662_s7 + $0x108] ss:$16 sps:$4 sm:$0xff]  }
 0x24f   : > { %7553 = vmatprep.subr.bf16.mxu1 %v10204_v29  ;;  %v10255_v29 = vld [vmem:[%s13662_s7 + $0x124] ss:$16 sps:$4 sm:$0xff]  }
 0x250   : > { %5732 = vmatmul.mubr.bf16.vlgmr.msra.gmra.mrb[0].mxu0 %v8185_v47 }
 0x251   : > { %6389 = vmatmul.mubr.bf16.vlgmr.msra.gmra.mrb[0].mxu1 %v8185_v47  ;;  %5741 = vmatprep.mubr.bf16.mxu0 %v8188_v8  ;;  %v10258_v47 = vld [vmem:[%s13662_s7 + $0x12c] ss:$16 sps:$4 sm:$0xff]  }
 0x252   : > { %6398 = vmatprep.mubr.bf16.mxu1 %v8188_v8  ;;  %7408 = vmatpush1.bf16.msra.mxu0 %v10199_v2  ;;  %v10253_v8 = vld [vmem:[%s13662_s7 + $0x120] ss:$16 sps:$4 sm:$0xff]   ;;  %v10273_v2 = vld [vmem:[%s13662_s7 + $0x184] ss:$16 sps:$4 sm:$0xff]  }
 0x253   : > { %7554 = vmatpush1.bf16.msra.mxu1 %v10202_v1  ;;  %7409 = vmatprep.subr.bf16.mxu0 %v10207_v38  ;;  %v10276_v1 = vld [vmem:[%s13662_s7 + $0x18c] ss:$16 sps:$4 sm:$0xff]   ;;  %v10274_v38 = vld [vmem:[%s13662_s7 + $0x188] ss:$16 sps:$4 sm:$0xff]  }
 0x254   : > { %7555 = vmatprep.subr.bf16.mxu1 %v10210_v36  ;;  %v10279_v36 = vld [vmem:[%s13662_s7 + $0x1a4] ss:$16 sps:$4 sm:$0xff]  }
 0x256   : > { %7410 = vmatpush1.bf16.msra.mxu0 %v10205_v49  ;;  %v10286_v49 = vld [vmem:[%s13662_s7 + $0x1c8] ss:$16 sps:$4 sm:$0xff]  }
 0x257   : > { %7556 = vmatpush1.bf16.msra.mxu1 %v10208_v53  ;;  %7411 = vmatprep.subr.bf16.mxu0 %v10213_v56  ;;  %v10291_v53 = vld [vmem:[%s13662_s7 + $0x1e4] ss:$16 sps:$4 sm:$0xff]   ;;  %v10294_v56 = vld [vmem:[%s13662_s7 + $0x1ec] ss:$16 sps:$4 sm:$0xff]  }
 0x258   : > { %7557 = vmatprep.subr.bf16.mxu1 %v10216_v25  ;;  %5742 = vmatmul.mubr.bf16.gmra.mrb[4].mxu0 %v8187_v63  ;;  %v10289_v25 = vld [vmem:[%s13662_s7 + $0x1e0] ss:$16 sps:$4 sm:$0xff]  }
 0x259   : > { %6399 = vmatmul.mubr.bf16.gmra.mrb[4].mxu1 %v8187_v63  ;;  %5751 = vmatprep.mubr.bf16.mxu0 %v8190_v54  ;;  %v10292_v63 = vld [vmem:[%s13662_s7 + $0x1e8] ss:$16 sps:$4 sm:$0xff]  }
 0x25a   : > { %6408 = vmatprep.mubr.bf16.mxu1 %v8190_v54  ;;  %7412 = vmatpush1.bf16.msra.mxu0 %v10211_v55  ;;  %v10297_v54 = vld [vmem:[%s13662_s7 + $0x204] ss:$16 sps:$4 sm:$0xff]   ;;  %v13015_v55 = vsub.s32 2, %v2216_v57 }
 0x25b   : > { %7558 = vmatpush1.bf16.msra.mxu1 %v10214_v58  ;;  %7413 = vmatprep.subr.bf16.mxu0 %v10219_v0  ;;  %v2213_v58 = vld [vmem:[%s13659_s4] sm:$0xf]  ;;  %v13020_v0 = vsub.s32 1, %v2216_v57 }
 0x25c   : > { %7559 = vmatprep.subr.bf16.mxu1 %v10222_v23  ;;  %v13022_v23 = vsub.s32 3, %v2216_v57  ;;  %v13025_v20 = vrot.slane %v2213_v58, %v13013_v32 }
 0x25e   : > { %7414 = vmatpush1.bf16.msra.mxu0 %v10217_v22  ;;  %v13031_v22 = vrot.slane %v2213_v58, %v13015_v55 }
 0x25f   : > { %7560 = vmatpush1.bf16.msra.mxu1 %v10220_v43  ;;  %7415 = vmatprep.subr.bf16.mxu0 %v10225_v4  ;;  %v6547_v43 = vld [vmem:[%s13661_s6] sm:$0xf]  ;;  %v13037_v4 = vrot.slane %v2213_v58, %v13020_v0 }
 0x260   : > { %7561 = vmatprep.subr.bf16.mxu1 %v10228_v16  ;;  %5752 = vmatmul.mubr.bf16.gmra.mrb[8].mxu0 %v8189_v51  ;;  %v13040_v16 = vrot.slane %v2213_v58, %v13022_v23 }
 0x261   : > { %6409 = vmatmul.mubr.bf16.gmra.mrb[8].mxu1 %v8189_v51  ;;  %5761 = vmatprep.mubr.bf16.mxu0 %v8192_v62 }
 0x262   : > { %6418 = vmatprep.mubr.bf16.mxu1 %v8192_v62  ;;  %7416 = vmatpush1.bf16.msra.mxu0 %v10223_v6  ;;  %v13043_v62 = vrot.slane %v6493_v5, %v13013_v32 }
 0x263   : > { %7562 = vmatpush1.bf16.msra.mxu1 %v10226_v10  ;;  %7417 = vmatprep.subr.bf16.mxu0 %v10231_v26  ;;  %v13046_v10 = vrot.slane %v6493_v5, %v13015_v55  ;;  %v13049_v26 = vrot.slane %v6493_v5, %v13020_v0 }
 0x264   : > { %7563 = vmatprep.subr.bf16.mxu1 %v10234_v14  ;;  %v13052_v14 = vrot.slane %v6493_v5, %v13022_v23 }
 0x266   : > { %7418 = vmatpush1.bf16.msra.mxu0 %v10229_v40 }
 0x267   : > { %7564 = vmatpush1.bf16.msra.mxu1 %v10232_v41  ;;  %7419 = vmatprep.subr.bf16.mxu0 %v10237_v59  ;;  %v13056_v41 = vrot.slane %v6547_v43, %v13013_v32 }
 0x268   : > { %7565 = vmatprep.subr.bf16.mxu1 %v10240_v7  ;;  %5762 = vmatmul.mubr.bf16.gmra.mrb[12].mxu0 %v8191_v48  ;;  %v13060_v7 = vrot.slane %v6547_v43, %v13015_v55 }
 0x269   : > { %6419 = vmatmul.mubr.bf16.gmra.mrb[12].mxu1 %v8191_v48 }
 0x26a   : > { %7420 = vmatpush1.bf16.msra.mxu0 %v10235_v33 }
 0x26b   : > { %7566 = vmatpush1.bf16.msra.mxu1 %v10238_v13  ;;  %7421 = vmatprep.subr.bf16.mxu0 %v10243_v24 }
 0x26c   : > { %7567 = vmatprep.subr.bf16.mxu1 %v10246_v17 }
 0x26e   : > { %7422 = vmatpush1.bf16.msra.mxu0 %v10241_v18 }
 0x26f   : > { %7568 = vmatpush1.bf16.msra.mxu1 %v10244_v52  ;;  %7423 = vmatprep.subr.bf16.mxu0 %v10249_v19  ;;  %v13065_v52 = vrot.slane %v6547_v43, %v13020_v0  ;;  %v13068_v19 = vrot.slane %v6547_v43, %v13022_v23 }
 0x270   : > { %7569 = vmatprep.subr.bf16.mxu1 %v10252_v39 }
 0x272   : > { %7424 = vmatpush1.bf16.msra.mxu0 %v10247_v21 }
 0x273   : > { %7570 = vmatpush1.bf16.msra.mxu1 %v10250_v27  ;;  %7425 = vmatprep.subr.bf16.mxu0 %v10255_v29 }
 0x274   : > { %7571 = vmatprep.subr.bf16.mxu1 %v10258_v47 }
 0x276   : > { %7426 = vmatpush1.bf16.msra.mxu0 %v10253_v8 }
 0x277   : > { %7572 = vmatpush1.bf16.msra.mxu1 %v10256_v15  ;;  %7427 = vmatprep.subr.bf16.mxu0 %v10261_v3 }
 0x278   : > { %7573 = vmatprep.subr.bf16.mxu1 %v10264_v30 }
 0x27a   : > { %7428 = vmatpush1.bf16.msra.mxu0 %v10259_v44 }
 0x27b   : > { %7574 = vmatpush1.bf16.msra.mxu1 %v10262_v34  ;;  %7429 = vmatprep.subr.bf16.mxu0 %v10267_v28 }
 0x27c   : > { %7575 = vmatprep.subr.bf16.mxu1 %v10270_v9 }
 0x27e   : > { %7430 = vmatpush1.bf16.msra.mxu0 %v10265_v31 }
 0x27f   : > { %7576 = vmatpush1.bf16.msra.mxu1 %v10268_v35  ;;  %7431 = vmatprep.subr.bf16.mxu0 %v10273_v2 }
 0x280   : > { %7577 = vmatprep.subr.bf16.mxu1 %v10276_v1 }
 0x282   : > { %7432 = vmatpush1.bf16.msra.mxu0 %v10271_v45 }
 0x283   : > { %7578 = vmatpush1.bf16.msra.mxu1 %v10274_v38  ;;  %7433 = vmatprep.subr.bf16.mxu0 %v10279_v36 }
 0x284   : > { %7579 = vmatprep.subr.bf16.mxu1 %v10282_v37 }
 0x286   : > { %7434 = vmatpush1.bf16.msra.mxu0 %v10277_v61 }
 0x287   : > { %7580 = vmatpush1.bf16.msra.mxu1 %v10280_v11  ;;  %7435 = vmatprep.subr.bf16.mxu0 %v10285_v50 }
 0x288   : > { %7581 = vmatprep.subr.bf16.mxu1 %v10288_v42 }
 0x28a   : > { %7436 = vmatpush1.bf16.msra.mxu0 %v10283_v46 }
 0x28b   : > { %7582 = vmatpush1.bf16.msra.mxu1 %v10286_v49  ;;  %7437 = vmatprep.subr.bf16.mxu0 %v10291_v53 }
 0x28c   : > { %7583 = vmatprep.subr.bf16.mxu1 %v10294_v56 }
 0x28e   : > { %7438 = vmatpush1.bf16.msra.mxu0 %v10289_v25 }
 0x28f   : > { %7584 = vmatpush1.bf16.msra.mxu1 %v10292_v63  ;;  %7480 = vmatprep.subr.bf16.mxu0 %v10297_v54 }
 0x290   : > { %7626 = vmatprep.subr.bf16.mxu1 %v10300_v12 }
 0x323   : > { %v5733_v51 = vpop.f32.mrb[0].mxu0 }
 0x324   : > { %v6390_v6 = vpop.f32.mrb[0].mxu1  ;;  %v8923_v40 = vadd.f32 %v5733_v51, %v13025_v20  ;;  %v5735_v48 = vpop.f32.mrb[1].mxu0 }
 0x325   : > { %v8939_v59 = vadd.f32 %v6390_v6, %v13031_v22  ;;  %v6392_v33 = vpop.f32.mrb[1].mxu1  ;;  %v8924_v13 = vadd.f32 %v5735_v48, %v13037_v4  ;;  %v5737_v17 = vpop.f32.mrb[2].mxu0 }
 0x326   : > { %v8940_v24 = vadd.f32 %v6392_v33, %v13040_v16  ;;  %v6394_v18 = vpop.f32.mrb[2].mxu1  ;;  %v6429_v39 = vmul.f32 0.01, %v8923_v40  ;;  %v8925_v27 = vadd.f32 %v5737_v17, %v13025_v20  ;;  %v5739_v47 = vpop.f32.mrb[3].mxu0 }
 0x327   : > { %v6431_v21 = vmul.f32 0.01, %v8939_v59  ;;  %v8941_v29 = vadd.f32 %v6394_v18, %v13031_v22  ;;  %v6396_v8 = vpop.f32.mrb[3].mxu1  ;;  %v6430_v15 = vmul.f32 0.01, %v8924_v13  ;;  %v8926_v30 = vadd.f32 %v5739_v47, %v13037_v4 }
 0x328   : > { %v6432_v3 = vmul.f32 0.01, %v8940_v24  ;;  %v8942_v44 = vadd.f32 %v6396_v8, %v13040_v16  ;;  %v6461_v34 = vmax.f32 %v8923_v40, %v6429_v39  ;;  %v6433_v9 = vmul.f32 0.01, %v8925_v27 }
 0x329   : > { %v6463_v28 = vmax.f32 %v8939_v59, %v6431_v21  ;;  %v6435_v31 = vmul.f32 0.01, %v8941_v29  ;;  %v6462_v35 = vmax.f32 %v8924_v13, %v6430_v15  ;;  %v6434_v1 = vmul.f32 0.01, %v8926_v30 }
 0x32a   : > { %v6464_v2 = vmax.f32 %v8940_v24, %v6432_v3  ;;  %v6436_v45 = vmul.f32 0.01, %v8942_v44  ;;  %v6515_v38 = vmul.f32 %v13043_v62, %v6461_v34  ;;  %v6465_v37 = vmax.f32 %v8925_v27, %v6433_v9 }
 0x32b   : > { %v6517_v36 = vmul.f32 %v13046_v10, %v6463_v28  ;;  %v6467_v61 = vmax.f32 %v8941_v29, %v6435_v31  ;;  %v6516_v11 = vmul.f32 %v13049_v26, %v6462_v35  ;;  %v6466_v42 = vmax.f32 %v8926_v30, %v6434_v1  ;;  %v5743_v49 = vpop.f32.mrb[4].mxu0 }
 0x32c   : > { %v13078_v50 = vmul.f32 %v13052_v14, %v6464_v2  ;;  %v6468_v46 = vmax.f32 %v8942_v44, %v6436_v45  ;;  %v6400_v53 = vpop.f32.mrb[4].mxu1  ;;  %v6569_v56 = vadd.f32 %v13056_v41, %v6515_v38  ;;  %v6519_v63 = vmul.f32 %v13043_v62, %v6465_v37  ;;  %v5745_v12 = vpop.f32.mrb[5].mxu0 }
 0x32d   : > { %v6571_v25 = vadd.f32 %v13060_v7, %v6517_v36  ;;  %v6521_v54 = vmul.f32 %v13046_v10, %v6467_v61  ;;  %v6402_v60 = vpop.f32.mrb[5].mxu1  ;;  %v6520_v57 = vmul.f32 %v13049_v26, %v6466_v42  ;;  %v8927_v5 = vadd.f32 %v5743_v49, %v13025_v20  ;;  %v5747_v51 = vpop.f32.mrb[6].mxu0 }
 0x32e   : > { %v13086_v58 = vmul.f32 %v13052_v14, %v6468_v46  ;;  %v8943_v43 = vadd.f32 %v6400_v53, %v13031_v22  ;;  %v6404_v6 = vpop.f32.mrb[6].mxu1  ;;  %v6573_v40 = vadd.f32 %v13056_v41, %v6519_v63  ;;  %v8928_v48 = vadd.f32 %v5745_v12, %v13037_v4  ;;  %v5749_v13 = vpop.f32.mrb[7].mxu0 }
 0x32f   : > { %v6575_v59 = vadd.f32 %v13060_v7, %v6521_v54  ;;  %v8944_v33 = vadd.f32 %v6402_v60, %v13040_v16  ;;  %v6406_v24 = vpop.f32.mrb[7].mxu1  ;;  %v6437_v17 = vmul.f32 0.01, %v8927_v5  ;;  %v8929_v39 = vadd.f32 %v5747_v51, %v13025_v20 }
 0x330   : > { %v6439_v18 = vmul.f32 0.01, %v8943_v43  ;;  %v8945_v21 = vadd.f32 %v6404_v6, %v13031_v22  ;;  %v13096_v27 = vpack.c.bf16 %v6573_v40, %v6569_v56  ;;  %v6438_v47 = vmul.f32 0.01, %v8928_v48 }
 0x331   : > { %v13098_v29 = vpack.c.bf16 %v6575_v59, %v6571_v25  ;;  %v6440_v8 = vmul.f32 0.01, %v8944_v33  ;;  %v6469_v15 = vmax.f32 %v8927_v5, %v6437_v17  ;;  %v6441_v30 = vmul.f32 0.01, %v8929_v39 }
 0x332   : > { %v6471_v3 = vmax.f32 %v8943_v43, %v6439_v18  ;;  %v6443_v44 = vmul.f32 0.01, %v8945_v21  ;;  %v6470_v34 = vmax.f32 %v8928_v48, %v6438_v47  ;;  %v8930_v9 = vadd.f32 %v5749_v13, %v13037_v4 }
 0x333   : > { %v6472_v28 = vmax.f32 %v8944_v33, %v6440_v8  ;;  %v8946_v31 = vadd.f32 %v6406_v24, %v13040_v16  ;;  %v13103_v35 = vmul.f32 %v13043_v62, %v6469_v15  ;;  %v6473_v1 = vmax.f32 %v8929_v39, %v6441_v30  ;;  %v5753_v38 = vpop.f32.mrb[8].mxu0  ;;  %v10303_v30 = vld [vmem:[%s13662_s7 + $0x224] ss:$16 sps:$4 sm:$0xff]  }
 0x334   : > { %v13106_v2 = vmul.f32 %v13046_v10, %v6471_v3  ;;  %v6475_v45 = vmax.f32 %v8945_v21, %v6443_v44  ;;  %v6410_v36 = vpop.f32.mrb[8].mxu1  ;;  %v13109_v37 = vmul.f32 %v13049_v26, %v6470_v34  ;;  %v6442_v42 = vmul.f32 0.01, %v8930_v9  ;;  %v5755_v49 = vpop.f32.mrb[9].mxu0 }
 0x335   : > { %v13112_v61 = vmul.f32 %v13052_v14, %v6472_v28  ;;  %v6444_v46 = vmul.f32 0.01, %v8946_v31  ;;  %v6412_v53 = vpop.f32.mrb[9].mxu1  ;;  %v13115_v56 = vmul.f32 %v13043_v62, %v6473_v1  ;;  %v8931_v63 = vadd.f32 %v5753_v38, %v13025_v20  ;;  %v5757_v12 = vpop.f32.mrb[10].mxu0 }
 0x336   : > { %v13118_v25 = vmul.f32 %v13046_v10, %v6475_v45  ;;  %v8947_v54 = vadd.f32 %v6410_v36, %v13031_v22  ;;  %v6414_v60 = vpop.f32.mrb[10].mxu1  ;;  %v6474_v5 = vmax.f32 %v8930_v9, %v6442_v42  ;;  %v6570_v51 = vadd.f32 %v13065_v52, %v6516_v11  ;;  %v5759_v40 = vpop.f32.mrb[11].mxu0  ;;  %v10295_v11 = vld [vmem:[%s13662_s7 + $0x200] ss:$16 sps:$4 sm:$0xff]  }
 0x337   : > { %v6476_v43 = vmax.f32 %v8946_v31, %v6444_v46  ;;  %v6574_v6 = vadd.f32 %v13065_v52, %v6520_v57  ;;  %v6416_v59 = vpop.f32.mrb[11].mxu1  ;;  %v6445_v48 = vmul.f32 0.01, %v8931_v63  ;;  %v8932_v13 = vadd.f32 %v5755_v49, %v13037_v4  ;;  %v10298_v57 = vld [vmem:[%s13662_s7 + $0x208] ss:$16 sps:$4 sm:$0xff]  }
 0x338   : > { %v6447_v33 = vmul.f32 0.01, %v8947_v54  ;;  %v8948_v24 = vadd.f32 %v6412_v53, %v13040_v16  ;;  %v6528_v17 = vmul.f32 %v13049_v26, %v6474_v5  ;;  %v8933_v21 = vadd.f32 %v5757_v12, %v13025_v20  ;;  %v10306_v31 = vld [vmem:[%s13662_s7 + $0x22c] ss:$16 sps:$4 sm:$0xff]   ;;  %v10301_v42 = vld [vmem:[%s13662_s7 + $0x220] ss:$16 sps:$4 sm:$0xff]  }
 0x339   : > { %v13128_v18 = vmul.f32 %v13052_v14, %v6476_v43  ;;  %v6602_v39 = vpack.c.bf16 %v6574_v6, %v6570_v51  ;;  %v6477_v47 = vmax.f32 %v8931_v63, %v6445_v48  ;;  %v6446_v15 = vmul.f32 0.01, %v8932_v13  ;;  %v10304_v43 = vld [vmem:[%s13662_s7 + $0x228] ss:$16 sps:$4 sm:$0xff]  }
 0x33a   : > { %v6479_v8 = vmax.f32 %v8947_v54, %v6447_v33  ;;  %v6448_v3 = vmul.f32 0.01, %v8948_v24  ;;  %v6449_v44 = vmul.f32 0.01, %v8933_v21  ;;  %v8949_v34 = vadd.f32 %v6414_v60, %v13031_v22 }
 0x33b   : > { %7439 = vmatprep.mubr.bf16.mxu0 %v6602_v39  ;;  %7585 = vmatprep.mubr.bf16.mxu1 %v6602_v39  ;;  %v8934_v28 = vadd.f32 %v5759_v40, %v13037_v4  ;;  %v8950_v9 = vadd.f32 %v6416_v59, %v13040_v16  ;;  %v13147_v1 = vmul.f32 %v13043_v62, %v6477_v47  ;;  %v5763_v46 = vpop.f32.mrb[12].mxu0 }
 0x33c   : > { %v13150_v45 = vmul.f32 %v13046_v10, %v6479_v8  ;;  %v6478_v38 = vmax.f32 %v8932_v13, %v6446_v15  ;;  %v6480_v36 = vmax.f32 %v8948_v24, %v6448_v3  ;;  %7440 = vmatmul.mubr.bf16.vlgmr.msra.gmra.mrb[16].mxu0 %v13096_v27  ;;  %v6420_v49 = vpop.f32.mrb[12].mxu1  ;;  %7586 = vmatmul.mubr.bf16.vlgmr.msra.gmra.mrb[16].mxu1 %v13096_v27  ;;  %v6451_v63 = vmul.f32 0.01, %v8949_v34  ;;  %v10309_v27 = vld [vmem:[%s13662_s7 + $0x244] ss:$16 sps:$4 sm:$0xff]   ;;  %v5765_v6 = vpop.f32.mrb[13].mxu0 }
 0x33d   : > { %7481 = vmatpush1.bf16.msra.mxu0 %v10295_v11  ;;  %v6481_v53 = vmax.f32 %v8933_v21, %v6449_v44  ;;  %v6450_v54 = vmul.f32 0.01, %v8934_v28  ;;  %v6452_v12 = vmul.f32 0.01, %v8950_v9  ;;  %7627 = vmatpush1.bf16.msra.mxu1 %v10298_v57  ;;  %v8935_v51 = vadd.f32 %v5763_v46, %v13025_v20  ;;  %v6422_v40 = vpop.f32.mrb[13].mxu1  ;;  %v5767_v39 = vpop.f32.mrb[14].mxu0 }
 0x33e   : > { %v13158_v60 = vmul.f32 %v13049_v26, %v6478_v38  ;;  %v13161_v5 = vmul.f32 %v13052_v14, %v6480_v36  ;;  %7482 = vmatprep.subr.bf16.mxu0 %v10303_v30  ;;  %v6483_v48 = vmax.f32 %v8949_v34, %v6451_v63  ;;  %7628 = vmatprep.subr.bf16.mxu1 %v10306_v31  ;;  %v10312_v24 = vld [vmem:[%s13662_s7 + $0x24c] ss:$16 sps:$4 sm:$0xff]   ;;  %v6424_v11 = vpop.f32.mrb[14].mxu1  ;;  %v5769_v15 = vpop.f32.mrb[15].mxu0  ;;  %v10310_v38 = vld [vmem:[%s13662_s7 + $0x248] ss:$16 sps:$4 sm:$0xff]  }
 0x33f   : > { %v13171_v59 = vmul.f32 %v13043_v62, %v6481_v53  ;;  %v6482_v33 = vmax.f32 %v8934_v28, %v6450_v54  ;;  %v6484_v13 = vmax.f32 %v8950_v9, %v6452_v12  ;;  %v6453_v57 = vmul.f32 0.01, %v8935_v51  ;;  %v6426_v3 = vpop.f32.mrb[15].mxu1  ;;  %v10307_v28 = vld [vmem:[%s13662_s7 + $0x240] ss:$16 sps:$4 sm:$0xff]  }
 0x340   : > { %v8951_v21 = vadd.f32 %v6420_v49, %v13031_v22  ;;  %v6578_v47 = vadd.f32 %v13065_v52, %v13109_v37  ;;  %v6582_v8 = vadd.f32 %v13065_v52, %v6528_v17  ;;  %v13181_v30 = vmul.f32 %v13046_v10, %v6483_v48 }
 0x341   : > { %v6536_v44 = vmul.f32 %v13049_v26, %v6482_v33  ;;  %v13185_v34 = vmul.f32 %v13052_v14, %v6484_v13  ;;  %7483 = vmatpush1.bf16.msra.mxu0 %v10301_v42  ;;  %v8936_v9 = vadd.f32 %v5765_v6, %v13037_v4  ;;  %7629 = vmatpush1.bf16.msra.mxu1 %v10304_v43  ;;  %v10315_v42 = vld [vmem:[%s13662_s7 + $0x264] ss:$16 sps:$4 sm:$0xff]  }
 0x342   : > { %v6485_v37 = vmax.f32 %v8935_v51, %v6453_v57  ;;  %v6455_v17 = vmul.f32 0.01, %v8951_v21  ;;  %v6606_v31 = vpack.c.bf16 %v6582_v8, %v6578_v47  ;;  %7484 = vmatprep.subr.bf16.mxu0 %v10309_v27  ;;  %v8952_v36 = vadd.f32 %v6422_v40, %v13040_v16  ;;  %7630 = vmatprep.subr.bf16.mxu1 %v10312_v24  ;;  %v10318_v27 = vld [vmem:[%s13662_s7 + $0x26c] ss:$16 sps:$4 sm:$0xff]   ;;  %v10316_v24 = vld [vmem:[%s13662_s7 + $0x268] ss:$16 sps:$4 sm:$0xff]  }
 0x343   : > { %v6454_v46 = vmul.f32 0.01, %v8936_v9  ;;  %v6577_v49 = vadd.f32 %v13056_v41, %v13103_v35  ;;  %v6581_v53 = vadd.f32 %v13056_v41, %v13115_v56  ;;  %v8937_v63 = vadd.f32 %v5767_v39, %v13025_v20  ;;  %v10313_v20 = vld [vmem:[%s13662_s7 + $0x260] ss:$16 sps:$4 sm:$0xff]  }
 0x344   : > { %v6539_v54 = vmul.f32 %v13043_v62, %v6485_v37  ;;  %v6487_v12 = vmax.f32 %v8951_v21, %v6455_v17  ;;  %7449 = vmatprep.mubr.bf16.mxu0 %v6606_v31  ;;  %7595 = vmatprep.mubr.bf16.mxu1 %v6606_v31  ;;  %v6456_v43 = vmul.f32 0.01, %v8952_v36  ;;  %v8953_v51 = vadd.f32 %v6424_v11, %v13031_v22  ;;  %v10319_v37 = vld [vmem:[%s13662_s7 + $0x280] ss:$16 sps:$4 sm:$0xff]  }
 0x345   : > { %v6486_v6 = vmax.f32 %v8936_v9, %v6454_v46  ;;  %v6605_v40 = vpack.c.bf16 %v6581_v53, %v6577_v49  ;;  %7485 = vmatpush1.bf16.msra.mxu0 %v10307_v28  ;;  %v6457_v35 = vmul.f32 0.01, %v8937_v63  ;;  %v8938_v56 = vadd.f32 %v5769_v15, %v13037_v4  ;;  %7631 = vmatpush1.bf16.msra.mxu1 %v10310_v38  ;;  %v10321_v4 = vld [vmem:[%s13662_s7 + $0x284] ss:$16 sps:$4 sm:$0xff]   ;;  %v10330_v49 = vld [vmem:[%s13662_s7 + $0x2ac] ss:$16 sps:$4 sm:$0xff]  }
 0x346   : > { %v13213_v48 = vmul.f32 %v13046_v10, %v6487_v12  ;;  %v6488_v33 = vmax.f32 %v8952_v36, %v6456_v43  ;;  %v6459_v22 = vmul.f32 0.01, %v8953_v51  ;;  %v8954_v13 = vadd.f32 %v6426_v3, %v13040_v16  ;;  %7486 = vmatprep.subr.bf16.mxu0 %v10315_v42  ;;  %v10324_v16 = vld [vmem:[%s13662_s7 + $0x28c] ss:$16 sps:$4 sm:$0xff]   ;;  %7632 = vmatprep.subr.bf16.mxu1 %v10318_v27 }
 0x347   : > { %v6540_v39 = vmul.f32 %v13049_v26, %v6486_v6  ;;  %7450 = vmatmul.mubr.bf16.gmra.mrb[20].mxu0 %v6605_v40  ;;  %7596 = vmatmul.mubr.bf16.gmra.mrb[20].mxu1 %v6605_v40  ;;  %v6489_v11 = vmax.f32 %v8937_v63, %v6457_v35  ;;  %v6458_v57 = vmul.f32 0.01, %v8938_v56  ;;  %v6586_v21 = vadd.f32 %v13065_v52, %v13158_v60 }
 0x348   : > { %v6542_v47 = vmul.f32 %v13052_v14, %v6488_v33  ;;  %v6491_v8 = vmax.f32 %v8953_v51, %v6459_v22  ;;  %v6460_v15 = vmul.f32 0.01, %v8954_v13  ;;  %v6590_v3 = vadd.f32 %v13065_v52, %v6536_v44  ;;  %v10327_v44 = vld [vmem:[%s13662_s7 + $0x2a4] ss:$16 sps:$4 sm:$0xff]   ;;  %v10336_v51 = vld [vmem:[%s13662_s7 + $0x2cc] ss:$16 sps:$4 sm:$0xff]  }
 0x349   : > { %v6543_v28 = vmul.f32 %v13043_v62, %v6489_v11  ;;  %v6490_v9 = vmax.f32 %v8938_v56, %v6458_v57  ;;  %7487 = vmatpush1.bf16.msra.mxu0 %v10313_v20  ;;  %v6585_v60 = vadd.f32 %v13056_v41, %v13147_v1  ;;  %v6589_v17 = vadd.f32 %v13056_v41, %v13171_v59  ;;  %v10322_v62 = vld [vmem:[%s13662_s7 + $0x288] ss:$16 sps:$4 sm:$0xff]   ;;  %v10331_v56 = vld [vmem:[%s13662_s7 + $0x2c0] ss:$16 sps:$4 sm:$0xff]   ;;  %v10342_v11 = vld [vmem:[%s13662_s7 + $0x2ec] ss:$16 sps:$4 sm:$0xff]  }
 0x34a   : > { %v6545_v31 = vmul.f32 %v13046_v10, %v6491_v8  ;;  %v6492_v38 = vmax.f32 %v8954_v13, %v6460_v15  ;;  %7633 = vmatpush1.bf16.msra.mxu1 %v10316_v24  ;;  %v6610_v36 = vpack.c.bf16 %v6590_v3, %v6586_v21  ;;  %7488 = vmatprep.subr.bf16.mxu0 %v10321_v4  ;;  %v10348_v57 = vld [vmem:[%s13662_s7 + $0x30c] ss:$16 sps:$4 sm:$0xff]   ;;  %v10343_v21 = vld [vmem:[%s13662_s7 + $0x300] ss:$16 sps:$4 sm:$0xff]   ;;  %v10352_v3 = vld [vmem:[%s13662_s7 + $0x328] ss:$16 sps:$4 sm:$0xff]  }
 0x34b   : > { %v6544_v42 = vmul.f32 %v13049_v26, %v6490_v9  ;;  %7634 = vmatprep.subr.bf16.mxu1 %v10324_v16  ;;  %v6609_v1 = vpack.c.bf16 %v6589_v17, %v6585_v60  ;;  %v6594_v59 = vadd.f32 %v13065_v52, %v6540_v39  ;;  %v6593_v10 = vadd.f32 %v13056_v41, %v6539_v54  ;;  %v10325_v26 = vld [vmem:[%s13662_s7 + $0x2a0] ss:$16 sps:$4 sm:$0xff]   ;;  %v10346_v16 = vld [vmem:[%s13662_s7 + $0x308] ss:$16 sps:$4 sm:$0xff]   ;;  %v10354_v8 = vld [vmem:[%s13662_s7 + $0x32c] ss:$16 sps:$4 sm:$0xff]  }
 0x34c   : > { %v6546_v46 = vmul.f32 %v13052_v14, %v6492_v38  ;;  %7459 = vmatprep.mubr.bf16.mxu0 %v6610_v36  ;;  %7605 = vmatprep.mubr.bf16.mxu1 %v6610_v36  ;;  %v6597_v53 = vadd.f32 %v13056_v41, %v6543_v28  ;;  %v6572_v63 = vadd.f32 %v13068_v19, %v13078_v50  ;;  %v10328_v41 = vld [vmem:[%s13662_s7 + $0x2a8] ss:$16 sps:$4 sm:$0xff]   ;;  %v10333_v50 = vld [vmem:[%s13662_s7 + $0x2c4] ss:$16 sps:$4 sm:$0xff]   ;;  %v10337_v39 = vld [vmem:[%s13662_s7 + $0x2e0] ss:$16 sps:$4 sm:$0xff]  }
 0x34d   : > { %7489 = vmatpush1.bf16.msra.mxu0 %v10319_v37  ;;  %v6598_v54 = vadd.f32 %v13065_v52, %v6544_v42  ;;  %v6576_v14 = vadd.f32 %v13068_v19, %v13086_v58  ;;  %v6580_v12 = vadd.f32 %v13068_v19, %v13112_v61  ;;  %v6584_v43 = vadd.f32 %v13068_v19, %v13128_v18  ;;  %v10349_v15 = vld [vmem:[%s13662_s7 + $0x320] ss:$16 sps:$4 sm:$0xff]   ;;  %v10357_v28 = vld [vmem:[%s13662_s7 + $0x344] ss:$16 sps:$4 sm:$0xff]   ;;  %v10360_v9 = vld [vmem:[%s13662_s7 + $0x34c] ss:$16 sps:$4 sm:$0xff]  }
 0x34e   : > { %7635 = vmatpush1.bf16.msra.mxu1 %v10322_v62  ;;  %7490 = vmatprep.subr.bf16.mxu0 %v10327_v44  ;;  %v6613_v52 = vpack.c.bf16 %v6597_v53, %v6593_v10  ;;  %v6579_v58 = vadd.f32 %v13060_v7, %v13106_v2  ;;  %v6583_v61 = vadd.f32 %v13060_v7, %v13118_v25  ;;  %v10355_v37 = vld [vmem:[%s13662_s7 + $0x340] ss:$16 sps:$4 sm:$0xff]   ;;  %v10358_v60 = vld [vmem:[%s13662_s7 + $0x348] ss:$16 sps:$4 sm:$0xff]   ;;  %v10363_v17 = vld [vmem:[%s13662_s7 + $0x364] ss:$16 sps:$4 sm:$0xff]  }
 0x34f   : > { %7460 = vmatmul.mubr.bf16.gmra.mrb[24].mxu0 %v6609_v1  ;;  %7606 = vmatmul.mubr.bf16.gmra.mrb[24].mxu1 %v6609_v1  ;;  %v6614_v18 = vpack.c.bf16 %v6598_v54, %v6594_v59  ;;  %v6604_v27 = vpack.c.bf16 %v6576_v14, %v6572_v63  ;;  %v13278_v6 = vpack.c.bf16 %v6584_v43, %v6580_v12  ;;  %v10361_v38 = vld [vmem:[%s13662_s7 + $0x360] ss:$16 sps:$4 sm:$0xff]   ;;  %v10364_v36 = vld [vmem:[%s13662_s7 + $0x368] ss:$16 sps:$4 sm:$0xff]   ;;  %v10369_v62 = vld [vmem:[%s13662_s7 + $0x384] ss:$16 sps:$4 sm:$0xff]  }
 0x350   : > { %7636 = vmatprep.subr.bf16.mxu1 %v10330_v49  ;;  %v13280_v40 = vpack.c.bf16 %v6583_v61, %v6579_v58  ;;  %v6588_v35 = vadd.f32 %v13068_v19, %v13161_v5  ;;  %v6592_v2 = vadd.f32 %v13068_v19, %v13185_v34  ;;  %v6587_v25 = vadd.f32 %v13060_v7, %v13150_v45  ;;  %v10334_v5 = vld [vmem:[%s13662_s7 + $0x2c8] ss:$16 sps:$4 sm:$0xff]   ;;  %v10339_v45 = vld [vmem:[%s13662_s7 + $0x2e4] ss:$16 sps:$4 sm:$0xff]   ;;  %v10372_v44 = vld [vmem:[%s13662_s7 + $0x38c] ss:$16 sps:$4 sm:$0xff]  }
 0x351   : > { %7491 = vmatpush1.bf16.msra.mxu0 %v10325_v26  ;;  %7469 = vmatprep.mubr.bf16.mxu0 %v6614_v18  ;;  %v6591_v20 = vadd.f32 %v13060_v7, %v13181_v30  ;;  %v6596_v33 = vadd.f32 %v13068_v19, %v6542_v47  ;;  %v6600_v22 = vadd.f32 %v13068_v19, %v6546_v46  ;;  %v10351_v47 = vld [vmem:[%s13662_s7 + $0x324] ss:$16 sps:$4 sm:$0xff]   ;;  %v10367_v42 = vld [vmem:[%s13662_s7 + $0x380] ss:$16 sps:$4 sm:$0xff]   ;;  %v10370_v1 = vld [vmem:[%s13662_s7 + $0x388] ss:$16 sps:$4 sm:$0xff]  }
 0x352   : > { %7637 = vmatpush1.bf16.msra.mxu1 %v10328_v41  ;;  %7492 = vmatprep.subr.bf16.mxu0 %v10333_v50  ;;  %v13301_v34 = vpack.c.bf16 %v6592_v2, %v6588_v35  ;;  %v6595_v13 = vadd.f32 %v13060_v7, %v13213_v48  ;;  %v6599_v30 = vadd.f32 %v13060_v7, %v6545_v31  ;;  %v10340_v7 = vld [vmem:[%s13662_s7 + $0x2e8] ss:$16 sps:$4 sm:$0xff]   ;;  %v10345_v48 = vld [vmem:[%s13662_s7 + $0x304] ss:$16 sps:$4 sm:$0xff]   ;;  %v10366_v31 = vld [vmem:[%s13662_s7 + $0x36c] ss:$16 sps:$4 sm:$0xff]  }
 0x353   : > { %7615 = vmatprep.mubr.bf16.mxu1 %v6614_v18  ;;  %7638 = vmatprep.subr.bf16.mxu1 %v10336_v51  ;;  %v13306_v19 = vpack.c.bf16 %v6591_v20, %v6587_v25  ;;  %v13308_v24 = vpack.c.bf16 %v6600_v22, %v6596_v33  ;;  %v10375_v59 = vld [vmem:[%s13662_s7 + $0x3a4] ss:$16 sps:$4 sm:$0xff]   ;;  %v10378_v10 = vld [vmem:[%s13662_s7 + $0x3ac] ss:$16 sps:$4 sm:$0xff]   ;;  %v10373_v46 = vld [vmem:[%s13662_s7 + $0x3a0] ss:$16 sps:$4 sm:$0xff]  }
 0x354   : > { %v13310_v4 = vpack.c.bf16 %v6599_v30, %v6595_v13  ;;  %v10376_v49 = vld [vmem:[%s13662_s7 + $0x3a8] ss:$16 sps:$4 sm:$0xff]   ;;  %v10381_v53 = vld [vmem:[%s13662_s7 + $0x3c4] ss:$16 sps:$4 sm:$0xff]   ;;  %v10384_v63 = vld [vmem:[%s13662_s7 + $0x3cc] ss:$16 sps:$4 sm:$0xff]  }
 0x355   : > { %7493 = vmatpush1.bf16.msra.mxu0 %v10331_v56  ;;  %v10379_v26 = vld [vmem:[%s13662_s7 + $0x3c0] ss:$16 sps:$4 sm:$0xff]   ;;  %v10382_v54 = vld [vmem:[%s13662_s7 + $0x3c8] ss:$16 sps:$4 sm:$0xff]   ;;  %v10387_v14 = vld [vmem:[%s13662_s7 + $0x3e4] ss:$16 sps:$4 sm:$0xff]  }
 0x356   : > { %7639 = vmatpush1.bf16.msra.mxu1 %v10334_v5  ;;  %7494 = vmatprep.subr.bf16.mxu0 %v10339_v45  ;;  %v10390_v12 = vld [vmem:[%s13662_s7 + $0x3ec] ss:$16 sps:$4 sm:$0xff]   ;;  %v10385_v43 = vld [vmem:[%s13662_s7 + $0x3e0] ss:$16 sps:$4 sm:$0xff]   ;;  %v10388_v41 = vld [vmem:[%s13662_s7 + $0x3e8] ss:$16 sps:$4 sm:$0xff]  }
 0x357   : > { %7470 = vmatmul.mubr.bf16.gmra.mrb[28].mxu0 %v6613_v52  ;;  %7616 = vmatmul.mubr.bf16.gmra.mrb[28].mxu1 %v6613_v52 }
 0x358   : > { %7512 = vmatprep.mubr.bf16.mxu0 %v6604_v27  ;;  %7658 = vmatprep.mubr.bf16.mxu1 %v6604_v27 }
 0x359   : > { %7640 = vmatprep.subr.bf16.mxu1 %v10342_v11  ;;  %7495 = vmatpush1.bf16.msra.mxu0 %v10337_v39 }
 0x35a   : > { %7641 = vmatpush1.bf16.msra.mxu1 %v10340_v7  ;;  %7496 = vmatprep.subr.bf16.mxu0 %v10345_v48 }
 0x35b   : > { %7642 = vmatprep.subr.bf16.mxu1 %v10348_v57 }
 0x35d   : > { %7497 = vmatpush1.bf16.msra.mxu0 %v10343_v21 }
 0x35e   : > { %7643 = vmatpush1.bf16.msra.mxu1 %v10346_v16  ;;  %7498 = vmatprep.subr.bf16.mxu0 %v10351_v47 }
 0x35f   : > { %7644 = vmatprep.subr.bf16.mxu1 %v10354_v8 }
 0x361   : > { %7499 = vmatpush1.bf16.msra.mxu0 %v10349_v15 }
 0x362   : > { %7645 = vmatpush1.bf16.msra.mxu1 %v10352_v3  ;;  %7500 = vmatprep.subr.bf16.mxu0 %v10357_v28 }
 0x363   : > { %7646 = vmatprep.subr.bf16.mxu1 %v10360_v9 }
 0x365   : > { %7501 = vmatpush1.bf16.msra.mxu0 %v10355_v37 }
 0x366   : > { %7647 = vmatpush1.bf16.msra.mxu1 %v10358_v60  ;;  %7502 = vmatprep.subr.bf16.mxu0 %v10363_v17 }
 0x367   : > { %7648 = vmatprep.subr.bf16.mxu1 %v10366_v31 }
 0x369   : > { %7503 = vmatpush1.bf16.msra.mxu0 %v10361_v38 }
 0x36a   : > { %7649 = vmatpush1.bf16.msra.mxu1 %v10364_v36  ;;  %7504 = vmatprep.subr.bf16.mxu0 %v10369_v62 }
 0x36b   : > { %7650 = vmatprep.subr.bf16.mxu1 %v10372_v44 }
 0x36d   : > { %7505 = vmatpush1.bf16.msra.mxu0 %v10367_v42 }
 0x36e   : > { %7651 = vmatpush1.bf16.msra.mxu1 %v10370_v1  ;;  %7506 = vmatprep.subr.bf16.mxu0 %v10375_v59 }
 0x36f   : > { %7652 = vmatprep.subr.bf16.mxu1 %v10378_v10 }
 0x371   : > { %7507 = vmatpush1.bf16.msra.mxu0 %v10373_v46 }
 0x372   : > { %7653 = vmatpush1.bf16.msra.mxu1 %v10376_v49  ;;  %7508 = vmatprep.subr.bf16.mxu0 %v10381_v53 }
 0x373   : > { %7654 = vmatprep.subr.bf16.mxu1 %v10384_v63 }
 0x375   : > { %7509 = vmatpush1.bf16.msra.mxu0 %v10379_v26 }
 0x376   : > { %7655 = vmatpush1.bf16.msra.mxu1 %v10382_v54  ;;  %7510 = vmatprep.subr.bf16.mxu0 %v10387_v14 }
 0x377   : > { %7656 = vmatprep.subr.bf16.mxu1 %v10390_v12 }
 0x379   : > { %7511 = vmatpush1.bf16.msra.mxu0 %v10385_v43 }
 0x37a   : > { %7657 = vmatpush1.bf16.msra.mxu1 %v10388_v41 }
 0x37c   : > { %7513 = vmatmul.mubr.bf16.vlgmr.msra.gmra.mrb[16].mxu0 %v13098_v29 }
 0x37d   : > { %7659 = vmatmul.mubr.bf16.vlgmr.msra.gmra.mrb[16].mxu1 %v13098_v29  ;;  %7522 = vmatprep.mubr.bf16.mxu0 %v13278_v6  ;;  %v6745_v29 = vld [vmem:[%s13663_s8] sm:$0xf] }
 0x37e   : > { %7668 = vmatprep.mubr.bf16.mxu1 %v13278_v6  ;;  %v13435_v50 = vrot.slane %v6745_v29, %v13013_v32  ;;  %v13438_v52 = vrot.slane %v6745_v29, %v13020_v0  ;;  %v13441_v61 = vrot.slane %v6745_v29, %v13015_v55 }
 0x384   : > { %7523 = vmatmul.mubr.bf16.gmra.mrb[20].mxu0 %v13280_v40 }
 0x385   : > { %7669 = vmatmul.mubr.bf16.gmra.mrb[20].mxu1 %v13280_v40  ;;  %7532 = vmatprep.mubr.bf16.mxu0 %v13301_v34  ;;  %v13446_v40 = vrot.slane %v6745_v29, %v13022_v23 }
 0x386   : > { %7678 = vmatprep.mubr.bf16.mxu1 %v13301_v34 }
 0x38c   : > { %7533 = vmatmul.mubr.bf16.gmra.mrb[24].mxu0 %v13306_v19 }
 0x38d   : > { %7679 = vmatmul.mubr.bf16.gmra.mrb[24].mxu1 %v13306_v19  ;;  %7542 = vmatprep.mubr.bf16.mxu0 %v13308_v24 }
 0x38e   : > { %7688 = vmatprep.mubr.bf16.mxu1 %v13308_v24 }
 0x394   : > { %7543 = vmatmul.mubr.bf16.gmra.mrb[28].mxu0 %v13310_v4 }
 0x395   : > { %7689 = vmatmul.mubr.bf16.gmra.mrb[28].mxu1 %v13310_v4 }
 0x44f   : > { %v7514_v58 = vpop.f32.mrb[16].mxu0 }
 0x450   : > { %v8955_v18 = vadd.f32 %v7514_v58, %v13435_v50  ;;  %v7660_v51 = vpop.f32.mrb[16].mxu1  ;;  %v7516_v27 = vpop.f32.mrb[17].mxu0 }
 0x451   : > { %v8956_v6 = vadd.f32 %v7516_v27, %v13438_v52  ;;  %v7662_v35 = vpop.f32.mrb[17].mxu1  ;;  %v7518_v2 = vpop.f32.mrb[18].mxu0  ;;  %v8971_v56 = vadd.f32 %v7660_v51, %v13441_v61 }
 0x452   : > { %v8957_v32 = vadd.f32 %v7518_v2, %v13435_v50  ;;  %v7664_v25 = vpop.f32.mrb[18].mxu1  ;;  %v7520_v0 = vpop.f32.mrb[19].mxu0  ;;  %v8972_v22 = vadd.f32 %v7662_v35, %v13446_v40 }
 0x453   : > { %v7699_v20 = vadd.f32 %v8956_v6, %v8955_v18  ;;  %v8958_v55 = vadd.f32 %v7520_v0, %v13438_v52  ;;  %v7666_v33 = vpop.f32.mrb[19].mxu1  ;;  %v8973_v5 = vadd.f32 %v7664_v25, %v13441_v61 }
 0x454   : > { %v8974_v23 = vadd.f32 %v7666_v33, %v13446_v40 }
 0x455   : > { %v7704_v45 = vadd.f32 %v8958_v55, %v8957_v32  ;;  %v7700_v34 = vadd.f32 %v8971_v56, %v7699_v20 }
 0x457   : > { %v7524_v13 = vpop.f32.mrb[20].mxu0  ;;  %v7701_v30 = vadd.f32 %v8972_v22, %v7700_v34  ;;  %v7705_v19 = vadd.f32 %v8973_v5, %v7704_v45 }
 0x458   : > { %v8959_v24 = vadd.f32 %v7524_v13, %v13435_v50  ;;  %v7670_v4 = vpop.f32.mrb[20].mxu1  ;;  %v7526_v39 = vpop.f32.mrb[21].mxu0 }
 0x459   : > { %v8960_v11 = vadd.f32 %v7526_v39, %v13438_v52  ;;  %v7672_v7 = vpop.f32.mrb[21].mxu1  ;;  %v7528_v48 = vpop.f32.mrb[22].mxu0  ;;  %7702 = vadd.xlane.f32.xlu0 %v7701_v30  ;;  %v7706_v57 = vadd.f32 %v8974_v23, %v7705_v19  ;;  %v8975_v8 = vadd.f32 %v7670_v4, %v13441_v61 }
 0x45a   : > { %v8961_v21 = vadd.f32 %v7528_v48, %v13435_v50  ;;  %v7674_v16 = vpop.f32.mrb[22].mxu1  ;;  %v7530_v47 = vpop.f32.mrb[23].mxu0  ;;  %v8976_v9 = vadd.f32 %v7672_v7, %v13446_v40 }
 0x45b   : > { %v7709_v15 = vadd.f32 %v8960_v11, %v8959_v24  ;;  %v8962_v3 = vadd.f32 %v7530_v47, %v13438_v52  ;;  %v7676_v28 = vpop.f32.mrb[23].mxu1  ;;  %v8977_v37 = vadd.f32 %v7674_v16, %v13441_v61 }
 0x45c   : > { %v8978_v31 = vadd.f32 %v7676_v28, %v13446_v40 }
 0x45d   : > { %v7714_v60 = vadd.f32 %v8962_v3, %v8961_v21  ;;  %7707 = vadd.xlane.f32.xlu0 %v7706_v57  ;;  %v7710_v17 = vadd.f32 %v8975_v8, %v7709_v15 }
 0x45f   : > { %v7534_v38 = vpop.f32.mrb[24].mxu0  ;;  %v7711_v36 = vadd.f32 %v8976_v9, %v7710_v17  ;;  %v7715_v62 = vadd.f32 %v8977_v37, %v7714_v60 }
 0x460   : > { %v8963_v44 = vadd.f32 %v7534_v38, %v13435_v50  ;;  %v7680_v42 = vpop.f32.mrb[24].mxu1  ;;  %v7536_v1 = vpop.f32.mrb[25].mxu0 }
 0x461   : > { %v8964_v59 = vadd.f32 %v7536_v1, %v13438_v52  ;;  %v7682_v10 = vpop.f32.mrb[25].mxu1  ;;  %v7538_v46 = vpop.f32.mrb[26].mxu0  ;;  %7712 = vadd.xlane.f32.xlu1 %v7711_v36  ;;  %v7716_v49 = vadd.f32 %v8978_v31, %v7715_v62  ;;  %v8979_v54 = vadd.f32 %v7680_v42, %v13441_v61 }
 0x462   : > { %v8965_v53 = vadd.f32 %v7538_v46, %v13435_v50  ;;  %v7684_v63 = vpop.f32.mrb[26].mxu1  ;;  %v7540_v26 = vpop.f32.mrb[27].mxu0  ;;  %v8980_v41 = vadd.f32 %v7682_v10, %v13446_v40 }
 0x463   : > { %v7719_v14 = vadd.f32 %v8964_v59, %v8963_v44  ;;  %v8966_v12 = vadd.f32 %v7540_v26, %v13438_v52  ;;  %v7686_v43 = vpop.f32.mrb[27].mxu1  ;;  %v8981_v29 = vadd.f32 %v7684_v63, %v13441_v61 }
 0x464   : > { %v8982_v51 = vadd.f32 %v7686_v43, %v13446_v40 }
 0x465   : > { %v7724_v58 = vadd.f32 %v8966_v12, %v8965_v53  ;;  %7717 = vadd.xlane.f32.xlu1 %v7716_v49  ;;  %v7720_v18 = vadd.f32 %v8979_v54, %v7719_v14 }
 0x467   : > { %v7544_v27 = vpop.f32.mrb[28].mxu0  ;;  %v7721_v6 = vadd.f32 %v8980_v41, %v7720_v18  ;;  %v7725_v35 = vadd.f32 %v8981_v29, %v7724_v58 }
 0x468   : > { %v8967_v2 = vadd.f32 %v7544_v27, %v13435_v50  ;;  %v7690_v32 = vpop.f32.mrb[28].mxu1  ;;  %v7546_v25 = vpop.f32.mrb[29].mxu0 }
 0x469   : > { %v8968_v0 = vadd.f32 %v7546_v25, %v13438_v52  ;;  %v7692_v56 = vpop.f32.mrb[29].mxu1  ;;  %v7548_v20 = vpop.f32.mrb[30].mxu0  ;;  %7722 = vadd.xlane.f32.xlu0 %v7721_v6  ;;  %v7726_v55 = vadd.f32 %v8982_v51, %v7725_v35  ;;  %v8983_v45 = vadd.f32 %v7690_v32, %v13441_v61 }
 0x46a   : > { %v8969_v33 = vadd.f32 %v7548_v20, %v13435_v50  ;;  %v7694_v22 = vpop.f32.mrb[30].mxu1  ;;  %v7550_v5 = vpop.f32.mrb[31].mxu0  ;;  %v8984_v30 = vadd.f32 %v7692_v56, %v13446_v40 }
 0x46b   : > { %v7729_v34 = vadd.f32 %v8968_v0, %v8967_v2  ;;  %v8970_v23 = vadd.f32 %v7550_v5, %v13438_v52  ;;  %v7696_v13 = vpop.f32.mrb[31].mxu1  ;;  %7727 = vadd.xlane.f32.xlu1 %v7726_v55  ;;  %v8985_v19 = vadd.f32 %v7694_v22, %v13441_v61 }
 0x46c   : > { %v8986_v39 = vadd.f32 %v7696_v13, %v13446_v40  ;;  %v7854_v13 = vld [vmem:[%s13494_s22 + $0x8] sm:$0xff] }
 0x46d   : > { %v7734_v24 = vadd.f32 %v8970_v23, %v8969_v33  ;;  %v7730_v4 = vadd.f32 %v8983_v45, %v7729_v34  ;;  %v7853_v45 = vld [vmem:[%s13494_s22] sm:$0xff] }
 0x46f   : > { %v7731_v11 = vadd.f32 %v8984_v30, %v7730_v4  ;;  %v7735_v7 = vadd.f32 %v8985_v19, %v7734_v24  ;;  %v7855_v30 = vld [vmem:[%s13494_s22 + $0x10] sm:$0xff]  ;;  %v7856_v24 = vld [vmem:[%s13494_s22 + $0x18] sm:$0xff] }
 0x471   : > { %7732 = vadd.xlane.f32.xlu0 %v7731_v11  ;;  %v7736_v50 = vadd.f32 %v8986_v39, %v7735_v7  ;;  %v7869_v39 = vunpack.c.l.bf16 %v7853_v45  ;;  %v7870_v11 = vunpack.c.h.bf16 %v7853_v45  ;;  %v13506_v7 = vstv %s7852_s29  ;;  %v7861_v45 = vld [vmem:[%s13494_s22 + $0x40] sm:$0xff]  ;;  %s10524_s29 = smov [#allocation5]  }
 0x472   : > { %s10463_s17 = sshll.u32 %s10524_s29, 4  ;;  %s10464_s17 = int_to_ptr.vmem [resolvable:$false] %s10463_s17 }
 0x473   : > { %7737 = vadd.xlane.f32.xlu1 %v7736_v50  ;;  %s10465_s18 = scalar_lea.vmem %s10464_s17, 8192  ;;  %p10466_p1 = scmp.lt.s32.totalorder %s13606_s30, %s10464_s17 }
 0x474   : > { %p10467_p2 = scmp.lt.s32.totalorder %s10465_s18, %s10459_s15 }
 0x476   : > { %p10468_p3 = por %p10467_p2, %p10466_p1 }
 0x478   : > { %p10469_p4 = pnand %p10468_p3, %p10462_p0 }
 0x4e6   : > { %v7703_v48 = vpop.xlane.xlu0 %7702 }
 0x4e7   : > { %v8897_v57 = vmul.f32 -0.001953125, %v7703_v48  ;;  %v7871_v48 = vunpack.c.l.bf16 %v7854_v13 }
 0x4e9   : > { %v7756_v21 = vmul.f32 1.442695, %v8897_v57  ;;  %v7872_v57 = vunpack.c.h.bf16 %v7854_v13 }
 0x4ea   : > { %v7708_v16 = vpop.xlane.xlu0 %7707 }
 0x4eb   : > { %10391 = vpow2.f32 %v7756_v21  ;;  %v8898_v52 = vmul.f32 -0.001953125, %v7708_v16  ;;  %v7873_v21 = vunpack.c.l.bf16 %v7855_v30  ;;  %v7857_v16 = vld [vmem:[%s13494_s22 + $0x20] sm:$0xff] }
 0x4ed   : > { %v7758_v47 = vmul.f32 1.442695, %v8898_v52  ;;  %v7874_v52 = vunpack.c.h.bf16 %v7855_v30 }
 0x4ee   : > { %v7713_v8 = vpop.xlane.xlu1 %7712 }
 0x4ef   : > { %10393 = vpow2.f32 %v7758_v47  ;;  %v8899_v15 = vmul.f32 -0.001953125, %v7713_v8  ;;  %v7875_v47 = vunpack.c.l.bf16 %v7856_v24 }
 0x4f1   : > { %v7760_v61 = vmul.f32 1.442695, %v8899_v15  ;;  %v7876_v15 = vunpack.c.h.bf16 %v7856_v24 }
 0x4f2   : > { %v7718_v3 = vpop.xlane.xlu1 %7717 }
 0x4f3   : > { %10395 = vpow2.f32 %v7760_v61  ;;  %v8900_v28 = vmul.f32 -0.001953125, %v7718_v3  ;;  %v7902_v3 = vmul.f32 %v13506_v7, %v7869_v39 }
 0x4f5   : > { %v10392_v40 = vpop.eup %10391  ;;  %v7762_v9 = vmul.f32 1.442695, %v8900_v28  ;;  %v7903_v28 = vmul.f32 %v13506_v7, %v7870_v11 }
 0x4f6   : > { %v7772_v37 = vadd.f32 1.0, %v10392_v40  ;;  %v7723_v60 = vpop.xlane.xlu0 %7722  ;;  %v7858_v40 = vld [vmem:[%s13494_s22 + $0x28] sm:$0xff] }
 0x4f7   : > { %10397 = vpow2.f32 %v7762_v9  ;;  %v8901_v17 = vmul.f32 -0.001953125, %v7723_v60  ;;  %v7877_v9 = vunpack.c.l.bf16 %v7857_v16  ;;  %v7904_v60 = vmul.f32 %v13506_v7, %v7871_v48 }
 0x4f8   : > { %10399 = vrcp.f32 %v7772_v37  ;;  %v7728_v31 = vpop.xlane.xlu1 %7727 }
 0x4f9   : > { %v10394_v38 = vpop.eup %10393  ;;  %v7764_v36 = vmul.f32 1.442695, %v8901_v17  ;;  %v8902_v62 = vmul.f32 -0.001953125, %v7728_v31  ;;  %v7905_v17 = vmul.f32 %v13506_v7, %v7872_v57  ;;  %v7906_v31 = vmul.f32 %v13506_v7, %v7873_v21  ;;  %v7863_v21 = vld [vmem:[%s13494_s22 + $0x50] sm:$0xff] }
 0x4fa   : > { %v7773_v44 = vadd.f32 1.0, %v10394_v38  ;;  %v7885_v57 = vunpack.c.l.bf16 %v7861_v45 }
 0x4fb   : > { %10401 = vpow2.f32 %v7764_v36  ;;  %v7766_v42 = vmul.f32 1.442695, %v8902_v62  ;;  %v7907_v62 = vmul.f32 %v13506_v7, %v7874_v52  ;;  %v7886_v52 = vunpack.c.h.bf16 %v7861_v45 }
 0x4fc   : > { %10403 = vrcp.f32 %v7773_v44  ;;  %v7908_v44 = vmul.f32 %v13506_v7, %v7875_v47 }
 0x4fd   : > { %v10396_v1 = vpop.eup %10395  ;;  %10405 = vpow2.f32 %v7766_v42  ;;  %v7878_v42 = vunpack.c.h.bf16 %v7857_v16 }
 0x4fe   : > { %v7774_v59 = vadd.f32 1.0, %v10396_v1  ;;  %v7733_v10 = vpop.xlane.xlu0 %7732 }
 0x4ff   : > { %v8903_v46 = vmul.f32 -0.001953125, %v7733_v10 }
 0x500   : > { %10407 = vrcp.f32 %v7774_v59  ;;  %v7738_v49 = vpop.xlane.xlu1 %7737 }
 0x501   : > { %v10398_v53 = vpop.eup %10397  ;;  %v7768_v63 = vmul.f32 1.442695, %v8903_v46  ;;  %v8904_v26 = vmul.f32 -0.001953125, %v7738_v49  ;;  %v7909_v46 = vmul.f32 %v13506_v7, %v7876_v15  ;;  %v7879_v49 = vunpack.c.l.bf16 %v7858_v40  ;;  %v7864_v15 = vld [vmem:[%s13494_s22 + $0x58] sm:$0xff] }
 0x502   : > { %v13478_v54 = vpop.eup %10399  ;;  %v7775_v14 = vadd.f32 1.0, %v10398_v53  ;;  %v7859_v53 = vld [vmem:[%s13494_s22 + $0x30] sm:$0xff] }
 0x503   : > { %v8905_v12 = vmul.f32 -1.442695, %v13478_v54  ;;  %10409 = vpow2.f32 %v7768_v63  ;;  %v7770_v43 = vmul.f32 1.442695, %v8904_v26  ;;  %v7880_v63 = vunpack.c.h.bf16 %v7858_v40 }
 0x504   : > { %10411 = vrcp.f32 %v7775_v14  ;;  %v7910_v26 = vmul.f32 %v13506_v7, %v7877_v9  ;;  %v7860_v14 = vld [vmem:[%s13494_s22 + $0x38] sm:$0xff] }
 0x505   : > { %v10402_v41 = vpop.eup %10401  ;;  %10413 = vpow2.f32 %v8905_v12 }
 0x506   : > { %v13482_v29 = vpop.eup %10403  ;;  %v7776_v58 = vadd.f32 1.0, %v10402_v41  ;;  %10415 = vpow2.f32 %v7770_v43 }
 0x507   : > { %v10406_v18 = vpop.eup %10405  ;;  %v8906_v51 = vmul.f32 -1.442695, %v13482_v29 }
 0x508   : > { %10417 = vrcp.f32 %v7776_v58  ;;  %v7777_v27 = vadd.f32 1.0, %v10406_v18 }
 0x509   : > { %10419 = vpow2.f32 %v8906_v51 }
 0x50a   : > { %v13485_v6 = vpop.eup %10407  ;;  %10421 = vrcp.f32 %v7777_v27 }
 0x50b   : > { %v8907_v35 = vmul.f32 -1.442695, %v13485_v6 }
 0x50d   : > { %v10410_v2 = vpop.eup %10409  ;;  %10423 = vpow2.f32 %v8907_v35  ;;  %v7881_v35 = vunpack.c.l.bf16 %v7859_v53 }
 0x50e   : > { %v13488_v32 = vpop.eup %10411  ;;  %v7778_v25 = vadd.f32 1.0, %v10410_v2 }
 0x50f   : > { %v10414_v0 = vpop.eup %10413  ;;  %v8908_v56 = vmul.f32 -1.442695, %v13488_v32  ;;  %v7914_v39 = vmul.f32 %v13506_v7, %v7881_v35 }
 0x510   : > { %v10416_v20 = vpop.eup %10415  ;;  %v7820_v55 = vadd.f32 1.0, %v10414_v0  ;;  %10425 = vrcp.f32 %v7778_v25 }
 0x511   : > { %10427 = vpow2.f32 %v8908_v56  ;;  %v7779_v33 = vadd.f32 1.0, %v10416_v20  ;;  %v7912_v56 = vmul.f32 %v13506_v7, %v7879_v49  ;;  %v7882_v20 = vunpack.c.h.bf16 %v7859_v53  ;;  %v7865_v49 = vld [vmem:[%s13494_s22 + $0x60] sm:$0xff] }
 0x512   : > { %v13496_v22 = vpop.eup %10417  ;;  %10429 = vrcp.f32 %v7820_v55  ;;  %v7883_v55 = vunpack.c.l.bf16 %v7860_v14 }
 0x513   : > { %v10420_v5 = vpop.eup %10419  ;;  %v8909_v34 = vmul.f32 -1.442695, %v13496_v22  ;;  %10431 = vrcp.f32 %v7779_v33  ;;  %v7913_v33 = vmul.f32 %v13506_v7, %v7880_v63 }
 0x514   : > { %v13500_v23 = vpop.eup %10421  ;;  %v7821_v19 = vadd.f32 1.0, %v10420_v5  ;;  %v7884_v5 = vunpack.c.h.bf16 %v7860_v14  ;;  %v7916_v48 = vmul.f32 %v13506_v7, %v7883_v55  ;;  %v7866_v14 = vld [vmem:[%s13494_s22 + $0x68] sm:$0xff] }
 0x515   : > { %10433 = vpow2.f32 %v8909_v34  ;;  %v8910_v4 = vmul.f32 -1.442695, %v13500_v23 }
 0x516   : > { %10435 = vrcp.f32 %v7821_v19  ;;  %v7917_v16 = vmul.f32 %v13506_v7, %v7884_v5 }
 0x517   : > { %v10424_v50 = vpop.eup %10423  ;;  %10437 = vpow2.f32 %v8910_v4 }
 0x518   : > { %v7822_v8 = vadd.f32 1.0, %v10424_v50  ;;  %v7915_v50 = vmul.f32 %v13506_v7, %v7882_v20  ;;  %v7868_v20 = vld [vmem:[%s13494_s22 + $0x78] sm:$0xff] }
 0x51a   : > { %v13510_v61 = vpop.eup %10425  ;;  %10439 = vrcp.f32 %v7822_v8 }
 0x51b   : > { %v10428_v37 = vpop.eup %10427  ;;  %v8911_v38 = vmul.f32 -1.442695, %v13510_v61 }
 0x51c   : > { %v10430_v36 = vpop.eup %10429  ;;  %v7823_v1 = vadd.f32 1.0, %v10428_v37 }
 0x51d   : > { %v13523_v59 = vpop.eup %10431  ;;  %v7844_v10 = vadd.f32 %v10430_v36, %v13478_v54  ;;  %10441 = vpow2.f32 %v8911_v38  ;;  %v7911_v54 = vmul.f32 %v13506_v7, %v7878_v42  ;;  %v7918_v36 = vmul.f32 %v13506_v7, %v7885_v57 }
 0x51e   : > { %10443 = vrcp.f32 %v7823_v1  ;;  %v8912_v12 = vmul.f32 -1.442695, %v13523_v59  ;;  %v7919_v1 = vmul.f32 %v13506_v7, %v7886_v52 }
 0x51f   : > { %v10434_v43 = vpop.eup %10433  ;;  %v7934_v41 = vmul.f32 %v7902_v3, %v7844_v10  ;;  %v7935_v58 = vmul.f32 %v7903_v28, %v7844_v10  ;;  %v7936_v18 = vmul.f32 %v7904_v60, %v7844_v10  ;;  %v7937_v51 = vmul.f32 %v7905_v17, %v7844_v10 }
 0x520   : > { %v10436_v27 = vpop.eup %10435  ;;  %v7824_v2 = vadd.f32 1.0, %v10434_v43  ;;  %10445 = vpow2.f32 %v8912_v12  ;;  %v7889_v60 = vunpack.c.l.bf16 %v7863_v21  ;;  %v7890_v17 = vunpack.c.h.bf16 %v7863_v21 }
 0x521   : > { %v10438_v25 = vpop.eup %10437  ;;  %7966 = vst [vmem:[%s13532_s27] sm:$0xff] %v7934_v41  ;;  %7967 = vst [vmem:[%s13532_s27 + $0x8] sm:$0xff] %v7935_v58  ;;  %v7845_v0 = vadd.f32 %v10436_v27, %v13482_v29  ;;  %v7862_v29 = vld [vmem:[%s13494_s22 + $0x48] sm:$0xff] }
 0x522   : > { %7968 = vst [vmem:[%s13532_s27 + $0x10] sm:$0xff] %v7936_v18  ;;  %7969 = vst [vmem:[%s13532_s27 + $0x18] sm:$0xff] %v7937_v51  ;;  %10447 = vrcp.f32 %v7824_v2  ;;  %v7825_v34 = vadd.f32 1.0, %v10438_v25  ;;  %v7887_v47 = vunpack.c.l.bf16 %v7862_v29  ;;  %v7888_v8 = vunpack.c.h.bf16 %v7862_v29 }
 0x523   : > { %v7938_v13 = vmul.f32 %v7906_v31, %v7845_v0  ;;  %v7939_v30 = vmul.f32 %v7907_v62, %v7845_v0  ;;  %v7940_v19 = vmul.f32 %v7908_v44, %v7845_v0  ;;  %v7941_v24 = vmul.f32 %v7909_v46, %v7845_v0 }
 0x524   : > { %v10440_v4 = vpop.eup %10439  ;;  %10449 = vrcp.f32 %v7825_v34  ;;  %v7891_v62 = vunpack.c.l.bf16 %v7864_v15  ;;  %v7892_v44 = vunpack.c.h.bf16 %v7864_v15  ;;  %v7920_v10 = vmul.f32 %v13506_v7, %v7887_v47 }
 0x525   : > { %7970 = vst [vmem:[%s13532_s27 + $0x20] sm:$0xff] %v7938_v13  ;;  %7971 = vst [vmem:[%s13532_s27 + $0x28] sm:$0xff] %v7939_v30  ;;  %v7846_v11 = vadd.f32 %v10440_v4, %v13485_v6  ;;  %v7921_v46 = vmul.f32 %v13506_v7, %v7888_v8  ;;  %v7922_v43 = vmul.f32 %v13506_v7, %v7889_v60  ;;  %v7894_v2 = vunpack.c.h.bf16 %v7865_v49 }
 0x526   : > { %7972 = vst [vmem:[%s13532_s27 + $0x30] sm:$0xff] %v7940_v19  ;;  %7973 = vst [vmem:[%s13532_s27 + $0x38] sm:$0xff] %v7941_v24  ;;  %v7923_v41 = vmul.f32 %v13506_v7, %v7890_v17  ;;  %v7924_v51 = vmul.f32 %v13506_v7, %v7891_v62  ;;  %v7925_v27 = vmul.f32 %v13506_v7, %v7892_v44  ;;  %v7895_v25 = vunpack.c.l.bf16 %v7866_v14 }
 0x527   : > { %v10442_v3 = vpop.eup %10441  ;;  %v7942_v28 = vmul.f32 %v7910_v26, %v7846_v11  ;;  %v7943_v40 = vmul.f32 %v7911_v54, %v7846_v11  ;;  %v7944_v6 = vmul.f32 %v7912_v56, %v7846_v11  ;;  %v7945_v9 = vmul.f32 %v7913_v33, %v7846_v11  ;;  %v7867_v56 = vld [vmem:[%s13494_s22 + $0x70] sm:$0xff] }
 0x528   : > { %v10444_v37 = vpop.eup %10443  ;;  %v7826_v31 = vadd.f32 1.0, %v10442_v3  ;;  %v7893_v54 = vunpack.c.l.bf16 %v7865_v49  ;;  %v7896_v0 = vunpack.c.h.bf16 %v7866_v14  ;;  %v7897_v34 = vunpack.c.l.bf16 %v7867_v56 }
 0x529   : > { %7974 = vst [vmem:[%s13532_s27 + $0x40] sm:$0xff] %v7942_v28  ;;  %7975 = vst [vmem:[%s13532_s27 + $0x48] sm:$0xff] %v7943_v40  ;;  %v7847_v38 = vadd.f32 %v10444_v37, %v13488_v32  ;;  %v7898_v13 = vunpack.c.h.bf16 %v7867_v56  ;;  %v7899_v30 = vunpack.c.l.bf16 %v7868_v20  ;;  %v7900_v19 = vunpack.c.h.bf16 %v7868_v20 }
 0x52a   : > { %7976 = vst [vmem:[%s13532_s27 + $0x50] sm:$0xff] %v7944_v6  ;;  %7977 = vst [vmem:[%s13532_s27 + $0x58] sm:$0xff] %v7945_v9  ;;  %v10446_v42 = vpop.eup %10445  ;;  %10451 = vrcp.f32 %v7826_v31  ;;  %v7926_v11 = vmul.f32 %v13506_v7, %v7893_v54 }
 0x52b   : > { %v7946_v53 = vmul.f32 %v7914_v39, %v7847_v38  ;;  %v7947_v63 = vmul.f32 %v7915_v50, %v7847_v38  ;;  %v7948_v32 = vmul.f32 %v7916_v48, %v7847_v38  ;;  %v7949_v26 = vmul.f32 %v7917_v16, %v7847_v38 }
 0x52c   : > { %v10448_v12 = vpop.eup %10447  ;;  %v7827_v58 = vadd.f32 1.0, %v10446_v42  ;;  %v7928_v50 = vmul.f32 %v13506_v7, %v7895_v25  ;;  %v7929_v48 = vmul.f32 %v13506_v7, %v7896_v0  ;;  %v7930_v16 = vmul.f32 %v13506_v7, %v7897_v34 }
 0x52d   : > { %7978 = vst [vmem:[%s13532_s27 + $0x60] sm:$0xff] %v7946_v53  ;;  %7979 = vst [vmem:[%s13532_s27 + $0x68] sm:$0xff] %v7947_v63  ;;  %v7848_v18 = vadd.f32 %v10448_v12, %v13496_v22  ;;  %v7931_v52 = vmul.f32 %v13506_v7, %v7898_v13  ;;  %v7932_v47 = vmul.f32 %v13506_v7, %v7899_v30 }
 0x52e   : > { %7980 = vst [vmem:[%s13532_s27 + $0x70] sm:$0xff] %v7948_v32  ;;  %7981 = vst [vmem:[%s13532_s27 + $0x78] sm:$0xff] %v7949_v26  ;;  %v10450_v35 = vpop.eup %10449  ;;  %10453 = vrcp.f32 %v7827_v58  ;;  %v7933_v8 = vmul.f32 %v13506_v7, %v7900_v19 }
 0x52f   : > { %v7950_v55 = vmul.f32 %v7918_v36, %v7848_v18  ;;  %v7951_v33 = vmul.f32 %v7919_v1, %v7848_v18  ;;  %v7952_v5 = vmul.f32 %v7920_v10, %v7848_v18  ;;  %v7953_v22 = vmul.f32 %v7921_v46, %v7848_v18 }
 0x530   : > { %v7849_v45 = vadd.f32 %v10450_v35, %v13500_v23  ;;  %v7927_v23 = vmul.f32 %v13506_v7, %v7894_v2 }
 0x531   : > { %7982 = vst [vmem:[%s13532_s27 + $0x80] sm:$0xff] %v7950_v55  ;;  %7983 = vst [vmem:[%s13532_s27 + $0x88] sm:$0xff] %v7951_v33 }
 0x532   : > { %7984 = vst [vmem:[%s13532_s27 + $0x90] sm:$0xff] %v7952_v5  ;;  %7985 = vst [vmem:[%s13532_s27 + $0x98] sm:$0xff] %v7953_v22  ;;  %v7954_v24 = vmul.f32 %v7922_v43, %v7849_v45  ;;  %v7955_v29 = vmul.f32 %v7923_v41, %v7849_v45  ;;  %v7956_v4 = vmul.f32 %v7924_v51, %v7849_v45 }
 0x533   : > { %v7957_v39 = vmul.f32 %v7925_v27, %v7849_v45 }
 0x534   : > { %v10452_v57 = vpop.eup %10451  ;;  %7986 = vst [vmem:[%s13532_s27 + $0xa0] sm:$0xff] %v7954_v24  ;;  %7987 = vst [vmem:[%s13532_s27 + $0xa8] sm:$0xff] %v7955_v29 }
 0x535   : > { %7988 = vst [vmem:[%s13532_s27 + $0xb0] sm:$0xff] %v7956_v4  ;;  %7989 = vst [vmem:[%s13532_s27 + $0xb8] sm:$0xff] %v7957_v39  ;;  %v7850_v21 = vadd.f32 %v10452_v57, %v13510_v61 }
 0x537   : > { %v7958_v15 = vmul.f32 %v7926_v11, %v7850_v21  ;;  %v7959_v3 = vmul.f32 %v7927_v23, %v7850_v21  ;;  %v7960_v28 = vmul.f32 %v7928_v50, %v7850_v21  ;;  %v7961_v40 = vmul.f32 %v7929_v48, %v7850_v21 }
 0x538   : > { %v10454_v6 = vpop.eup %10453 }
 0x539   : > { %7990 = vst [vmem:[%s13532_s27 + $0xc0] sm:$0xff] %v7958_v15  ;;  %7991 = vst [vmem:[%s13532_s27 + $0xc8] sm:$0xff] %v7959_v3  ;;  %v7851_v61 = vadd.f32 %v10454_v6, %v13523_v59 }
 0x53a   : > { %7992 = vst [vmem:[%s13532_s27 + $0xd0] sm:$0xff] %v7960_v28  ;;  %7993 = vst [vmem:[%s13532_s27 + $0xd8] sm:$0xff] %v7961_v40 }
 0x53b   : > { %v7962_v7 = vmul.f32 %v7930_v16, %v7851_v61  ;;  %v7963_v9 = vmul.f32 %v7931_v52, %v7851_v61  ;;  %v7964_v37 = vmul.f32 %v7932_v47, %v7851_v61  ;;  %v7965_v60 = vmul.f32 %v7933_v8, %v7851_v61 }
 0x53d   : > { %7994 = vst [vmem:[%s13532_s27 + $0xe0] sm:$0xff] %v7962_v7  ;;  %7995 = vst [vmem:[%s13532_s27 + $0xe8] sm:$0xff] %v7963_v9 }
 0x53e   : > { %7996 = vst [vmem:[%s13532_s27 + $0xf0] sm:$0xff] %v7964_v37  ;;  %7997 = vst [vmem:[%s13532_s27 + $0xf8] sm:$0xff] %v7965_v60 }
 0x53f   : > { %10472 = shalt.err (!%p10469_p4)
}
 0x540   : > { %s10473_s22 = scalar_lea.hbm %s13604_s10, 4096  ;;  %s10477_s27 = scalar_lea.hbm %s13664_s9, 8192 }
 0x541   : > { %p10474_p7 = scmp.ne.s32.totalorder %s13604_s10, %s10473_s22  ;;  %p10478_p10 = scmp.lt.u32.totalorder %s13604_s10, %s13664_s9 }
 0x542   : > { %p10479_p11 = scmp.lt.u32.totalorder %s10477_s27, %s10473_s22  ;;  %p10481_p13 = scmp.lt.u32.totalorder %s10473_s22, %s13604_s10 }
 0x543   : > { %p10475_p8 = pnand %p10474_p7, %p10618_p5 }
 0x544   : > { %p10480_p12 = por %p10479_p11, %p10478_p10 }
 0x545   : > { %p10476_p9 = pneg %p10475_p8 }
 0x546   : > { %p10482_p0 = por %p10481_p13, %p10480_p12 }
 0x548   : > { %p10483_p1 = pnand %p10482_p0, %p10476_p9 }
 0x54a   : > { %10486 = shalt.err (!%p10483_p1)
}
 0x54b   : > { %s10525_s24 = smov 512   ;;  %s10526_s15 = smov 32  }
 0x54c   : > { %9275 = dma.vmem_to_hbm [thread:$0]  (%p10618_p5), %s13606_s30, 4096, %s13604_s10, %s13614_s0, %s10525_s24, %s10525_s24, %s10526_s15  }
 0x54d PF: > { %p9281_p2 = scmp.ge.s32.totalorder %s10521_s14, 2  ;;  %s8028_s29 = sand.u32 1, %s10509_s11  }
 0x54e   : > { %s8029_s17 = scalar_lea.sflag [#allocation6], %s8028_s29 }
 0x54f   : > { %p9278_p3 = pnand %p9281_p2, %p10622_p6 }
 0x551   : > { %10504 = dma.done.wait (!%p9278_p3), %s8029_s17, 4096  }
 0x552   : > { %10506 = vsyncadd (!%p9278_p3), %s8029_s17, 4294963200  ;;  %p20_p4 = scmp.ge.s32.totalorder %s10605_s16, 4   ;;  %s13671_s11 = smov %s10513_s12 }
 0x553   : > { %s13672_s12 = smov %s10517_s13  ;;  %s13673_s13 = smov %s10616_s19 }
 0x554   : > { %s13674_s14 = smov %s10605_s16  ;;  %22 = sbr.rel (!%p20_p4) target bundleno = 5 (0x5), region = 96 }
 0x55b   :  { %8034 = vsyncpa [#allocation6], 1 }
 0x55c   :  { %8036 = vsyncpa [#allocation6 + $0x1], 1 }

</bundles_post_ra>
